<compile_context>
chip_gen: v7x
topology: tpu7x:2x2x1
jax: 0.10.0
libtpu: 0.0.40
codegen_flags: <defaults>
</compile_context>

<pallas_src>
import jax
import jax.numpy as jnp
from jax import lax
from jax.experimental import pallas as pl
from jax.experimental.pallas import tpu as pltpu

# ---- hyper-parameters (small, consistent with the module structure) ----
BATCH = 2
SEQ = 8
D_IN = 128          # wav2vec2 hidden size (768 in the real model)
HID = 128           # hidden_dim (256 default)
C4 = HID // 4       # channels per temporal-conv branch
OUT = 64            # output_dim
RHID = HID // 2     # regressor hidden
NUM_LAYERS = 2      # projection layers
KS_DESC = (7, 5, 3, 1)      # temporal conv kernel sizes, widest first (working order)
PAD = max(KS_DESC) // 2     # 3
TAPS = 2 * PAD + 1          # 7
NUM_PIECES = sum(KS_DESC)   # 16 zero-free conv matmul pieces
MHA_HEADS = 4
DH = HID // MHA_HEADS
NUM_PROJ_HEADS = 4
NUM_EMOTIONS = 7
FINAL = 1
EPS_LN = 1e-5

# ---- row layout of the packed per-emotion vector blob (width = HID = 128 lanes) ----
ROW_CONV_B = 0
ROW_PROJ_B = ROW_CONV_B + NUM_PROJ_HEADS                      # 4
ROW_LN_G = ROW_PROJ_B + NUM_PROJ_HEADS * NUM_LAYERS           # 12
ROW_LN_B = ROW_LN_G + NUM_PROJ_HEADS * NUM_LAYERS             # 20
ROW_AIN_B = ROW_LN_B + NUM_PROJ_HEADS * NUM_LAYERS            # 28
ROW_AOUT_B = ROW_AIN_B + NUM_PROJ_HEADS * 3                   # 40
ROW_ALN_G = ROW_AOUT_B + NUM_PROJ_HEADS                       # 44
ROW_ALN_B = ROW_ALN_G + NUM_PROJ_HEADS                        # 48
ROW_HEAD_B = ROW_ALN_B + NUM_PROJ_HEADS                       # 52
NVEC = ROW_HEAD_B + (NUM_PROJ_HEADS * OUT) // HID             # 54

# ---- rows of the shared (non-emotion) vector blob ----
IV_BI1, IV_GI, IV_BTI, IV_BI2, IV_BR1, IV_WR2, IV_BR2 = range(7)
NIVEC = 8


def _gelu(x):
    # TODO(synk): PyTorch F.gelu defaults to the erf-exact form; tanh approximation used
    # because erf lowering inside Mosaic is not guaranteed (difference ~1e-3).
    c = jnp.float32(0.7978845608028654)  # sqrt(2/pi)
    return 0.5 * x * (1.0 + jnp.tanh(c * (x + 0.044715 * x * x * x)))


def _layernorm(x, g, b):
    mu = jnp.mean(x, axis=-1, keepdims=True)
    var = jnp.mean(jnp.square(x - mu), axis=-1, keepdims=True)
    return (x - mu) * lax.rsqrt(var + EPS_LN) * g + b


# =====================================================================================
# Fused kernel: one grid point per batch sample.
#   zero-free temporal convs (16 bf16 pieces, all 4 branches x 4 proj heads) ->
#   per-projection-head residual blocks / self-attention / masked mean pool / output
#   projection (looped over the 4 proj heads in-VMEM) -> integration layer ->
#   intensity regressor -> single lane-dense [1, 128] output row.
# =====================================================================================
def fused_kernel(lbl_ref, xp_ref, mrow_ref,
                 conv_w_ref, proj_w_ref, attn_in_w_ref, attn_out_w_ref, head_w_ref,
                 vec_ref, wi1_ref, wi2_ref, wr1_ref, ivec_ref,
                 out_ref):
    del lbl_ref  # emotion index is consumed by the index_maps (scalar prefetch)

    xp = xp_ref[0].astype(jnp.bfloat16)   # [S + 2*PAD, D_IN], bf16 straight into the MXU
    m_row = mrow_ref[0]                   # [1, S] float mask
    key_valid = m_row > 0.5

    # seven time-shifted bf16 views of the padded input, shared by all conv pieces
    shifted = [xp[t:t + SEQ, :] for t in range(TAPS)]

    # ---- zero-free fused temporal convs ----
    # conv_w_ref holds 16 pieces [D_IN, 4*C4]; piece (kernel k, tap j) multiplies
    # shifted[PAD - k//2 + j].  Each branch-group accumulator is head-minor: lanes
    # [h*C4, (h+1)*C4) hold head h's C4 channels for that kernel size.
    group_acc = []
    piece = 0
    for k in KS_DESC:                     # (7, 5, 3, 1) — widest first
        start = PAD - k // 2
        acc = jnp.zeros((SEQ, NUM_PROJ_HEADS * C4), jnp.float32)
        for j in range(k):
            acc = acc + jnp.dot(shifted[start + j], conv_w_ref[0, piece],
                                preferred_element_type=jnp.float32)
            piece += 1
        group_acc.append(acc)

    # masked-mean-pool denominator, shared by all heads
    # NOTE: assumes at least one valid frame per sample; an all-zero mask yields uniform
    # attention rows that are then zeroed by the masked pooling (denominator clamped).
    denom = jnp.maximum(jnp.sum(m_row, axis=-1, keepdims=True), jnp.float32(1e-9))
    inv_denom = pl.reciprocal(denom, approx=True)              # [1, 1]

    def vrow(r):                  # one 128-wide row of the packed per-emotion blob
        return vec_ref[0, r:r + 1, :]

    wi1 = wi1_ref[...]            # [4*OUT, HID] bf16, resident; sliced per head below
    scale = jnp.float32(1.0 / (DH ** 0.5))
    z_acc = jnp.zeros((1, HID), jnp.float32)   # feats @ Wi1, accumulated head by head

    for h in range(NUM_PROJ_HEADS):
        # gather this head's 4 branch slabs (working channel order per head: k7|k5|k3|k1)
        x_h = jnp.concatenate([g[:, h * C4:(h + 1) * C4] for g in group_acc], axis=-1)
        x_h = _gelu(x_h + vrow(ROW_CONV_B + h))                               # [S, HID]

        # residual projection blocks: Linear -> LayerNorm -> GELU (+ residual)
        for l in range(NUM_LAYERS):
            y = jnp.dot(x_h.astype(jnp.bfloat16), proj_w_ref[0, h, l],
                        preferred_element_type=jnp.float32)
            y = y + vrow(ROW_PROJ_B + h * NUM_LAYERS + l)
            y = _gelu(_layernorm(y, vrow(ROW_LN_G + h * NUM_LAYERS + l),
                                 vrow(ROW_LN_B + h * NUM_LAYERS + l)))
            x_h = y + x_h

        # self attention (batch_first MHA, 4 heads) with key_padding_mask
        residual = x_h
        qkv = jnp.dot(x_h.astype(jnp.bfloat16), attn_in_w_ref[0, h],
                      preferred_element_type=jnp.float32)                     # [S, 3*HID]
        q_all = qkv[:, 0:HID] + vrow(ROW_AIN_B + 3 * h)
        k_all = qkv[:, HID:2 * HID] + vrow(ROW_AIN_B + 3 * h + 1)
        v_all = qkv[:, 2 * HID:3 * HID] + vrow(ROW_AIN_B + 3 * h + 2)
        w_out = attn_out_w_ref[0, h]                                          # [HID, HID] bf16
        # per-MHA-head context folded straight into the output projection (no concat)
        o = jnp.zeros((SEQ, HID), jnp.float32)
        for a in range(MHA_HEADS):
            q = q_all[:, a * DH:(a + 1) * DH] * scale
            k_ = k_all[:, a * DH:(a + 1) * DH]
            v = v_all[:, a * DH:(a + 1) * DH]
            s = jnp.dot(q, k_.T, preferred_element_type=jnp.float32)          # [S, S]
            s = jnp.where(key_valid, s, jnp.float32(-1e30))
            s = s - jnp.max(s, axis=-1, keepdims=True)
            e = jnp.exp(s)
            p = e * pl.reciprocal(jnp.sum(e, axis=-1, keepdims=True), approx=True)
            av = jnp.dot(p, v, preferred_element_type=jnp.float32)            # [S, DH]
            o = o + jnp.dot(av.astype(jnp.bfloat16), w_out[a * DH:(a + 1) * DH, :],
                            preferred_element_type=jnp.float32)
        o = o + vrow(ROW_AOUT_B + h)
        x_h = _layernorm(o + residual, vrow(ROW_ALN_G + h), vrow(ROW_ALN_B + h))

        # masked mean pooling over time (mask-row matmul == masked sum)
        pooled = jnp.dot(m_row, x_h, preferred_element_type=jnp.float32) * inv_denom

        # per-head output projection -> 64-d feature, folded directly into the
        # integration layer's first matmul (feats never leave VMEM)
        feat_h = jnp.dot(pooled.astype(jnp.bfloat16), head_w_ref[0, h],
                         preferred_element_type=jnp.float32)
        feat_h = feat_h + vec_ref[0, ROW_HEAD_B + h // 2:ROW_HEAD_B + h // 2 + 1,
                                  (h % 2) * OUT:(h % 2) * OUT + OUT]
        z_acc = z_acc + jnp.dot(feat_h.astype(jnp.bfloat16),
                                wi1[h * OUT:(h + 1) * OUT, :],
                                preferred_element_type=jnp.float32)

    # ---- integration layer: Linear -> LayerNorm -> GELU -> Linear ----
    z = _gelu(_layernorm(z_acc + ivec_ref[IV_BI1:IV_BI1 + 1, :],
                         ivec_ref[IV_GI:IV_GI + 1, :],
                         ivec_ref[IV_BTI:IV_BTI + 1, :]))
    emb = jnp.dot(z.astype(jnp.bfloat16), wi2_ref[...],
                  preferred_element_type=jnp.float32) + ivec_ref[IV_BI2:IV_BI2 + 1, 0:OUT]

    # ---- intensity regressor: Linear -> GELU -> (Dropout=id) -> Linear ----
    r = _gelu(jnp.dot(emb.astype(jnp.bfloat16), wr1_ref[...],
                      preferred_element_type=jnp.float32)
              + ivec_ref[IV_BR1:IV_BR1 + 1, 0:RHID])
    inten = jnp.sum(r * ivec_ref[IV_WR2:IV_WR2 + 1, 0:RHID], axis=-1, keepdims=True) \
        + ivec_ref[IV_BR2:IV_BR2 + 1, 0:1]

    # lane-dense packed output: embedding in lanes [0, OUT), intensity in lane OUT
    out_ref[0] = jnp.concatenate(
        [emb, inten, jnp.zeros((1, HID - OUT - FINAL), jnp.float32)], axis=-1)


# ---- BlockSpec helpers (index_maps receive the scalar-prefetched emotion labels) ----
def _bspec(*rest):                 # per-batch block
    n = len(rest)
    return pl.BlockSpec((1,) + tuple(rest), lambda b, lbl, _n=n: (b,) + (0,) * _n)


def _espec(*rest):                 # per-emotion block selected via scalar prefetch
    n = len(rest)
    return pl.BlockSpec((1,) + tuple(rest), lambda b, lbl, _n=n: (lbl[b],) + (0,) * _n)


def _shared_spec(*shape):          # shared params: same block every step
    n = len(shape)
    return pl.BlockSpec(tuple(shape), lambda b, lbl, _n=n: (0,) * _n)


_in_specs = [
    _bspec(SEQ + 2 * PAD, D_IN),                         # padded hidden states (f32)
    _bspec(1, SEQ),                                      # attention mask (row form)
    _espec(NUM_PIECES, D_IN, NUM_PROJ_HEADS * C4),       # zero-free conv pieces (bf16)
    _espec(NUM_PROJ_HEADS, NUM_LAYERS, HID, HID),        # proj weights (bf16)
    _espec(NUM_PROJ_HEADS, HID, 3 * HID),                # attn in_proj weights (bf16)
    _espec(NUM_PROJ_HEADS, HID, HID),                    # attn out_proj weights (bf16)
    _espec(NUM_PROJ_HEADS, HID, OUT),                    # head output proj weights (bf16)
    _espec(NVEC, HID),                                   # packed bias/LN blob (f32)
    _shared_spec(NUM_PROJ_HEADS * OUT, HID),             # integration W1 (bf16)
    _shared_spec(HID, OUT),                              # integration W2 (bf16)
    _shared_spec(OUT, RHID),                             # regressor W1 (bf16)
    _shared_spec(NIVEC, HID),                            # packed shared vectors (f32)
]

fused_fn = pl.pallas_call(
    fused_kernel,
    out_shape=jax.ShapeDtypeStruct((BATCH, 1, HID), jnp.float32),
    grid_spec=pltpu.PrefetchScalarGridSpec(
        num_scalar_prefetch=1,
        grid=(BATCH,),
        in_specs=_in_specs,
        out_specs=_bspec(1, HID)),
    compiler_params=pltpu.CompilerParams(dimension_semantics=("parallel",)),
)


# =====================================================================================
# Parameter init (deterministic, synthetic) in the packed kernel layout.
# =====================================================================================
def init_params(key):
    ks = iter(jax.random.split(key, 48))

    def w(shape, scale=0.05):
        return (scale * jax.random.normal(next(ks), shape)).astype(jnp.float32)

    E, H, L = NUM_EMOTIONS, NUM_PROJ_HEADS, NUM_LAYERS

    # Zero-free fused temporal convs.  Working channel order per head is k7|k5|k3|k1
    # (widest kernel first); weights stored as 16 (kernel, tap) pieces of [D_IN, H*C4],
    # head-minor within each piece.
    # TODO(synk): when importing real PyTorch weights, apply the fixed per-head channel
    # permutation (k1,k3,k5,k7 -> k7,k5,k3,k1) consistently to conv biases, proj_w rows &
    # columns, LN params, attn in_proj rows, attn out_proj columns and head_w rows.
    pieces, branch_b = [], []
    for k in KS_DESC:
        wk = w((E, H, k, D_IN, C4))          # Conv1d weights per (emotion, head, tap)
        for j in range(k):
            pieces.append(wk[:, :, j])       # [E, H, D_IN, C4]
        branch_b.append(w((E, H, C4)))
    conv_w = jnp.stack(pieces, axis=1)                        # [E, 16, H, D_IN, C4]
    conv_w = conv_w.transpose(0, 1, 3, 2, 4).reshape(E, NUM_PIECES, D_IN, H * C4)
    conv_w = conv_w.astype(jnp.bfloat16)
    conv_b = jnp.concatenate(branch_b, axis=-1)               # [E, H, HID]  (k7|k5|k3|k1)

    proj_w = w((E, H, L, HID, HID)).astype(jnp.bfloat16)
    proj_b = w((E, H, L, HID))
    ln_g = jnp.ones((E, H, L, HID), jnp.float32)
    ln_b = jnp.zeros((E, H, L, HID), jnp.float32)
    attn_in_w = w((E, H, HID, 3 * HID)).astype(jnp.bfloat16)
    attn_in_b = w((E, H, 3, HID))                             # q / k / v rows
    attn_out_w = w((E, H, HID, HID)).astype(jnp.bfloat16)
    attn_out_b = w((E, H, HID))
    attn_ln_g = jnp.ones((E, H, HID), jnp.float32)
    attn_ln_b = jnp.zeros((E, H, HID), jnp.float32)
    head_w = w((E, H, HID, OUT)).astype(jnp.bfloat16)
    head_b = w((E, H, OUT))

    vec = jnp.concatenate([
        conv_b,                                      # rows 0..3
        proj_b.reshape(E, H * L, HID),               # 4..11
        ln_g.reshape(E, H * L, HID),                 # 12..19
        ln_b.reshape(E, H * L, HID),                 # 20..27
        attn_in_b.reshape(E, H * 3, HID),            # 28..39
        attn_out_b,                                  # 40..43
        attn_ln_g,                                   # 44..47
        attn_ln_b,                                   # 48..51
        head_b.reshape(E, (H * OUT) // HID, HID),    # 52..53
    ], axis=1)                                       # [E, NVEC, HID]
    assert vec.shape == (E, NVEC, HID)

    # shared integration layer + intensity regressor (large matrices in bf16)
    wi1 = w((H * OUT, HID)).astype(jnp.bfloat16)
    bi1 = w((HID,))
    gi = jnp.ones((HID,), jnp.float32)
    bti = jnp.zeros((HID,), jnp.float32)
    wi2 = w((HID, OUT)).astype(jnp.bfloat16)
    bi2 = w((OUT,))
    wr1 = w((OUT, RHID)).astype(jnp.bfloat16)
    br1 = w((RHID,))
    wr2 = w((RHID,))                                 # regressor final weight, stored as a row
    br2 = w((1,))

    def row(v):
        return jnp.pad(v, (0, HID - v.shape[0]))[None, :]

    ivec = jnp.concatenate([row(bi1), row(gi), row(bti), row(bi2), row(br1),
                            row(wr2), row(br2),
                            jnp.zeros((1, HID), jnp.float32)], axis=0)   # [NIVEC, HID]

    return dict(conv_w=conv_w, proj_w=proj_w, attn_in_w=attn_in_w, attn_out_w=attn_out_w,
                head_w=head_w, vec=vec, wi1=wi1, wi2=wi2, wr1=wr1, ivec=ivec)


@jax.jit
def emotion_intensity_forward(params, hidden_states, attention_mask, emotion_labels):
    """hidden_states: [B, S, D_IN] f32; attention_mask: [B, S] int; emotion_labels: [B] int."""
    labels = emotion_labels.astype(jnp.int32)
    # Sort the batch by emotion label so consecutive grid steps with the same label reuse
    # the already-resident per-emotion weight blob (no re-DMA); un-permute afterwards.
    order = jnp.argsort(labels)
    inv_order = jnp.argsort(order)

    xp = jnp.pad(hidden_states, ((0, 0), (PAD, PAD), (0, 0)))      # time pre-padding for convs
    xp = jnp.take(xp, order, axis=0)
    mask_row = jnp.take(attention_mask.astype(jnp.float32), order, axis=0)[:, None, :]
    labels_s = jnp.take(labels, order, axis=0)

    packed = fused_fn(
        labels_s, xp, mask_row,
        params['conv_w'], params['proj_w'], params['attn_in_w'], params['attn_out_w'],
        params['head_w'], params['vec'],
        params['wi1'], params['wi2'], params['wr1'], params['ivec'])

    packed = jnp.take(packed, inv_order, axis=0)                   # [B, 1, HID]
    embeddings = packed[:, 0, 0:OUT]
    intensity = packed[:, 0, OUT:OUT + FINAL]
    return {'intensity': intensity, 'embeddings': embeddings}


if __name__ == "__main__":
    key = jax.random.PRNGKey(0)
    kp, kx = jax.random.split(key, 2)
    params = init_params(kp)
    hidden_states = jax.random.normal(kx, (BATCH, SEQ, D_IN), jnp.float32)
    # first sample fully valid, second sample has its last 3 frames padded
    attention_mask = jnp.array([[1] * SEQ, [1] * (SEQ - 3) + [0] * 3], dtype=jnp.int32)
    emotion_labels = jnp.array([2, 5], dtype=jnp.int32)

    out = emotion_intensity_forward(params, hidden_states, attention_mask, emotion_labels)
    jax.block_until_ready(out)

    assert out['intensity'].shape == (BATCH, FINAL)
    assert out['embeddings'].shape == (BATCH, OUT)
    assert bool(jnp.all(jnp.isfinite(out['intensity'])))
    assert bool(jnp.all(jnp.isfinite(out['embeddings'])))
    print("KERNEL_OK")
</pallas_src>

<mosaic_0001>
module attributes {stable_mosaic.version = 11 : i64} {
  func.func @fused_kernel(%arg0: i32, %arg1: memref<2xi32, #tpu.memory_space<smem>>, %arg2: memref<1x14x128xf32, #tpu.memory_space<vmem>>, %arg3: memref<1x1x8xf32, #tpu.memory_space<vmem>>, %arg4: memref<1x16x128x128xbf16, #tpu.memory_space<vmem>>, %arg5: memref<1x4x2x128x128xbf16, #tpu.memory_space<vmem>>, %arg6: memref<1x4x128x384xbf16, #tpu.memory_space<vmem>>, %arg7: memref<1x4x128x128xbf16, #tpu.memory_space<vmem>>, %arg8: memref<1x4x128x64xbf16, #tpu.memory_space<vmem>>, %arg9: memref<1x54x128xf32, #tpu.memory_space<vmem>>, %arg10: memref<256x128xbf16, #tpu.memory_space<vmem>>, %arg11: memref<128x64xbf16, #tpu.memory_space<vmem>>, %arg12: memref<64x64xbf16, #tpu.memory_space<vmem>>, %arg13: memref<8x128xf32, #tpu.memory_space<vmem>>, %arg14: memref<1x1x128xf32, #tpu.memory_space<vmem>>) attributes {dimension_semantics = [#tpu.dimension_semantics<parallel>], iteration_bounds = array<i64: 2>, scalar_prefetch = 1 : i64, scratch_operands = 0 : i64, tpu.core_type = #tpu.core_type<tc>, window_params = [{transform_indices = @transform_0, window_bounds = array<i64: 1, 14, 128>}, {transform_indices = @transform_1, window_bounds = array<i64: 1, 1, 8>}, {transform_indices = @transform_2, window_bounds = array<i64: 1, 16, 128, 128>}, {transform_indices = @transform_3, window_bounds = array<i64: 1, 4, 2, 128, 128>}, {transform_indices = @transform_4, window_bounds = array<i64: 1, 4, 128, 384>}, {transform_indices = @transform_5, window_bounds = array<i64: 1, 4, 128, 128>}, {transform_indices = @transform_6, window_bounds = array<i64: 1, 4, 128, 64>}, {transform_indices = @transform_7, window_bounds = array<i64: 1, 54, 128>}, {pipeline_mode = #tpu.pipeline_mode<synchronous>, transform_indices = @transform_8, window_bounds = array<i64: 256, 128>}, {pipeline_mode = #tpu.pipeline_mode<synchronous>, transform_indices = @transform_9, window_bounds = array<i64: 128, 64>}, {pipeline_mode = #tpu.pipeline_mode<synchronous>, transform_indices = @transform_10, window_bounds = array<i64: 64, 64>}, {pipeline_mode = #tpu.pipeline_mode<synchronous>, transform_indices = @transform_11, window_bounds = array<i64: 8, 128>}, {transform_indices = @transform_12, window_bounds = array<i64: 1, 1, 128>}]} {
    %c0 = arith.constant 0 : index
    %c0_0 = arith.constant 0 : index
    %c0_1 = arith.constant 0 : index
    %0 = vector.load %arg2[%c0, %c0_0, %c0_1] : memref<1x14x128xf32, #tpu.memory_space<vmem>>, vector<1x14x128xf32>
    %1 = vector.shape_cast %0 : vector<1x14x128xf32> to vector<14x128xf32>
    %2 = arith.truncf %1 : vector<14x128xf32> to vector<14x128xbf16>
    %c0_2 = arith.constant 0 : index
    %c0_3 = arith.constant 0 : index
    %c0_4 = arith.constant 0 : index
    %3 = vector.load %arg3[%c0_2, %c0_3, %c0_4] : memref<1x1x8xf32, #tpu.memory_space<vmem>>, vector<1x1x8xf32>
    %4 = vector.shape_cast %3 : vector<1x1x8xf32> to vector<1x8xf32>
    %cst = arith.constant 5.000000e-01 : f32
    %5 = vector.broadcast %cst : f32 to vector<1x8xf32>
    %6 = arith.cmpf ogt, %4, %5 : vector<1x8xf32>
    %7 = vector.extract_strided_slice %2 {offsets = [0, 0], sizes = [8, 128], strides = [1, 1]} : vector<14x128xbf16> to vector<8x128xbf16>
    %8 = vector.extract_strided_slice %2 {offsets = [1, 0], sizes = [8, 128], strides = [1, 1]} : vector<14x128xbf16> to vector<8x128xbf16>
    %9 = vector.extract_strided_slice %2 {offsets = [2, 0], sizes = [8, 128], strides = [1, 1]} : vector<14x128xbf16> to vector<8x128xbf16>
    %10 = vector.extract_strided_slice %2 {offsets = [3, 0], sizes = [8, 128], strides = [1, 1]} : vector<14x128xbf16> to vector<8x128xbf16>
    %11 = vector.extract_strided_slice %2 {offsets = [4, 0], sizes = [8, 128], strides = [1, 1]} : vector<14x128xbf16> to vector<8x128xbf16>
    %12 = vector.extract_strided_slice %2 {offsets = [5, 0], sizes = [8, 128], strides = [1, 1]} : vector<14x128xbf16> to vector<8x128xbf16>
    %13 = vector.extract_strided_slice %2 {offsets = [6, 0], sizes = [8, 128], strides = [1, 1]} : vector<14x128xbf16> to vector<8x128xbf16>
    %cst_5 = arith.constant 0.000000e+00 : f32
    %14 = vector.broadcast %cst_5 : f32 to vector<8x128xf32>
    %c0_6 = arith.constant 0 : index
    %c0_7 = arith.constant 0 : index
    %c0_8 = arith.constant 0 : index
    %c0_9 = arith.constant 0 : index
    %15 = vector.load %arg4[%c0_6, %c0_7, %c0_8, %c0_9] : memref<1x16x128x128xbf16, #tpu.memory_space<vmem>>, vector<1x1x128x128xbf16>
    %16 = vector.shape_cast %15 : vector<1x1x128x128xbf16> to vector<128x128xbf16>
    %cst_10 = arith.constant dense<0.000000e+00> : vector<8x128xf32>
    %17 = tpu.matmul %7, %16, %cst_10 {dimension_numbers = #tpu.dot_dimension_numbers<[1], [0], [0], [1], [0, 0, 1, 1], [], []>} : vector<8x128xbf16>, vector<128x128xbf16>, vector<8x128xf32> -> vector<8x128xf32>
    %18 = arith.addf %14, %17 : vector<8x128xf32>
    %c0_11 = arith.constant 0 : index
    %c1 = arith.constant 1 : index
    %c0_12 = arith.constant 0 : index
    %c0_13 = arith.constant 0 : index
    %19 = vector.load %arg4[%c0_11, %c1, %c0_12, %c0_13] : memref<1x16x128x128xbf16, #tpu.memory_space<vmem>>, vector<1x1x128x128xbf16>
    %20 = vector.shape_cast %19 : vector<1x1x128x128xbf16> to vector<128x128xbf16>
    %cst_14 = arith.constant dense<0.000000e+00> : vector<8x128xf32>
    %21 = tpu.matmul %8, %20, %cst_14 {dimension_numbers = #tpu.dot_dimension_numbers<[1], [0], [0], [1], [0, 0, 1, 1], [], []>} : vector<8x128xbf16>, vector<128x128xbf16>, vector<8x128xf32> -> vector<8x128xf32>
    %22 = arith.addf %18, %21 : vector<8x128xf32>
    %c0_15 = arith.constant 0 : index
    %c2 = arith.constant 2 : index
    %c0_16 = arith.constant 0 : index
    %c0_17 = arith.constant 0 : index
    %23 = vector.load %arg4[%c0_15, %c2, %c0_16, %c0_17] : memref<1x16x128x128xbf16, #tpu.memory_space<vmem>>, vector<1x1x128x128xbf16>
    %24 = vector.shape_cast %23 : vector<1x1x128x128xbf16> to vector<128x128xbf16>
    %cst_18 = arith.constant dense<0.000000e+00> : vector<8x128xf32>
    %25 = tpu.matmul %9, %24, %cst_18 {dimension_numbers = #tpu.dot_dimension_numbers<[1], [0], [0], [1], [0, 0, 1, 1], [], []>} : vector<8x128xbf16>, vector<128x128xbf16>, vector<8x128xf32> -> vector<8x128xf32>
    %26 = arith.addf %22, %25 : vector<8x128xf32>
    %c0_19 = arith.constant 0 : index
    %c3 = arith.constant 3 : index
    %c0_20 = arith.constant 0 : index
    %c0_21 = arith.constant 0 : index
    %27 = vector.load %arg4[%c0_19, %c3, %c0_20, %c0_21] : memref<1x16x128x128xbf16, #tpu.memory_space<vmem>>, vector<1x1x128x128xbf16>
    %28 = vector.shape_cast %27 : vector<1x1x128x128xbf16> to vector<128x128xbf16>
    %cst_22 = arith.constant dense<0.000000e+00> : vector<8x128xf32>
    %29 = tpu.matmul %10, %28, %cst_22 {dimension_numbers = #tpu.dot_dimension_numbers<[1], [0], [0], [1], [0, 0, 1, 1], [], []>} : vector<8x128xbf16>, vector<128x128xbf16>, vector<8x128xf32> -> vector<8x128xf32>
    %30 = arith.addf %26, %29 : vector<8x128xf32>
    %c0_23 = arith.constant 0 : index
    %c4 = arith.constant 4 : index
    %c0_24 = arith.constant 0 : index
    %c0_25 = arith.constant 0 : index
    %31 = vector.load %arg4[%c0_23, %c4, %c0_24, %c0_25] : memref<1x16x128x128xbf16, #tpu.memory_space<vmem>>, vector<1x1x128x128xbf16>
    %32 = vector.shape_cast %31 : vector<1x1x128x128xbf16> to vector<128x128xbf16>
    %cst_26 = arith.constant dense<0.000000e+00> : vector<8x128xf32>
    %33 = tpu.matmul %11, %32, %cst_26 {dimension_numbers = #tpu.dot_dimension_numbers<[1], [0], [0], [1], [0, 0, 1, 1], [], []>} : vector<8x128xbf16>, vector<128x128xbf16>, vector<8x128xf32> -> vector<8x128xf32>
    %34 = arith.addf %30, %33 : vector<8x128xf32>
    %c0_27 = arith.constant 0 : index
    %c5 = arith.constant 5 : index
    %c0_28 = arith.constant 0 : index
    %c0_29 = arith.constant 0 : index
    %35 = vector.load %arg4[%c0_27, %c5, %c0_28, %c0_29] : memref<1x16x128x128xbf16, #tpu.memory_space<vmem>>, vector<1x1x128x128xbf16>
    %36 = vector.shape_cast %35 : vector<1x1x128x128xbf16> to vector<128x128xbf16>
    %cst_30 = arith.constant dense<0.000000e+00> : vector<8x128xf32>
    %37 = tpu.matmul %12, %36, %cst_30 {dimension_numbers = #tpu.dot_dimension_numbers<[1], [0], [0], [1], [0, 0, 1, 1], [], []>} : vector<8x128xbf16>, vector<128x128xbf16>, vector<8x128xf32> -> vector<8x128xf32>
    %38 = arith.addf %34, %37 : vector<8x128xf32>
    %c0_31 = arith.constant 0 : index
    %c6 = arith.constant 6 : index
    %c0_32 = arith.constant 0 : index
    %c0_33 = arith.constant 0 : index
    %39 = vector.load %arg4[%c0_31, %c6, %c0_32, %c0_33] : memref<1x16x128x128xbf16, #tpu.memory_space<vmem>>, vector<1x1x128x128xbf16>
    %40 = vector.shape_cast %39 : vector<1x1x128x128xbf16> to vector<128x128xbf16>
    %cst_34 = arith.constant dense<0.000000e+00> : vector<8x128xf32>
    %41 = tpu.matmul %13, %40, %cst_34 {dimension_numbers = #tpu.dot_dimension_numbers<[1], [0], [0], [1], [0, 0, 1, 1], [], []>} : vector<8x128xbf16>, vector<128x128xbf16>, vector<8x128xf32> -> vector<8x128xf32>
    %42 = arith.addf %38, %41 : vector<8x128xf32>
    %cst_35 = arith.constant 0.000000e+00 : f32
    %43 = vector.broadcast %cst_35 : f32 to vector<8x128xf32>
    %c0_36 = arith.constant 0 : index
    %c7 = arith.constant 7 : index
    %c0_37 = arith.constant 0 : index
    %c0_38 = arith.constant 0 : index
    %44 = vector.load %arg4[%c0_36, %c7, %c0_37, %c0_38] : memref<1x16x128x128xbf16, #tpu.memory_space<vmem>>, vector<1x1x128x128xbf16>
    %45 = vector.shape_cast %44 : vector<1x1x128x128xbf16> to vector<128x128xbf16>
    %cst_39 = arith.constant dense<0.000000e+00> : vector<8x128xf32>
    %46 = tpu.matmul %8, %45, %cst_39 {dimension_numbers = #tpu.dot_dimension_numbers<[1], [0], [0], [1], [0, 0, 1, 1], [], []>} : vector<8x128xbf16>, vector<128x128xbf16>, vector<8x128xf32> -> vector<8x128xf32>
    %47 = arith.addf %43, %46 : vector<8x128xf32>
    %c0_40 = arith.constant 0 : index
    %c8 = arith.constant 8 : index
    %c0_41 = arith.constant 0 : index
    %c0_42 = arith.constant 0 : index
    %48 = vector.load %arg4[%c0_40, %c8, %c0_41, %c0_42] : memref<1x16x128x128xbf16, #tpu.memory_space<vmem>>, vector<1x1x128x128xbf16>
    %49 = vector.shape_cast %48 : vector<1x1x128x128xbf16> to vector<128x128xbf16>
    %cst_43 = arith.constant dense<0.000000e+00> : vector<8x128xf32>
    %50 = tpu.matmul %9, %49, %cst_43 {dimension_numbers = #tpu.dot_dimension_numbers<[1], [0], [0], [1], [0, 0, 1, 1], [], []>} : vector<8x128xbf16>, vector<128x128xbf16>, vector<8x128xf32> -> vector<8x128xf32>
    %51 = arith.addf %47, %50 : vector<8x128xf32>
    %c0_44 = arith.constant 0 : index
    %c9 = arith.constant 9 : index
    %c0_45 = arith.constant 0 : index
    %c0_46 = arith.constant 0 : index
    %52 = vector.load %arg4[%c0_44, %c9, %c0_45, %c0_46] : memref<1x16x128x128xbf16, #tpu.memory_space<vmem>>, vector<1x1x128x128xbf16>
    %53 = vector.shape_cast %52 : vector<1x1x128x128xbf16> to vector<128x128xbf16>
    %cst_47 = arith.constant dense<0.000000e+00> : vector<8x128xf32>
    %54 = tpu.matmul %10, %53, %cst_47 {dimension_numbers = #tpu.dot_dimension_numbers<[1], [0], [0], [1], [0, 0, 1, 1], [], []>} : vector<8x128xbf16>, vector<128x128xbf16>, vector<8x128xf32> -> vector<8x128xf32>
    %55 = arith.addf %51, %54 : vector<8x128xf32>
    %c0_48 = arith.constant 0 : index
    %c10 = arith.constant 10 : index
    %c0_49 = arith.constant 0 : index
    %c0_50 = arith.constant 0 : index
    %56 = vector.load %arg4[%c0_48, %c10, %c0_49, %c0_50] : memref<1x16x128x128xbf16, #tpu.memory_space<vmem>>, vector<1x1x128x128xbf16>
    %57 = vector.shape_cast %56 : vector<1x1x128x128xbf16> to vector<128x128xbf16>
    %cst_51 = arith.constant dense<0.000000e+00> : vector<8x128xf32>
    %58 = tpu.matmul %11, %57, %cst_51 {dimension_numbers = #tpu.dot_dimension_numbers<[1], [0], [0], [1], [0, 0, 1, 1], [], []>} : vector<8x128xbf16>, vector<128x128xbf16>, vector<8x128xf32> -> vector<8x128xf32>
    %59 = arith.addf %55, %58 : vector<8x128xf32>
    %c0_52 = arith.constant 0 : index
    %c11 = arith.constant 11 : index
    %c0_53 = arith.constant 0 : index
    %c0_54 = arith.constant 0 : index
    %60 = vector.load %arg4[%c0_52, %c11, %c0_53, %c0_54] : memref<1x16x128x128xbf16, #tpu.memory_space<vmem>>, vector<1x1x128x128xbf16>
    %61 = vector.shape_cast %60 : vector<1x1x128x128xbf16> to vector<128x128xbf16>
    %cst_55 = arith.constant dense<0.000000e+00> : vector<8x128xf32>
    %62 = tpu.matmul %12, %61, %cst_55 {dimension_numbers = #tpu.dot_dimension_numbers<[1], [0], [0], [1], [0, 0, 1, 1], [], []>} : vector<8x128xbf16>, vector<128x128xbf16>, vector<8x128xf32> -> vector<8x128xf32>
    %63 = arith.addf %59, %62 : vector<8x128xf32>
    %cst_56 = arith.constant 0.000000e+00 : f32
    %64 = vector.broadcast %cst_56 : f32 to vector<8x128xf32>
    %c0_57 = arith.constant 0 : index
    %c12 = arith.constant 12 : index
    %c0_58 = arith.constant 0 : index
    %c0_59 = arith.constant 0 : index
    %65 = vector.load %arg4[%c0_57, %c12, %c0_58, %c0_59] : memref<1x16x128x128xbf16, #tpu.memory_space<vmem>>, vector<1x1x128x128xbf16>
    %66 = vector.shape_cast %65 : vector<1x1x128x128xbf16> to vector<128x128xbf16>
    %cst_60 = arith.constant dense<0.000000e+00> : vector<8x128xf32>
    %67 = tpu.matmul %9, %66, %cst_60 {dimension_numbers = #tpu.dot_dimension_numbers<[1], [0], [0], [1], [0, 0, 1, 1], [], []>} : vector<8x128xbf16>, vector<128x128xbf16>, vector<8x128xf32> -> vector<8x128xf32>
    %68 = arith.addf %64, %67 : vector<8x128xf32>
    %c0_61 = arith.constant 0 : index
    %c13 = arith.constant 13 : index
    %c0_62 = arith.constant 0 : index
    %c0_63 = arith.constant 0 : index
    %69 = vector.load %arg4[%c0_61, %c13, %c0_62, %c0_63] : memref<1x16x128x128xbf16, #tpu.memory_space<vmem>>, vector<1x1x128x128xbf16>
    %70 = vector.shape_cast %69 : vector<1x1x128x128xbf16> to vector<128x128xbf16>
    %cst_64 = arith.constant dense<0.000000e+00> : vector<8x128xf32>
    %71 = tpu.matmul %10, %70, %cst_64 {dimension_numbers = #tpu.dot_dimension_numbers<[1], [0], [0], [1], [0, 0, 1, 1], [], []>} : vector<8x128xbf16>, vector<128x128xbf16>, vector<8x128xf32> -> vector<8x128xf32>
    %72 = arith.addf %68, %71 : vector<8x128xf32>
    %c0_65 = arith.constant 0 : index
    %c14 = arith.constant 14 : index
    %c0_66 = arith.constant 0 : index
    %c0_67 = arith.constant 0 : index
    %73 = vector.load %arg4[%c0_65, %c14, %c0_66, %c0_67] : memref<1x16x128x128xbf16, #tpu.memory_space<vmem>>, vector<1x1x128x128xbf16>
    %74 = vector.shape_cast %73 : vector<1x1x128x128xbf16> to vector<128x128xbf16>
    %cst_68 = arith.constant dense<0.000000e+00> : vector<8x128xf32>
    %75 = tpu.matmul %11, %74, %cst_68 {dimension_numbers = #tpu.dot_dimension_numbers<[1], [0], [0], [1], [0, 0, 1, 1], [], []>} : vector<8x128xbf16>, vector<128x128xbf16>, vector<8x128xf32> -> vector<8x128xf32>
    %76 = arith.addf %72, %75 : vector<8x128xf32>
    %cst_69 = arith.constant 0.000000e+00 : f32
    %77 = vector.broadcast %cst_69 : f32 to vector<8x128xf32>
    %c0_70 = arith.constant 0 : index
    %c15 = arith.constant 15 : index
    %c0_71 = arith.constant 0 : index
    %c0_72 = arith.constant 0 : index
    %78 = vector.load %arg4[%c0_70, %c15, %c0_71, %c0_72] : memref<1x16x128x128xbf16, #tpu.memory_space<vmem>>, vector<1x1x128x128xbf16>
    %79 = vector.shape_cast %78 : vector<1x1x128x128xbf16> to vector<128x128xbf16>
    %cst_73 = arith.constant dense<0.000000e+00> : vector<8x128xf32>
    %80 = tpu.matmul %10, %79, %cst_73 {dimension_numbers = #tpu.dot_dimension_numbers<[1], [0], [0], [1], [0, 0, 1, 1], [], []>} : vector<8x128xbf16>, vector<128x128xbf16>, vector<8x128xf32> -> vector<8x128xf32>
    %81 = arith.addf %77, %80 : vector<8x128xf32>
    %cst_74 = arith.constant dense<0.000000e+00> : vector<1xf32>
    %82 = vector.multi_reduction <add>, %4, %cst_74 [1] : vector<1x8xf32> to vector<1xf32>
    %83 = vector.shape_cast %82 : vector<1xf32> to vector<1x1xf32>
    %cst_75 = arith.constant 9.99999971E-10 : f32
    %84 = vector.broadcast %cst_75 : f32 to vector<1x1xf32>
    %85 = arith.maximumf %83, %84 : vector<1x1xf32>
    %86 = tpu.reciprocal %85 {approx = true} : vector<1x1xf32> -> vector<1x1xf32>
    %c0_76 = arith.constant 0 : index
    %c0_77 = arith.constant 0 : index
    %87 = vector.load %arg10[%c0_76, %c0_77] : memref<256x128xbf16, #tpu.memory_space<vmem>>, vector<256x128xbf16>
    %cst_78 = arith.constant 0.000000e+00 : f32
    %88 = vector.broadcast %cst_78 : f32 to vector<1x128xf32>
    %89 = vector.extract_strided_slice %42 {offsets = [0, 0], sizes = [8, 32], strides = [1, 1]} : vector<8x128xf32> to vector<8x32xf32>
    %90 = vector.extract_strided_slice %63 {offsets = [0, 0], sizes = [8, 32], strides = [1, 1]} : vector<8x128xf32> to vector<8x32xf32>
    %91 = vector.extract_strided_slice %76 {offsets = [0, 0], sizes = [8, 32], strides = [1, 1]} : vector<8x128xf32> to vector<8x32xf32>
    %92 = vector.extract_strided_slice %81 {offsets = [0, 0], sizes = [8, 32], strides = [1, 1]} : vector<8x128xf32> to vector<8x32xf32>
    %93 = tpu.concatenate %89, %90, %91, %92 in 1 : vector<8x32xf32>, vector<8x32xf32>, vector<8x32xf32>, vector<8x32xf32> -> vector<8x128xf32>
    %c0_79 = arith.constant 0 : index
    %c0_80 = arith.constant 0 : index
    %c0_81 = arith.constant 0 : index
    %94 = vector.load %arg9[%c0_79, %c0_80, %c0_81] : memref<1x54x128xf32, #tpu.memory_space<vmem>>, vector<1x1x128xf32>
    %95 = vector.shape_cast %94 : vector<1x1x128xf32> to vector<1x128xf32>
    %96 = vector.broadcast %95 : vector<1x128xf32> to vector<8x128xf32>
    %97 = arith.addf %93, %96 : vector<8x128xf32>
    %cst_82 = arith.constant 5.000000e-01 : f32
    %98 = vector.broadcast %cst_82 : f32 to vector<8x128xf32>
    %99 = arith.mulf %98, %97 : vector<8x128xf32>
    %cst_83 = arith.constant 4.471500e-02 : f32
    %100 = vector.broadcast %cst_83 : f32 to vector<8x128xf32>
    %101 = arith.mulf %100, %97 : vector<8x128xf32>
    %102 = arith.mulf %101, %97 : vector<8x128xf32>
    %103 = arith.mulf %102, %97 : vector<8x128xf32>
    %104 = arith.addf %97, %103 : vector<8x128xf32>
    %cst_84 = arith.constant 0.797884583 : f32
    %105 = vector.broadcast %cst_84 : f32 to vector<8x128xf32>
    %106 = arith.mulf %105, %104 : vector<8x128xf32>
    %107 = math.tanh %106 : vector<8x128xf32>
    %cst_85 = arith.constant 1.000000e+00 : f32
    %108 = vector.broadcast %cst_85 : f32 to vector<8x128xf32>
    %109 = arith.addf %108, %107 : vector<8x128xf32>
    %110 = arith.mulf %99, %109 : vector<8x128xf32>
    %111 = arith.truncf %110 : vector<8x128xf32> to vector<8x128xbf16>
    %c0_86 = arith.constant 0 : index
    %c0_87 = arith.constant 0 : index
    %c0_88 = arith.constant 0 : index
    %c0_89 = arith.constant 0 : index
    %c0_90 = arith.constant 0 : index
    %112 = vector.load %arg5[%c0_86, %c0_87, %c0_88, %c0_89, %c0_90] : memref<1x4x2x128x128xbf16, #tpu.memory_space<vmem>>, vector<1x1x1x128x128xbf16>
    %113 = vector.shape_cast %112 : vector<1x1x1x128x128xbf16> to vector<128x128xbf16>
    %cst_91 = arith.constant dense<0.000000e+00> : vector<8x128xf32>
    %114 = tpu.matmul %111, %113, %cst_91 {dimension_numbers = #tpu.dot_dimension_numbers<[1], [0], [0], [1], [0, 0, 1, 1], [], []>} : vector<8x128xbf16>, vector<128x128xbf16>, vector<8x128xf32> -> vector<8x128xf32>
    %c0_92 = arith.constant 0 : index
    %c4_93 = arith.constant 4 : index
    %c0_94 = arith.constant 0 : index
    %115 = vector.load %arg9[%c0_92, %c4_93, %c0_94] : memref<1x54x128xf32, #tpu.memory_space<vmem>>, vector<1x1x128xf32>
    %116 = vector.shape_cast %115 : vector<1x1x128xf32> to vector<1x128xf32>
    %117 = vector.broadcast %116 : vector<1x128xf32> to vector<8x128xf32>
    %118 = arith.addf %114, %117 : vector<8x128xf32>
    %c0_95 = arith.constant 0 : index
    %c12_96 = arith.constant 12 : index
    %c0_97 = arith.constant 0 : index
    %119 = vector.load %arg9[%c0_95, %c12_96, %c0_97] : memref<1x54x128xf32, #tpu.memory_space<vmem>>, vector<1x1x128xf32>
    %120 = vector.shape_cast %119 : vector<1x1x128xf32> to vector<1x128xf32>
    %c0_98 = arith.constant 0 : index
    %c20 = arith.constant 20 : index
    %c0_99 = arith.constant 0 : index
    %121 = vector.load %arg9[%c0_98, %c20, %c0_99] : memref<1x54x128xf32, #tpu.memory_space<vmem>>, vector<1x1x128xf32>
    %122 = vector.shape_cast %121 : vector<1x1x128xf32> to vector<1x128xf32>
    %cst_100 = arith.constant dense<0.000000e+00> : vector<8xf32>
    %123 = vector.multi_reduction <add>, %118, %cst_100 [1] : vector<8x128xf32> to vector<8xf32>
    %124 = vector.shape_cast %123 : vector<8xf32> to vector<8x1xf32>
    %cst_101 = arith.constant 1.280000e+02 : f32
    %125 = vector.broadcast %cst_101 : f32 to vector<8x1xf32>
    %126 = arith.divf %124, %125 : vector<8x1xf32>
    %127 = vector.broadcast %126 : vector<8x1xf32> to vector<8x128xf32>
    %128 = arith.subf %118, %127 : vector<8x128xf32>
    %129 = arith.mulf %128, %128 : vector<8x128xf32>
    %cst_102 = arith.constant dense<0.000000e+00> : vector<8xf32>
    %130 = vector.multi_reduction <add>, %129, %cst_102 [1] : vector<8x128xf32> to vector<8xf32>
    %131 = vector.shape_cast %130 : vector<8xf32> to vector<8x1xf32>
    %cst_103 = arith.constant 1.280000e+02 : f32
    %132 = vector.broadcast %cst_103 : f32 to vector<8x1xf32>
    %133 = arith.divf %131, %132 : vector<8x1xf32>
    %134 = vector.broadcast %126 : vector<8x1xf32> to vector<8x128xf32>
    %135 = arith.subf %118, %134 : vector<8x128xf32>
    %cst_104 = arith.constant 9.99999974E-6 : f32
    %136 = vector.broadcast %cst_104 : f32 to vector<8x1xf32>
    %137 = arith.addf %133, %136 : vector<8x1xf32>
    %138 = math.rsqrt %137 : vector<8x1xf32>
    %139 = vector.broadcast %138 : vector<8x1xf32> to vector<8x128xf32>
    %140 = arith.mulf %135, %139 : vector<8x128xf32>
    %141 = vector.broadcast %120 : vector<1x128xf32> to vector<8x128xf32>
    %142 = arith.mulf %140, %141 : vector<8x128xf32>
    %143 = vector.broadcast %122 : vector<1x128xf32> to vector<8x128xf32>
    %144 = arith.addf %142, %143 : vector<8x128xf32>
    %cst_105 = arith.constant 5.000000e-01 : f32
    %145 = vector.broadcast %cst_105 : f32 to vector<8x128xf32>
    %146 = arith.mulf %145, %144 : vector<8x128xf32>
    %cst_106 = arith.constant 4.471500e-02 : f32
    %147 = vector.broadcast %cst_106 : f32 to vector<8x128xf32>
    %148 = arith.mulf %147, %144 : vector<8x128xf32>
    %149 = arith.mulf %148, %144 : vector<8x128xf32>
    %150 = arith.mulf %149, %144 : vector<8x128xf32>
    %151 = arith.addf %144, %150 : vector<8x128xf32>
    %cst_107 = arith.constant 0.797884583 : f32
    %152 = vector.broadcast %cst_107 : f32 to vector<8x128xf32>
    %153 = arith.mulf %152, %151 : vector<8x128xf32>
    %154 = math.tanh %153 : vector<8x128xf32>
    %cst_108 = arith.constant 1.000000e+00 : f32
    %155 = vector.broadcast %cst_108 : f32 to vector<8x128xf32>
    %156 = arith.addf %155, %154 : vector<8x128xf32>
    %157 = arith.mulf %146, %156 : vector<8x128xf32>
    %158 = arith.addf %157, %110 : vector<8x128xf32>
    %159 = arith.truncf %158 : vector<8x128xf32> to vector<8x128xbf16>
    %c0_109 = arith.constant 0 : index
    %c0_110 = arith.constant 0 : index
    %c1_111 = arith.constant 1 : index
    %c0_112 = arith.constant 0 : index
    %c0_113 = arith.constant 0 : index
    %160 = vector.load %arg5[%c0_109, %c0_110, %c1_111, %c0_112, %c0_113] : memref<1x4x2x128x128xbf16, #tpu.memory_space<vmem>>, vector<1x1x1x128x128xbf16>
    %161 = vector.shape_cast %160 : vector<1x1x1x128x128xbf16> to vector<128x128xbf16>
    %cst_114 = arith.constant dense<0.000000e+00> : vector<8x128xf32>
    %162 = tpu.matmul %159, %161, %cst_114 {dimension_numbers = #tpu.dot_dimension_numbers<[1], [0], [0], [1], [0, 0, 1, 1], [], []>} : vector<8x128xbf16>, vector<128x128xbf16>, vector<8x128xf32> -> vector<8x128xf32>
    %c0_115 = arith.constant 0 : index
    %c5_116 = arith.constant 5 : index
    %c0_117 = arith.constant 0 : index
    %163 = vector.load %arg9[%c0_115, %c5_116, %c0_117] : memref<1x54x128xf32, #tpu.memory_space<vmem>>, vector<1x1x128xf32>
    %164 = vector.shape_cast %163 : vector<1x1x128xf32> to vector<1x128xf32>
    %165 = vector.broadcast %164 : vector<1x128xf32> to vector<8x128xf32>
    %166 = arith.addf %162, %165 : vector<8x128xf32>
    %c0_118 = arith.constant 0 : index
    %c13_119 = arith.constant 13 : index
    %c0_120 = arith.constant 0 : index
    %167 = vector.load %arg9[%c0_118, %c13_119, %c0_120] : memref<1x54x128xf32, #tpu.memory_space<vmem>>, vector<1x1x128xf32>
    %168 = vector.shape_cast %167 : vector<1x1x128xf32> to vector<1x128xf32>
    %c0_121 = arith.constant 0 : index
    %c21 = arith.constant 21 : index
    %c0_122 = arith.constant 0 : index
    %169 = vector.load %arg9[%c0_121, %c21, %c0_122] : memref<1x54x128xf32, #tpu.memory_space<vmem>>, vector<1x1x128xf32>
    %170 = vector.shape_cast %169 : vector<1x1x128xf32> to vector<1x128xf32>
    %cst_123 = arith.constant dense<0.000000e+00> : vector<8xf32>
    %171 = vector.multi_reduction <add>, %166, %cst_123 [1] : vector<8x128xf32> to vector<8xf32>
    %172 = vector.shape_cast %171 : vector<8xf32> to vector<8x1xf32>
    %cst_124 = arith.constant 1.280000e+02 : f32
    %173 = vector.broadcast %cst_124 : f32 to vector<8x1xf32>
    %174 = arith.divf %172, %173 : vector<8x1xf32>
    %175 = vector.broadcast %174 : vector<8x1xf32> to vector<8x128xf32>
    %176 = arith.subf %166, %175 : vector<8x128xf32>
    %177 = arith.mulf %176, %176 : vector<8x128xf32>
    %cst_125 = arith.constant dense<0.000000e+00> : vector<8xf32>
    %178 = vector.multi_reduction <add>, %177, %cst_125 [1] : vector<8x128xf32> to vector<8xf32>
    %179 = vector.shape_cast %178 : vector<8xf32> to vector<8x1xf32>
    %cst_126 = arith.constant 1.280000e+02 : f32
    %180 = vector.broadcast %cst_126 : f32 to vector<8x1xf32>
    %181 = arith.divf %179, %180 : vector<8x1xf32>
    %182 = vector.broadcast %174 : vector<8x1xf32> to vector<8x128xf32>
    %183 = arith.subf %166, %182 : vector<8x128xf32>
    %cst_127 = arith.constant 9.99999974E-6 : f32
    %184 = vector.broadcast %cst_127 : f32 to vector<8x1xf32>
    %185 = arith.addf %181, %184 : vector<8x1xf32>
    %186 = math.rsqrt %185 : vector<8x1xf32>
    %187 = vector.broadcast %186 : vector<8x1xf32> to vector<8x128xf32>
    %188 = arith.mulf %183, %187 : vector<8x128xf32>
    %189 = vector.broadcast %168 : vector<1x128xf32> to vector<8x128xf32>
    %190 = arith.mulf %188, %189 : vector<8x128xf32>
    %191 = vector.broadcast %170 : vector<1x128xf32> to vector<8x128xf32>
    %192 = arith.addf %190, %191 : vector<8x128xf32>
    %cst_128 = arith.constant 5.000000e-01 : f32
    %193 = vector.broadcast %cst_128 : f32 to vector<8x128xf32>
    %194 = arith.mulf %193, %192 : vector<8x128xf32>
    %cst_129 = arith.constant 4.471500e-02 : f32
    %195 = vector.broadcast %cst_129 : f32 to vector<8x128xf32>
    %196 = arith.mulf %195, %192 : vector<8x128xf32>
    %197 = arith.mulf %196, %192 : vector<8x128xf32>
    %198 = arith.mulf %197, %192 : vector<8x128xf32>
    %199 = arith.addf %192, %198 : vector<8x128xf32>
    %cst_130 = arith.constant 0.797884583 : f32
    %200 = vector.broadcast %cst_130 : f32 to vector<8x128xf32>
    %201 = arith.mulf %200, %199 : vector<8x128xf32>
    %202 = math.tanh %201 : vector<8x128xf32>
    %cst_131 = arith.constant 1.000000e+00 : f32
    %203 = vector.broadcast %cst_131 : f32 to vector<8x128xf32>
    %204 = arith.addf %203, %202 : vector<8x128xf32>
    %205 = arith.mulf %194, %204 : vector<8x128xf32>
    %206 = arith.addf %205, %158 : vector<8x128xf32>
    %207 = arith.truncf %206 : vector<8x128xf32> to vector<8x128xbf16>
    %c0_132 = arith.constant 0 : index
    %c0_133 = arith.constant 0 : index
    %c0_134 = arith.constant 0 : index
    %c0_135 = arith.constant 0 : index
    %208 = vector.load %arg6[%c0_132, %c0_133, %c0_134, %c0_135] : memref<1x4x128x384xbf16, #tpu.memory_space<vmem>>, vector<1x1x128x384xbf16>
    %209 = vector.shape_cast %208 : vector<1x1x128x384xbf16> to vector<128x384xbf16>
    %cst_136 = arith.constant dense<0.000000e+00> : vector<8x384xf32>
    %210 = tpu.matmul %207, %209, %cst_136 {dimension_numbers = #tpu.dot_dimension_numbers<[1], [0], [0], [1], [0, 0, 1, 1], [], []>} : vector<8x128xbf16>, vector<128x384xbf16>, vector<8x384xf32> -> vector<8x384xf32>
    %211 = vector.extract_strided_slice %210 {offsets = [0, 0], sizes = [8, 128], strides = [1, 1]} : vector<8x384xf32> to vector<8x128xf32>
    %c0_137 = arith.constant 0 : index
    %c28 = arith.constant 28 : index
    %c0_138 = arith.constant 0 : index
    %212 = vector.load %arg9[%c0_137, %c28, %c0_138] : memref<1x54x128xf32, #tpu.memory_space<vmem>>, vector<1x1x128xf32>
    %213 = vector.shape_cast %212 : vector<1x1x128xf32> to vector<1x128xf32>
    %214 = vector.broadcast %213 : vector<1x128xf32> to vector<8x128xf32>
    %215 = arith.addf %211, %214 : vector<8x128xf32>
    %216 = vector.extract_strided_slice %210 {offsets = [0, 128], sizes = [8, 128], strides = [1, 1]} : vector<8x384xf32> to vector<8x128xf32>
    %c0_139 = arith.constant 0 : index
    %c29 = arith.constant 29 : index
    %c0_140 = arith.constant 0 : index
    %217 = vector.load %arg9[%c0_139, %c29, %c0_140] : memref<1x54x128xf32, #tpu.memory_space<vmem>>, vector<1x1x128xf32>
    %218 = vector.shape_cast %217 : vector<1x1x128xf32> to vector<1x128xf32>
    %219 = vector.broadcast %218 : vector<1x128xf32> to vector<8x128xf32>
    %220 = arith.addf %216, %219 : vector<8x128xf32>
    %221 = vector.extract_strided_slice %210 {offsets = [0, 256], sizes = [8, 128], strides = [1, 1]} : vector<8x384xf32> to vector<8x128xf32>
    %c0_141 = arith.constant 0 : index
    %c30 = arith.constant 30 : index
    %c0_142 = arith.constant 0 : index
    %222 = vector.load %arg9[%c0_141, %c30, %c0_142] : memref<1x54x128xf32, #tpu.memory_space<vmem>>, vector<1x1x128xf32>
    %223 = vector.shape_cast %222 : vector<1x1x128xf32> to vector<1x128xf32>
    %224 = vector.broadcast %223 : vector<1x128xf32> to vector<8x128xf32>
    %225 = arith.addf %221, %224 : vector<8x128xf32>
    %c0_143 = arith.constant 0 : index
    %c0_144 = arith.constant 0 : index
    %c0_145 = arith.constant 0 : index
    %c0_146 = arith.constant 0 : index
    %226 = vector.load %arg7[%c0_143, %c0_144, %c0_145, %c0_146] : memref<1x4x128x128xbf16, #tpu.memory_space<vmem>>, vector<1x1x128x128xbf16>
    %227 = vector.shape_cast %226 : vector<1x1x128x128xbf16> to vector<128x128xbf16>
    %cst_147 = arith.constant 0.000000e+00 : f32
    %228 = vector.broadcast %cst_147 : f32 to vector<8x128xf32>
    %229 = vector.extract_strided_slice %215 {offsets = [0, 0], sizes = [8, 32], strides = [1, 1]} : vector<8x128xf32> to vector<8x32xf32>
    %cst_148 = arith.constant 0.176776692 : f32
    %230 = vector.broadcast %cst_148 : f32 to vector<8x32xf32>
    %231 = arith.mulf %229, %230 : vector<8x32xf32>
    %232 = vector.extract_strided_slice %220 {offsets = [0, 0], sizes = [8, 32], strides = [1, 1]} : vector<8x128xf32> to vector<8x32xf32>
    %233 = vector.extract_strided_slice %225 {offsets = [0, 0], sizes = [8, 32], strides = [1, 1]} : vector<8x128xf32> to vector<8x32xf32>
    %234 = tpu.transpose %232, [1, 0] : vector<8x32xf32> -> vector<32x8xf32>
    %cst_149 = arith.constant dense<0.000000e+00> : vector<8x8xf32>
    %235 = tpu.matmul %231, %234, %cst_149 {dimension_numbers = #tpu.dot_dimension_numbers<[1], [0], [0], [1], [0, 0, 1, 1], [], []>} : vector<8x32xf32>, vector<32x8xf32>, vector<8x8xf32> -> vector<8x8xf32>
    %cst_150 = arith.constant -1.000000e+30 : f32
    %236 = vector.shape_cast %6 : vector<1x8xi1> to vector<1x8xi1>
    %237 = vector.broadcast %236 : vector<1x8xi1> to vector<8x8xi1>
    %238 = vector.broadcast %cst_150 : f32 to vector<8x8xf32>
    %239 = arith.select %237, %235, %238 : vector<8x8xi1>, vector<8x8xf32>
    %cst_151 = arith.constant dense<0xFF800000> : vector<8xf32>
    %240 = vector.multi_reduction <maximumf>, %239, %cst_151 [1] : vector<8x8xf32> to vector<8xf32>
    %241 = vector.shape_cast %240 : vector<8xf32> to vector<8x1xf32>
    %242 = vector.broadcast %241 : vector<8x1xf32> to vector<8x8xf32>
    %243 = arith.subf %239, %242 : vector<8x8xf32>
    %244 = math.exp %243 : vector<8x8xf32>
    %cst_152 = arith.constant dense<0.000000e+00> : vector<8xf32>
    %245 = vector.multi_reduction <add>, %244, %cst_152 [1] : vector<8x8xf32> to vector<8xf32>
    %246 = vector.shape_cast %245 : vector<8xf32> to vector<8x1xf32>
    %247 = tpu.reciprocal %246 {approx = true} : vector<8x1xf32> -> vector<8x1xf32>
    %248 = vector.broadcast %247 : vector<8x1xf32> to vector<8x8xf32>
    %249 = arith.mulf %244, %248 : vector<8x8xf32>
    %cst_153 = arith.constant dense<0.000000e+00> : vector<8x32xf32>
    %250 = tpu.matmul %249, %233, %cst_153 {dimension_numbers = #tpu.dot_dimension_numbers<[1], [0], [0], [1], [0, 0, 1, 1], [], []>} : vector<8x8xf32>, vector<8x32xf32>, vector<8x32xf32> -> vector<8x32xf32>
    %251 = arith.truncf %250 : vector<8x32xf32> to vector<8x32xbf16>
    %252 = vector.extract_strided_slice %227 {offsets = [0, 0], sizes = [32, 128], strides = [1, 1]} : vector<128x128xbf16> to vector<32x128xbf16>
    %cst_154 = arith.constant dense<0.000000e+00> : vector<8x128xf32>
    %253 = tpu.matmul %251, %252, %cst_154 {dimension_numbers = #tpu.dot_dimension_numbers<[1], [0], [0], [1], [0, 0, 1, 1], [], []>} : vector<8x32xbf16>, vector<32x128xbf16>, vector<8x128xf32> -> vector<8x128xf32>
    %254 = arith.addf %228, %253 : vector<8x128xf32>
    %255 = vector.extract_strided_slice %215 {offsets = [0, 32], sizes = [8, 32], strides = [1, 1]} : vector<8x128xf32> to vector<8x32xf32>
    %cst_155 = arith.constant 0.176776692 : f32
    %256 = vector.broadcast %cst_155 : f32 to vector<8x32xf32>
    %257 = arith.mulf %255, %256 : vector<8x32xf32>
    %258 = vector.extract_strided_slice %220 {offsets = [0, 32], sizes = [8, 32], strides = [1, 1]} : vector<8x128xf32> to vector<8x32xf32>
    %259 = vector.extract_strided_slice %225 {offsets = [0, 32], sizes = [8, 32], strides = [1, 1]} : vector<8x128xf32> to vector<8x32xf32>
    %260 = tpu.transpose %258, [1, 0] : vector<8x32xf32> -> vector<32x8xf32>
    %cst_156 = arith.constant dense<0.000000e+00> : vector<8x8xf32>
    %261 = tpu.matmul %257, %260, %cst_156 {dimension_numbers = #tpu.dot_dimension_numbers<[1], [0], [0], [1], [0, 0, 1, 1], [], []>} : vector<8x32xf32>, vector<32x8xf32>, vector<8x8xf32> -> vector<8x8xf32>
    %cst_157 = arith.constant -1.000000e+30 : f32
    %262 = vector.shape_cast %6 : vector<1x8xi1> to vector<1x8xi1>
    %263 = vector.broadcast %262 : vector<1x8xi1> to vector<8x8xi1>
    %264 = vector.broadcast %cst_157 : f32 to vector<8x8xf32>
    %265 = arith.select %263, %261, %264 : vector<8x8xi1>, vector<8x8xf32>
    %cst_158 = arith.constant dense<0xFF800000> : vector<8xf32>
    %266 = vector.multi_reduction <maximumf>, %265, %cst_158 [1] : vector<8x8xf32> to vector<8xf32>
    %267 = vector.shape_cast %266 : vector<8xf32> to vector<8x1xf32>
    %268 = vector.broadcast %267 : vector<8x1xf32> to vector<8x8xf32>
    %269 = arith.subf %265, %268 : vector<8x8xf32>
    %270 = math.exp %269 : vector<8x8xf32>
    %cst_159 = arith.constant dense<0.000000e+00> : vector<8xf32>
    %271 = vector.multi_reduction <add>, %270, %cst_159 [1] : vector<8x8xf32> to vector<8xf32>
    %272 = vector.shape_cast %271 : vector<8xf32> to vector<8x1xf32>
    %273 = tpu.reciprocal %272 {approx = true} : vector<8x1xf32> -> vector<8x1xf32>
    %274 = vector.broadcast %273 : vector<8x1xf32> to vector<8x8xf32>
    %275 = arith.mulf %270, %274 : vector<8x8xf32>
    %cst_160 = arith.constant dense<0.000000e+00> : vector<8x32xf32>
    %276 = tpu.matmul %275, %259, %cst_160 {dimension_numbers = #tpu.dot_dimension_numbers<[1], [0], [0], [1], [0, 0, 1, 1], [], []>} : vector<8x8xf32>, vector<8x32xf32>, vector<8x32xf32> -> vector<8x32xf32>
    %277 = arith.truncf %276 : vector<8x32xf32> to vector<8x32xbf16>
    %278 = vector.extract_strided_slice %227 {offsets = [32, 0], sizes = [32, 128], strides = [1, 1]} : vector<128x128xbf16> to vector<32x128xbf16>
    %cst_161 = arith.constant dense<0.000000e+00> : vector<8x128xf32>
    %279 = tpu.matmul %277, %278, %cst_161 {dimension_numbers = #tpu.dot_dimension_numbers<[1], [0], [0], [1], [0, 0, 1, 1], [], []>} : vector<8x32xbf16>, vector<32x128xbf16>, vector<8x128xf32> -> vector<8x128xf32>
    %280 = arith.addf %254, %279 : vector<8x128xf32>
    %281 = vector.extract_strided_slice %215 {offsets = [0, 64], sizes = [8, 32], strides = [1, 1]} : vector<8x128xf32> to vector<8x32xf32>
    %cst_162 = arith.constant 0.176776692 : f32
    %282 = vector.broadcast %cst_162 : f32 to vector<8x32xf32>
    %283 = arith.mulf %281, %282 : vector<8x32xf32>
    %284 = vector.extract_strided_slice %220 {offsets = [0, 64], sizes = [8, 32], strides = [1, 1]} : vector<8x128xf32> to vector<8x32xf32>
    %285 = vector.extract_strided_slice %225 {offsets = [0, 64], sizes = [8, 32], strides = [1, 1]} : vector<8x128xf32> to vector<8x32xf32>
    %286 = tpu.transpose %284, [1, 0] : vector<8x32xf32> -> vector<32x8xf32>
    %cst_163 = arith.constant dense<0.000000e+00> : vector<8x8xf32>
    %287 = tpu.matmul %283, %286, %cst_163 {dimension_numbers = #tpu.dot_dimension_numbers<[1], [0], [0], [1], [0, 0, 1, 1], [], []>} : vector<8x32xf32>, vector<32x8xf32>, vector<8x8xf32> -> vector<8x8xf32>
    %cst_164 = arith.constant -1.000000e+30 : f32
    %288 = vector.shape_cast %6 : vector<1x8xi1> to vector<1x8xi1>
    %289 = vector.broadcast %288 : vector<1x8xi1> to vector<8x8xi1>
    %290 = vector.broadcast %cst_164 : f32 to vector<8x8xf32>
    %291 = arith.select %289, %287, %290 : vector<8x8xi1>, vector<8x8xf32>
    %cst_165 = arith.constant dense<0xFF800000> : vector<8xf32>
    %292 = vector.multi_reduction <maximumf>, %291, %cst_165 [1] : vector<8x8xf32> to vector<8xf32>
    %293 = vector.shape_cast %292 : vector<8xf32> to vector<8x1xf32>
    %294 = vector.broadcast %293 : vector<8x1xf32> to vector<8x8xf32>
    %295 = arith.subf %291, %294 : vector<8x8xf32>
    %296 = math.exp %295 : vector<8x8xf32>
    %cst_166 = arith.constant dense<0.000000e+00> : vector<8xf32>
    %297 = vector.multi_reduction <add>, %296, %cst_166 [1] : vector<8x8xf32> to vector<8xf32>
    %298 = vector.shape_cast %297 : vector<8xf32> to vector<8x1xf32>
    %299 = tpu.reciprocal %298 {approx = true} : vector<8x1xf32> -> vector<8x1xf32>
    %300 = vector.broadcast %299 : vector<8x1xf32> to vector<8x8xf32>
    %301 = arith.mulf %296, %300 : vector<8x8xf32>
    %cst_167 = arith.constant dense<0.000000e+00> : vector<8x32xf32>
    %302 = tpu.matmul %301, %285, %cst_167 {dimension_numbers = #tpu.dot_dimension_numbers<[1], [0], [0], [1], [0, 0, 1, 1], [], []>} : vector<8x8xf32>, vector<8x32xf32>, vector<8x32xf32> -> vector<8x32xf32>
    %303 = arith.truncf %302 : vector<8x32xf32> to vector<8x32xbf16>
    %304 = vector.extract_strided_slice %227 {offsets = [64, 0], sizes = [32, 128], strides = [1, 1]} : vector<128x128xbf16> to vector<32x128xbf16>
    %cst_168 = arith.constant dense<0.000000e+00> : vector<8x128xf32>
    %305 = tpu.matmul %303, %304, %cst_168 {dimension_numbers = #tpu.dot_dimension_numbers<[1], [0], [0], [1], [0, 0, 1, 1], [], []>} : vector<8x32xbf16>, vector<32x128xbf16>, vector<8x128xf32> -> vector<8x128xf32>
    %306 = arith.addf %280, %305 : vector<8x128xf32>
    %307 = vector.extract_strided_slice %215 {offsets = [0, 96], sizes = [8, 32], strides = [1, 1]} : vector<8x128xf32> to vector<8x32xf32>
    %cst_169 = arith.constant 0.176776692 : f32
    %308 = vector.broadcast %cst_169 : f32 to vector<8x32xf32>
    %309 = arith.mulf %307, %308 : vector<8x32xf32>
    %310 = vector.extract_strided_slice %220 {offsets = [0, 96], sizes = [8, 32], strides = [1, 1]} : vector<8x128xf32> to vector<8x32xf32>
    %311 = vector.extract_strided_slice %225 {offsets = [0, 96], sizes = [8, 32], strides = [1, 1]} : vector<8x128xf32> to vector<8x32xf32>
    %312 = tpu.transpose %310, [1, 0] : vector<8x32xf32> -> vector<32x8xf32>
    %cst_170 = arith.constant dense<0.000000e+00> : vector<8x8xf32>
    %313 = tpu.matmul %309, %312, %cst_170 {dimension_numbers = #tpu.dot_dimension_numbers<[1], [0], [0], [1], [0, 0, 1, 1], [], []>} : vector<8x32xf32>, vector<32x8xf32>, vector<8x8xf32> -> vector<8x8xf32>
    %cst_171 = arith.constant -1.000000e+30 : f32
    %314 = vector.shape_cast %6 : vector<1x8xi1> to vector<1x8xi1>
    %315 = vector.broadcast %314 : vector<1x8xi1> to vector<8x8xi1>
    %316 = vector.broadcast %cst_171 : f32 to vector<8x8xf32>
    %317 = arith.select %315, %313, %316 : vector<8x8xi1>, vector<8x8xf32>
    %cst_172 = arith.constant dense<0xFF800000> : vector<8xf32>
    %318 = vector.multi_reduction <maximumf>, %317, %cst_172 [1] : vector<8x8xf32> to vector<8xf32>
    %319 = vector.shape_cast %318 : vector<8xf32> to vector<8x1xf32>
    %320 = vector.broadcast %319 : vector<8x1xf32> to vector<8x8xf32>
    %321 = arith.subf %317, %320 : vector<8x8xf32>
    %322 = math.exp %321 : vector<8x8xf32>
    %cst_173 = arith.constant dense<0.000000e+00> : vector<8xf32>
    %323 = vector.multi_reduction <add>, %322, %cst_173 [1] : vector<8x8xf32> to vector<8xf32>
    %324 = vector.shape_cast %323 : vector<8xf32> to vector<8x1xf32>
    %325 = tpu.reciprocal %324 {approx = true} : vector<8x1xf32> -> vector<8x1xf32>
    %326 = vector.broadcast %325 : vector<8x1xf32> to vector<8x8xf32>
    %327 = arith.mulf %322, %326 : vector<8x8xf32>
    %cst_174 = arith.constant dense<0.000000e+00> : vector<8x32xf32>
    %328 = tpu.matmul %327, %311, %cst_174 {dimension_numbers = #tpu.dot_dimension_numbers<[1], [0], [0], [1], [0, 0, 1, 1], [], []>} : vector<8x8xf32>, vector<8x32xf32>, vector<8x32xf32> -> vector<8x32xf32>
    %329 = arith.truncf %328 : vector<8x32xf32> to vector<8x32xbf16>
    %330 = vector.extract_strided_slice %227 {offsets = [96, 0], sizes = [32, 128], strides = [1, 1]} : vector<128x128xbf16> to vector<32x128xbf16>
    %cst_175 = arith.constant dense<0.000000e+00> : vector<8x128xf32>
    %331 = tpu.matmul %329, %330, %cst_175 {dimension_numbers = #tpu.dot_dimension_numbers<[1], [0], [0], [1], [0, 0, 1, 1], [], []>} : vector<8x32xbf16>, vector<32x128xbf16>, vector<8x128xf32> -> vector<8x128xf32>
    %332 = arith.addf %306, %331 : vector<8x128xf32>
    %c0_176 = arith.constant 0 : index
    %c40 = arith.constant 40 : index
    %c0_177 = arith.constant 0 : index
    %333 = vector.load %arg9[%c0_176, %c40, %c0_177] : memref<1x54x128xf32, #tpu.memory_space<vmem>>, vector<1x1x128xf32>
    %334 = vector.shape_cast %333 : vector<1x1x128xf32> to vector<1x128xf32>
    %335 = vector.broadcast %334 : vector<1x128xf32> to vector<8x128xf32>
    %336 = arith.addf %332, %335 : vector<8x128xf32>
    %337 = arith.addf %336, %206 : vector<8x128xf32>
    %c0_178 = arith.constant 0 : index
    %c44 = arith.constant 44 : index
    %c0_179 = arith.constant 0 : index
    %338 = vector.load %arg9[%c0_178, %c44, %c0_179] : memref<1x54x128xf32, #tpu.memory_space<vmem>>, vector<1x1x128xf32>
    %339 = vector.shape_cast %338 : vector<1x1x128xf32> to vector<1x128xf32>
    %c0_180 = arith.constant 0 : index
    %c48 = arith.constant 48 : index
    %c0_181 = arith.constant 0 : index
    %340 = vector.load %arg9[%c0_180, %c48, %c0_181] : memref<1x54x128xf32, #tpu.memory_space<vmem>>, vector<1x1x128xf32>
    %341 = vector.shape_cast %340 : vector<1x1x128xf32> to vector<1x128xf32>
    %cst_182 = arith.constant dense<0.000000e+00> : vector<8xf32>
    %342 = vector.multi_reduction <add>, %337, %cst_182 [1] : vector<8x128xf32> to vector<8xf32>
    %343 = vector.shape_cast %342 : vector<8xf32> to vector<8x1xf32>
    %cst_183 = arith.constant 1.280000e+02 : f32
    %344 = vector.broadcast %cst_183 : f32 to vector<8x1xf32>
    %345 = arith.divf %343, %344 : vector<8x1xf32>
    %346 = vector.broadcast %345 : vector<8x1xf32> to vector<8x128xf32>
    %347 = arith.subf %337, %346 : vector<8x128xf32>
    %348 = arith.mulf %347, %347 : vector<8x128xf32>
    %cst_184 = arith.constant dense<0.000000e+00> : vector<8xf32>
    %349 = vector.multi_reduction <add>, %348, %cst_184 [1] : vector<8x128xf32> to vector<8xf32>
    %350 = vector.shape_cast %349 : vector<8xf32> to vector<8x1xf32>
    %cst_185 = arith.constant 1.280000e+02 : f32
    %351 = vector.broadcast %cst_185 : f32 to vector<8x1xf32>
    %352 = arith.divf %350, %351 : vector<8x1xf32>
    %353 = vector.broadcast %345 : vector<8x1xf32> to vector<8x128xf32>
    %354 = arith.subf %337, %353 : vector<8x128xf32>
    %cst_186 = arith.constant 9.99999974E-6 : f32
    %355 = vector.broadcast %cst_186 : f32 to vector<8x1xf32>
    %356 = arith.addf %352, %355 : vector<8x1xf32>
    %357 = math.rsqrt %356 : vector<8x1xf32>
    %358 = vector.broadcast %357 : vector<8x1xf32> to vector<8x128xf32>
    %359 = arith.mulf %354, %358 : vector<8x128xf32>
    %360 = vector.broadcast %339 : vector<1x128xf32> to vector<8x128xf32>
    %361 = arith.mulf %359, %360 : vector<8x128xf32>
    %362 = vector.broadcast %341 : vector<1x128xf32> to vector<8x128xf32>
    %363 = arith.addf %361, %362 : vector<8x128xf32>
    %cst_187 = arith.constant dense<0.000000e+00> : vector<1x128xf32>
    %364 = tpu.matmul %4, %363, %cst_187 {dimension_numbers = #tpu.dot_dimension_numbers<[1], [0], [0], [1], [0, 0, 1, 1], [], []>} : vector<1x8xf32>, vector<8x128xf32>, vector<1x128xf32> -> vector<1x128xf32>
    %365 = vector.broadcast %86 : vector<1x1xf32> to vector<1x128xf32>
    %366 = arith.mulf %364, %365 : vector<1x128xf32>
    %367 = arith.truncf %366 : vector<1x128xf32> to vector<1x128xbf16>
    %c0_188 = arith.constant 0 : index
    %c0_189 = arith.constant 0 : index
    %c0_190 = arith.constant 0 : index
    %c0_191 = arith.constant 0 : index
    %368 = vector.load %arg8[%c0_188, %c0_189, %c0_190, %c0_191] : memref<1x4x128x64xbf16, #tpu.memory_space<vmem>>, vector<1x1x128x64xbf16>
    %369 = vector.shape_cast %368 : vector<1x1x128x64xbf16> to vector<128x64xbf16>
    %cst_192 = arith.constant dense<0.000000e+00> : vector<1x64xf32>
    %370 = tpu.matmul %367, %369, %cst_192 {dimension_numbers = #tpu.dot_dimension_numbers<[1], [0], [0], [1], [0, 0, 1, 1], [], []>} : vector<1x128xbf16>, vector<128x64xbf16>, vector<1x64xf32> -> vector<1x64xf32>
    %c0_193 = arith.constant 0 : index
    %c52 = arith.constant 52 : index
    %c0_194 = arith.constant 0 : index
    %371 = vector.load %arg9[%c0_193, %c52, %c0_194] : memref<1x54x128xf32, #tpu.memory_space<vmem>>, vector<1x1x64xf32>
    %372 = vector.shape_cast %371 : vector<1x1x64xf32> to vector<1x64xf32>
    %373 = arith.addf %370, %372 : vector<1x64xf32>
    %374 = arith.truncf %373 : vector<1x64xf32> to vector<1x64xbf16>
    %375 = vector.extract_strided_slice %87 {offsets = [0, 0], sizes = [64, 128], strides = [1, 1]} : vector<256x128xbf16> to vector<64x128xbf16>
    %cst_195 = arith.constant dense<0.000000e+00> : vector<1x128xf32>
    %376 = tpu.matmul %374, %375, %cst_195 {dimension_numbers = #tpu.dot_dimension_numbers<[1], [0], [0], [1], [0, 0, 1, 1], [], []>} : vector<1x64xbf16>, vector<64x128xbf16>, vector<1x128xf32> -> vector<1x128xf32>
    %377 = arith.addf %88, %376 : vector<1x128xf32>
    %378 = vector.extract_strided_slice %42 {offsets = [0, 32], sizes = [8, 32], strides = [1, 1]} : vector<8x128xf32> to vector<8x32xf32>
    %379 = vector.extract_strided_slice %63 {offsets = [0, 32], sizes = [8, 32], strides = [1, 1]} : vector<8x128xf32> to vector<8x32xf32>
    %380 = vector.extract_strided_slice %76 {offsets = [0, 32], sizes = [8, 32], strides = [1, 1]} : vector<8x128xf32> to vector<8x32xf32>
    %381 = vector.extract_strided_slice %81 {offsets = [0, 32], sizes = [8, 32], strides = [1, 1]} : vector<8x128xf32> to vector<8x32xf32>
    %382 = tpu.concatenate %378, %379, %380, %381 in 1 : vector<8x32xf32>, vector<8x32xf32>, vector<8x32xf32>, vector<8x32xf32> -> vector<8x128xf32>
    %c0_196 = arith.constant 0 : index
    %c1_197 = arith.constant 1 : index
    %c0_198 = arith.constant 0 : index
    %383 = vector.load %arg9[%c0_196, %c1_197, %c0_198] : memref<1x54x128xf32, #tpu.memory_space<vmem>>, vector<1x1x128xf32>
    %384 = vector.shape_cast %383 : vector<1x1x128xf32> to vector<1x128xf32>
    %385 = vector.broadcast %384 : vector<1x128xf32> to vector<8x128xf32>
    %386 = arith.addf %382, %385 : vector<8x128xf32>
    %cst_199 = arith.constant 5.000000e-01 : f32
    %387 = vector.broadcast %cst_199 : f32 to vector<8x128xf32>
    %388 = arith.mulf %387, %386 : vector<8x128xf32>
    %cst_200 = arith.constant 4.471500e-02 : f32
    %389 = vector.broadcast %cst_200 : f32 to vector<8x128xf32>
    %390 = arith.mulf %389, %386 : vector<8x128xf32>
    %391 = arith.mulf %390, %386 : vector<8x128xf32>
    %392 = arith.mulf %391, %386 : vector<8x128xf32>
    %393 = arith.addf %386, %392 : vector<8x128xf32>
    %cst_201 = arith.constant 0.797884583 : f32
    %394 = vector.broadcast %cst_201 : f32 to vector<8x128xf32>
    %395 = arith.mulf %394, %393 : vector<8x128xf32>
    %396 = math.tanh %395 : vector<8x128xf32>
    %cst_202 = arith.constant 1.000000e+00 : f32
    %397 = vector.broadcast %cst_202 : f32 to vector<8x128xf32>
    %398 = arith.addf %397, %396 : vector<8x128xf32>
    %399 = arith.mulf %388, %398 : vector<8x128xf32>
    %400 = arith.truncf %399 : vector<8x128xf32> to vector<8x128xbf16>
    %c0_203 = arith.constant 0 : index
    %c1_204 = arith.constant 1 : index
    %c0_205 = arith.constant 0 : index
    %c0_206 = arith.constant 0 : index
    %c0_207 = arith.constant 0 : index
    %401 = vector.load %arg5[%c0_203, %c1_204, %c0_205, %c0_206, %c0_207] : memref<1x4x2x128x128xbf16, #tpu.memory_space<vmem>>, vector<1x1x1x128x128xbf16>
    %402 = vector.shape_cast %401 : vector<1x1x1x128x128xbf16> to vector<128x128xbf16>
    %cst_208 = arith.constant dense<0.000000e+00> : vector<8x128xf32>
    %403 = tpu.matmul %400, %402, %cst_208 {dimension_numbers = #tpu.dot_dimension_numbers<[1], [0], [0], [1], [0, 0, 1, 1], [], []>} : vector<8x128xbf16>, vector<128x128xbf16>, vector<8x128xf32> -> vector<8x128xf32>
    %c0_209 = arith.constant 0 : index
    %c6_210 = arith.constant 6 : index
    %c0_211 = arith.constant 0 : index
    %404 = vector.load %arg9[%c0_209, %c6_210, %c0_211] : memref<1x54x128xf32, #tpu.memory_space<vmem>>, vector<1x1x128xf32>
    %405 = vector.shape_cast %404 : vector<1x1x128xf32> to vector<1x128xf32>
    %406 = vector.broadcast %405 : vector<1x128xf32> to vector<8x128xf32>
    %407 = arith.addf %403, %406 : vector<8x128xf32>
    %c0_212 = arith.constant 0 : index
    %c14_213 = arith.constant 14 : index
    %c0_214 = arith.constant 0 : index
    %408 = vector.load %arg9[%c0_212, %c14_213, %c0_214] : memref<1x54x128xf32, #tpu.memory_space<vmem>>, vector<1x1x128xf32>
    %409 = vector.shape_cast %408 : vector<1x1x128xf32> to vector<1x128xf32>
    %c0_215 = arith.constant 0 : index
    %c22 = arith.constant 22 : index
    %c0_216 = arith.constant 0 : index
    %410 = vector.load %arg9[%c0_215, %c22, %c0_216] : memref<1x54x128xf32, #tpu.memory_space<vmem>>, vector<1x1x128xf32>
    %411 = vector.shape_cast %410 : vector<1x1x128xf32> to vector<1x128xf32>
    %cst_217 = arith.constant dense<0.000000e+00> : vector<8xf32>
    %412 = vector.multi_reduction <add>, %407, %cst_217 [1] : vector<8x128xf32> to vector<8xf32>
    %413 = vector.shape_cast %412 : vector<8xf32> to vector<8x1xf32>
    %cst_218 = arith.constant 1.280000e+02 : f32
    %414 = vector.broadcast %cst_218 : f32 to vector<8x1xf32>
    %415 = arith.divf %413, %414 : vector<8x1xf32>
    %416 = vector.broadcast %415 : vector<8x1xf32> to vector<8x128xf32>
    %417 = arith.subf %407, %416 : vector<8x128xf32>
    %418 = arith.mulf %417, %417 : vector<8x128xf32>
    %cst_219 = arith.constant dense<0.000000e+00> : vector<8xf32>
    %419 = vector.multi_reduction <add>, %418, %cst_219 [1] : vector<8x128xf32> to vector<8xf32>
    %420 = vector.shape_cast %419 : vector<8xf32> to vector<8x1xf32>
    %cst_220 = arith.constant 1.280000e+02 : f32
    %421 = vector.broadcast %cst_220 : f32 to vector<8x1xf32>
    %422 = arith.divf %420, %421 : vector<8x1xf32>
    %423 = vector.broadcast %415 : vector<8x1xf32> to vector<8x128xf32>
    %424 = arith.subf %407, %423 : vector<8x128xf32>
    %cst_221 = arith.constant 9.99999974E-6 : f32
    %425 = vector.broadcast %cst_221 : f32 to vector<8x1xf32>
    %426 = arith.addf %422, %425 : vector<8x1xf32>
    %427 = math.rsqrt %426 : vector<8x1xf32>
    %428 = vector.broadcast %427 : vector<8x1xf32> to vector<8x128xf32>
    %429 = arith.mulf %424, %428 : vector<8x128xf32>
    %430 = vector.broadcast %409 : vector<1x128xf32> to vector<8x128xf32>
    %431 = arith.mulf %429, %430 : vector<8x128xf32>
    %432 = vector.broadcast %411 : vector<1x128xf32> to vector<8x128xf32>
    %433 = arith.addf %431, %432 : vector<8x128xf32>
    %cst_222 = arith.constant 5.000000e-01 : f32
    %434 = vector.broadcast %cst_222 : f32 to vector<8x128xf32>
    %435 = arith.mulf %434, %433 : vector<8x128xf32>
    %cst_223 = arith.constant 4.471500e-02 : f32
    %436 = vector.broadcast %cst_223 : f32 to vector<8x128xf32>
    %437 = arith.mulf %436, %433 : vector<8x128xf32>
    %438 = arith.mulf %437, %433 : vector<8x128xf32>
    %439 = arith.mulf %438, %433 : vector<8x128xf32>
    %440 = arith.addf %433, %439 : vector<8x128xf32>
    %cst_224 = arith.constant 0.797884583 : f32
    %441 = vector.broadcast %cst_224 : f32 to vector<8x128xf32>
    %442 = arith.mulf %441, %440 : vector<8x128xf32>
    %443 = math.tanh %442 : vector<8x128xf32>
    %cst_225 = arith.constant 1.000000e+00 : f32
    %444 = vector.broadcast %cst_225 : f32 to vector<8x128xf32>
    %445 = arith.addf %444, %443 : vector<8x128xf32>
    %446 = arith.mulf %435, %445 : vector<8x128xf32>
    %447 = arith.addf %446, %399 : vector<8x128xf32>
    %448 = arith.truncf %447 : vector<8x128xf32> to vector<8x128xbf16>
    %c0_226 = arith.constant 0 : index
    %c1_227 = arith.constant 1 : index
    %c1_228 = arith.constant 1 : index
    %c0_229 = arith.constant 0 : index
    %c0_230 = arith.constant 0 : index
    %449 = vector.load %arg5[%c0_226, %c1_227, %c1_228, %c0_229, %c0_230] : memref<1x4x2x128x128xbf16, #tpu.memory_space<vmem>>, vector<1x1x1x128x128xbf16>
    %450 = vector.shape_cast %449 : vector<1x1x1x128x128xbf16> to vector<128x128xbf16>
    %cst_231 = arith.constant dense<0.000000e+00> : vector<8x128xf32>
    %451 = tpu.matmul %448, %450, %cst_231 {dimension_numbers = #tpu.dot_dimension_numbers<[1], [0], [0], [1], [0, 0, 1, 1], [], []>} : vector<8x128xbf16>, vector<128x128xbf16>, vector<8x128xf32> -> vector<8x128xf32>
    %c0_232 = arith.constant 0 : index
    %c7_233 = arith.constant 7 : index
    %c0_234 = arith.constant 0 : index
    %452 = vector.load %arg9[%c0_232, %c7_233, %c0_234] : memref<1x54x128xf32, #tpu.memory_space<vmem>>, vector<1x1x128xf32>
    %453 = vector.shape_cast %452 : vector<1x1x128xf32> to vector<1x128xf32>
    %454 = vector.broadcast %453 : vector<1x128xf32> to vector<8x128xf32>
    %455 = arith.addf %451, %454 : vector<8x128xf32>
    %c0_235 = arith.constant 0 : index
    %c15_236 = arith.constant 15 : index
    %c0_237 = arith.constant 0 : index
    %456 = vector.load %arg9[%c0_235, %c15_236, %c0_237] : memref<1x54x128xf32, #tpu.memory_space<vmem>>, vector<1x1x128xf32>
    %457 = vector.shape_cast %456 : vector<1x1x128xf32> to vector<1x128xf32>
    %c0_238 = arith.constant 0 : index
    %c23 = arith.constant 23 : index
    %c0_239 = arith.constant 0 : index
    %458 = vector.load %arg9[%c0_238, %c23, %c0_239] : memref<1x54x128xf32, #tpu.memory_space<vmem>>, vector<1x1x128xf32>
    %459 = vector.shape_cast %458 : vector<1x1x128xf32> to vector<1x128xf32>
    %cst_240 = arith.constant dense<0.000000e+00> : vector<8xf32>
    %460 = vector.multi_reduction <add>, %455, %cst_240 [1] : vector<8x128xf32> to vector<8xf32>
    %461 = vector.shape_cast %460 : vector<8xf32> to vector<8x1xf32>
    %cst_241 = arith.constant 1.280000e+02 : f32
    %462 = vector.broadcast %cst_241 : f32 to vector<8x1xf32>
    %463 = arith.divf %461, %462 : vector<8x1xf32>
    %464 = vector.broadcast %463 : vector<8x1xf32> to vector<8x128xf32>
    %465 = arith.subf %455, %464 : vector<8x128xf32>
    %466 = arith.mulf %465, %465 : vector<8x128xf32>
    %cst_242 = arith.constant dense<0.000000e+00> : vector<8xf32>
    %467 = vector.multi_reduction <add>, %466, %cst_242 [1] : vector<8x128xf32> to vector<8xf32>
    %468 = vector.shape_cast %467 : vector<8xf32> to vector<8x1xf32>
    %cst_243 = arith.constant 1.280000e+02 : f32
    %469 = vector.broadcast %cst_243 : f32 to vector<8x1xf32>
    %470 = arith.divf %468, %469 : vector<8x1xf32>
    %471 = vector.broadcast %463 : vector<8x1xf32> to vector<8x128xf32>
    %472 = arith.subf %455, %471 : vector<8x128xf32>
    %cst_244 = arith.constant 9.99999974E-6 : f32
    %473 = vector.broadcast %cst_244 : f32 to vector<8x1xf32>
    %474 = arith.addf %470, %473 : vector<8x1xf32>
    %475 = math.rsqrt %474 : vector<8x1xf32>
    %476 = vector.broadcast %475 : vector<8x1xf32> to vector<8x128xf32>
    %477 = arith.mulf %472, %476 : vector<8x128xf32>
    %478 = vector.broadcast %457 : vector<1x128xf32> to vector<8x128xf32>
    %479 = arith.mulf %477, %478 : vector<8x128xf32>
    %480 = vector.broadcast %459 : vector<1x128xf32> to vector<8x128xf32>
    %481 = arith.addf %479, %480 : vector<8x128xf32>
    %cst_245 = arith.constant 5.000000e-01 : f32
    %482 = vector.broadcast %cst_245 : f32 to vector<8x128xf32>
    %483 = arith.mulf %482, %481 : vector<8x128xf32>
    %cst_246 = arith.constant 4.471500e-02 : f32
    %484 = vector.broadcast %cst_246 : f32 to vector<8x128xf32>
    %485 = arith.mulf %484, %481 : vector<8x128xf32>
    %486 = arith.mulf %485, %481 : vector<8x128xf32>
    %487 = arith.mulf %486, %481 : vector<8x128xf32>
    %488 = arith.addf %481, %487 : vector<8x128xf32>
    %cst_247 = arith.constant 0.797884583 : f32
    %489 = vector.broadcast %cst_247 : f32 to vector<8x128xf32>
    %490 = arith.mulf %489, %488 : vector<8x128xf32>
    %491 = math.tanh %490 : vector<8x128xf32>
    %cst_248 = arith.constant 1.000000e+00 : f32
    %492 = vector.broadcast %cst_248 : f32 to vector<8x128xf32>
    %493 = arith.addf %492, %491 : vector<8x128xf32>
    %494 = arith.mulf %483, %493 : vector<8x128xf32>
    %495 = arith.addf %494, %447 : vector<8x128xf32>
    %496 = arith.truncf %495 : vector<8x128xf32> to vector<8x128xbf16>
    %c0_249 = arith.constant 0 : index
    %c1_250 = arith.constant 1 : index
    %c0_251 = arith.constant 0 : index
    %c0_252 = arith.constant 0 : index
    %497 = vector.load %arg6[%c0_249, %c1_250, %c0_251, %c0_252] : memref<1x4x128x384xbf16, #tpu.memory_space<vmem>>, vector<1x1x128x384xbf16>
    %498 = vector.shape_cast %497 : vector<1x1x128x384xbf16> to vector<128x384xbf16>
    %cst_253 = arith.constant dense<0.000000e+00> : vector<8x384xf32>
    %499 = tpu.matmul %496, %498, %cst_253 {dimension_numbers = #tpu.dot_dimension_numbers<[1], [0], [0], [1], [0, 0, 1, 1], [], []>} : vector<8x128xbf16>, vector<128x384xbf16>, vector<8x384xf32> -> vector<8x384xf32>
    %500 = vector.extract_strided_slice %499 {offsets = [0, 0], sizes = [8, 128], strides = [1, 1]} : vector<8x384xf32> to vector<8x128xf32>
    %c0_254 = arith.constant 0 : index
    %c31 = arith.constant 31 : index
    %c0_255 = arith.constant 0 : index
    %501 = vector.load %arg9[%c0_254, %c31, %c0_255] : memref<1x54x128xf32, #tpu.memory_space<vmem>>, vector<1x1x128xf32>
    %502 = vector.shape_cast %501 : vector<1x1x128xf32> to vector<1x128xf32>
    %503 = vector.broadcast %502 : vector<1x128xf32> to vector<8x128xf32>
    %504 = arith.addf %500, %503 : vector<8x128xf32>
    %505 = vector.extract_strided_slice %499 {offsets = [0, 128], sizes = [8, 128], strides = [1, 1]} : vector<8x384xf32> to vector<8x128xf32>
    %c0_256 = arith.constant 0 : index
    %c32 = arith.constant 32 : index
    %c0_257 = arith.constant 0 : index
    %506 = vector.load %arg9[%c0_256, %c32, %c0_257] : memref<1x54x128xf32, #tpu.memory_space<vmem>>, vector<1x1x128xf32>
    %507 = vector.shape_cast %506 : vector<1x1x128xf32> to vector<1x128xf32>
    %508 = vector.broadcast %507 : vector<1x128xf32> to vector<8x128xf32>
    %509 = arith.addf %505, %508 : vector<8x128xf32>
    %510 = vector.extract_strided_slice %499 {offsets = [0, 256], sizes = [8, 128], strides = [1, 1]} : vector<8x384xf32> to vector<8x128xf32>
    %c0_258 = arith.constant 0 : index
    %c33 = arith.constant 33 : index
    %c0_259 = arith.constant 0 : index
    %511 = vector.load %arg9[%c0_258, %c33, %c0_259] : memref<1x54x128xf32, #tpu.memory_space<vmem>>, vector<1x1x128xf32>
    %512 = vector.shape_cast %511 : vector<1x1x128xf32> to vector<1x128xf32>
    %513 = vector.broadcast %512 : vector<1x128xf32> to vector<8x128xf32>
    %514 = arith.addf %510, %513 : vector<8x128xf32>
    %c0_260 = arith.constant 0 : index
    %c1_261 = arith.constant 1 : index
    %c0_262 = arith.constant 0 : index
    %c0_263 = arith.constant 0 : index
    %515 = vector.load %arg7[%c0_260, %c1_261, %c0_262, %c0_263] : memref<1x4x128x128xbf16, #tpu.memory_space<vmem>>, vector<1x1x128x128xbf16>
    %516 = vector.shape_cast %515 : vector<1x1x128x128xbf16> to vector<128x128xbf16>
    %cst_264 = arith.constant 0.000000e+00 : f32
    %517 = vector.broadcast %cst_264 : f32 to vector<8x128xf32>
    %518 = vector.extract_strided_slice %504 {offsets = [0, 0], sizes = [8, 32], strides = [1, 1]} : vector<8x128xf32> to vector<8x32xf32>
    %cst_265 = arith.constant 0.176776692 : f32
    %519 = vector.broadcast %cst_265 : f32 to vector<8x32xf32>
    %520 = arith.mulf %518, %519 : vector<8x32xf32>
    %521 = vector.extract_strided_slice %509 {offsets = [0, 0], sizes = [8, 32], strides = [1, 1]} : vector<8x128xf32> to vector<8x32xf32>
    %522 = vector.extract_strided_slice %514 {offsets = [0, 0], sizes = [8, 32], strides = [1, 1]} : vector<8x128xf32> to vector<8x32xf32>
    %523 = tpu.transpose %521, [1, 0] : vector<8x32xf32> -> vector<32x8xf32>
    %cst_266 = arith.constant dense<0.000000e+00> : vector<8x8xf32>
    %524 = tpu.matmul %520, %523, %cst_266 {dimension_numbers = #tpu.dot_dimension_numbers<[1], [0], [0], [1], [0, 0, 1, 1], [], []>} : vector<8x32xf32>, vector<32x8xf32>, vector<8x8xf32> -> vector<8x8xf32>
    %cst_267 = arith.constant -1.000000e+30 : f32
    %525 = vector.shape_cast %6 : vector<1x8xi1> to vector<1x8xi1>
    %526 = vector.broadcast %525 : vector<1x8xi1> to vector<8x8xi1>
    %527 = vector.broadcast %cst_267 : f32 to vector<8x8xf32>
    %528 = arith.select %526, %524, %527 : vector<8x8xi1>, vector<8x8xf32>
    %cst_268 = arith.constant dense<0xFF800000> : vector<8xf32>
    %529 = vector.multi_reduction <maximumf>, %528, %cst_268 [1] : vector<8x8xf32> to vector<8xf32>
    %530 = vector.shape_cast %529 : vector<8xf32> to vector<8x1xf32>
    %531 = vector.broadcast %530 : vector<8x1xf32> to vector<8x8xf32>
    %532 = arith.subf %528, %531 : vector<8x8xf32>
    %533 = math.exp %532 : vector<8x8xf32>
    %cst_269 = arith.constant dense<0.000000e+00> : vector<8xf32>
    %534 = vector.multi_reduction <add>, %533, %cst_269 [1] : vector<8x8xf32> to vector<8xf32>
    %535 = vector.shape_cast %534 : vector<8xf32> to vector<8x1xf32>
    %536 = tpu.reciprocal %535 {approx = true} : vector<8x1xf32> -> vector<8x1xf32>
    %537 = vector.broadcast %536 : vector<8x1xf32> to vector<8x8xf32>
    %538 = arith.mulf %533, %537 : vector<8x8xf32>
    %cst_270 = arith.constant dense<0.000000e+00> : vector<8x32xf32>
    %539 = tpu.matmul %538, %522, %cst_270 {dimension_numbers = #tpu.dot_dimension_numbers<[1], [0], [0], [1], [0, 0, 1, 1], [], []>} : vector<8x8xf32>, vector<8x32xf32>, vector<8x32xf32> -> vector<8x32xf32>
    %540 = arith.truncf %539 : vector<8x32xf32> to vector<8x32xbf16>
    %541 = vector.extract_strided_slice %516 {offsets = [0, 0], sizes = [32, 128], strides = [1, 1]} : vector<128x128xbf16> to vector<32x128xbf16>
    %cst_271 = arith.constant dense<0.000000e+00> : vector<8x128xf32>
    %542 = tpu.matmul %540, %541, %cst_271 {dimension_numbers = #tpu.dot_dimension_numbers<[1], [0], [0], [1], [0, 0, 1, 1], [], []>} : vector<8x32xbf16>, vector<32x128xbf16>, vector<8x128xf32> -> vector<8x128xf32>
    %543 = arith.addf %517, %542 : vector<8x128xf32>
    %544 = vector.extract_strided_slice %504 {offsets = [0, 32], sizes = [8, 32], strides = [1, 1]} : vector<8x128xf32> to vector<8x32xf32>
    %cst_272 = arith.constant 0.176776692 : f32
    %545 = vector.broadcast %cst_272 : f32 to vector<8x32xf32>
    %546 = arith.mulf %544, %545 : vector<8x32xf32>
    %547 = vector.extract_strided_slice %509 {offsets = [0, 32], sizes = [8, 32], strides = [1, 1]} : vector<8x128xf32> to vector<8x32xf32>
    %548 = vector.extract_strided_slice %514 {offsets = [0, 32], sizes = [8, 32], strides = [1, 1]} : vector<8x128xf32> to vector<8x32xf32>
    %549 = tpu.transpose %547, [1, 0] : vector<8x32xf32> -> vector<32x8xf32>
    %cst_273 = arith.constant dense<0.000000e+00> : vector<8x8xf32>
    %550 = tpu.matmul %546, %549, %cst_273 {dimension_numbers = #tpu.dot_dimension_numbers<[1], [0], [0], [1], [0, 0, 1, 1], [], []>} : vector<8x32xf32>, vector<32x8xf32>, vector<8x8xf32> -> vector<8x8xf32>
    %cst_274 = arith.constant -1.000000e+30 : f32
    %551 = vector.shape_cast %6 : vector<1x8xi1> to vector<1x8xi1>
    %552 = vector.broadcast %551 : vector<1x8xi1> to vector<8x8xi1>
    %553 = vector.broadcast %cst_274 : f32 to vector<8x8xf32>
    %554 = arith.select %552, %550, %553 : vector<8x8xi1>, vector<8x8xf32>
    %cst_275 = arith.constant dense<0xFF800000> : vector<8xf32>
    %555 = vector.multi_reduction <maximumf>, %554, %cst_275 [1] : vector<8x8xf32> to vector<8xf32>
    %556 = vector.shape_cast %555 : vector<8xf32> to vector<8x1xf32>
    %557 = vector.broadcast %556 : vector<8x1xf32> to vector<8x8xf32>
    %558 = arith.subf %554, %557 : vector<8x8xf32>
    %559 = math.exp %558 : vector<8x8xf32>
    %cst_276 = arith.constant dense<0.000000e+00> : vector<8xf32>
    %560 = vector.multi_reduction <add>, %559, %cst_276 [1] : vector<8x8xf32> to vector<8xf32>
    %561 = vector.shape_cast %560 : vector<8xf32> to vector<8x1xf32>
    %562 = tpu.reciprocal %561 {approx = true} : vector<8x1xf32> -> vector<8x1xf32>
    %563 = vector.broadcast %562 : vector<8x1xf32> to vector<8x8xf32>
    %564 = arith.mulf %559, %563 : vector<8x8xf32>
    %cst_277 = arith.constant dense<0.000000e+00> : vector<8x32xf32>
    %565 = tpu.matmul %564, %548, %cst_277 {dimension_numbers = #tpu.dot_dimension_numbers<[1], [0], [0], [1], [0, 0, 1, 1], [], []>} : vector<8x8xf32>, vector<8x32xf32>, vector<8x32xf32> -> vector<8x32xf32>
    %566 = arith.truncf %565 : vector<8x32xf32> to vector<8x32xbf16>
    %567 = vector.extract_strided_slice %516 {offsets = [32, 0], sizes = [32, 128], strides = [1, 1]} : vector<128x128xbf16> to vector<32x128xbf16>
    %cst_278 = arith.constant dense<0.000000e+00> : vector<8x128xf32>
    %568 = tpu.matmul %566, %567, %cst_278 {dimension_numbers = #tpu.dot_dimension_numbers<[1], [0], [0], [1], [0, 0, 1, 1], [], []>} : vector<8x32xbf16>, vector<32x128xbf16>, vector<8x128xf32> -> vector<8x128xf32>
    %569 = arith.addf %543, %568 : vector<8x128xf32>
    %570 = vector.extract_strided_slice %504 {offsets = [0, 64], sizes = [8, 32], strides = [1, 1]} : vector<8x128xf32> to vector<8x32xf32>
    %cst_279 = arith.constant 0.176776692 : f32
    %571 = vector.broadcast %cst_279 : f32 to vector<8x32xf32>
    %572 = arith.mulf %570, %571 : vector<8x32xf32>
    %573 = vector.extract_strided_slice %509 {offsets = [0, 64], sizes = [8, 32], strides = [1, 1]} : vector<8x128xf32> to vector<8x32xf32>
    %574 = vector.extract_strided_slice %514 {offsets = [0, 64], sizes = [8, 32], strides = [1, 1]} : vector<8x128xf32> to vector<8x32xf32>
    %575 = tpu.transpose %573, [1, 0] : vector<8x32xf32> -> vector<32x8xf32>
    %cst_280 = arith.constant dense<0.000000e+00> : vector<8x8xf32>
    %576 = tpu.matmul %572, %575, %cst_280 {dimension_numbers = #tpu.dot_dimension_numbers<[1], [0], [0], [1], [0, 0, 1, 1], [], []>} : vector<8x32xf32>, vector<32x8xf32>, vector<8x8xf32> -> vector<8x8xf32>
    %cst_281 = arith.constant -1.000000e+30 : f32
    %577 = vector.shape_cast %6 : vector<1x8xi1> to vector<1x8xi1>
    %578 = vector.broadcast %577 : vector<1x8xi1> to vector<8x8xi1>
    %579 = vector.broadcast %cst_281 : f32 to vector<8x8xf32>
    %580 = arith.select %578, %576, %579 : vector<8x8xi1>, vector<8x8xf32>
    %cst_282 = arith.constant dense<0xFF800000> : vector<8xf32>
    %581 = vector.multi_reduction <maximumf>, %580, %cst_282 [1] : vector<8x8xf32> to vector<8xf32>
    %582 = vector.shape_cast %581 : vector<8xf32> to vector<8x1xf32>
    %583 = vector.broadcast %582 : vector<8x1xf32> to vector<8x8xf32>
    %584 = arith.subf %580, %583 : vector<8x8xf32>
    %585 = math.exp %584 : vector<8x8xf32>
    %cst_283 = arith.constant dense<0.000000e+00> : vector<8xf32>
    %586 = vector.multi_reduction <add>, %585, %cst_283 [1] : vector<8x8xf32> to vector<8xf32>
    %587 = vector.shape_cast %586 : vector<8xf32> to vector<8x1xf32>
    %588 = tpu.reciprocal %587 {approx = true} : vector<8x1xf32> -> vector<8x1xf32>
    %589 = vector.broadcast %588 : vector<8x1xf32> to vector<8x8xf32>
    %590 = arith.mulf %585, %589 : vector<8x8xf32>
    %cst_284 = arith.constant dense<0.000000e+00> : vector<8x32xf32>
    %591 = tpu.matmul %590, %574, %cst_284 {dimension_numbers = #tpu.dot_dimension_numbers<[1], [0], [0], [1], [0, 0, 1, 1], [], []>} : vector<8x8xf32>, vector<8x32xf32>, vector<8x32xf32> -> vector<8x32xf32>
    %592 = arith.truncf %591 : vector<8x32xf32> to vector<8x32xbf16>
    %593 = vector.extract_strided_slice %516 {offsets = [64, 0], sizes = [32, 128], strides = [1, 1]} : vector<128x128xbf16> to vector<32x128xbf16>
    %cst_285 = arith.constant dense<0.000000e+00> : vector<8x128xf32>
    %594 = tpu.matmul %592, %593, %cst_285 {dimension_numbers = #tpu.dot_dimension_numbers<[1], [0], [0], [1], [0, 0, 1, 1], [], []>} : vector<8x32xbf16>, vector<32x128xbf16>, vector<8x128xf32> -> vector<8x128xf32>
    %595 = arith.addf %569, %594 : vector<8x128xf32>
    %596 = vector.extract_strided_slice %504 {offsets = [0, 96], sizes = [8, 32], strides = [1, 1]} : vector<8x128xf32> to vector<8x32xf32>
    %cst_286 = arith.constant 0.176776692 : f32
    %597 = vector.broadcast %cst_286 : f32 to vector<8x32xf32>
    %598 = arith.mulf %596, %597 : vector<8x32xf32>
    %599 = vector.extract_strided_slice %509 {offsets = [0, 96], sizes = [8, 32], strides = [1, 1]} : vector<8x128xf32> to vector<8x32xf32>
    %600 = vector.extract_strided_slice %514 {offsets = [0, 96], sizes = [8, 32], strides = [1, 1]} : vector<8x128xf32> to vector<8x32xf32>
    %601 = tpu.transpose %599, [1, 0] : vector<8x32xf32> -> vector<32x8xf32>
    %cst_287 = arith.constant dense<0.000000e+00> : vector<8x8xf32>
    %602 = tpu.matmul %598, %601, %cst_287 {dimension_numbers = #tpu.dot_dimension_numbers<[1], [0], [0], [1], [0, 0, 1, 1], [], []>} : vector<8x32xf32>, vector<32x8xf32>, vector<8x8xf32> -> vector<8x8xf32>
    %cst_288 = arith.constant -1.000000e+30 : f32
    %603 = vector.shape_cast %6 : vector<1x8xi1> to vector<1x8xi1>
    %604 = vector.broadcast %603 : vector<1x8xi1> to vector<8x8xi1>
    %605 = vector.broadcast %cst_288 : f32 to vector<8x8xf32>
    %606 = arith.select %604, %602, %605 : vector<8x8xi1>, vector<8x8xf32>
    %cst_289 = arith.constant dense<0xFF800000> : vector<8xf32>
    %607 = vector.multi_reduction <maximumf>, %606, %cst_289 [1] : vector<8x8xf32> to vector<8xf32>
    %608 = vector.shape_cast %607 : vector<8xf32> to vector<8x1xf32>
    %609 = vector.broadcast %608 : vector<8x1xf32> to vector<8x8xf32>
    %610 = arith.subf %606, %609 : vector<8x8xf32>
    %611 = math.exp %610 : vector<8x8xf32>
    %cst_290 = arith.constant dense<0.000000e+00> : vector<8xf32>
    %612 = vector.multi_reduction <add>, %611, %cst_290 [1] : vector<8x8xf32> to vector<8xf32>
    %613 = vector.shape_cast %612 : vector<8xf32> to vector<8x1xf32>
    %614 = tpu.reciprocal %613 {approx = true} : vector<8x1xf32> -> vector<8x1xf32>
    %615 = vector.broadcast %614 : vector<8x1xf32> to vector<8x8xf32>
    %616 = arith.mulf %611, %615 : vector<8x8xf32>
    %cst_291 = arith.constant dense<0.000000e+00> : vector<8x32xf32>
    %617 = tpu.matmul %616, %600, %cst_291 {dimension_numbers = #tpu.dot_dimension_numbers<[1], [0], [0], [1], [0, 0, 1, 1], [], []>} : vector<8x8xf32>, vector<8x32xf32>, vector<8x32xf32> -> vector<8x32xf32>
    %618 = arith.truncf %617 : vector<8x32xf32> to vector<8x32xbf16>
    %619 = vector.extract_strided_slice %516 {offsets = [96, 0], sizes = [32, 128], strides = [1, 1]} : vector<128x128xbf16> to vector<32x128xbf16>
    %cst_292 = arith.constant dense<0.000000e+00> : vector<8x128xf32>
    %620 = tpu.matmul %618, %619, %cst_292 {dimension_numbers = #tpu.dot_dimension_numbers<[1], [0], [0], [1], [0, 0, 1, 1], [], []>} : vector<8x32xbf16>, vector<32x128xbf16>, vector<8x128xf32> -> vector<8x128xf32>
    %621 = arith.addf %595, %620 : vector<8x128xf32>
    %c0_293 = arith.constant 0 : index
    %c41 = arith.constant 41 : index
    %c0_294 = arith.constant 0 : index
    %622 = vector.load %arg9[%c0_293, %c41, %c0_294] : memref<1x54x128xf32, #tpu.memory_space<vmem>>, vector<1x1x128xf32>
    %623 = vector.shape_cast %622 : vector<1x1x128xf32> to vector<1x128xf32>
    %624 = vector.broadcast %623 : vector<1x128xf32> to vector<8x128xf32>
    %625 = arith.addf %621, %624 : vector<8x128xf32>
    %626 = arith.addf %625, %495 : vector<8x128xf32>
    %c0_295 = arith.constant 0 : index
    %c45 = arith.constant 45 : index
    %c0_296 = arith.constant 0 : index
    %627 = vector.load %arg9[%c0_295, %c45, %c0_296] : memref<1x54x128xf32, #tpu.memory_space<vmem>>, vector<1x1x128xf32>
    %628 = vector.shape_cast %627 : vector<1x1x128xf32> to vector<1x128xf32>
    %c0_297 = arith.constant 0 : index
    %c49 = arith.constant 49 : index
    %c0_298 = arith.constant 0 : index
    %629 = vector.load %arg9[%c0_297, %c49, %c0_298] : memref<1x54x128xf32, #tpu.memory_space<vmem>>, vector<1x1x128xf32>
    %630 = vector.shape_cast %629 : vector<1x1x128xf32> to vector<1x128xf32>
    %cst_299 = arith.constant dense<0.000000e+00> : vector<8xf32>
    %631 = vector.multi_reduction <add>, %626, %cst_299 [1] : vector<8x128xf32> to vector<8xf32>
    %632 = vector.shape_cast %631 : vector<8xf32> to vector<8x1xf32>
    %cst_300 = arith.constant 1.280000e+02 : f32
    %633 = vector.broadcast %cst_300 : f32 to vector<8x1xf32>
    %634 = arith.divf %632, %633 : vector<8x1xf32>
    %635 = vector.broadcast %634 : vector<8x1xf32> to vector<8x128xf32>
    %636 = arith.subf %626, %635 : vector<8x128xf32>
    %637 = arith.mulf %636, %636 : vector<8x128xf32>
    %cst_301 = arith.constant dense<0.000000e+00> : vector<8xf32>
    %638 = vector.multi_reduction <add>, %637, %cst_301 [1] : vector<8x128xf32> to vector<8xf32>
    %639 = vector.shape_cast %638 : vector<8xf32> to vector<8x1xf32>
    %cst_302 = arith.constant 1.280000e+02 : f32
    %640 = vector.broadcast %cst_302 : f32 to vector<8x1xf32>
    %641 = arith.divf %639, %640 : vector<8x1xf32>
    %642 = vector.broadcast %634 : vector<8x1xf32> to vector<8x128xf32>
    %643 = arith.subf %626, %642 : vector<8x128xf32>
    %cst_303 = arith.constant 9.99999974E-6 : f32
    %644 = vector.broadcast %cst_303 : f32 to vector<8x1xf32>
    %645 = arith.addf %641, %644 : vector<8x1xf32>
    %646 = math.rsqrt %645 : vector<8x1xf32>
    %647 = vector.broadcast %646 : vector<8x1xf32> to vector<8x128xf32>
    %648 = arith.mulf %643, %647 : vector<8x128xf32>
    %649 = vector.broadcast %628 : vector<1x128xf32> to vector<8x128xf32>
    %650 = arith.mulf %648, %649 : vector<8x128xf32>
    %651 = vector.broadcast %630 : vector<1x128xf32> to vector<8x128xf32>
    %652 = arith.addf %650, %651 : vector<8x128xf32>
    %cst_304 = arith.constant dense<0.000000e+00> : vector<1x128xf32>
    %653 = tpu.matmul %4, %652, %cst_304 {dimension_numbers = #tpu.dot_dimension_numbers<[1], [0], [0], [1], [0, 0, 1, 1], [], []>} : vector<1x8xf32>, vector<8x128xf32>, vector<1x128xf32> -> vector<1x128xf32>
    %654 = vector.broadcast %86 : vector<1x1xf32> to vector<1x128xf32>
    %655 = arith.mulf %653, %654 : vector<1x128xf32>
    %656 = arith.truncf %655 : vector<1x128xf32> to vector<1x128xbf16>
    %c0_305 = arith.constant 0 : index
    %c1_306 = arith.constant 1 : index
    %c0_307 = arith.constant 0 : index
    %c0_308 = arith.constant 0 : index
    %657 = vector.load %arg8[%c0_305, %c1_306, %c0_307, %c0_308] : memref<1x4x128x64xbf16, #tpu.memory_space<vmem>>, vector<1x1x128x64xbf16>
    %658 = vector.shape_cast %657 : vector<1x1x128x64xbf16> to vector<128x64xbf16>
    %cst_309 = arith.constant dense<0.000000e+00> : vector<1x64xf32>
    %659 = tpu.matmul %656, %658, %cst_309 {dimension_numbers = #tpu.dot_dimension_numbers<[1], [0], [0], [1], [0, 0, 1, 1], [], []>} : vector<1x128xbf16>, vector<128x64xbf16>, vector<1x64xf32> -> vector<1x64xf32>
    %c0_310 = arith.constant 0 : index
    %c52_311 = arith.constant 52 : index
    %c64 = arith.constant 64 : index
    %660 = vector.load %arg9[%c0_310, %c52_311, %c64] : memref<1x54x128xf32, #tpu.memory_space<vmem>>, vector<1x1x64xf32>
    %661 = vector.shape_cast %660 : vector<1x1x64xf32> to vector<1x64xf32>
    %662 = arith.addf %659, %661 : vector<1x64xf32>
    %663 = arith.truncf %662 : vector<1x64xf32> to vector<1x64xbf16>
    %664 = vector.extract_strided_slice %87 {offsets = [64, 0], sizes = [64, 128], strides = [1, 1]} : vector<256x128xbf16> to vector<64x128xbf16>
    %cst_312 = arith.constant dense<0.000000e+00> : vector<1x128xf32>
    %665 = tpu.matmul %663, %664, %cst_312 {dimension_numbers = #tpu.dot_dimension_numbers<[1], [0], [0], [1], [0, 0, 1, 1], [], []>} : vector<1x64xbf16>, vector<64x128xbf16>, vector<1x128xf32> -> vector<1x128xf32>
    %666 = arith.addf %377, %665 : vector<1x128xf32>
    %667 = vector.extract_strided_slice %42 {offsets = [0, 64], sizes = [8, 32], strides = [1, 1]} : vector<8x128xf32> to vector<8x32xf32>
    %668 = vector.extract_strided_slice %63 {offsets = [0, 64], sizes = [8, 32], strides = [1, 1]} : vector<8x128xf32> to vector<8x32xf32>
    %669 = vector.extract_strided_slice %76 {offsets = [0, 64], sizes = [8, 32], strides = [1, 1]} : vector<8x128xf32> to vector<8x32xf32>
    %670 = vector.extract_strided_slice %81 {offsets = [0, 64], sizes = [8, 32], strides = [1, 1]} : vector<8x128xf32> to vector<8x32xf32>
    %671 = tpu.concatenate %667, %668, %669, %670 in 1 : vector<8x32xf32>, vector<8x32xf32>, vector<8x32xf32>, vector<8x32xf32> -> vector<8x128xf32>
    %c0_313 = arith.constant 0 : index
    %c2_314 = arith.constant 2 : index
    %c0_315 = arith.constant 0 : index
    %672 = vector.load %arg9[%c0_313, %c2_314, %c0_315] : memref<1x54x128xf32, #tpu.memory_space<vmem>>, vector<1x1x128xf32>
    %673 = vector.shape_cast %672 : vector<1x1x128xf32> to vector<1x128xf32>
    %674 = vector.broadcast %673 : vector<1x128xf32> to vector<8x128xf32>
    %675 = arith.addf %671, %674 : vector<8x128xf32>
    %cst_316 = arith.constant 5.000000e-01 : f32
    %676 = vector.broadcast %cst_316 : f32 to vector<8x128xf32>
    %677 = arith.mulf %676, %675 : vector<8x128xf32>
    %cst_317 = arith.constant 4.471500e-02 : f32
    %678 = vector.broadcast %cst_317 : f32 to vector<8x128xf32>
    %679 = arith.mulf %678, %675 : vector<8x128xf32>
    %680 = arith.mulf %679, %675 : vector<8x128xf32>
    %681 = arith.mulf %680, %675 : vector<8x128xf32>
    %682 = arith.addf %675, %681 : vector<8x128xf32>
    %cst_318 = arith.constant 0.797884583 : f32
    %683 = vector.broadcast %cst_318 : f32 to vector<8x128xf32>
    %684 = arith.mulf %683, %682 : vector<8x128xf32>
    %685 = math.tanh %684 : vector<8x128xf32>
    %cst_319 = arith.constant 1.000000e+00 : f32
    %686 = vector.broadcast %cst_319 : f32 to vector<8x128xf32>
    %687 = arith.addf %686, %685 : vector<8x128xf32>
    %688 = arith.mulf %677, %687 : vector<8x128xf32>
    %689 = arith.truncf %688 : vector<8x128xf32> to vector<8x128xbf16>
    %c0_320 = arith.constant 0 : index
    %c2_321 = arith.constant 2 : index
    %c0_322 = arith.constant 0 : index
    %c0_323 = arith.constant 0 : index
    %c0_324 = arith.constant 0 : index
    %690 = vector.load %arg5[%c0_320, %c2_321, %c0_322, %c0_323, %c0_324] : memref<1x4x2x128x128xbf16, #tpu.memory_space<vmem>>, vector<1x1x1x128x128xbf16>
    %691 = vector.shape_cast %690 : vector<1x1x1x128x128xbf16> to vector<128x128xbf16>
    %cst_325 = arith.constant dense<0.000000e+00> : vector<8x128xf32>
    %692 = tpu.matmul %689, %691, %cst_325 {dimension_numbers = #tpu.dot_dimension_numbers<[1], [0], [0], [1], [0, 0, 1, 1], [], []>} : vector<8x128xbf16>, vector<128x128xbf16>, vector<8x128xf32> -> vector<8x128xf32>
    %c0_326 = arith.constant 0 : index
    %c8_327 = arith.constant 8 : index
    %c0_328 = arith.constant 0 : index
    %693 = vector.load %arg9[%c0_326, %c8_327, %c0_328] : memref<1x54x128xf32, #tpu.memory_space<vmem>>, vector<1x1x128xf32>
    %694 = vector.shape_cast %693 : vector<1x1x128xf32> to vector<1x128xf32>
    %695 = vector.broadcast %694 : vector<1x128xf32> to vector<8x128xf32>
    %696 = arith.addf %692, %695 : vector<8x128xf32>
    %c0_329 = arith.constant 0 : index
    %c16 = arith.constant 16 : index
    %c0_330 = arith.constant 0 : index
    %697 = vector.load %arg9[%c0_329, %c16, %c0_330] : memref<1x54x128xf32, #tpu.memory_space<vmem>>, vector<1x1x128xf32>
    %698 = vector.shape_cast %697 : vector<1x1x128xf32> to vector<1x128xf32>
    %c0_331 = arith.constant 0 : index
    %c24 = arith.constant 24 : index
    %c0_332 = arith.constant 0 : index
    %699 = vector.load %arg9[%c0_331, %c24, %c0_332] : memref<1x54x128xf32, #tpu.memory_space<vmem>>, vector<1x1x128xf32>
    %700 = vector.shape_cast %699 : vector<1x1x128xf32> to vector<1x128xf32>
    %cst_333 = arith.constant dense<0.000000e+00> : vector<8xf32>
    %701 = vector.multi_reduction <add>, %696, %cst_333 [1] : vector<8x128xf32> to vector<8xf32>
    %702 = vector.shape_cast %701 : vector<8xf32> to vector<8x1xf32>
    %cst_334 = arith.constant 1.280000e+02 : f32
    %703 = vector.broadcast %cst_334 : f32 to vector<8x1xf32>
    %704 = arith.divf %702, %703 : vector<8x1xf32>
    %705 = vector.broadcast %704 : vector<8x1xf32> to vector<8x128xf32>
    %706 = arith.subf %696, %705 : vector<8x128xf32>
    %707 = arith.mulf %706, %706 : vector<8x128xf32>
    %cst_335 = arith.constant dense<0.000000e+00> : vector<8xf32>
    %708 = vector.multi_reduction <add>, %707, %cst_335 [1] : vector<8x128xf32> to vector<8xf32>
    %709 = vector.shape_cast %708 : vector<8xf32> to vector<8x1xf32>
    %cst_336 = arith.constant 1.280000e+02 : f32
    %710 = vector.broadcast %cst_336 : f32 to vector<8x1xf32>
    %711 = arith.divf %709, %710 : vector<8x1xf32>
    %712 = vector.broadcast %704 : vector<8x1xf32> to vector<8x128xf32>
    %713 = arith.subf %696, %712 : vector<8x128xf32>
    %cst_337 = arith.constant 9.99999974E-6 : f32
    %714 = vector.broadcast %cst_337 : f32 to vector<8x1xf32>
    %715 = arith.addf %711, %714 : vector<8x1xf32>
    %716 = math.rsqrt %715 : vector<8x1xf32>
    %717 = vector.broadcast %716 : vector<8x1xf32> to vector<8x128xf32>
    %718 = arith.mulf %713, %717 : vector<8x128xf32>
    %719 = vector.broadcast %698 : vector<1x128xf32> to vector<8x128xf32>
    %720 = arith.mulf %718, %719 : vector<8x128xf32>
    %721 = vector.broadcast %700 : vector<1x128xf32> to vector<8x128xf32>
    %722 = arith.addf %720, %721 : vector<8x128xf32>
    %cst_338 = arith.constant 5.000000e-01 : f32
    %723 = vector.broadcast %cst_338 : f32 to vector<8x128xf32>
    %724 = arith.mulf %723, %722 : vector<8x128xf32>
    %cst_339 = arith.constant 4.471500e-02 : f32
    %725 = vector.broadcast %cst_339 : f32 to vector<8x128xf32>
    %726 = arith.mulf %725, %722 : vector<8x128xf32>
    %727 = arith.mulf %726, %722 : vector<8x128xf32>
    %728 = arith.mulf %727, %722 : vector<8x128xf32>
    %729 = arith.addf %722, %728 : vector<8x128xf32>
    %cst_340 = arith.constant 0.797884583 : f32
    %730 = vector.broadcast %cst_340 : f32 to vector<8x128xf32>
    %731 = arith.mulf %730, %729 : vector<8x128xf32>
    %732 = math.tanh %731 : vector<8x128xf32>
    %cst_341 = arith.constant 1.000000e+00 : f32
    %733 = vector.broadcast %cst_341 : f32 to vector<8x128xf32>
    %734 = arith.addf %733, %732 : vector<8x128xf32>
    %735 = arith.mulf %724, %734 : vector<8x128xf32>
    %736 = arith.addf %735, %688 : vector<8x128xf32>
    %737 = arith.truncf %736 : vector<8x128xf32> to vector<8x128xbf16>
    %c0_342 = arith.constant 0 : index
    %c2_343 = arith.constant 2 : index
    %c1_344 = arith.constant 1 : index
    %c0_345 = arith.constant 0 : index
    %c0_346 = arith.constant 0 : index
    %738 = vector.load %arg5[%c0_342, %c2_343, %c1_344, %c0_345, %c0_346] : memref<1x4x2x128x128xbf16, #tpu.memory_space<vmem>>, vector<1x1x1x128x128xbf16>
    %739 = vector.shape_cast %738 : vector<1x1x1x128x128xbf16> to vector<128x128xbf16>
    %cst_347 = arith.constant dense<0.000000e+00> : vector<8x128xf32>
    %740 = tpu.matmul %737, %739, %cst_347 {dimension_numbers = #tpu.dot_dimension_numbers<[1], [0], [0], [1], [0, 0, 1, 1], [], []>} : vector<8x128xbf16>, vector<128x128xbf16>, vector<8x128xf32> -> vector<8x128xf32>
    %c0_348 = arith.constant 0 : index
    %c9_349 = arith.constant 9 : index
    %c0_350 = arith.constant 0 : index
    %741 = vector.load %arg9[%c0_348, %c9_349, %c0_350] : memref<1x54x128xf32, #tpu.memory_space<vmem>>, vector<1x1x128xf32>
    %742 = vector.shape_cast %741 : vector<1x1x128xf32> to vector<1x128xf32>
    %743 = vector.broadcast %742 : vector<1x128xf32> to vector<8x128xf32>
    %744 = arith.addf %740, %743 : vector<8x128xf32>
    %c0_351 = arith.constant 0 : index
    %c17 = arith.constant 17 : index
    %c0_352 = arith.constant 0 : index
    %745 = vector.load %arg9[%c0_351, %c17, %c0_352] : memref<1x54x128xf32, #tpu.memory_space<vmem>>, vector<1x1x128xf32>
    %746 = vector.shape_cast %745 : vector<1x1x128xf32> to vector<1x128xf32>
    %c0_353 = arith.constant 0 : index
    %c25 = arith.constant 25 : index
    %c0_354 = arith.constant 0 : index
    %747 = vector.load %arg9[%c0_353, %c25, %c0_354] : memref<1x54x128xf32, #tpu.memory_space<vmem>>, vector<1x1x128xf32>
    %748 = vector.shape_cast %747 : vector<1x1x128xf32> to vector<1x128xf32>
    %cst_355 = arith.constant dense<0.000000e+00> : vector<8xf32>
    %749 = vector.multi_reduction <add>, %744, %cst_355 [1] : vector<8x128xf32> to vector<8xf32>
    %750 = vector.shape_cast %749 : vector<8xf32> to vector<8x1xf32>
    %cst_356 = arith.constant 1.280000e+02 : f32
    %751 = vector.broadcast %cst_356 : f32 to vector<8x1xf32>
    %752 = arith.divf %750, %751 : vector<8x1xf32>
    %753 = vector.broadcast %752 : vector<8x1xf32> to vector<8x128xf32>
    %754 = arith.subf %744, %753 : vector<8x128xf32>
    %755 = arith.mulf %754, %754 : vector<8x128xf32>
    %cst_357 = arith.constant dense<0.000000e+00> : vector<8xf32>
    %756 = vector.multi_reduction <add>, %755, %cst_357 [1] : vector<8x128xf32> to vector<8xf32>
    %757 = vector.shape_cast %756 : vector<8xf32> to vector<8x1xf32>
    %cst_358 = arith.constant 1.280000e+02 : f32
    %758 = vector.broadcast %cst_358 : f32 to vector<8x1xf32>
    %759 = arith.divf %757, %758 : vector<8x1xf32>
    %760 = vector.broadcast %752 : vector<8x1xf32> to vector<8x128xf32>
    %761 = arith.subf %744, %760 : vector<8x128xf32>
    %cst_359 = arith.constant 9.99999974E-6 : f32
    %762 = vector.broadcast %cst_359 : f32 to vector<8x1xf32>
    %763 = arith.addf %759, %762 : vector<8x1xf32>
    %764 = math.rsqrt %763 : vector<8x1xf32>
    %765 = vector.broadcast %764 : vector<8x1xf32> to vector<8x128xf32>
    %766 = arith.mulf %761, %765 : vector<8x128xf32>
    %767 = vector.broadcast %746 : vector<1x128xf32> to vector<8x128xf32>
    %768 = arith.mulf %766, %767 : vector<8x128xf32>
    %769 = vector.broadcast %748 : vector<1x128xf32> to vector<8x128xf32>
    %770 = arith.addf %768, %769 : vector<8x128xf32>
    %cst_360 = arith.constant 5.000000e-01 : f32
    %771 = vector.broadcast %cst_360 : f32 to vector<8x128xf32>
    %772 = arith.mulf %771, %770 : vector<8x128xf32>
    %cst_361 = arith.constant 4.471500e-02 : f32
    %773 = vector.broadcast %cst_361 : f32 to vector<8x128xf32>
    %774 = arith.mulf %773, %770 : vector<8x128xf32>
    %775 = arith.mulf %774, %770 : vector<8x128xf32>
    %776 = arith.mulf %775, %770 : vector<8x128xf32>
    %777 = arith.addf %770, %776 : vector<8x128xf32>
    %cst_362 = arith.constant 0.797884583 : f32
    %778 = vector.broadcast %cst_362 : f32 to vector<8x128xf32>
    %779 = arith.mulf %778, %777 : vector<8x128xf32>
    %780 = math.tanh %779 : vector<8x128xf32>
    %cst_363 = arith.constant 1.000000e+00 : f32
    %781 = vector.broadcast %cst_363 : f32 to vector<8x128xf32>
    %782 = arith.addf %781, %780 : vector<8x128xf32>
    %783 = arith.mulf %772, %782 : vector<8x128xf32>
    %784 = arith.addf %783, %736 : vector<8x128xf32>
    %785 = arith.truncf %784 : vector<8x128xf32> to vector<8x128xbf16>
    %c0_364 = arith.constant 0 : index
    %c2_365 = arith.constant 2 : index
    %c0_366 = arith.constant 0 : index
    %c0_367 = arith.constant 0 : index
    %786 = vector.load %arg6[%c0_364, %c2_365, %c0_366, %c0_367] : memref<1x4x128x384xbf16, #tpu.memory_space<vmem>>, vector<1x1x128x384xbf16>
    %787 = vector.shape_cast %786 : vector<1x1x128x384xbf16> to vector<128x384xbf16>
    %cst_368 = arith.constant dense<0.000000e+00> : vector<8x384xf32>
    %788 = tpu.matmul %785, %787, %cst_368 {dimension_numbers = #tpu.dot_dimension_numbers<[1], [0], [0], [1], [0, 0, 1, 1], [], []>} : vector<8x128xbf16>, vector<128x384xbf16>, vector<8x384xf32> -> vector<8x384xf32>
    %789 = vector.extract_strided_slice %788 {offsets = [0, 0], sizes = [8, 128], strides = [1, 1]} : vector<8x384xf32> to vector<8x128xf32>
    %c0_369 = arith.constant 0 : index
    %c34 = arith.constant 34 : index
    %c0_370 = arith.constant 0 : index
    %790 = vector.load %arg9[%c0_369, %c34, %c0_370] : memref<1x54x128xf32, #tpu.memory_space<vmem>>, vector<1x1x128xf32>
    %791 = vector.shape_cast %790 : vector<1x1x128xf32> to vector<1x128xf32>
    %792 = vector.broadcast %791 : vector<1x128xf32> to vector<8x128xf32>
    %793 = arith.addf %789, %792 : vector<8x128xf32>
    %794 = vector.extract_strided_slice %788 {offsets = [0, 128], sizes = [8, 128], strides = [1, 1]} : vector<8x384xf32> to vector<8x128xf32>
    %c0_371 = arith.constant 0 : index
    %c35 = arith.constant 35 : index
    %c0_372 = arith.constant 0 : index
    %795 = vector.load %arg9[%c0_371, %c35, %c0_372] : memref<1x54x128xf32, #tpu.memory_space<vmem>>, vector<1x1x128xf32>
    %796 = vector.shape_cast %795 : vector<1x1x128xf32> to vector<1x128xf32>
    %797 = vector.broadcast %796 : vector<1x128xf32> to vector<8x128xf32>
    %798 = arith.addf %794, %797 : vector<8x128xf32>
    %799 = vector.extract_strided_slice %788 {offsets = [0, 256], sizes = [8, 128], strides = [1, 1]} : vector<8x384xf32> to vector<8x128xf32>
    %c0_373 = arith.constant 0 : index
    %c36 = arith.constant 36 : index
    %c0_374 = arith.constant 0 : index
    %800 = vector.load %arg9[%c0_373, %c36, %c0_374] : memref<1x54x128xf32, #tpu.memory_space<vmem>>, vector<1x1x128xf32>
    %801 = vector.shape_cast %800 : vector<1x1x128xf32> to vector<1x128xf32>
    %802 = vector.broadcast %801 : vector<1x128xf32> to vector<8x128xf32>
    %803 = arith.addf %799, %802 : vector<8x128xf32>
    %c0_375 = arith.constant 0 : index
    %c2_376 = arith.constant 2 : index
    %c0_377 = arith.constant 0 : index
    %c0_378 = arith.constant 0 : index
    %804 = vector.load %arg7[%c0_375, %c2_376, %c0_377, %c0_378] : memref<1x4x128x128xbf16, #tpu.memory_space<vmem>>, vector<1x1x128x128xbf16>
    %805 = vector.shape_cast %804 : vector<1x1x128x128xbf16> to vector<128x128xbf16>
    %cst_379 = arith.constant 0.000000e+00 : f32
    %806 = vector.broadcast %cst_379 : f32 to vector<8x128xf32>
    %807 = vector.extract_strided_slice %793 {offsets = [0, 0], sizes = [8, 32], strides = [1, 1]} : vector<8x128xf32> to vector<8x32xf32>
    %cst_380 = arith.constant 0.176776692 : f32
    %808 = vector.broadcast %cst_380 : f32 to vector<8x32xf32>
    %809 = arith.mulf %807, %808 : vector<8x32xf32>
    %810 = vector.extract_strided_slice %798 {offsets = [0, 0], sizes = [8, 32], strides = [1, 1]} : vector<8x128xf32> to vector<8x32xf32>
    %811 = vector.extract_strided_slice %803 {offsets = [0, 0], sizes = [8, 32], strides = [1, 1]} : vector<8x128xf32> to vector<8x32xf32>
    %812 = tpu.transpose %810, [1, 0] : vector<8x32xf32> -> vector<32x8xf32>
    %cst_381 = arith.constant dense<0.000000e+00> : vector<8x8xf32>
    %813 = tpu.matmul %809, %812, %cst_381 {dimension_numbers = #tpu.dot_dimension_numbers<[1], [0], [0], [1], [0, 0, 1, 1], [], []>} : vector<8x32xf32>, vector<32x8xf32>, vector<8x8xf32> -> vector<8x8xf32>
    %cst_382 = arith.constant -1.000000e+30 : f32
    %814 = vector.shape_cast %6 : vector<1x8xi1> to vector<1x8xi1>
    %815 = vector.broadcast %814 : vector<1x8xi1> to vector<8x8xi1>
    %816 = vector.broadcast %cst_382 : f32 to vector<8x8xf32>
    %817 = arith.select %815, %813, %816 : vector<8x8xi1>, vector<8x8xf32>
    %cst_383 = arith.constant dense<0xFF800000> : vector<8xf32>
    %818 = vector.multi_reduction <maximumf>, %817, %cst_383 [1] : vector<8x8xf32> to vector<8xf32>
    %819 = vector.shape_cast %818 : vector<8xf32> to vector<8x1xf32>
    %820 = vector.broadcast %819 : vector<8x1xf32> to vector<8x8xf32>
    %821 = arith.subf %817, %820 : vector<8x8xf32>
    %822 = math.exp %821 : vector<8x8xf32>
    %cst_384 = arith.constant dense<0.000000e+00> : vector<8xf32>
    %823 = vector.multi_reduction <add>, %822, %cst_384 [1] : vector<8x8xf32> to vector<8xf32>
    %824 = vector.shape_cast %823 : vector<8xf32> to vector<8x1xf32>
    %825 = tpu.reciprocal %824 {approx = true} : vector<8x1xf32> -> vector<8x1xf32>
    %826 = vector.broadcast %825 : vector<8x1xf32> to vector<8x8xf32>
    %827 = arith.mulf %822, %826 : vector<8x8xf32>
    %cst_385 = arith.constant dense<0.000000e+00> : vector<8x32xf32>
    %828 = tpu.matmul %827, %811, %cst_385 {dimension_numbers = #tpu.dot_dimension_numbers<[1], [0], [0], [1], [0, 0, 1, 1], [], []>} : vector<8x8xf32>, vector<8x32xf32>, vector<8x32xf32> -> vector<8x32xf32>
    %829 = arith.truncf %828 : vector<8x32xf32> to vector<8x32xbf16>
    %830 = vector.extract_strided_slice %805 {offsets = [0, 0], sizes = [32, 128], strides = [1, 1]} : vector<128x128xbf16> to vector<32x128xbf16>
    %cst_386 = arith.constant dense<0.000000e+00> : vector<8x128xf32>
    %831 = tpu.matmul %829, %830, %cst_386 {dimension_numbers = #tpu.dot_dimension_numbers<[1], [0], [0], [1], [0, 0, 1, 1], [], []>} : vector<8x32xbf16>, vector<32x128xbf16>, vector<8x128xf32> -> vector<8x128xf32>
    %832 = arith.addf %806, %831 : vector<8x128xf32>
    %833 = vector.extract_strided_slice %793 {offsets = [0, 32], sizes = [8, 32], strides = [1, 1]} : vector<8x128xf32> to vector<8x32xf32>
    %cst_387 = arith.constant 0.176776692 : f32
    %834 = vector.broadcast %cst_387 : f32 to vector<8x32xf32>
    %835 = arith.mulf %833, %834 : vector<8x32xf32>
    %836 = vector.extract_strided_slice %798 {offsets = [0, 32], sizes = [8, 32], strides = [1, 1]} : vector<8x128xf32> to vector<8x32xf32>
    %837 = vector.extract_strided_slice %803 {offsets = [0, 32], sizes = [8, 32], strides = [1, 1]} : vector<8x128xf32> to vector<8x32xf32>
    %838 = tpu.transpose %836, [1, 0] : vector<8x32xf32> -> vector<32x8xf32>
    %cst_388 = arith.constant dense<0.000000e+00> : vector<8x8xf32>
    %839 = tpu.matmul %835, %838, %cst_388 {dimension_numbers = #tpu.dot_dimension_numbers<[1], [0], [0], [1], [0, 0, 1, 1], [], []>} : vector<8x32xf32>, vector<32x8xf32>, vector<8x8xf32> -> vector<8x8xf32>
    %cst_389 = arith.constant -1.000000e+30 : f32
    %840 = vector.shape_cast %6 : vector<1x8xi1> to vector<1x8xi1>
    %841 = vector.broadcast %840 : vector<1x8xi1> to vector<8x8xi1>
    %842 = vector.broadcast %cst_389 : f32 to vector<8x8xf32>
    %843 = arith.select %841, %839, %842 : vector<8x8xi1>, vector<8x8xf32>
    %cst_390 = arith.constant dense<0xFF800000> : vector<8xf32>
    %844 = vector.multi_reduction <maximumf>, %843, %cst_390 [1] : vector<8x8xf32> to vector<8xf32>
    %845 = vector.shape_cast %844 : vector<8xf32> to vector<8x1xf32>
    %846 = vector.broadcast %845 : vector<8x1xf32> to vector<8x8xf32>
    %847 = arith.subf %843, %846 : vector<8x8xf32>
    %848 = math.exp %847 : vector<8x8xf32>
    %cst_391 = arith.constant dense<0.000000e+00> : vector<8xf32>
    %849 = vector.multi_reduction <add>, %848, %cst_391 [1] : vector<8x8xf32> to vector<8xf32>
    %850 = vector.shape_cast %849 : vector<8xf32> to vector<8x1xf32>
    %851 = tpu.reciprocal %850 {approx = true} : vector<8x1xf32> -> vector<8x1xf32>
    %852 = vector.broadcast %851 : vector<8x1xf32> to vector<8x8xf32>
    %853 = arith.mulf %848, %852 : vector<8x8xf32>
    %cst_392 = arith.constant dense<0.000000e+00> : vector<8x32xf32>
    %854 = tpu.matmul %853, %837, %cst_392 {dimension_numbers = #tpu.dot_dimension_numbers<[1], [0], [0], [1], [0, 0, 1, 1], [], []>} : vector<8x8xf32>, vector<8x32xf32>, vector<8x32xf32> -> vector<8x32xf32>
    %855 = arith.truncf %854 : vector<8x32xf32> to vector<8x32xbf16>
    %856 = vector.extract_strided_slice %805 {offsets = [32, 0], sizes = [32, 128], strides = [1, 1]} : vector<128x128xbf16> to vector<32x128xbf16>
    %cst_393 = arith.constant dense<0.000000e+00> : vector<8x128xf32>
    %857 = tpu.matmul %855, %856, %cst_393 {dimension_numbers = #tpu.dot_dimension_numbers<[1], [0], [0], [1], [0, 0, 1, 1], [], []>} : vector<8x32xbf16>, vector<32x128xbf16>, vector<8x128xf32> -> vector<8x128xf32>
    %858 = arith.addf %832, %857 : vector<8x128xf32>
    %859 = vector.extract_strided_slice %793 {offsets = [0, 64], sizes = [8, 32], strides = [1, 1]} : vector<8x128xf32> to vector<8x32xf32>
    %cst_394 = arith.constant 0.176776692 : f32
    %860 = vector.broadcast %cst_394 : f32 to vector<8x32xf32>
    %861 = arith.mulf %859, %860 : vector<8x32xf32>
    %862 = vector.extract_strided_slice %798 {offsets = [0, 64], sizes = [8, 32], strides = [1, 1]} : vector<8x128xf32> to vector<8x32xf32>
    %863 = vector.extract_strided_slice %803 {offsets = [0, 64], sizes = [8, 32], strides = [1, 1]} : vector<8x128xf32> to vector<8x32xf32>
    %864 = tpu.transpose %862, [1, 0] : vector<8x32xf32> -> vector<32x8xf32>
    %cst_395 = arith.constant dense<0.000000e+00> : vector<8x8xf32>
    %865 = tpu.matmul %861, %864, %cst_395 {dimension_numbers = #tpu.dot_dimension_numbers<[1], [0], [0], [1], [0, 0, 1, 1], [], []>} : vector<8x32xf32>, vector<32x8xf32>, vector<8x8xf32> -> vector<8x8xf32>
    %cst_396 = arith.constant -1.000000e+30 : f32
    %866 = vector.shape_cast %6 : vector<1x8xi1> to vector<1x8xi1>
    %867 = vector.broadcast %866 : vector<1x8xi1> to vector<8x8xi1>
    %868 = vector.broadcast %cst_396 : f32 to vector<8x8xf32>
    %869 = arith.select %867, %865, %868 : vector<8x8xi1>, vector<8x8xf32>
    %cst_397 = arith.constant dense<0xFF800000> : vector<8xf32>
    %870 = vector.multi_reduction <maximumf>, %869, %cst_397 [1] : vector<8x8xf32> to vector<8xf32>
    %871 = vector.shape_cast %870 : vector<8xf32> to vector<8x1xf32>
    %872 = vector.broadcast %871 : vector<8x1xf32> to vector<8x8xf32>
    %873 = arith.subf %869, %872 : vector<8x8xf32>
    %874 = math.exp %873 : vector<8x8xf32>
    %cst_398 = arith.constant dense<0.000000e+00> : vector<8xf32>
    %875 = vector.multi_reduction <add>, %874, %cst_398 [1] : vector<8x8xf32> to vector<8xf32>
    %876 = vector.shape_cast %875 : vector<8xf32> to vector<8x1xf32>
    %877 = tpu.reciprocal %876 {approx = true} : vector<8x1xf32> -> vector<8x1xf32>
    %878 = vector.broadcast %877 : vector<8x1xf32> to vector<8x8xf32>
    %879 = arith.mulf %874, %878 : vector<8x8xf32>
    %cst_399 = arith.constant dense<0.000000e+00> : vector<8x32xf32>
    %880 = tpu.matmul %879, %863, %cst_399 {dimension_numbers = #tpu.dot_dimension_numbers<[1], [0], [0], [1], [0, 0, 1, 1], [], []>} : vector<8x8xf32>, vector<8x32xf32>, vector<8x32xf32> -> vector<8x32xf32>
    %881 = arith.truncf %880 : vector<8x32xf32> to vector<8x32xbf16>
    %882 = vector.extract_strided_slice %805 {offsets = [64, 0], sizes = [32, 128], strides = [1, 1]} : vector<128x128xbf16> to vector<32x128xbf16>
    %cst_400 = arith.constant dense<0.000000e+00> : vector<8x128xf32>
    %883 = tpu.matmul %881, %882, %cst_400 {dimension_numbers = #tpu.dot_dimension_numbers<[1], [0], [0], [1], [0, 0, 1, 1], [], []>} : vector<8x32xbf16>, vector<32x128xbf16>, vector<8x128xf32> -> vector<8x128xf32>
    %884 = arith.addf %858, %883 : vector<8x128xf32>
    %885 = vector.extract_strided_slice %793 {offsets = [0, 96], sizes = [8, 32], strides = [1, 1]} : vector<8x128xf32> to vector<8x32xf32>
    %cst_401 = arith.constant 0.176776692 : f32
    %886 = vector.broadcast %cst_401 : f32 to vector<8x32xf32>
    %887 = arith.mulf %885, %886 : vector<8x32xf32>
    %888 = vector.extract_strided_slice %798 {offsets = [0, 96], sizes = [8, 32], strides = [1, 1]} : vector<8x128xf32> to vector<8x32xf32>
    %889 = vector.extract_strided_slice %803 {offsets = [0, 96], sizes = [8, 32], strides = [1, 1]} : vector<8x128xf32> to vector<8x32xf32>
    %890 = tpu.transpose %888, [1, 0] : vector<8x32xf32> -> vector<32x8xf32>
    %cst_402 = arith.constant dense<0.000000e+00> : vector<8x8xf32>
    %891 = tpu.matmul %887, %890, %cst_402 {dimension_numbers = #tpu.dot_dimension_numbers<[1], [0], [0], [1], [0, 0, 1, 1], [], []>} : vector<8x32xf32>, vector<32x8xf32>, vector<8x8xf32> -> vector<8x8xf32>
    %cst_403 = arith.constant -1.000000e+30 : f32
    %892 = vector.shape_cast %6 : vector<1x8xi1> to vector<1x8xi1>
    %893 = vector.broadcast %892 : vector<1x8xi1> to vector<8x8xi1>
    %894 = vector.broadcast %cst_403 : f32 to vector<8x8xf32>
    %895 = arith.select %893, %891, %894 : vector<8x8xi1>, vector<8x8xf32>
    %cst_404 = arith.constant dense<0xFF800000> : vector<8xf32>
    %896 = vector.multi_reduction <maximumf>, %895, %cst_404 [1] : vector<8x8xf32> to vector<8xf32>
    %897 = vector.shape_cast %896 : vector<8xf32> to vector<8x1xf32>
    %898 = vector.broadcast %897 : vector<8x1xf32> to vector<8x8xf32>
    %899 = arith.subf %895, %898 : vector<8x8xf32>
    %900 = math.exp %899 : vector<8x8xf32>
    %cst_405 = arith.constant dense<0.000000e+00> : vector<8xf32>
    %901 = vector.multi_reduction <add>, %900, %cst_405 [1] : vector<8x8xf32> to vector<8xf32>
    %902 = vector.shape_cast %901 : vector<8xf32> to vector<8x1xf32>
    %903 = tpu.reciprocal %902 {approx = true} : vector<8x1xf32> -> vector<8x1xf32>
    %904 = vector.broadcast %903 : vector<8x1xf32> to vector<8x8xf32>
    %905 = arith.mulf %900, %904 : vector<8x8xf32>
    %cst_406 = arith.constant dense<0.000000e+00> : vector<8x32xf32>
    %906 = tpu.matmul %905, %889, %cst_406 {dimension_numbers = #tpu.dot_dimension_numbers<[1], [0], [0], [1], [0, 0, 1, 1], [], []>} : vector<8x8xf32>, vector<8x32xf32>, vector<8x32xf32> -> vector<8x32xf32>
    %907 = arith.truncf %906 : vector<8x32xf32> to vector<8x32xbf16>
    %908 = vector.extract_strided_slice %805 {offsets = [96, 0], sizes = [32, 128], strides = [1, 1]} : vector<128x128xbf16> to vector<32x128xbf16>
    %cst_407 = arith.constant dense<0.000000e+00> : vector<8x128xf32>
    %909 = tpu.matmul %907, %908, %cst_407 {dimension_numbers = #tpu.dot_dimension_numbers<[1], [0], [0], [1], [0, 0, 1, 1], [], []>} : vector<8x32xbf16>, vector<32x128xbf16>, vector<8x128xf32> -> vector<8x128xf32>
    %910 = arith.addf %884, %909 : vector<8x128xf32>
    %c0_408 = arith.constant 0 : index
    %c42 = arith.constant 42 : index
    %c0_409 = arith.constant 0 : index
    %911 = vector.load %arg9[%c0_408, %c42, %c0_409] : memref<1x54x128xf32, #tpu.memory_space<vmem>>, vector<1x1x128xf32>
    %912 = vector.shape_cast %911 : vector<1x1x128xf32> to vector<1x128xf32>
    %913 = vector.broadcast %912 : vector<1x128xf32> to vector<8x128xf32>
    %914 = arith.addf %910, %913 : vector<8x128xf32>
    %915 = arith.addf %914, %784 : vector<8x128xf32>
    %c0_410 = arith.constant 0 : index
    %c46 = arith.constant 46 : index
    %c0_411 = arith.constant 0 : index
    %916 = vector.load %arg9[%c0_410, %c46, %c0_411] : memref<1x54x128xf32, #tpu.memory_space<vmem>>, vector<1x1x128xf32>
    %917 = vector.shape_cast %916 : vector<1x1x128xf32> to vector<1x128xf32>
    %c0_412 = arith.constant 0 : index
    %c50 = arith.constant 50 : index
    %c0_413 = arith.constant 0 : index
    %918 = vector.load %arg9[%c0_412, %c50, %c0_413] : memref<1x54x128xf32, #tpu.memory_space<vmem>>, vector<1x1x128xf32>
    %919 = vector.shape_cast %918 : vector<1x1x128xf32> to vector<1x128xf32>
    %cst_414 = arith.constant dense<0.000000e+00> : vector<8xf32>
    %920 = vector.multi_reduction <add>, %915, %cst_414 [1] : vector<8x128xf32> to vector<8xf32>
    %921 = vector.shape_cast %920 : vector<8xf32> to vector<8x1xf32>
    %cst_415 = arith.constant 1.280000e+02 : f32
    %922 = vector.broadcast %cst_415 : f32 to vector<8x1xf32>
    %923 = arith.divf %921, %922 : vector<8x1xf32>
    %924 = vector.broadcast %923 : vector<8x1xf32> to vector<8x128xf32>
    %925 = arith.subf %915, %924 : vector<8x128xf32>
    %926 = arith.mulf %925, %925 : vector<8x128xf32>
    %cst_416 = arith.constant dense<0.000000e+00> : vector<8xf32>
    %927 = vector.multi_reduction <add>, %926, %cst_416 [1] : vector<8x128xf32> to vector<8xf32>
    %928 = vector.shape_cast %927 : vector<8xf32> to vector<8x1xf32>
    %cst_417 = arith.constant 1.280000e+02 : f32
    %929 = vector.broadcast %cst_417 : f32 to vector<8x1xf32>
    %930 = arith.divf %928, %929 : vector<8x1xf32>
    %931 = vector.broadcast %923 : vector<8x1xf32> to vector<8x128xf32>
    %932 = arith.subf %915, %931 : vector<8x128xf32>
    %cst_418 = arith.constant 9.99999974E-6 : f32
    %933 = vector.broadcast %cst_418 : f32 to vector<8x1xf32>
    %934 = arith.addf %930, %933 : vector<8x1xf32>
    %935 = math.rsqrt %934 : vector<8x1xf32>
    %936 = vector.broadcast %935 : vector<8x1xf32> to vector<8x128xf32>
    %937 = arith.mulf %932, %936 : vector<8x128xf32>
    %938 = vector.broadcast %917 : vector<1x128xf32> to vector<8x128xf32>
    %939 = arith.mulf %937, %938 : vector<8x128xf32>
    %940 = vector.broadcast %919 : vector<1x128xf32> to vector<8x128xf32>
    %941 = arith.addf %939, %940 : vector<8x128xf32>
    %cst_419 = arith.constant dense<0.000000e+00> : vector<1x128xf32>
    %942 = tpu.matmul %4, %941, %cst_419 {dimension_numbers = #tpu.dot_dimension_numbers<[1], [0], [0], [1], [0, 0, 1, 1], [], []>} : vector<1x8xf32>, vector<8x128xf32>, vector<1x128xf32> -> vector<1x128xf32>
    %943 = vector.broadcast %86 : vector<1x1xf32> to vector<1x128xf32>
    %944 = arith.mulf %942, %943 : vector<1x128xf32>
    %945 = arith.truncf %944 : vector<1x128xf32> to vector<1x128xbf16>
    %c0_420 = arith.constant 0 : index
    %c2_421 = arith.constant 2 : index
    %c0_422 = arith.constant 0 : index
    %c0_423 = arith.constant 0 : index
    %946 = vector.load %arg8[%c0_420, %c2_421, %c0_422, %c0_423] : memref<1x4x128x64xbf16, #tpu.memory_space<vmem>>, vector<1x1x128x64xbf16>
    %947 = vector.shape_cast %946 : vector<1x1x128x64xbf16> to vector<128x64xbf16>
    %cst_424 = arith.constant dense<0.000000e+00> : vector<1x64xf32>
    %948 = tpu.matmul %945, %947, %cst_424 {dimension_numbers = #tpu.dot_dimension_numbers<[1], [0], [0], [1], [0, 0, 1, 1], [], []>} : vector<1x128xbf16>, vector<128x64xbf16>, vector<1x64xf32> -> vector<1x64xf32>
    %c0_425 = arith.constant 0 : index
    %c53 = arith.constant 53 : index
    %c0_426 = arith.constant 0 : index
    %949 = vector.load %arg9[%c0_425, %c53, %c0_426] : memref<1x54x128xf32, #tpu.memory_space<vmem>>, vector<1x1x64xf32>
    %950 = vector.shape_cast %949 : vector<1x1x64xf32> to vector<1x64xf32>
    %951 = arith.addf %948, %950 : vector<1x64xf32>
    %952 = arith.truncf %951 : vector<1x64xf32> to vector<1x64xbf16>
    %953 = vector.extract_strided_slice %87 {offsets = [128, 0], sizes = [64, 128], strides = [1, 1]} : vector<256x128xbf16> to vector<64x128xbf16>
    %cst_427 = arith.constant dense<0.000000e+00> : vector<1x128xf32>
    %954 = tpu.matmul %952, %953, %cst_427 {dimension_numbers = #tpu.dot_dimension_numbers<[1], [0], [0], [1], [0, 0, 1, 1], [], []>} : vector<1x64xbf16>, vector<64x128xbf16>, vector<1x128xf32> -> vector<1x128xf32>
    %955 = arith.addf %666, %954 : vector<1x128xf32>
    %956 = vector.extract_strided_slice %42 {offsets = [0, 96], sizes = [8, 32], strides = [1, 1]} : vector<8x128xf32> to vector<8x32xf32>
    %957 = vector.extract_strided_slice %63 {offsets = [0, 96], sizes = [8, 32], strides = [1, 1]} : vector<8x128xf32> to vector<8x32xf32>
    %958 = vector.extract_strided_slice %76 {offsets = [0, 96], sizes = [8, 32], strides = [1, 1]} : vector<8x128xf32> to vector<8x32xf32>
    %959 = vector.extract_strided_slice %81 {offsets = [0, 96], sizes = [8, 32], strides = [1, 1]} : vector<8x128xf32> to vector<8x32xf32>
    %960 = tpu.concatenate %956, %957, %958, %959 in 1 : vector<8x32xf32>, vector<8x32xf32>, vector<8x32xf32>, vector<8x32xf32> -> vector<8x128xf32>
    %c0_428 = arith.constant 0 : index
    %c3_429 = arith.constant 3 : index
    %c0_430 = arith.constant 0 : index
    %961 = vector.load %arg9[%c0_428, %c3_429, %c0_430] : memref<1x54x128xf32, #tpu.memory_space<vmem>>, vector<1x1x128xf32>
    %962 = vector.shape_cast %961 : vector<1x1x128xf32> to vector<1x128xf32>
    %963 = vector.broadcast %962 : vector<1x128xf32> to vector<8x128xf32>
    %964 = arith.addf %960, %963 : vector<8x128xf32>
    %cst_431 = arith.constant 5.000000e-01 : f32
    %965 = vector.broadcast %cst_431 : f32 to vector<8x128xf32>
    %966 = arith.mulf %965, %964 : vector<8x128xf32>
    %cst_432 = arith.constant 4.471500e-02 : f32
    %967 = vector.broadcast %cst_432 : f32 to vector<8x128xf32>
    %968 = arith.mulf %967, %964 : vector<8x128xf32>
    %969 = arith.mulf %968, %964 : vector<8x128xf32>
    %970 = arith.mulf %969, %964 : vector<8x128xf32>
    %971 = arith.addf %964, %970 : vector<8x128xf32>
    %cst_433 = arith.constant 0.797884583 : f32
    %972 = vector.broadcast %cst_433 : f32 to vector<8x128xf32>
    %973 = arith.mulf %972, %971 : vector<8x128xf32>
    %974 = math.tanh %973 : vector<8x128xf32>
    %cst_434 = arith.constant 1.000000e+00 : f32
    %975 = vector.broadcast %cst_434 : f32 to vector<8x128xf32>
    %976 = arith.addf %975, %974 : vector<8x128xf32>
    %977 = arith.mulf %966, %976 : vector<8x128xf32>
    %978 = arith.truncf %977 : vector<8x128xf32> to vector<8x128xbf16>
    %c0_435 = arith.constant 0 : index
    %c3_436 = arith.constant 3 : index
    %c0_437 = arith.constant 0 : index
    %c0_438 = arith.constant 0 : index
    %c0_439 = arith.constant 0 : index
    %979 = vector.load %arg5[%c0_435, %c3_436, %c0_437, %c0_438, %c0_439] : memref<1x4x2x128x128xbf16, #tpu.memory_space<vmem>>, vector<1x1x1x128x128xbf16>
    %980 = vector.shape_cast %979 : vector<1x1x1x128x128xbf16> to vector<128x128xbf16>
    %cst_440 = arith.constant dense<0.000000e+00> : vector<8x128xf32>
    %981 = tpu.matmul %978, %980, %cst_440 {dimension_numbers = #tpu.dot_dimension_numbers<[1], [0], [0], [1], [0, 0, 1, 1], [], []>} : vector<8x128xbf16>, vector<128x128xbf16>, vector<8x128xf32> -> vector<8x128xf32>
    %c0_441 = arith.constant 0 : index
    %c10_442 = arith.constant 10 : index
    %c0_443 = arith.constant 0 : index
    %982 = vector.load %arg9[%c0_441, %c10_442, %c0_443] : memref<1x54x128xf32, #tpu.memory_space<vmem>>, vector<1x1x128xf32>
    %983 = vector.shape_cast %982 : vector<1x1x128xf32> to vector<1x128xf32>
    %984 = vector.broadcast %983 : vector<1x128xf32> to vector<8x128xf32>
    %985 = arith.addf %981, %984 : vector<8x128xf32>
    %c0_444 = arith.constant 0 : index
    %c18 = arith.constant 18 : index
    %c0_445 = arith.constant 0 : index
    %986 = vector.load %arg9[%c0_444, %c18, %c0_445] : memref<1x54x128xf32, #tpu.memory_space<vmem>>, vector<1x1x128xf32>
    %987 = vector.shape_cast %986 : vector<1x1x128xf32> to vector<1x128xf32>
    %c0_446 = arith.constant 0 : index
    %c26 = arith.constant 26 : index
    %c0_447 = arith.constant 0 : index
    %988 = vector.load %arg9[%c0_446, %c26, %c0_447] : memref<1x54x128xf32, #tpu.memory_space<vmem>>, vector<1x1x128xf32>
    %989 = vector.shape_cast %988 : vector<1x1x128xf32> to vector<1x128xf32>
    %cst_448 = arith.constant dense<0.000000e+00> : vector<8xf32>
    %990 = vector.multi_reduction <add>, %985, %cst_448 [1] : vector<8x128xf32> to vector<8xf32>
    %991 = vector.shape_cast %990 : vector<8xf32> to vector<8x1xf32>
    %cst_449 = arith.constant 1.280000e+02 : f32
    %992 = vector.broadcast %cst_449 : f32 to vector<8x1xf32>
    %993 = arith.divf %991, %992 : vector<8x1xf32>
    %994 = vector.broadcast %993 : vector<8x1xf32> to vector<8x128xf32>
    %995 = arith.subf %985, %994 : vector<8x128xf32>
    %996 = arith.mulf %995, %995 : vector<8x128xf32>
    %cst_450 = arith.constant dense<0.000000e+00> : vector<8xf32>
    %997 = vector.multi_reduction <add>, %996, %cst_450 [1] : vector<8x128xf32> to vector<8xf32>
    %998 = vector.shape_cast %997 : vector<8xf32> to vector<8x1xf32>
    %cst_451 = arith.constant 1.280000e+02 : f32
    %999 = vector.broadcast %cst_451 : f32 to vector<8x1xf32>
    %1000 = arith.divf %998, %999 : vector<8x1xf32>
    %1001 = vector.broadcast %993 : vector<8x1xf32> to vector<8x128xf32>
    %1002 = arith.subf %985, %1001 : vector<8x128xf32>
    %cst_452 = arith.constant 9.99999974E-6 : f32
    %1003 = vector.broadcast %cst_452 : f32 to vector<8x1xf32>
    %1004 = arith.addf %1000, %1003 : vector<8x1xf32>
    %1005 = math.rsqrt %1004 : vector<8x1xf32>
    %1006 = vector.broadcast %1005 : vector<8x1xf32> to vector<8x128xf32>
    %1007 = arith.mulf %1002, %1006 : vector<8x128xf32>
    %1008 = vector.broadcast %987 : vector<1x128xf32> to vector<8x128xf32>
    %1009 = arith.mulf %1007, %1008 : vector<8x128xf32>
    %1010 = vector.broadcast %989 : vector<1x128xf32> to vector<8x128xf32>
    %1011 = arith.addf %1009, %1010 : vector<8x128xf32>
    %cst_453 = arith.constant 5.000000e-01 : f32
    %1012 = vector.broadcast %cst_453 : f32 to vector<8x128xf32>
    %1013 = arith.mulf %1012, %1011 : vector<8x128xf32>
    %cst_454 = arith.constant 4.471500e-02 : f32
    %1014 = vector.broadcast %cst_454 : f32 to vector<8x128xf32>
    %1015 = arith.mulf %1014, %1011 : vector<8x128xf32>
    %1016 = arith.mulf %1015, %1011 : vector<8x128xf32>
    %1017 = arith.mulf %1016, %1011 : vector<8x128xf32>
    %1018 = arith.addf %1011, %1017 : vector<8x128xf32>
    %cst_455 = arith.constant 0.797884583 : f32
    %1019 = vector.broadcast %cst_455 : f32 to vector<8x128xf32>
    %1020 = arith.mulf %1019, %1018 : vector<8x128xf32>
    %1021 = math.tanh %1020 : vector<8x128xf32>
    %cst_456 = arith.constant 1.000000e+00 : f32
    %1022 = vector.broadcast %cst_456 : f32 to vector<8x128xf32>
    %1023 = arith.addf %1022, %1021 : vector<8x128xf32>
    %1024 = arith.mulf %1013, %1023 : vector<8x128xf32>
    %1025 = arith.addf %1024, %977 : vector<8x128xf32>
    %1026 = arith.truncf %1025 : vector<8x128xf32> to vector<8x128xbf16>
    %c0_457 = arith.constant 0 : index
    %c3_458 = arith.constant 3 : index
    %c1_459 = arith.constant 1 : index
    %c0_460 = arith.constant 0 : index
    %c0_461 = arith.constant 0 : index
    %1027 = vector.load %arg5[%c0_457, %c3_458, %c1_459, %c0_460, %c0_461] : memref<1x4x2x128x128xbf16, #tpu.memory_space<vmem>>, vector<1x1x1x128x128xbf16>
    %1028 = vector.shape_cast %1027 : vector<1x1x1x128x128xbf16> to vector<128x128xbf16>
    %cst_462 = arith.constant dense<0.000000e+00> : vector<8x128xf32>
    %1029 = tpu.matmul %1026, %1028, %cst_462 {dimension_numbers = #tpu.dot_dimension_numbers<[1], [0], [0], [1], [0, 0, 1, 1], [], []>} : vector<8x128xbf16>, vector<128x128xbf16>, vector<8x128xf32> -> vector<8x128xf32>
    %c0_463 = arith.constant 0 : index
    %c11_464 = arith.constant 11 : index
    %c0_465 = arith.constant 0 : index
    %1030 = vector.load %arg9[%c0_463, %c11_464, %c0_465] : memref<1x54x128xf32, #tpu.memory_space<vmem>>, vector<1x1x128xf32>
    %1031 = vector.shape_cast %1030 : vector<1x1x128xf32> to vector<1x128xf32>
    %1032 = vector.broadcast %1031 : vector<1x128xf32> to vector<8x128xf32>
    %1033 = arith.addf %1029, %1032 : vector<8x128xf32>
    %c0_466 = arith.constant 0 : index
    %c19 = arith.constant 19 : index
    %c0_467 = arith.constant 0 : index
    %1034 = vector.load %arg9[%c0_466, %c19, %c0_467] : memref<1x54x128xf32, #tpu.memory_space<vmem>>, vector<1x1x128xf32>
    %1035 = vector.shape_cast %1034 : vector<1x1x128xf32> to vector<1x128xf32>
    %c0_468 = arith.constant 0 : index
    %c27 = arith.constant 27 : index
    %c0_469 = arith.constant 0 : index
    %1036 = vector.load %arg9[%c0_468, %c27, %c0_469] : memref<1x54x128xf32, #tpu.memory_space<vmem>>, vector<1x1x128xf32>
    %1037 = vector.shape_cast %1036 : vector<1x1x128xf32> to vector<1x128xf32>
    %cst_470 = arith.constant dense<0.000000e+00> : vector<8xf32>
    %1038 = vector.multi_reduction <add>, %1033, %cst_470 [1] : vector<8x128xf32> to vector<8xf32>
    %1039 = vector.shape_cast %1038 : vector<8xf32> to vector<8x1xf32>
    %cst_471 = arith.constant 1.280000e+02 : f32
    %1040 = vector.broadcast %cst_471 : f32 to vector<8x1xf32>
    %1041 = arith.divf %1039, %1040 : vector<8x1xf32>
    %1042 = vector.broadcast %1041 : vector<8x1xf32> to vector<8x128xf32>
    %1043 = arith.subf %1033, %1042 : vector<8x128xf32>
    %1044 = arith.mulf %1043, %1043 : vector<8x128xf32>
    %cst_472 = arith.constant dense<0.000000e+00> : vector<8xf32>
    %1045 = vector.multi_reduction <add>, %1044, %cst_472 [1] : vector<8x128xf32> to vector<8xf32>
    %1046 = vector.shape_cast %1045 : vector<8xf32> to vector<8x1xf32>
    %cst_473 = arith.constant 1.280000e+02 : f32
    %1047 = vector.broadcast %cst_473 : f32 to vector<8x1xf32>
    %1048 = arith.divf %1046, %1047 : vector<8x1xf32>
    %1049 = vector.broadcast %1041 : vector<8x1xf32> to vector<8x128xf32>
    %1050 = arith.subf %1033, %1049 : vector<8x128xf32>
    %cst_474 = arith.constant 9.99999974E-6 : f32
    %1051 = vector.broadcast %cst_474 : f32 to vector<8x1xf32>
    %1052 = arith.addf %1048, %1051 : vector<8x1xf32>
    %1053 = math.rsqrt %1052 : vector<8x1xf32>
    %1054 = vector.broadcast %1053 : vector<8x1xf32> to vector<8x128xf32>
    %1055 = arith.mulf %1050, %1054 : vector<8x128xf32>
    %1056 = vector.broadcast %1035 : vector<1x128xf32> to vector<8x128xf32>
    %1057 = arith.mulf %1055, %1056 : vector<8x128xf32>
    %1058 = vector.broadcast %1037 : vector<1x128xf32> to vector<8x128xf32>
    %1059 = arith.addf %1057, %1058 : vector<8x128xf32>
    %cst_475 = arith.constant 5.000000e-01 : f32
    %1060 = vector.broadcast %cst_475 : f32 to vector<8x128xf32>
    %1061 = arith.mulf %1060, %1059 : vector<8x128xf32>
    %cst_476 = arith.constant 4.471500e-02 : f32
    %1062 = vector.broadcast %cst_476 : f32 to vector<8x128xf32>
    %1063 = arith.mulf %1062, %1059 : vector<8x128xf32>
    %1064 = arith.mulf %1063, %1059 : vector<8x128xf32>
    %1065 = arith.mulf %1064, %1059 : vector<8x128xf32>
    %1066 = arith.addf %1059, %1065 : vector<8x128xf32>
    %cst_477 = arith.constant 0.797884583 : f32
    %1067 = vector.broadcast %cst_477 : f32 to vector<8x128xf32>
    %1068 = arith.mulf %1067, %1066 : vector<8x128xf32>
    %1069 = math.tanh %1068 : vector<8x128xf32>
    %cst_478 = arith.constant 1.000000e+00 : f32
    %1070 = vector.broadcast %cst_478 : f32 to vector<8x128xf32>
    %1071 = arith.addf %1070, %1069 : vector<8x128xf32>
    %1072 = arith.mulf %1061, %1071 : vector<8x128xf32>
    %1073 = arith.addf %1072, %1025 : vector<8x128xf32>
    %1074 = arith.truncf %1073 : vector<8x128xf32> to vector<8x128xbf16>
    %c0_479 = arith.constant 0 : index
    %c3_480 = arith.constant 3 : index
    %c0_481 = arith.constant 0 : index
    %c0_482 = arith.constant 0 : index
    %1075 = vector.load %arg6[%c0_479, %c3_480, %c0_481, %c0_482] : memref<1x4x128x384xbf16, #tpu.memory_space<vmem>>, vector<1x1x128x384xbf16>
    %1076 = vector.shape_cast %1075 : vector<1x1x128x384xbf16> to vector<128x384xbf16>
    %cst_483 = arith.constant dense<0.000000e+00> : vector<8x384xf32>
    %1077 = tpu.matmul %1074, %1076, %cst_483 {dimension_numbers = #tpu.dot_dimension_numbers<[1], [0], [0], [1], [0, 0, 1, 1], [], []>} : vector<8x128xbf16>, vector<128x384xbf16>, vector<8x384xf32> -> vector<8x384xf32>
    %1078 = vector.extract_strided_slice %1077 {offsets = [0, 0], sizes = [8, 128], strides = [1, 1]} : vector<8x384xf32> to vector<8x128xf32>
    %c0_484 = arith.constant 0 : index
    %c37 = arith.constant 37 : index
    %c0_485 = arith.constant 0 : index
    %1079 = vector.load %arg9[%c0_484, %c37, %c0_485] : memref<1x54x128xf32, #tpu.memory_space<vmem>>, vector<1x1x128xf32>
    %1080 = vector.shape_cast %1079 : vector<1x1x128xf32> to vector<1x128xf32>
    %1081 = vector.broadcast %1080 : vector<1x128xf32> to vector<8x128xf32>
    %1082 = arith.addf %1078, %1081 : vector<8x128xf32>
    %1083 = vector.extract_strided_slice %1077 {offsets = [0, 128], sizes = [8, 128], strides = [1, 1]} : vector<8x384xf32> to vector<8x128xf32>
    %c0_486 = arith.constant 0 : index
    %c38 = arith.constant 38 : index
    %c0_487 = arith.constant 0 : index
    %1084 = vector.load %arg9[%c0_486, %c38, %c0_487] : memref<1x54x128xf32, #tpu.memory_space<vmem>>, vector<1x1x128xf32>
    %1085 = vector.shape_cast %1084 : vector<1x1x128xf32> to vector<1x128xf32>
    %1086 = vector.broadcast %1085 : vector<1x128xf32> to vector<8x128xf32>
    %1087 = arith.addf %1083, %1086 : vector<8x128xf32>
    %1088 = vector.extract_strided_slice %1077 {offsets = [0, 256], sizes = [8, 128], strides = [1, 1]} : vector<8x384xf32> to vector<8x128xf32>
    %c0_488 = arith.constant 0 : index
    %c39 = arith.constant 39 : index
    %c0_489 = arith.constant 0 : index
    %1089 = vector.load %arg9[%c0_488, %c39, %c0_489] : memref<1x54x128xf32, #tpu.memory_space<vmem>>, vector<1x1x128xf32>
    %1090 = vector.shape_cast %1089 : vector<1x1x128xf32> to vector<1x128xf32>
    %1091 = vector.broadcast %1090 : vector<1x128xf32> to vector<8x128xf32>
    %1092 = arith.addf %1088, %1091 : vector<8x128xf32>
    %c0_490 = arith.constant 0 : index
    %c3_491 = arith.constant 3 : index
    %c0_492 = arith.constant 0 : index
    %c0_493 = arith.constant 0 : index
    %1093 = vector.load %arg7[%c0_490, %c3_491, %c0_492, %c0_493] : memref<1x4x128x128xbf16, #tpu.memory_space<vmem>>, vector<1x1x128x128xbf16>
    %1094 = vector.shape_cast %1093 : vector<1x1x128x128xbf16> to vector<128x128xbf16>
    %cst_494 = arith.constant 0.000000e+00 : f32
    %1095 = vector.broadcast %cst_494 : f32 to vector<8x128xf32>
    %1096 = vector.extract_strided_slice %1082 {offsets = [0, 0], sizes = [8, 32], strides = [1, 1]} : vector<8x128xf32> to vector<8x32xf32>
    %cst_495 = arith.constant 0.176776692 : f32
    %1097 = vector.broadcast %cst_495 : f32 to vector<8x32xf32>
    %1098 = arith.mulf %1096, %1097 : vector<8x32xf32>
    %1099 = vector.extract_strided_slice %1087 {offsets = [0, 0], sizes = [8, 32], strides = [1, 1]} : vector<8x128xf32> to vector<8x32xf32>
    %1100 = vector.extract_strided_slice %1092 {offsets = [0, 0], sizes = [8, 32], strides = [1, 1]} : vector<8x128xf32> to vector<8x32xf32>
    %1101 = tpu.transpose %1099, [1, 0] : vector<8x32xf32> -> vector<32x8xf32>
    %cst_496 = arith.constant dense<0.000000e+00> : vector<8x8xf32>
    %1102 = tpu.matmul %1098, %1101, %cst_496 {dimension_numbers = #tpu.dot_dimension_numbers<[1], [0], [0], [1], [0, 0, 1, 1], [], []>} : vector<8x32xf32>, vector<32x8xf32>, vector<8x8xf32> -> vector<8x8xf32>
    %cst_497 = arith.constant -1.000000e+30 : f32
    %1103 = vector.shape_cast %6 : vector<1x8xi1> to vector<1x8xi1>
    %1104 = vector.broadcast %1103 : vector<1x8xi1> to vector<8x8xi1>
    %1105 = vector.broadcast %cst_497 : f32 to vector<8x8xf32>
    %1106 = arith.select %1104, %1102, %1105 : vector<8x8xi1>, vector<8x8xf32>
    %cst_498 = arith.constant dense<0xFF800000> : vector<8xf32>
    %1107 = vector.multi_reduction <maximumf>, %1106, %cst_498 [1] : vector<8x8xf32> to vector<8xf32>
    %1108 = vector.shape_cast %1107 : vector<8xf32> to vector<8x1xf32>
    %1109 = vector.broadcast %1108 : vector<8x1xf32> to vector<8x8xf32>
    %1110 = arith.subf %1106, %1109 : vector<8x8xf32>
    %1111 = math.exp %1110 : vector<8x8xf32>
    %cst_499 = arith.constant dense<0.000000e+00> : vector<8xf32>
    %1112 = vector.multi_reduction <add>, %1111, %cst_499 [1] : vector<8x8xf32> to vector<8xf32>
    %1113 = vector.shape_cast %1112 : vector<8xf32> to vector<8x1xf32>
    %1114 = tpu.reciprocal %1113 {approx = true} : vector<8x1xf32> -> vector<8x1xf32>
    %1115 = vector.broadcast %1114 : vector<8x1xf32> to vector<8x8xf32>
    %1116 = arith.mulf %1111, %1115 : vector<8x8xf32>
    %cst_500 = arith.constant dense<0.000000e+00> : vector<8x32xf32>
    %1117 = tpu.matmul %1116, %1100, %cst_500 {dimension_numbers = #tpu.dot_dimension_numbers<[1], [0], [0], [1], [0, 0, 1, 1], [], []>} : vector<8x8xf32>, vector<8x32xf32>, vector<8x32xf32> -> vector<8x32xf32>
    %1118 = arith.truncf %1117 : vector<8x32xf32> to vector<8x32xbf16>
    %1119 = vector.extract_strided_slice %1094 {offsets = [0, 0], sizes = [32, 128], strides = [1, 1]} : vector<128x128xbf16> to vector<32x128xbf16>
    %cst_501 = arith.constant dense<0.000000e+00> : vector<8x128xf32>
    %1120 = tpu.matmul %1118, %1119, %cst_501 {dimension_numbers = #tpu.dot_dimension_numbers<[1], [0], [0], [1], [0, 0, 1, 1], [], []>} : vector<8x32xbf16>, vector<32x128xbf16>, vector<8x128xf32> -> vector<8x128xf32>
    %1121 = arith.addf %1095, %1120 : vector<8x128xf32>
    %1122 = vector.extract_strided_slice %1082 {offsets = [0, 32], sizes = [8, 32], strides = [1, 1]} : vector<8x128xf32> to vector<8x32xf32>
    %cst_502 = arith.constant 0.176776692 : f32
    %1123 = vector.broadcast %cst_502 : f32 to vector<8x32xf32>
    %1124 = arith.mulf %1122, %1123 : vector<8x32xf32>
    %1125 = vector.extract_strided_slice %1087 {offsets = [0, 32], sizes = [8, 32], strides = [1, 1]} : vector<8x128xf32> to vector<8x32xf32>
    %1126 = vector.extract_strided_slice %1092 {offsets = [0, 32], sizes = [8, 32], strides = [1, 1]} : vector<8x128xf32> to vector<8x32xf32>
    %1127 = tpu.transpose %1125, [1, 0] : vector<8x32xf32> -> vector<32x8xf32>
    %cst_503 = arith.constant dense<0.000000e+00> : vector<8x8xf32>
    %1128 = tpu.matmul %1124, %1127, %cst_503 {dimension_numbers = #tpu.dot_dimension_numbers<[1], [0], [0], [1], [0, 0, 1, 1], [], []>} : vector<8x32xf32>, vector<32x8xf32>, vector<8x8xf32> -> vector<8x8xf32>
    %cst_504 = arith.constant -1.000000e+30 : f32
    %1129 = vector.shape_cast %6 : vector<1x8xi1> to vector<1x8xi1>
    %1130 = vector.broadcast %1129 : vector<1x8xi1> to vector<8x8xi1>
    %1131 = vector.broadcast %cst_504 : f32 to vector<8x8xf32>
    %1132 = arith.select %1130, %1128, %1131 : vector<8x8xi1>, vector<8x8xf32>
    %cst_505 = arith.constant dense<0xFF800000> : vector<8xf32>
    %1133 = vector.multi_reduction <maximumf>, %1132, %cst_505 [1] : vector<8x8xf32> to vector<8xf32>
    %1134 = vector.shape_cast %1133 : vector<8xf32> to vector<8x1xf32>
    %1135 = vector.broadcast %1134 : vector<8x1xf32> to vector<8x8xf32>
    %1136 = arith.subf %1132, %1135 : vector<8x8xf32>
    %1137 = math.exp %1136 : vector<8x8xf32>
    %cst_506 = arith.constant dense<0.000000e+00> : vector<8xf32>
    %1138 = vector.multi_reduction <add>, %1137, %cst_506 [1] : vector<8x8xf32> to vector<8xf32>
    %1139 = vector.shape_cast %1138 : vector<8xf32> to vector<8x1xf32>
    %1140 = tpu.reciprocal %1139 {approx = true} : vector<8x1xf32> -> vector<8x1xf32>
    %1141 = vector.broadcast %1140 : vector<8x1xf32> to vector<8x8xf32>
    %1142 = arith.mulf %1137, %1141 : vector<8x8xf32>
    %cst_507 = arith.constant dense<0.000000e+00> : vector<8x32xf32>
    %1143 = tpu.matmul %1142, %1126, %cst_507 {dimension_numbers = #tpu.dot_dimension_numbers<[1], [0], [0], [1], [0, 0, 1, 1], [], []>} : vector<8x8xf32>, vector<8x32xf32>, vector<8x32xf32> -> vector<8x32xf32>
    %1144 = arith.truncf %1143 : vector<8x32xf32> to vector<8x32xbf16>
    %1145 = vector.extract_strided_slice %1094 {offsets = [32, 0], sizes = [32, 128], strides = [1, 1]} : vector<128x128xbf16> to vector<32x128xbf16>
    %cst_508 = arith.constant dense<0.000000e+00> : vector<8x128xf32>
    %1146 = tpu.matmul %1144, %1145, %cst_508 {dimension_numbers = #tpu.dot_dimension_numbers<[1], [0], [0], [1], [0, 0, 1, 1], [], []>} : vector<8x32xbf16>, vector<32x128xbf16>, vector<8x128xf32> -> vector<8x128xf32>
    %1147 = arith.addf %1121, %1146 : vector<8x128xf32>
    %1148 = vector.extract_strided_slice %1082 {offsets = [0, 64], sizes = [8, 32], strides = [1, 1]} : vector<8x128xf32> to vector<8x32xf32>
    %cst_509 = arith.constant 0.176776692 : f32
    %1149 = vector.broadcast %cst_509 : f32 to vector<8x32xf32>
    %1150 = arith.mulf %1148, %1149 : vector<8x32xf32>
    %1151 = vector.extract_strided_slice %1087 {offsets = [0, 64], sizes = [8, 32], strides = [1, 1]} : vector<8x128xf32> to vector<8x32xf32>
    %1152 = vector.extract_strided_slice %1092 {offsets = [0, 64], sizes = [8, 32], strides = [1, 1]} : vector<8x128xf32> to vector<8x32xf32>
    %1153 = tpu.transpose %1151, [1, 0] : vector<8x32xf32> -> vector<32x8xf32>
    %cst_510 = arith.constant dense<0.000000e+00> : vector<8x8xf32>
    %1154 = tpu.matmul %1150, %1153, %cst_510 {dimension_numbers = #tpu.dot_dimension_numbers<[1], [0], [0], [1], [0, 0, 1, 1], [], []>} : vector<8x32xf32>, vector<32x8xf32>, vector<8x8xf32> -> vector<8x8xf32>
    %cst_511 = arith.constant -1.000000e+30 : f32
    %1155 = vector.shape_cast %6 : vector<1x8xi1> to vector<1x8xi1>
    %1156 = vector.broadcast %1155 : vector<1x8xi1> to vector<8x8xi1>
    %1157 = vector.broadcast %cst_511 : f32 to vector<8x8xf32>
    %1158 = arith.select %1156, %1154, %1157 : vector<8x8xi1>, vector<8x8xf32>
    %cst_512 = arith.constant dense<0xFF800000> : vector<8xf32>
    %1159 = vector.multi_reduction <maximumf>, %1158, %cst_512 [1] : vector<8x8xf32> to vector<8xf32>
    %1160 = vector.shape_cast %1159 : vector<8xf32> to vector<8x1xf32>
    %1161 = vector.broadcast %1160 : vector<8x1xf32> to vector<8x8xf32>
    %1162 = arith.subf %1158, %1161 : vector<8x8xf32>
    %1163 = math.exp %1162 : vector<8x8xf32>
    %cst_513 = arith.constant dense<0.000000e+00> : vector<8xf32>
    %1164 = vector.multi_reduction <add>, %1163, %cst_513 [1] : vector<8x8xf32> to vector<8xf32>
    %1165 = vector.shape_cast %1164 : vector<8xf32> to vector<8x1xf32>
    %1166 = tpu.reciprocal %1165 {approx = true} : vector<8x1xf32> -> vector<8x1xf32>
    %1167 = vector.broadcast %1166 : vector<8x1xf32> to vector<8x8xf32>
    %1168 = arith.mulf %1163, %1167 : vector<8x8xf32>
    %cst_514 = arith.constant dense<0.000000e+00> : vector<8x32xf32>
    %1169 = tpu.matmul %1168, %1152, %cst_514 {dimension_numbers = #tpu.dot_dimension_numbers<[1], [0], [0], [1], [0, 0, 1, 1], [], []>} : vector<8x8xf32>, vector<8x32xf32>, vector<8x32xf32> -> vector<8x32xf32>
    %1170 = arith.truncf %1169 : vector<8x32xf32> to vector<8x32xbf16>
    %1171 = vector.extract_strided_slice %1094 {offsets = [64, 0], sizes = [32, 128], strides = [1, 1]} : vector<128x128xbf16> to vector<32x128xbf16>
    %cst_515 = arith.constant dense<0.000000e+00> : vector<8x128xf32>
    %1172 = tpu.matmul %1170, %1171, %cst_515 {dimension_numbers = #tpu.dot_dimension_numbers<[1], [0], [0], [1], [0, 0, 1, 1], [], []>} : vector<8x32xbf16>, vector<32x128xbf16>, vector<8x128xf32> -> vector<8x128xf32>
    %1173 = arith.addf %1147, %1172 : vector<8x128xf32>
    %1174 = vector.extract_strided_slice %1082 {offsets = [0, 96], sizes = [8, 32], strides = [1, 1]} : vector<8x128xf32> to vector<8x32xf32>
    %cst_516 = arith.constant 0.176776692 : f32
    %1175 = vector.broadcast %cst_516 : f32 to vector<8x32xf32>
    %1176 = arith.mulf %1174, %1175 : vector<8x32xf32>
    %1177 = vector.extract_strided_slice %1087 {offsets = [0, 96], sizes = [8, 32], strides = [1, 1]} : vector<8x128xf32> to vector<8x32xf32>
    %1178 = vector.extract_strided_slice %1092 {offsets = [0, 96], sizes = [8, 32], strides = [1, 1]} : vector<8x128xf32> to vector<8x32xf32>
    %1179 = tpu.transpose %1177, [1, 0] : vector<8x32xf32> -> vector<32x8xf32>
    %cst_517 = arith.constant dense<0.000000e+00> : vector<8x8xf32>
    %1180 = tpu.matmul %1176, %1179, %cst_517 {dimension_numbers = #tpu.dot_dimension_numbers<[1], [0], [0], [1], [0, 0, 1, 1], [], []>} : vector<8x32xf32>, vector<32x8xf32>, vector<8x8xf32> -> vector<8x8xf32>
    %cst_518 = arith.constant -1.000000e+30 : f32
    %1181 = vector.shape_cast %6 : vector<1x8xi1> to vector<1x8xi1>
    %1182 = vector.broadcast %1181 : vector<1x8xi1> to vector<8x8xi1>
    %1183 = vector.broadcast %cst_518 : f32 to vector<8x8xf32>
    %1184 = arith.select %1182, %1180, %1183 : vector<8x8xi1>, vector<8x8xf32>
    %cst_519 = arith.constant dense<0xFF800000> : vector<8xf32>
    %1185 = vector.multi_reduction <maximumf>, %1184, %cst_519 [1] : vector<8x8xf32> to vector<8xf32>
    %1186 = vector.shape_cast %1185 : vector<8xf32> to vector<8x1xf32>
    %1187 = vector.broadcast %1186 : vector<8x1xf32> to vector<8x8xf32>
    %1188 = arith.subf %1184, %1187 : vector<8x8xf32>
    %1189 = math.exp %1188 : vector<8x8xf32>
    %cst_520 = arith.constant dense<0.000000e+00> : vector<8xf32>
    %1190 = vector.multi_reduction <add>, %1189, %cst_520 [1] : vector<8x8xf32> to vector<8xf32>
    %1191 = vector.shape_cast %1190 : vector<8xf32> to vector<8x1xf32>
    %1192 = tpu.reciprocal %1191 {approx = true} : vector<8x1xf32> -> vector<8x1xf32>
    %1193 = vector.broadcast %1192 : vector<8x1xf32> to vector<8x8xf32>
    %1194 = arith.mulf %1189, %1193 : vector<8x8xf32>
    %cst_521 = arith.constant dense<0.000000e+00> : vector<8x32xf32>
    %1195 = tpu.matmul %1194, %1178, %cst_521 {dimension_numbers = #tpu.dot_dimension_numbers<[1], [0], [0], [1], [0, 0, 1, 1], [], []>} : vector<8x8xf32>, vector<8x32xf32>, vector<8x32xf32> -> vector<8x32xf32>
    %1196 = arith.truncf %1195 : vector<8x32xf32> to vector<8x32xbf16>
    %1197 = vector.extract_strided_slice %1094 {offsets = [96, 0], sizes = [32, 128], strides = [1, 1]} : vector<128x128xbf16> to vector<32x128xbf16>
    %cst_522 = arith.constant dense<0.000000e+00> : vector<8x128xf32>
    %1198 = tpu.matmul %1196, %1197, %cst_522 {dimension_numbers = #tpu.dot_dimension_numbers<[1], [0], [0], [1], [0, 0, 1, 1], [], []>} : vector<8x32xbf16>, vector<32x128xbf16>, vector<8x128xf32> -> vector<8x128xf32>
    %1199 = arith.addf %1173, %1198 : vector<8x128xf32>
    %c0_523 = arith.constant 0 : index
    %c43 = arith.constant 43 : index
    %c0_524 = arith.constant 0 : index
    %1200 = vector.load %arg9[%c0_523, %c43, %c0_524] : memref<1x54x128xf32, #tpu.memory_space<vmem>>, vector<1x1x128xf32>
    %1201 = vector.shape_cast %1200 : vector<1x1x128xf32> to vector<1x128xf32>
    %1202 = vector.broadcast %1201 : vector<1x128xf32> to vector<8x128xf32>
    %1203 = arith.addf %1199, %1202 : vector<8x128xf32>
    %1204 = arith.addf %1203, %1073 : vector<8x128xf32>
    %c0_525 = arith.constant 0 : index
    %c47 = arith.constant 47 : index
    %c0_526 = arith.constant 0 : index
    %1205 = vector.load %arg9[%c0_525, %c47, %c0_526] : memref<1x54x128xf32, #tpu.memory_space<vmem>>, vector<1x1x128xf32>
    %1206 = vector.shape_cast %1205 : vector<1x1x128xf32> to vector<1x128xf32>
    %c0_527 = arith.constant 0 : index
    %c51 = arith.constant 51 : index
    %c0_528 = arith.constant 0 : index
    %1207 = vector.load %arg9[%c0_527, %c51, %c0_528] : memref<1x54x128xf32, #tpu.memory_space<vmem>>, vector<1x1x128xf32>
    %1208 = vector.shape_cast %1207 : vector<1x1x128xf32> to vector<1x128xf32>
    %cst_529 = arith.constant dense<0.000000e+00> : vector<8xf32>
    %1209 = vector.multi_reduction <add>, %1204, %cst_529 [1] : vector<8x128xf32> to vector<8xf32>
    %1210 = vector.shape_cast %1209 : vector<8xf32> to vector<8x1xf32>
    %cst_530 = arith.constant 1.280000e+02 : f32
    %1211 = vector.broadcast %cst_530 : f32 to vector<8x1xf32>
    %1212 = arith.divf %1210, %1211 : vector<8x1xf32>
    %1213 = vector.broadcast %1212 : vector<8x1xf32> to vector<8x128xf32>
    %1214 = arith.subf %1204, %1213 : vector<8x128xf32>
    %1215 = arith.mulf %1214, %1214 : vector<8x128xf32>
    %cst_531 = arith.constant dense<0.000000e+00> : vector<8xf32>
    %1216 = vector.multi_reduction <add>, %1215, %cst_531 [1] : vector<8x128xf32> to vector<8xf32>
    %1217 = vector.shape_cast %1216 : vector<8xf32> to vector<8x1xf32>
    %cst_532 = arith.constant 1.280000e+02 : f32
    %1218 = vector.broadcast %cst_532 : f32 to vector<8x1xf32>
    %1219 = arith.divf %1217, %1218 : vector<8x1xf32>
    %1220 = vector.broadcast %1212 : vector<8x1xf32> to vector<8x128xf32>
    %1221 = arith.subf %1204, %1220 : vector<8x128xf32>
    %cst_533 = arith.constant 9.99999974E-6 : f32
    %1222 = vector.broadcast %cst_533 : f32 to vector<8x1xf32>
    %1223 = arith.addf %1219, %1222 : vector<8x1xf32>
    %1224 = math.rsqrt %1223 : vector<8x1xf32>
    %1225 = vector.broadcast %1224 : vector<8x1xf32> to vector<8x128xf32>
    %1226 = arith.mulf %1221, %1225 : vector<8x128xf32>
    %1227 = vector.broadcast %1206 : vector<1x128xf32> to vector<8x128xf32>
    %1228 = arith.mulf %1226, %1227 : vector<8x128xf32>
    %1229 = vector.broadcast %1208 : vector<1x128xf32> to vector<8x128xf32>
    %1230 = arith.addf %1228, %1229 : vector<8x128xf32>
    %cst_534 = arith.constant dense<0.000000e+00> : vector<1x128xf32>
    %1231 = tpu.matmul %4, %1230, %cst_534 {dimension_numbers = #tpu.dot_dimension_numbers<[1], [0], [0], [1], [0, 0, 1, 1], [], []>} : vector<1x8xf32>, vector<8x128xf32>, vector<1x128xf32> -> vector<1x128xf32>
    %1232 = vector.broadcast %86 : vector<1x1xf32> to vector<1x128xf32>
    %1233 = arith.mulf %1231, %1232 : vector<1x128xf32>
    %1234 = arith.truncf %1233 : vector<1x128xf32> to vector<1x128xbf16>
    %c0_535 = arith.constant 0 : index
    %c3_536 = arith.constant 3 : index
    %c0_537 = arith.constant 0 : index
    %c0_538 = arith.constant 0 : index
    %1235 = vector.load %arg8[%c0_535, %c3_536, %c0_537, %c0_538] : memref<1x4x128x64xbf16, #tpu.memory_space<vmem>>, vector<1x1x128x64xbf16>
    %1236 = vector.shape_cast %1235 : vector<1x1x128x64xbf16> to vector<128x64xbf16>
    %cst_539 = arith.constant dense<0.000000e+00> : vector<1x64xf32>
    %1237 = tpu.matmul %1234, %1236, %cst_539 {dimension_numbers = #tpu.dot_dimension_numbers<[1], [0], [0], [1], [0, 0, 1, 1], [], []>} : vector<1x128xbf16>, vector<128x64xbf16>, vector<1x64xf32> -> vector<1x64xf32>
    %c0_540 = arith.constant 0 : index
    %c53_541 = arith.constant 53 : index
    %c64_542 = arith.constant 64 : index
    %1238 = vector.load %arg9[%c0_540, %c53_541, %c64_542] : memref<1x54x128xf32, #tpu.memory_space<vmem>>, vector<1x1x64xf32>
    %1239 = vector.shape_cast %1238 : vector<1x1x64xf32> to vector<1x64xf32>
    %1240 = arith.addf %1237, %1239 : vector<1x64xf32>
    %1241 = arith.truncf %1240 : vector<1x64xf32> to vector<1x64xbf16>
    %1242 = vector.extract_strided_slice %87 {offsets = [192, 0], sizes = [64, 128], strides = [1, 1]} : vector<256x128xbf16> to vector<64x128xbf16>
    %cst_543 = arith.constant dense<0.000000e+00> : vector<1x128xf32>
    %1243 = tpu.matmul %1241, %1242, %cst_543 {dimension_numbers = #tpu.dot_dimension_numbers<[1], [0], [0], [1], [0, 0, 1, 1], [], []>} : vector<1x64xbf16>, vector<64x128xbf16>, vector<1x128xf32> -> vector<1x128xf32>
    %1244 = arith.addf %955, %1243 : vector<1x128xf32>
    %c0_544 = arith.constant 0 : index
    %c0_545 = arith.constant 0 : index
    %1245 = vector.load %arg13[%c0_544, %c0_545] : memref<8x128xf32, #tpu.memory_space<vmem>>, vector<1x128xf32>
    %1246 = arith.addf %1244, %1245 : vector<1x128xf32>
    %c1_546 = arith.constant 1 : index
    %c0_547 = arith.constant 0 : index
    %1247 = vector.load %arg13[%c1_546, %c0_547] : memref<8x128xf32, #tpu.memory_space<vmem>>, vector<1x128xf32>
    %c2_548 = arith.constant 2 : index
    %c0_549 = arith.constant 0 : index
    %1248 = vector.load %arg13[%c2_548, %c0_549] : memref<8x128xf32, #tpu.memory_space<vmem>>, vector<1x128xf32>
    %cst_550 = arith.constant dense<0.000000e+00> : vector<1xf32>
    %1249 = vector.multi_reduction <add>, %1246, %cst_550 [1] : vector<1x128xf32> to vector<1xf32>
    %1250 = vector.shape_cast %1249 : vector<1xf32> to vector<1x1xf32>
    %cst_551 = arith.constant 1.280000e+02 : f32
    %1251 = vector.broadcast %cst_551 : f32 to vector<1x1xf32>
    %1252 = arith.divf %1250, %1251 : vector<1x1xf32>
    %1253 = vector.broadcast %1252 : vector<1x1xf32> to vector<1x128xf32>
    %1254 = arith.subf %1246, %1253 : vector<1x128xf32>
    %1255 = arith.mulf %1254, %1254 : vector<1x128xf32>
    %cst_552 = arith.constant dense<0.000000e+00> : vector<1xf32>
    %1256 = vector.multi_reduction <add>, %1255, %cst_552 [1] : vector<1x128xf32> to vector<1xf32>
    %1257 = vector.shape_cast %1256 : vector<1xf32> to vector<1x1xf32>
    %cst_553 = arith.constant 1.280000e+02 : f32
    %1258 = vector.broadcast %cst_553 : f32 to vector<1x1xf32>
    %1259 = arith.divf %1257, %1258 : vector<1x1xf32>
    %1260 = vector.broadcast %1252 : vector<1x1xf32> to vector<1x128xf32>
    %1261 = arith.subf %1246, %1260 : vector<1x128xf32>
    %cst_554 = arith.constant 9.99999974E-6 : f32
    %1262 = vector.broadcast %cst_554 : f32 to vector<1x1xf32>
    %1263 = arith.addf %1259, %1262 : vector<1x1xf32>
    %1264 = math.rsqrt %1263 : vector<1x1xf32>
    %1265 = vector.broadcast %1264 : vector<1x1xf32> to vector<1x128xf32>
    %1266 = arith.mulf %1261, %1265 : vector<1x128xf32>
    %1267 = arith.mulf %1266, %1247 : vector<1x128xf32>
    %1268 = arith.addf %1267, %1248 : vector<1x128xf32>
    %cst_555 = arith.constant 5.000000e-01 : f32
    %1269 = vector.broadcast %cst_555 : f32 to vector<1x128xf32>
    %1270 = arith.mulf %1269, %1268 : vector<1x128xf32>
    %cst_556 = arith.constant 4.471500e-02 : f32
    %1271 = vector.broadcast %cst_556 : f32 to vector<1x128xf32>
    %1272 = arith.mulf %1271, %1268 : vector<1x128xf32>
    %1273 = arith.mulf %1272, %1268 : vector<1x128xf32>
    %1274 = arith.mulf %1273, %1268 : vector<1x128xf32>
    %1275 = arith.addf %1268, %1274 : vector<1x128xf32>
    %cst_557 = arith.constant 0.797884583 : f32
    %1276 = vector.broadcast %cst_557 : f32 to vector<1x128xf32>
    %1277 = arith.mulf %1276, %1275 : vector<1x128xf32>
    %1278 = math.tanh %1277 : vector<1x128xf32>
    %cst_558 = arith.constant 1.000000e+00 : f32
    %1279 = vector.broadcast %cst_558 : f32 to vector<1x128xf32>
    %1280 = arith.addf %1279, %1278 : vector<1x128xf32>
    %1281 = arith.mulf %1270, %1280 : vector<1x128xf32>
    %1282 = arith.truncf %1281 : vector<1x128xf32> to vector<1x128xbf16>
    %c0_559 = arith.constant 0 : index
    %c0_560 = arith.constant 0 : index
    %1283 = vector.load %arg11[%c0_559, %c0_560] : memref<128x64xbf16, #tpu.memory_space<vmem>>, vector<128x64xbf16>
    %cst_561 = arith.constant dense<0.000000e+00> : vector<1x64xf32>
    %1284 = tpu.matmul %1282, %1283, %cst_561 {dimension_numbers = #tpu.dot_dimension_numbers<[1], [0], [0], [1], [0, 0, 1, 1], [], []>} : vector<1x128xbf16>, vector<128x64xbf16>, vector<1x64xf32> -> vector<1x64xf32>
    %c3_562 = arith.constant 3 : index
    %c0_563 = arith.constant 0 : index
    %1285 = vector.load %arg13[%c3_562, %c0_563] : memref<8x128xf32, #tpu.memory_space<vmem>>, vector<1x64xf32>
    %1286 = arith.addf %1284, %1285 : vector<1x64xf32>
    %1287 = arith.truncf %1286 : vector<1x64xf32> to vector<1x64xbf16>
    %c0_564 = arith.constant 0 : index
    %c0_565 = arith.constant 0 : index
    %1288 = vector.load %arg12[%c0_564, %c0_565] : memref<64x64xbf16, #tpu.memory_space<vmem>>, vector<64x64xbf16>
    %cst_566 = arith.constant dense<0.000000e+00> : vector<1x64xf32>
    %1289 = tpu.matmul %1287, %1288, %cst_566 {dimension_numbers = #tpu.dot_dimension_numbers<[1], [0], [0], [1], [0, 0, 1, 1], [], []>} : vector<1x64xbf16>, vector<64x64xbf16>, vector<1x64xf32> -> vector<1x64xf32>
    %c4_567 = arith.constant 4 : index
    %c0_568 = arith.constant 0 : index
    %1290 = vector.load %arg13[%c4_567, %c0_568] : memref<8x128xf32, #tpu.memory_space<vmem>>, vector<1x64xf32>
    %1291 = arith.addf %1289, %1290 : vector<1x64xf32>
    %cst_569 = arith.constant 5.000000e-01 : f32
    %1292 = vector.broadcast %cst_569 : f32 to vector<1x64xf32>
    %1293 = arith.mulf %1292, %1291 : vector<1x64xf32>
    %cst_570 = arith.constant 4.471500e-02 : f32
    %1294 = vector.broadcast %cst_570 : f32 to vector<1x64xf32>
    %1295 = arith.mulf %1294, %1291 : vector<1x64xf32>
    %1296 = arith.mulf %1295, %1291 : vector<1x64xf32>
    %1297 = arith.mulf %1296, %1291 : vector<1x64xf32>
    %1298 = arith.addf %1291, %1297 : vector<1x64xf32>
    %cst_571 = arith.constant 0.797884583 : f32
    %1299 = vector.broadcast %cst_571 : f32 to vector<1x64xf32>
    %1300 = arith.mulf %1299, %1298 : vector<1x64xf32>
    %1301 = math.tanh %1300 : vector<1x64xf32>
    %cst_572 = arith.constant 1.000000e+00 : f32
    %1302 = vector.broadcast %cst_572 : f32 to vector<1x64xf32>
    %1303 = arith.addf %1302, %1301 : vector<1x64xf32>
    %1304 = arith.mulf %1293, %1303 : vector<1x64xf32>
    %c5_573 = arith.constant 5 : index
    %c0_574 = arith.constant 0 : index
    %1305 = vector.load %arg13[%c5_573, %c0_574] : memref<8x128xf32, #tpu.memory_space<vmem>>, vector<1x64xf32>
    %1306 = arith.mulf %1304, %1305 : vector<1x64xf32>
    %cst_575 = arith.constant dense<0.000000e+00> : vector<1xf32>
    %1307 = vector.multi_reduction <add>, %1306, %cst_575 [1] : vector<1x64xf32> to vector<1xf32>
    %1308 = vector.shape_cast %1307 : vector<1xf32> to vector<1x1xf32>
    %c6_576 = arith.constant 6 : index
    %c0_577 = arith.constant 0 : index
    %1309 = vector.load %arg13[%c6_576, %c0_577] : memref<8x128xf32, #tpu.memory_space<vmem>>, vector<1x1xf32>
    %1310 = arith.addf %1308, %1309 : vector<1x1xf32>
    %cst_578 = arith.constant 0.000000e+00 : f32
    %1311 = vector.broadcast %cst_578 : f32 to vector<1x63xf32>
    %1312 = tpu.concatenate %1286, %1310, %1311 in 1 : vector<1x64xf32>, vector<1x1xf32>, vector<1x63xf32> -> vector<1x128xf32>
    %c0_579 = arith.constant 0 : index
    %c0_580 = arith.constant 0 : index
    %c0_581 = arith.constant 0 : index
    %1313 = vector.load %arg14[%c0_579, %c0_580, %c0_581] : memref<1x1x128xf32, #tpu.memory_space<vmem>>, vector<1x1x128xf32>
    %1314 = vector.shape_cast %1313 : vector<1x1x128xf32> to vector<1x128xf32>
    %1315 = vector.shape_cast %1312 : vector<1x128xf32> to vector<1x1x128xf32>
    tpu.vector_store %arg14[%c0_579, %c0_580, %c0_581], %1315 {strides = array<i32>} : memref<1x1x128xf32, #tpu.memory_space<vmem>>, vector<1x1x128xf32>,
    return
  }
  func.func @transform_0(%arg0: i32, %arg1: memref<2xi32, #tpu.memory_space<smem>>) -> (i32, i32, i32) {
    %c0_i32 = arith.constant 0 : i32
    %c0_i32_0 = arith.constant 0 : i32
    %c0_i32_1 = arith.constant 0 : i32
    return %arg0, %c0_i32, %c0_i32_0 : i32, i32, i32
  }
  func.func @transform_1(%arg0: i32, %arg1: memref<2xi32, #tpu.memory_space<smem>>) -> (i32, i32, i32) {
    %c0_i32 = arith.constant 0 : i32
    %c0_i32_0 = arith.constant 0 : i32
    %c0_i32_1 = arith.constant 0 : i32
    return %arg0, %c0_i32, %c0_i32_0 : i32, i32, i32
  }
  func.func @transform_2(%arg0: i32, %arg1: memref<2xi32, #tpu.memory_space<smem>>) -> (i32, i32, i32, i32) {
    %0 = arith.index_cast %arg0 : i32 to index
    %1 = memref.load %arg1[%0] : memref<2xi32, #tpu.memory_space<smem>>
    %c0_i32 = arith.constant 0 : i32
    %c0_i32_0 = arith.constant 0 : i32
    %c0_i32_1 = arith.constant 0 : i32
    %c0_i32_2 = arith.constant 0 : i32
    return %1, %c0_i32, %c0_i32_0, %c0_i32_1 : i32, i32, i32, i32
  }
  func.func @transform_3(%arg0: i32, %arg1: memref<2xi32, #tpu.memory_space<smem>>) -> (i32, i32, i32, i32, i32) {
    %0 = arith.index_cast %arg0 : i32 to index
    %1 = memref.load %arg1[%0] : memref<2xi32, #tpu.memory_space<smem>>
    %c0_i32 = arith.constant 0 : i32
    %c0_i32_0 = arith.constant 0 : i32
    %c0_i32_1 = arith.constant 0 : i32
    %c0_i32_2 = arith.constant 0 : i32
    %c0_i32_3 = arith.constant 0 : i32
    return %1, %c0_i32, %c0_i32_0, %c0_i32_1, %c0_i32_2 : i32, i32, i32, i32, i32
  }
  func.func @transform_4(%arg0: i32, %arg1: memref<2xi32, #tpu.memory_space<smem>>) -> (i32, i32, i32, i32) {
    %0 = arith.index_cast %arg0 : i32 to index
    %1 = memref.load %arg1[%0] : memref<2xi32, #tpu.memory_space<smem>>
    %c0_i32 = arith.constant 0 : i32
    %c0_i32_0 = arith.constant 0 : i32
    %c0_i32_1 = arith.constant 0 : i32
    %c0_i32_2 = arith.constant 0 : i32
    return %1, %c0_i32, %c0_i32_0, %c0_i32_1 : i32, i32, i32, i32
  }
  func.func @transform_5(%arg0: i32, %arg1: memref<2xi32, #tpu.memory_space<smem>>) -> (i32, i32, i32, i32) {
    %0 = arith.index_cast %arg0 : i32 to index
    %1 = memref.load %arg1[%0] : memref<2xi32, #tpu.memory_space<smem>>
    %c0_i32 = arith.constant 0 : i32
    %c0_i32_0 = arith.constant 0 : i32
    %c0_i32_1 = arith.constant 0 : i32
    %c0_i32_2 = arith.constant 0 : i32
    return %1, %c0_i32, %c0_i32_0, %c0_i32_1 : i32, i32, i32, i32
  }
  func.func @transform_6(%arg0: i32, %arg1: memref<2xi32, #tpu.memory_space<smem>>) -> (i32, i32, i32, i32) {
    %0 = arith.index_cast %arg0 : i32 to index
    %1 = memref.load %arg1[%0] : memref<2xi32, #tpu.memory_space<smem>>
    %c0_i32 = arith.constant 0 : i32
    %c0_i32_0 = arith.constant 0 : i32
    %c0_i32_1 = arith.constant 0 : i32
    %c0_i32_2 = arith.constant 0 : i32
    return %1, %c0_i32, %c0_i32_0, %c0_i32_1 : i32, i32, i32, i32
  }
  func.func @transform_7(%arg0: i32, %arg1: memref<2xi32, #tpu.memory_space<smem>>) -> (i32, i32, i32) {
    %0 = arith.index_cast %arg0 : i32 to index
    %1 = memref.load %arg1[%0] : memref<2xi32, #tpu.memory_space<smem>>
    %c0_i32 = arith.constant 0 : i32
    %c0_i32_0 = arith.constant 0 : i32
    %c0_i32_1 = arith.constant 0 : i32
    return %1, %c0_i32, %c0_i32_0 : i32, i32, i32
  }
  func.func @transform_8(%arg0: i32, %arg1: memref<2xi32, #tpu.memory_space<smem>>) -> (i32, i32) {
    %c0_i32 = arith.constant 0 : i32
    %c0_i32_0 = arith.constant 0 : i32
    %c0_i32_1 = arith.constant 0 : i32
    return %c0_i32, %c0_i32_0 : i32, i32
  }
  func.func @transform_9(%arg0: i32, %arg1: memref<2xi32, #tpu.memory_space<smem>>) -> (i32, i32) {
    %c0_i32 = arith.constant 0 : i32
    %c0_i32_0 = arith.constant 0 : i32
    %c0_i32_1 = arith.constant 0 : i32
    return %c0_i32, %c0_i32_0 : i32, i32
  }
  func.func @transform_10(%arg0: i32, %arg1: memref<2xi32, #tpu.memory_space<smem>>) -> (i32, i32) {
    %c0_i32 = arith.constant 0 : i32
    %c0_i32_0 = arith.constant 0 : i32
    %c0_i32_1 = arith.constant 0 : i32
    return %c0_i32, %c0_i32_0 : i32, i32
  }
  func.func @transform_11(%arg0: i32, %arg1: memref<2xi32, #tpu.memory_space<smem>>) -> (i32, i32) {
    %c0_i32 = arith.constant 0 : i32
    %c0_i32_0 = arith.constant 0 : i32
    %c0_i32_1 = arith.constant 0 : i32
    return %c0_i32, %c0_i32_0 : i32, i32
  }
  func.func @transform_12(%arg0: i32, %arg1: memref<2xi32, #tpu.memory_space<smem>>) -> (i32, i32, i32) {
    %c0_i32 = arith.constant 0 : i32
    %c0_i32_0 = arith.constant 0 : i32
    %c0_i32_1 = arith.constant 0 : i32
    return %arg0, %c0_i32, %c0_i32_0 : i32, i32, i32
  }
}

</mosaic_0001>

<bundles_post_ra>
// kernel: emotion_intensity_forward.1
= control target key start
LH: loop header
LB: loop body
LE: loop exit
PB: predicated region body
PF: predicated region fallthrough
CT: control target
= control target key end

     0   :  { %s15717_s0 = inlined_call_operand.vmem [shape: s32[2], index: 0, kind: input, shape index: {}]   ;;  %s15718_s1 = inlined_call_operand.vmem [shape: f32[2,14,128], index: 1, kind: input, shape index: {}]   ;;  %s15719_s2 = inlined_call_operand.vmem [shape: f32[2,1,8], index: 2, kind: input, shape index: {}]   ;;  %s15720_s3 = inlined_call_operand.hbm [shape: bf16[7,16,128,128], index: 3, kind: input, shape index: {}]   ;;  %s15721_s4 = inlined_call_operand.vmem [shape: bf16[7,4,2,128,128], index: 4, kind: input, shape index: {}]   ;;  %s15722_s5 = inlined_call_operand.hbm [shape: bf16[7,4,128,384], index: 5, kind: input, shape index: {}]   ;;  %s15723_s6 = inlined_call_operand.hbm [shape: bf16[7,4,128,128], index: 6, kind: input, shape index: {}]   ;;  %s15724_s7 = inlined_call_operand.vmem [shape: bf16[7,4,128,64], index: 7, kind: input, shape index: {}]   ;;  %s15725_s8 = inlined_call_operand.hbm [shape: f32[7,54,128], index: 8, kind: input, shape index: {}]   ;;  %s15726_s9 = inlined_call_operand.hbm [shape: bf16[256,128], index: 9, kind: input, shape index: {}]   ;;  %s15727_s10 = inlined_call_operand.vmem [shape: bf16[128,64], index: 10, kind: input, shape index: {}]   ;;  %s15728_s11 = inlined_call_operand.hbm [shape: bf16[64,64], index: 11, kind: input, shape index: {}]   ;;  %s15729_s12 = inlined_call_operand.hbm [shape: f32[8,128], index: 12, kind: input, shape index: {}]   ;;  %s15730_s13 = inlined_call_operand.vmem [shape: f32[2,1,128], index: 13, kind: output, shape index: {}]  }
   0x1   :  { %15753 = sst [smem:[#allocation38_spill]] %s15718_s1  ;;  %s18_s27 = sshll.u32 %s15717_s0, 4  ;;  %s19_s27 = int_to_ptr.vmem [resolvable:$true] %s18_s27 }
   0x2   :  { %15754 = sst [smem:[#allocation39_spill]] %s15719_s2  ;;  %s13261_s28 = scalar_lea.vmem %s19_s27, 16 }
   0x3   :  { %15755 = sst [smem:[#allocation40_spill]] %s15720_s3  ;;  %p13262_p0 = scmp.ne.s32.totalorder %s19_s27, %s13261_s28 }
   0x4   :  { %15756 = sst [smem:[#allocation41_spill]] %s15721_s4  ;;  %p13266_p1 = scmp.lt.s32.totalorder %s19_s27, %s19_s27 }
   0x5   :  { %15757 = sst [smem:[#allocation42_spill]] %s15722_s5  ;;  %p13267_p2 = scmp.lt.s32.totalorder %s13261_s28, %s13261_s28 }
   0x6   :  { %15758 = sst [smem:[#allocation43_spill]] %s15723_s6 }
   0x7   :  { %15759 = sst [smem:[#allocation44_spill]] %s15724_s7  ;;  %p13268_p3 = por %p13267_p2, %p13266_p1 }
   0x8   :  { %15760 = sst [smem:[#allocation45_spill]] %s15725_s8 }
   0x9   :  { %15761 = sst [smem:[#allocation46_spill]] %s15726_s9  ;;  %p13269_p4 = pnand %p13268_p3, %p13262_p0 }
   0xa   :  { %15762 = sst [smem:[#allocation47_spill]] %s15727_s10 }
   0xb   :  { %15763 = sst [smem:[#allocation48_spill]] %s15728_s11 }
   0xc   :  { %15764 = sst [smem:[#allocation49_spill]] %s15729_s12 }
   0xd   :  { %15765 = sst [smem:[#allocation50_spill]] %s15730_s13 }
   0xe   :  { %13272 = shalt.err (!%p13269_p4)  }
   0xf   :  { %s13607_s29 = smov [#allocation3]  }
  0x10   :  { %21 = dma.vmem_to_smem %s19_s27, 16, %s13607_s29, [#allocation2] }
  0x11   :  { %13529 = dma.done.wait [#allocation2], 16 }
  0x12   :  { %13530 = vsyncadd [#allocation2], 4294967280 }
  0x13   :  { %23 = sfence }
  0x14   :  { %24 = vsyncpa [#allocation5], 0 }
  0x15   :  { %26 = vsyncpa [#allocation5 + $0x1], 0 }
  0x16   :  { %27 = vsyncpa [#allocation7], 0 }
  0x17   :  { %29 = vsyncpa [#allocation7 + $0x1], 0 }
  0x18   :  { %30 = vsyncpa [#allocation10], 0 }
  0x19   :  { %32 = vsyncpa [#allocation10 + $0x1], 0 }
  0x1a   :  { %33 = vsyncpa [#allocation13], 0  ;;  %s13700_s0 = smov 0   ;;  %s13702_s30 = smov 0  }
  0x1b   :  { %s13704_s14 = smov 0   ;;  %s13706_s15 = smov 0  }
  0x1c   :  { %s13708_s16 = smov 0   ;;  %s13710_s17 = smov 0  }
  0x1d   :  { %s13712_s18 = smov 0   ;;  %s13714_s19 = smov 0  }
  0x1e   :  { %s13716_s20 = smov 0   ;;  %s13718_s21 = smov 0  }
  0x1f   :  { %s13720_s22 = smov 0   ;;  %s13722_s23 = smov 0  }
  0x20   :  { %s13724_s24 = smov 0  }
  0x21 LB: > { %15766 = sst [smem:[#allocation30_spill]] %s13557_s0  ;;  %s13608_s25 = smov [#allocation11]   ;;  %s13605_s24 = sphi %s13724_s24, %s15857_s24   ;;  %s13601_s23 = sphi %s13722_s23, %s15844_s23   ;;  %s13597_s22 = sphi %s13720_s22, %s15856_s22   ;;  %s13593_s21 = sphi %s13718_s21, %s15855_s21   ;;  %s13589_s20 = sphi %s13716_s20, %s15854_s20   ;;  %s13585_s19 = sphi %s13714_s19, %s15853_s19   ;;  %s13581_s18 = sphi %s13712_s18, %s15852_s18   ;;  %s13577_s17 = sphi %s13710_s17, %s15851_s17   ;;  %s13573_s16 = sphi %s13708_s16, %s15850_s16   ;;  %s13569_s15 = sphi %s13706_s15, %s15849_s15   ;;  %s13565_s14 = sphi %s13704_s14, %s15848_s14   ;;  %s13561_s30 = sphi %s13702_s30, %s15847_s30   ;;  %s13557_s0 = sphi %s13700_s0, %s15840_s0  }
  0x22   : > { %15767 = sst [smem:[#allocation31_spill]] %s13561_s30  ;;  %s386_s26 = sshll.u32 %s13608_s25, 4  ;;  %s13771_s26 = int_to_ptr.vmem [resolvable:$true] %s386_s26 }
  0x23   : > { %15768 = sst [smem:[#allocation32_spill]] %s13565_s14  ;;  %s13766_s27 = sadd.s32 4294967295, %s13605_s24  }
  0x24   : > { %15769 = sst [smem:[#allocation33_spill]] %s13601_s23  ;;  %p9936_p5 = scmp.ge.s32.totalorder %s13605_s24, 1 }
  0x25   : > { %p15745_p6 = scmp.eq.s32.totalorder %s13766_s27, 0  ;;  %p374_p7 = scmp.lt.s32.totalorder %s13605_s24, 3 }
  0x26   : > { %s13609_s29 = smov [#allocation12]   ;;  %s15773_s9 = sld [smem:[#allocation46_spill]] }
  0x27   : > { %p13773_p8 = pnand %p9936_p5, %p374_p7  ;;  %s402_s13 = sshll.u32 %s13609_s29, 4  ;;  %s13785_s13 = int_to_ptr.vmem [resolvable:$true] %s402_s13 }
  0x29   : > { %s15770_s28 = scalar_select %p13773_p8, 1, 0 }
  0x2a   : > { %p12569_p9 = pneg %p13773_p8 }
  0x2b   : > { %15771 = sst [smem:[#allocation34_spill]] %s15770_s28 }
  0x2c   : > { %p13781_p10 = pnand %p12569_p9, %p15745_p6  ;;  %s13273_s2 = scalar_lea.hbm %s15773_s9, 2048 }
  0x2d   : > { %p13274_p11 = scmp.ne.s32.totalorder %s15773_s9, %s13273_s2  ;;  %p13280_p1 = scmp.lt.u32.totalorder %s13273_s2, %s15773_s9 }
  0x2e   : > { %p13795_p12 = pneg %p13781_p10 }
  0x30   : > { %p13276_p13 = pnand %p13795_p12, %p13274_p11 }
  0x32   : > { %p13277_p0 = pneg %p13276_p13 }
  0x34   : > { %p13282_p2 = pnand %p13280_p1, %p13277_p0 }
  0x36   : > { %13285 = shalt.err (!%p13282_p2)
}
  0x37   : > { %s13286_s1 = scalar_lea.vmem %s13771_s26, 2048  ;;  %p13294_p7 = scmp.lt.s32.totalorder %s13771_s26, %s13771_s26 }
  0x38   : > { %p13287_p3 = scmp.ne.s32.totalorder %s13771_s26, %s13286_s1  ;;  %p13295_p9 = scmp.lt.s32.totalorder %s13286_s1, %s13286_s1 }
  0x3a   : > { %p13289_p4 = pnand %p13287_p3, %p13795_p12  ;;  %p13296_p11 = por %p13295_p9, %p13294_p7 }
  0x3c   : > { %p13290_p5 = pneg %p13289_p4 }
  0x3e   : > { %p13297_p13 = pnand %p13296_p11, %p13290_p5 }
  0x40   : > { %13300 = shalt.err (!%p13297_p13)
}
  0x41   : > { %s15738_s4 = smov 64   ;;  %s15740_s2 = smov 4  }
  0x42   : > { %12572 = dma.hbm_to_vmem [thread:$0]  (!%p13781_p10), %s15773_s9, 2048, %s13771_s26, [#allocation10], %s15738_s4, %s15738_s4, %s15740_s2  }
  0x43   : > { %s15775_s11 = sld [smem:[#allocation48_spill]] }
  0x49   : > { %s13301_s1 = scalar_lea.hbm %s15775_s11, 512 }
  0x4a   : > { %p13302_p0 = scmp.ne.s32.totalorder %s15775_s11, %s13301_s1  ;;  %p13308_p3 = scmp.lt.u32.totalorder %s13301_s1, %s15775_s11 }
  0x4c   : > { %p13304_p1 = pnand %p13302_p0, %p13795_p12 }
  0x4e   : > { %p13305_p2 = pneg %p13304_p1 }
  0x50   : > { %p13310_p4 = pnand %p13308_p3, %p13305_p2 }
  0x52   : > { %13313 = shalt.err (!%p13310_p4)
}
  0x53   : > { %s13314_s26 = scalar_lea.vmem %s13785_s13, 512  ;;  %p13322_p11 = scmp.lt.s32.totalorder %s13785_s13, %s13785_s13 }
  0x54   : > { %p13315_p5 = scmp.ne.s32.totalorder %s13785_s13, %s13314_s26  ;;  %p13323_p13 = scmp.lt.s32.totalorder %s13314_s26, %s13314_s26 }
  0x56   : > { %p13317_p7 = pnand %p13315_p5, %p13795_p12  ;;  %p13324_p0 = por %p13323_p13, %p13322_p11 }
  0x58   : > { %p13318_p9 = pneg %p13317_p7 }
  0x5a   : > { %p13325_p1 = pnand %p13324_p0, %p13318_p9 }
  0x5c   : > { %13328 = shalt.err (!%p13325_p1)
}
  0x5d   : > { %12575 = dma.hbm_to_vmem [thread:$0]  (!%p13781_p10), %s15775_s11, 512, %s13785_s13, [#allocation13], %s15738_s4, %s15738_s4, %s15740_s2  }
  0x5e   : > { %s13846_s30 = sadd.s32 1, %s13605_s24   ;;  %p15746_p2 = scmp.eq.s32.totalorder %s13605_s24, 0 }
  0x5f   : > { %s151_s14 = sld [smem:[#allocation3 + %s13605_s24]]  ;;  %p163_p3 = scmp.ne.s32.totalorder %s13589_s20, %s13585_s19 }
  0x60   : > { %s152_s7 = sld [smem:[#allocation3 + %s13846_s30]]  ;;  %s156_s8 = sadd.s32 1, %s13589_s20 }
  0x61   : > { %p169_p4 = scmp.ne.s32.totalorder %s13585_s19, %s13581_s18  ;;  %p13858_p5 = por %p163_p3, %p15746_p2 }
  0x62   : > { %p15744_p7 = scmp.lt.s32.totalorder %s13605_s24, 2  ;;  %s475_s1 = sand.u32 1, %s13589_s20  }
  0x63   : > { %p13865_p9 = por %p169_p4, %p15745_p6  ;;  %s12535_s6 = smul.u32 768, %s475_s1 }
  0x64   : > { %p13875_p11 = pnand %p15744_p7, %p13858_p5  ;;  %s15781_s12 = sld [smem:[#allocation49_spill]] }
  0x65   : > { %s15777_s13 = scalar_select %p13865_p9, 1, 0 }
  0x66   : > { %s15779_s18 = scalar_select %p13875_p11, 1, 0 }
  0x67   : > { %15778 = sst [smem:[#allocation35_spill]] %s15777_s13  ;;  %s153_s26 = ssub.s32 %s151_s14, %s152_s7 }
  0x68   : > { %p154_p13 = scmp.eq.s32.totalorder %s153_s26, 0  ;;  %s477_s29 = scalar_lea.vmem [#allocation6], %s12535_s6 }
  0x69   : > { %s12550_s4 = scalar_select %p13858_p5, [#allocation3], [#allocation16] }
  0x6a   : > { %s13880_s0 = scalar_select %p154_p13, %s13589_s20, %s156_s8  }
  0x6b   : > { %s12551_s2 = scalar_select %p13858_p5, %s13605_s24, 0 }
  0x6c   : > { %15780 = sst [smem:[#allocation36_spill]] %s13880_s0  ;;  %s15859_s4 = smov (!%p15744_p7, %s12550_s4), [#allocation20] }
  0x6d   : > { %s15861_s2 = smov (!%p15744_p7, %s12551_s2), 0  ;;  %s485_s9 = sshll.u32 %s477_s29, 4  ;;  %s13891_s9 = int_to_ptr.vmem [resolvable:$true] %s485_s9 }
  0x6e   : > { %s478_s11 = sld [smem:[%s15859_s4 + %s15861_s2]]  ;;  %s13612_s13 = smov [#allocation14]  }
  0x6f   : > { %s416_s14 = sshll.u32 %s13612_s13, 4  ;;  %s13329_s8 = scalar_lea.hbm %s15781_s12, 128  ;;  %s417_s14 = int_to_ptr.vmem [resolvable:$true] %s416_s14 }
  0x70   : > { %p13330_p0 = scmp.ne.s32.totalorder %s15781_s12, %s13329_s8  ;;  %p13336_p4 = scmp.lt.u32.totalorder %s13329_s8, %s15781_s12 }
  0x72   : > { %p13332_p1 = pnand %p13330_p0, %p13795_p12 }
  0x74   : > { %p13333_p3 = pneg %p13332_p1 }
  0x76   : > { %p13338_p5 = pnand %p13336_p4, %p13333_p3 }
  0x78   : > { %13341 = shalt.err (!%p13338_p5)
}
  0x79   : > { %s13342_s4 = scalar_lea.vmem %s417_s14, 128  ;;  %p13350_p2 = scmp.lt.s32.totalorder %s417_s14, %s417_s14 }
  0x7a   : > { %p13343_p13 = scmp.ne.s32.totalorder %s417_s14, %s13342_s4  ;;  %p13351_p9 = scmp.lt.s32.totalorder %s13342_s4, %s13342_s4 }
  0x7c   : > { %p13345_p7 = pnand %p13343_p13, %p13795_p12  ;;  %p13352_p8 = por %p13351_p9, %p13350_p2 }
  0x7e   : > { %p13346_p6 = pneg %p13345_p7 }
  0x80   : > { %p13353_p11 = pnand %p13352_p8, %p13346_p6 }
  0x82   : > { %13356 = shalt.err (!%p13353_p11)
}
  0x83   : > { %12578 = dma.hbm_to_vmem [thread:$0]  (!%p13781_p10), %s15781_s12, 128, %s417_s14, [#allocation13]  }
  0x84   : > { %s12536_s29 = smul.u32 12288, %s478_s11  ;;  %s13912_s28 = sld [smem:[#allocation3 + %s13605_s24]] }
  0x85   : > { %s15782_s5 = sld [smem:[#allocation42_spill]]  ;;  %s15783_s8 = sand.u32 1, %s13605_s24  }
  0x86   : > { %s13920_s25 = sld [smem:[#allocation3 + %s13846_s30]]  ;;  %s13924_s26 = scalar_lea.sflag [#allocation7], %s15783_s8 }
  0x87   : > { %p15784_p8 = scmp.ne.s32.totalorder %s15779_s18, 0 }
  0x89   : > { %p13359_p10 = pneg %p15784_p8 }
  0x8b   : > { %s13917_s1 = scalar_lea.hbm %s15782_s5, %s12536_s29  ;;  %s13362_s6 = scalar_lea.hbm %s15782_s5, 86016 }
  0x8c   : > { %s13357_s10 = scalar_lea.hbm %s13917_s1, 12288  ;;  %p13363_p7 = scmp.lt.u32.totalorder %s13917_s1, %s15782_s5 }
  0x8d   : > { %p13358_p6 = scmp.ne.s32.totalorder %s13917_s1, %s13357_s10  ;;  %p13364_p9 = scmp.lt.u32.totalorder %s13362_s6, %s13357_s10 }
  0x8e   : > { %p13366_p0 = scmp.lt.u32.totalorder %s13357_s10, %s13917_s1 }
  0x8f   : > { %p13360_p12 = pnand %p13359_p10, %p13358_p6  ;;  %p13365_p11 = por %p13364_p9, %p13363_p7 }
  0x91   : > { %p13361_p2 = pneg %p13360_p12  ;;  %p13367_p1 = por %p13366_p0, %p13365_p11 }
  0x93   : > { %p13368_p3 = pnand %p13367_p1, %p13361_p2 }
  0x95   : > { %13371 = shalt.err (!%p13368_p3)
}
  0x96   : > { %s13372_s13 = scalar_lea.vmem %s13891_s9, 12288  ;;  %s13613_s29 = smov [#allocation6]  }
  0x97   : > { %p13373_p4 = scmp.ne.s32.totalorder %s13891_s9, %s13372_s13  ;;  %s13377_s0 = sshll.u32 %s13613_s29, 4  ;;  %s13378_s0 = int_to_ptr.vmem [resolvable:$false] %s13377_s0 }
  0x98   : > { %s13379_s7 = scalar_lea.vmem %s13378_s0, 24576  ;;  %p13380_p6 = scmp.lt.s32.totalorder %s13891_s9, %s13378_s0 }
  0x99   : > { %p13375_p5 = pnand %p13373_p4, %p13359_p10  ;;  %p13381_p12 = scmp.lt.s32.totalorder %s13379_s7, %s13372_s13 }
  0x9b   : > { %p13376_p13 = pneg %p13375_p5  ;;  %p13382_p7 = por %p13381_p12, %p13380_p6 }
  0x9d   : > { %p13383_p9 = pnand %p13382_p7, %p13376_p13 }
  0x9f   : > { %13386 = shalt.err (!%p13383_p9)
}
  0xa0   : > { %s13614_s8 = smov 192   ;;  %s13615_s10 = smov 12  }
  0xa1   : > { %12589 = dma.hbm_to_vmem [thread:$0]  (!%p15784_p8), %s13917_s1, 12288, %s13891_s9, %s13924_s26, %s13614_s8, %s13614_s8, %s13615_s10  }
  0xa2   : > { %s100_s11 = sadd.s32 1, %s13601_s23  ;;  %p107_p10 = scmp.ne.s32.totalorder %s13601_s23, %s13597_s22 }
  0xa3   : > { %p113_p2 = scmp.ne.s32.totalorder %s13597_s22, %s13593_s21  ;;  %s441_s14 = sand.u32 1, %s13601_s23  }
  0xa4   : > { %p15785_p11 = scmp.eq.s32.totalorder %s13605_s24, 0  ;;  %p15787_p1 = scmp.eq.s32.totalorder %s13766_s27, 0 }
  0xa5   : > { %s9941_s9 = sshll.u32 %s441_s14, 10  ;;  %s97_s21 = ssub.s32 %s13912_s28, %s13920_s25 }
  0xa6   : > { %p13960_p0 = por %p15785_p11, %p107_p10  ;;  %p13966_p3 = por %p15787_p1, %p113_p2 }
  0xa7   : > { %p98_p8 = scmp.eq.s32.totalorder %s97_s21, 0  ;;  %s445_s1 = scalar_lea.vmem [#allocation4], %s9941_s9 }
  0xa8   : > { %s15788_s18 = scalar_select %p13966_p3, 1, 0 }
  0xa9   : > { %s453_s4 = sshll.u32 %s445_s1, 4  ;;  %p15790_p4 = scmp.lt.s32.totalorder %s13605_s24, 2  ;;  %s13984_s4 = int_to_ptr.vmem [resolvable:$true] %s453_s4 }
  0xaa   : > { %s12547_s2 = scalar_select %p13960_p0, [#allocation3], [#allocation15] }
  0xab   : > { %s13975_s13 = scalar_select %p98_p8, %s13601_s23, %s100_s11  }
  0xac   : > { %s12548_s29 = scalar_select %p13960_p0, %s13605_s24, 0 }
  0xad   : > { %15789 = sst [smem:[#allocation37_spill]] %s13975_s13  ;;  %s15863_s2 = smov (!%p15790_p4, %s12547_s2), [#allocation19] }
  0xae   : > { %p15791_p5 = pmov %p15790_p4  ;;  %p15792_p13 = pmov %p15790_p4 }
  0xaf   : > { %s13995_s0 = sld [smem:[#allocation3 + %s13605_s24]]  ;;  %p191_p12 = scmp.ne.s32.totalorder %s13577_s17, %s13573_s16 }
  0xb0   : > { %s15865_s29 = smov (!%p15791_p5, %s12548_s29), 0  ;;  %p13990_p6 = pnand %p15792_p13, %p13960_p0 }
  0xb1   : > { %s446_s25 = sld [smem:[%s15863_s2 + %s15865_s29]]  ;;  %p15795_p9 = pmov %p15785_p11 }
  0xb2   : > { %s13998_s7 = sld [smem:[#allocation3 + %s13846_s30]]  ;;  %s14016_s1 = scalar_lea.sflag [#allocation5], %s441_s14 }
  0xb3   : > { %s15794_s3 = sld [smem:[#allocation40_spill]]  ;;  %p14012_p10 = por %p191_p12, %p15795_p9 }
  0xb4   : > { %p13389_p11 = pneg %p13990_p6 }
  0xb7   : > { %s11012_s10 = sshll.u32 %s446_s25, 14 }
  0xb9   : > { %s14008_s6 = scalar_lea.hbm %s15794_s3, %s11012_s10  ;;  %s13392_s10 = scalar_lea.hbm %s15794_s3, 114688 }
  0xba   : > { %s13387_s2 = scalar_lea.hbm %s14008_s6, 16384  ;;  %p13393_p8 = scmp.lt.u32.totalorder %s14008_s6, %s15794_s3 }
  0xbb   : > { %p13388_p2 = scmp.ne.s32.totalorder %s14008_s6, %s13387_s2  ;;  %p13394_p4 = scmp.lt.u32.totalorder %s13392_s10, %s13387_s2 }
  0xbc   : > { %p13396_p13 = scmp.lt.u32.totalorder %s13387_s2, %s14008_s6 }
  0xbd   : > { %p13390_p0 = pnand %p13389_p11, %p13388_p2  ;;  %p13395_p5 = por %p13394_p4, %p13393_p8 }
  0xbf   : > { %p13391_p1 = pneg %p13390_p0  ;;  %p13397_p12 = por %p13396_p13, %p13395_p5 }
  0xc1   : > { %p13398_p9 = pnand %p13397_p12, %p13391_p1 }
  0xc3   : > { %13401 = shalt.err (!%p13398_p9)
}
  0xc4   : > { %s13402_s14 = scalar_lea.vmem %s13984_s4, 16384  ;;  %s13616_s29 = smov [#allocation4]  }
  0xc5   : > { %p13403_p2 = scmp.ne.s32.totalorder %s13984_s4, %s13402_s14  ;;  %s13407_s25 = sshll.u32 %s13616_s29, 4  ;;  %s13408_s25 = int_to_ptr.vmem [resolvable:$false] %s13407_s25 }
  0xc6   : > { %s13409_s11 = scalar_lea.vmem %s13408_s25, 32768  ;;  %p13410_p3 = scmp.lt.s32.totalorder %s13984_s4, %s13408_s25 }
  0xc7   : > { %p13405_p0 = pnand %p13403_p2, %p13389_p11  ;;  %p13411_p8 = scmp.lt.s32.totalorder %s13409_s11, %s13402_s14 }
  0xc9   : > { %p13406_p7 = pneg %p13405_p0  ;;  %p13412_p4 = por %p13411_p8, %p13410_p3 }
  0xcb   : > { %p13413_p5 = pnand %p13412_p4, %p13406_p7 }
  0xcd   : > { %13416 = shalt.err (!%p13413_p5)
}
  0xce   : > { %s15797_s2 = smov 4   ;;  %s15798_s10 = smov 64  }
  0xcf   : > { %12584 = dma.hbm_to_vmem [thread:$0]  (!%p13990_p6), %s14008_s6, 16384, %s13984_s4, %s14016_s1, %s15798_s10, %s15798_s10, %s15797_s2  }
  0xd0   : > { %p15799_p3 = scmp.eq.s32.totalorder %s13766_s27, 0  ;;  %p15800_p7 = scmp.ne.s32.totalorder %s13573_s16, %s13569_s15 }
  0xd1   : > { %s497_s9 = sand.u32 1, %s13577_s17   ;;  %s181_s14 = ssub.s32 %s13995_s0, %s13998_s7 }
  0xd2   : > { %p14052_p11 = por %p15800_p7, %p15799_p3  ;;  %s15802_s29 = sld [smem:[#allocation31_spill]] }
  0xd3   : > { %s15803_s25 = sld [smem:[#allocation32_spill]]  ;;  %s9945_s11 = sshll.u32 %s497_s9, 8 }
  0xd4   : > { %p182_p1 = scmp.eq.s32.totalorder %s181_s14, 0  ;;  %s15804_s8 = sld [smem:[#allocation30_spill]] }
  0xd5   : > { %s12553_s3 = scalar_select %p14012_p10, [#allocation3], [#allocation17] }
  0xd6   : > { %s15805_s5 = sadd.s32 1, %s13577_s17  ;;  %p15806_p6 = scmp.lt.s32.totalorder %s13605_s24, 2 }
  0xd7   : > { %s14064_s12 = scalar_select %p182_p1, %s13577_s17, %s15805_s5  }
  0xd8   : > { %s12554_s15 = scalar_select %p14012_p10, %s13605_s24, 0 }
  0xd9   : > { %s15867_s3 = smov (!%p15806_p6, %s12553_s3), [#allocation21]  ;;  %p15807_p13 = pmov %p15806_p6 }
  0xda   : > { %p15808_p12 = pmov %p15806_p6  ;;  %s499_s7 = scalar_lea.vmem [#allocation8], %s9945_s11 }
  0xdb   : > { %s15869_s15 = smov (!%p15807_p13, %s12554_s15), 0  ;;  %s507_s6 = sshll.u32 %s499_s7, 4  ;;  %s14084_s6 = int_to_ptr.vmem [resolvable:$true] %s507_s6 }
  0xdc   : > { %p14077_p9 = pnand %p15808_p12, %p14012_p10  ;;  %s500_s0 = sld [smem:[%s15867_s3 + %s15869_s15]] }
  0xdd   : > { %s14082_s1 = sld [smem:[#allocation3 + %s13605_s24]] }
  0xde   : > { %s14087_s5 = sld [smem:[#allocation3 + %s13846_s30]]  ;;  %p13419_p8 = pneg %p14077_p9 }
  0xdf   : > { %s15810_s13 = sld [smem:[#allocation43_spill]] }
  0xe2   : > { %s11013_s9 = sshll.u32 %s500_s0, 12 }
  0xe5   : > { %s14094_s23 = scalar_lea.hbm %s15810_s13, %s11013_s9  ;;  %s13422_s0 = scalar_lea.hbm %s15810_s13, 28672 }
  0xe6   : > { %s13417_s3 = scalar_lea.hbm %s14094_s23, 4096  ;;  %p13423_p3 = scmp.lt.u32.totalorder %s14094_s23, %s15810_s13 }
  0xe7   : > { %p13418_p0 = scmp.ne.s32.totalorder %s14094_s23, %s13417_s3  ;;  %p13424_p7 = scmp.lt.u32.totalorder %s13422_s0, %s13417_s3 }
  0xe8   : > { %p13426_p6 = scmp.lt.u32.totalorder %s13417_s3, %s14094_s23 }
  0xe9   : > { %p13420_p4 = pnand %p13419_p8, %p13418_p0  ;;  %p13425_p1 = por %p13424_p7, %p13423_p3 }
  0xeb   : > { %p13421_p5 = pneg %p13420_p4  ;;  %p13427_p13 = por %p13426_p6, %p13425_p1 }
  0xed   : > { %p13428_p12 = pnand %p13427_p13, %p13421_p5 }
  0xef   : > { %13431 = shalt.err (!%p13428_p12)
}
  0xf0   : > { %s13432_s14 = scalar_lea.vmem %s14084_s6, 4096  ;;  %s13617_s21 = smov [#allocation8]  }
  0xf1   : > { %p13433_p0 = scmp.ne.s32.totalorder %s14084_s6, %s13432_s14  ;;  %s13437_s11 = sshll.u32 %s13617_s21, 4  ;;  %s13438_s11 = int_to_ptr.vmem [resolvable:$false] %s13437_s11 }
  0xf2   : > { %s13439_s15 = scalar_lea.vmem %s13438_s11, 8192  ;;  %p13440_p10 = scmp.lt.s32.totalorder %s14084_s6, %s13438_s11 }
  0xf3   : > { %p13435_p4 = pnand %p13433_p0, %p13419_p8  ;;  %p13441_p3 = scmp.lt.s32.totalorder %s13439_s15, %s13432_s14 }
  0xf5   : > { %p13436_p2 = pneg %p13435_p4  ;;  %p13442_p7 = por %p13441_p3, %p13440_p10 }
  0xf7   : > { %p13443_p1 = pnand %p13442_p7, %p13436_p2 }
  0xf9   : > { %13446 = shalt.err (!%p13443_p1)
}
  0xfa   : > { %12594 = dma.hbm_to_vmem [thread:$0]  (!%p14077_p9), %s14094_s23, 4096, %s14084_s6, %s13924_s26, %s15798_s10, %s15798_s10, %s15797_s2  }
  0xfb   : > { %p15811_p2 = scmp.eq.s32.totalorder %s13766_s27, 0  ;;  %p15812_p10 = scmp.ne.s32.totalorder %s15802_s29, %s15804_s8 }
  0xfc   : > { %s240_s3 = sadd.s32 1, %s15803_s25  ;;  %s529_s0 = sand.u32 1, %s15803_s25  }
  0xfd   : > { %p14132_p8 = por %p15812_p10, %p15811_p2  ;;  %s237_s7 = ssub.s32 %s14082_s1, %s14087_s5 }
  0xfe   : > { %p15814_p5 = scmp.eq.s32.totalorder %s13605_s24, 0  ;;  %p15815_p6 = scmp.ne.s32.totalorder %s15803_s25, %s15802_s29 }
  0xff   : > { %s15813_s4 = scalar_select %p14132_p8, 1, 0 }
 0x100   : > { %p249_p13 = por %p15815_p6, %p15814_p5  ;;  %p238_p12 = scmp.eq.s32.totalorder %s237_s7, 0 }
 0x101   : > { %s12537_s9 = smul.u32 56, %s529_s0  ;;  %p15816_p0 = scmp.lt.s32.totalorder %s13605_s24, 2 }
 0x102   : > { %s15871_s25 = smov (!%p238_p12, %s15803_s25), %s240_s3  ;;  %s15820_s5 = sld [smem:[#allocation45_spill]] }
 0x103   : > { %p14147_p4 = pnand %p15816_p0, %p249_p13  ;;  %p15818_p9 = pmov %p15816_p0 }
 0x104   : > { %s12556_s23 = scalar_select %p249_p13, [#allocation3], [#allocation18] }
 0x105   : > { %s12557_s26 = scalar_select %p249_p13, %s13605_s24, 0 }
 0x106   : > { %s15873_s23 = smov (!%p15818_p9, %s12556_s23), [#allocation22]  ;;  %p15819_p3 = pmov %p15816_p0 }
 0x107   : > { %s531_s2 = scalar_lea.vmem [#allocation9], %s12537_s9  ;;  %s15821_s11 = sand.u32 1, %s13605_s24  }
 0x108   : > { %s15875_s26 = smov (!%p15819_p3, %s12557_s26), 0  ;;  %s539_s10 = sshll.u32 %s531_s2, 4  ;;  %s14159_s10 = int_to_ptr.vmem [resolvable:$true] %s539_s10 }
 0x109   : > { %s532_s8 = sld [smem:[%s15873_s23 + %s15875_s26]]  ;;  %s14168_s15 = scalar_lea.sflag [#allocation10], %s15821_s11 }
 0x10a   : > { %p13449_p1 = pneg %p14147_p4  ;;  %s13452_s9 = scalar_lea.hbm %s15820_s5, 6272 }
 0x10f   : > { %s12538_s29 = smul.u32 896, %s532_s8 }
 0x111   : > { %s14164_s21 = scalar_lea.hbm %s15820_s5, %s12538_s29 }
 0x112   : > { %s13447_s3 = scalar_lea.hbm %s14164_s21, 896  ;;  %p13453_p5 = scmp.lt.u32.totalorder %s14164_s21, %s15820_s5 }
 0x113   : > { %p13448_p7 = scmp.ne.s32.totalorder %s14164_s21, %s13447_s3  ;;  %p13454_p6 = scmp.lt.u32.totalorder %s13452_s9, %s13447_s3 }
 0x114   : > { %p13456_p12 = scmp.lt.u32.totalorder %s13447_s3, %s14164_s21 }
 0x115   : > { %p13450_p2 = pnand %p13449_p1, %p13448_p7  ;;  %p13455_p13 = por %p13454_p6, %p13453_p5 }
 0x117   : > { %p13451_p10 = pneg %p13450_p2  ;;  %p13457_p0 = por %p13456_p12, %p13455_p13 }
 0x119   : > { %p13458_p9 = pnand %p13457_p0, %p13451_p10 }
 0x11b   : > { %13461 = shalt.err (!%p13458_p9)
}
 0x11c   : > { %s13462_s26 = scalar_lea.vmem %s14159_s10, 896  ;;  %s13618_s8 = smov [#allocation9]  }
 0x11d   : > { %p13463_p3 = scmp.ne.s32.totalorder %s14159_s10, %s13462_s26  ;;  %s13467_s2 = sshll.u32 %s13618_s8, 4  ;;  %s13468_s2 = int_to_ptr.vmem [resolvable:$false] %s13467_s2 }
 0x11e   : > { %s13469_s29 = scalar_lea.vmem %s13468_s2, 1792  ;;  %p13470_p8 = scmp.lt.s32.totalorder %s14159_s10, %s13468_s2 }
 0x11f   : > { %p13465_p7 = pnand %p13463_p3, %p13449_p1  ;;  %p13471_p5 = scmp.lt.s32.totalorder %s13469_s29, %s13462_s26 }
 0x121   : > { %p13466_p2 = pneg %p13465_p7  ;;  %p13472_p6 = por %p13471_p5, %p13470_p8 }
 0x123   : > { %p13473_p13 = pnand %p13472_p6, %p13466_p2 }
 0x125   : > { %13476 = shalt.err (!%p13473_p13)
}
 0x126   : > { %s13619_s6 = smov 128   ;;  %s13620_s1 = smov 8  }
 0x127   : > { %12599 = dma.hbm_to_vmem [thread:$0]  (!%p14147_p4), %s14164_s21, 896, %s14159_s10, %s14168_s15, %s13619_s6, %s13619_s6, %s13620_s1  }
 0x128   : > { %s15822_s11 = sld [smem:[#allocation34_spill]] }
 0x12e   : > { %p15823_p1 = scmp.ne.s32.totalorder %s15822_s11, 0 }
 0x12f   : > { %s553_s3 = sand.u32 (!%p15823_p1), 1, %s13597_s22   ;;  %p15824_p8 = scmp.ne.s32.totalorder (!%p15823_p1), %s15788_s18, 0 }
 0x130   : > { %551 = sbr.rel (%p15823_p1) target bundleno = 18708 (0x4914), region = 68  ;;  %s9950_s0 = sshll.u32 (!%p15823_p1), %s553_s3, 10 }
 0x131   : > { %s554_s7 = scalar_lea.sflag (!%p15823_p1), [#allocation5], %s553_s3  ;;  %s14199_s9 = scalar_lea.vmem (!%p15823_p1), [#allocation4], %s9950_s0 }
 0x137   : > { %13532 = dma.done.wait (%p15824_p8), %s554_s7, 16384  }
 0x138   : > { %13534 = vsyncadd (%p15824_p8), %s554_s7, 4294950912  ;;  %s15825_s23 = sld [smem:[#allocation35_spill]]  ;;  %s562_s14 = sand.u32 1, %s13766_s27  }
 0x139   : > { %s564_s10 = sand.u32 1, %s13585_s19   ;;  %s563_s15 = scalar_lea.sflag [#allocation7], %s562_s14 }
 0x13a   : > { %s12539_s21 = smul.u32 768, %s564_s10 }
 0x13c   : > { %s14207_s24 = scalar_lea.vmem [#allocation6], %s12539_s21 }
 0x13e   : > { %p15826_p4 = scmp.ne.s32.totalorder %s15825_s23, 0 }
 0x140   : > { %13536 = dma.done.wait (%p15826_p4), %s563_s15, 12288  }
 0x141   : > { %13538 = vsyncadd (%p15826_p4), %s563_s15, 4294955008  ;;  %s573_s26 = sand.u32 1, %s13573_s16  }
 0x142   : > { %s9951_s8 = sshll.u32 %s573_s26, 8 }
 0x143   : > { %s14214_s18 = scalar_lea.vmem [#allocation8], %s9951_s8 }
 0x144   : > { %13540 = dma.done.wait (%p14052_p11), %s563_s15, 4096  }
 0x145   : > { %13542 = vsyncadd (%p14052_p11), %s563_s15, 4294963200  ;;  %s15827_s2 = sld [smem:[#allocation31_spill]]  ;;  %s581_s1 = scalar_lea.sflag [#allocation10], %s562_s14 }
 0x146   : > { %p15828_p10 = scmp.ne.s32.totalorder %s15813_s4, 0 }
 0x14b   : > { %s582_s29 = sand.u32 1, %s15827_s2  }
 0x14c   : > { %s12540_s6 = smul.u32 56, %s582_s29 }
 0x14e   : > { %s14221_s11 = scalar_lea.vmem [#allocation9], %s12540_s6 }
 0x14f   : > { %13544 = dma.done.wait (%p15828_p10), %s581_s1, 896  }
 0x150   : > { %13546 = vsyncadd (%p15828_p10), %s581_s1, 4294966400  ;;  %p15829_p12 = scmp.eq.s32.totalorder %s13766_s27, 0 }
 0x152   : > { %13548 = dma.done.wait (%p15829_p12), [#allocation10], 2048   ;;  %p15830_p0 = pmov %p15829_p12 }
 0x154   : > { %13550 = vsyncadd (%p15830_p0), [#allocation10], 4294965248  ;;  %p15831_p11 = pmov %p15830_p0 }
 0x155   : > { %p15832_p9 = pmov %p15830_p0 }
 0x156   : > { %13552 = dma.done.wait (%p15831_p11), [#allocation13], 640  }
 0x157   : > { %13554 = vsyncadd (%p15832_p9), [#allocation13], 4294966656  ;;  %v13621_v0 = vmov 0.0   ;;  %vm13622_vm0 = vmmov 0   ;;  %v12727_v1 = vld [vmem:[%s14199_s9 + $0x40] sm:$0xff]   ;;  %v12729_v3 = vld [vmem:[%s14199_s9 + $0x48] sm:$0xff]  }
 0x158   : > { %11459 = vmatprep.subr.bf16.mxu0 %v13621_v0  ;;  %11599 = vmatprep.subr.bf16.mxu1 %v13621_v0  ;;  %v12728_v2 = vld [vmem:[%s14199_s9 + $0x200] sm:$0xff]   ;;  %p670_p3 = scmp.lt.s32.totalorder %s13766_s27, 1  ;;  %v12730_v4 = vld [vmem:[%s14199_s9 + $0x208] sm:$0xff]   ;;  %v12731_v5 = vld [vmem:[%s14199_s9 + $0x50] sm:$0xff]   ;;  %s15833_s7 = sld [smem:[#allocation38_spill]]  ;;  %vm2466_vm1 = vcmask 261120  }
 0x159   : > { %11475 = vmatprep.mubr.msk.bf16.mxu0 %vm13622_vm0, %v13621_v0  ;;  %11615 = vmatprep.mubr.msk.bf16.mxu1 %vm13622_vm0, %v13621_v0  ;;  %v12732_v6 = vld [vmem:[%s14199_s9 + $0x210] sm:$0xff]   ;;  %v12733_v7 = vld [vmem:[%s14199_s9 + $0x58] sm:$0xff]   ;;  %v12735_v9 = vld [vmem:[%s14199_s9 + $0x60] sm:$0xff]   ;;  %s679_s14 = sld [smem:[#allocation3 + %s13766_s27]]  ;;  %s13624_s2 = smov 96   ;;  %vm2468_vm2 = vcmask 523264  }
 0x15a   : > { %11460 = vmatpush3.bf16.msra.mxu0 %v12727_v1  ;;  %11600 = vmatpush3.bf16.msra.mxu1 %v12728_v2  ;;  %s14250_s28 = scalar_select %p670_p3, %s13766_s27, 1  ;;  %v12734_v8 = vld [vmem:[%s14199_s9 + $0x218] sm:$0xff]   ;;  %v12736_v10 = vld [vmem:[%s14199_s9 + $0x220] sm:$0xff]   ;;  %v12737_v14 = vld [vmem:[%s14199_s9 + $0x68] sm:$0xff]   ;;  %vm2470_vm3 = vcmask 785408   ;;  %vm3135_vm6 = vcmask 64512  }
 0x15b   : > { %11461 = vmatprep.subr.bf16.mxu0 %v13621_v0  ;;  %11601 = vmatprep.subr.bf16.mxu1 %v13621_v0  ;;  %v12738_v15 = vld [vmem:[%s14199_s9 + $0x228] sm:$0xff]   ;;  %v12739_v18 = vld [vmem:[%s14199_s9 + $0x70] sm:$0xff]   ;;  %v12741_v24 = vld [vmem:[%s14199_s9 + $0x78] sm:$0xff]   ;;  %s15834_s26 = sld [smem:[#allocation41_spill]]  ;;  %s13625_s29 = smov 64   ;;  %vm2416_vm7 = vcmask 57344  }
 0x15c   : > { %s11014_s4 = sshll.u32 %s14250_s28, 4  ;;  %v12740_v20 = vld [vmem:[%s14199_s9 + $0x230] sm:$0xff]   ;;  %v12742_v25 = vld [vmem:[%s14199_s9 + $0x238] sm:$0xff]   ;;  %v12743_v27 = vld [vmem:[%s14199_s9] sm:$0xff]   ;;  %s688_s0 = sld [smem:[#allocation3 + %s13766_s27]]  ;;  %vm9504_vm8 = vcmask 1040384  }
 0x15d   : > { %v12744_v30 = vld [vmem:[%s14199_s9 + $0x1c0] sm:$0xff]   ;;  %v12745_v33 = vld [vmem:[%s14199_s9 + $0x8] sm:$0xff]   ;;  %v12747_v35 = vld [vmem:[%s14199_s9 + $0x10] sm:$0xff]   ;;  %vm9723_vm9 = vcmask 516096   ;;  %vm9734_vm10 = vcmask 531456  }
 0x15e   : > { %11462 = vmatpush3.bf16.msra.mxu0 %v12729_v3  ;;  %11602 = vmatpush3.bf16.msra.mxu1 %v12730_v4  ;;  %s674_s23 = scalar_lea.vmem %s15833_s7, %s11014_s4  ;;  %v12746_v34 = vld [vmem:[%s14199_s9 + $0x1c8] sm:$0xff]   ;;  %v12748_v36 = vld [vmem:[%s14199_s9 + $0x1d0] sm:$0xff]   ;;  %v12749_v37 = vld [vmem:[%s14199_s9 + $0x18] sm:$0xff]   ;;  %s15835_s4 = sld [smem:[#allocation39_spill]] }
 0x15f   : > { %11463 = vmatprep.subr.bf16.mxu0 %v13621_v0  ;;  %11603 = vmatprep.subr.bf16.mxu1 %v13621_v0  ;;  %v700_v11 = vld [vmem:[%s674_s23] sm:$0xff]  ;;  %v701_v12 = vld [vmem:[%s674_s23 + $0x8] sm:$0x3f]  ;;  %v12750_v38 = vld [vmem:[%s14199_s9 + $0x1d8] sm:$0xff]   ;;  %p680_p7 = scmp.lt.s32.totalorder %s679_s14, 6 }
 0x160   : > { %v14267_v13 = vpack.c.bf16 %v701_v12, %v700_v11  ;;  %v12751_v39 = vld [vmem:[%s14199_s9 + $0x20] sm:$0xff]   ;;  %v12753_v41 = vld [vmem:[%s14199_s9 + $0x28] sm:$0xff]   ;;  %v12755_v43 = vld [vmem:[%s14199_s9 + $0x30] sm:$0xff]  }
 0x161   : > { %v12752_v40 = vld [vmem:[%s14199_s9 + $0x1e0] sm:$0xff]   ;;  %v12754_v42 = vld [vmem:[%s14199_s9 + $0x1e8] sm:$0xff]   ;;  %v12756_v44 = vld [vmem:[%s14199_s9 + $0x1f0] sm:$0xff]   ;;  %s15877_s14 = smov (!%p680_p7, %s679_s14), 6 }
 0x162   : > { %11464 = vmatpush3.bf16.msra.mxu0 %v12731_v5  ;;  %11604 = vmatpush3.bf16.msra.mxu1 %v12732_v6  ;;  %v739_v16 = vshrl.u32 %v14267_v13, 16  ;;  %v741_v17 = vshll.u32 %v14267_v13, 16  ;;  %v14289_v28 = vrot.slane %v14267_v13, 1  ;;  %v12757_v45 = vld [vmem:[%s14199_s9 + $0x38] sm:$0xff]   ;;  %v12759_v47 = vld [vmem:[%s14199_s9 + $0x80] sm:$0xff]   ;;  %v12761_v49 = vld [vmem:[%s14199_s9 + $0x88] sm:$0xff]  }
 0x163   : > { %11465 = vmatprep.subr.bf16.mxu0 %v13621_v0  ;;  %11605 = vmatprep.subr.bf16.mxu1 %v13621_v0  ;;  %v12758_v46 = vld [vmem:[%s14199_s9 + $0x1f8] sm:$0xff]   ;;  %v12760_v48 = vld [vmem:[%s14199_s9 + $0x240] sm:$0xff]   ;;  %v12762_v50 = vld [vmem:[%s14199_s9 + $0x248] sm:$0xff]   ;;  %s11015_s10 = sshll.u32 %s15877_s14, 9  ;;  %p689_p2 = scmp.lt.s32.totalorder %s688_s0, 6 }
 0x164   : > { %v1048_v19 = vrot.slane %v739_v16, 1  ;;  %v1049_v21 = vrot.slane %v741_v17, 2  ;;  %v743_v22 = vrot.slane %v741_v17, 1  ;;  %v1266_v29 = vrot.slane %v739_v16, 2  ;;  %v12763_v51 = vld [vmem:[%s14199_s9 + $0x90] sm:$0xff]   ;;  %v12765_v53 = vld [vmem:[%s14199_s9 + $0x98] sm:$0xff]   ;;  %s14579_s8 = scalar_lea.vmem %s15834_s26, %s11015_s10  ;;  %s14716_s3 = scalar_lea.vmem %s15835_s4, %s14250_s28 }
 0x165   : > { %v1267_v31 = vrot.slane %v741_v17, 3  ;;  %v12764_v52 = vld [vmem:[%s14199_s9 + $0x250] sm:$0xff]   ;;  %v12766_v54 = vld [vmem:[%s14199_s9 + $0x258] sm:$0xff]   ;;  %v12767_v55 = vld [vmem:[%s14199_s9 + $0xa0] sm:$0xff]   ;;  %s15879_s0 = smov (!%p689_p2, %s688_s0), 6  ;;  %s15836_s10 = sld [smem:[#allocation44_spill]] }
 0x166   : > { %11466 = vmatpush3.bf16.msra.mxu0 %v12733_v7  ;;  %11606 = vmatpush3.bf16.msra.mxu1 %v12734_v8  ;;  %v14279_v23 = vor.u32 %v1049_v21, %v1048_v19  ;;  %v14285_v26 = vor.u32 %v743_v22, %v739_v16  ;;  %v12768_v56 = vld [vmem:[%s14199_s9 + $0x260] sm:$0xff]   ;;  %v12769_v57 = vld [vmem:[%s14199_s9 + $0xa8] sm:$0xff]   ;;  %v12771_v59 = vld [vmem:[%s14199_s9 + $0xb0] sm:$0xff]   ;;  %s11016_s7 = sshll.u32 %s15879_s0, 8 }
 0x167   : > { %11467 = vmatprep.subr.bf16.mxu0 %v13621_v0  ;;  %11607 = vmatprep.subr.bf16.mxu1 %v13621_v0  ;;  %v14295_v32 = vor.u32 %v1267_v31, %v1266_v29  ;;  %v12770_v58 = vld [vmem:[%s14199_s9 + $0x268] sm:$0xff]   ;;  %v12772_v60 = vld [vmem:[%s14199_s9 + $0x270] sm:$0xff]   ;;  %v12773_v61 = vld [vmem:[%s14199_s9 + $0xb8] sm:$0xff]  }
 0x168   : > { %v12774_v62 = vld [vmem:[%s14199_s9 + $0x278] sm:$0xff]   ;;  %v12775_v63 = vld [vmem:[%s14199_s9 + $0xc0] sm:$0xff]   ;;  %v12777_v2 = vld [vmem:[%s14199_s9 + $0xc8] sm:$0xff]  }
 0x169   : > { %v12776_v1 = vld [vmem:[%s14199_s9 + $0x280] sm:$0xff]   ;;  %v12778_v3 = vld [vmem:[%s14199_s9 + $0x288] sm:$0xff]   ;;  %v12779_v4 = vld [vmem:[%s14199_s9 + $0xd0] sm:$0xff]  }
 0x16a   : > { %11468 = vmatpush3.bf16.msra.mxu0 %v12735_v9  ;;  %11608 = vmatpush3.bf16.msra.mxu1 %v12736_v10  ;;  %v12780_v5 = vld [vmem:[%s14199_s9 + $0x290] sm:$0xff]   ;;  %v12781_v6 = vld [vmem:[%s14199_s9 + $0xd8] sm:$0xff]   ;;  %v12783_v8 = vld [vmem:[%s14199_s9 + $0xe0] sm:$0xff]  }
 0x16b   : > { %11469 = vmatprep.subr.bf16.mxu0 %v13621_v0  ;;  %11609 = vmatprep.subr.bf16.mxu1 %v13621_v0  ;;  %v12782_v7 = vld [vmem:[%s14199_s9 + $0x298] sm:$0xff]   ;;  %v12784_v9 = vld [vmem:[%s14199_s9 + $0x2a0] sm:$0xff]   ;;  %v12785_v10 = vld [vmem:[%s14199_s9 + $0xe8] sm:$0xff]   ;;  %s14861_s21 = scalar_lea.vmem %s15836_s10, %s11016_s7 }
 0x16c   : > { %v12786_v11 = vld [vmem:[%s14199_s9 + $0x2a8] sm:$0xff]   ;;  %v12787_v12 = vld [vmem:[%s14199_s9 + $0xf0] sm:$0xff]   ;;  %v12790_v16 = vld [vmem:[%s14199_s9 + $0x2b8] sm:$0xff]  }
 0x16d   : > { %v12791_v17 = vld [vmem:[%s14199_s9 + $0x100] sm:$0xff]   ;;  %v12794_v21 = vld [vmem:[%s14199_s9 + $0x2c8] sm:$0xff]   ;;  %v12795_v22 = vld [vmem:[%s14199_s9 + $0x110] sm:$0xff]  }
 0x16e   : > { %11470 = vmatpush3.bf16.msra.mxu0 %v12737_v14  ;;  %11610 = vmatpush3.bf16.msra.mxu1 %v12738_v15  ;;  %v12788_v14 = vld [vmem:[%s14199_s9 + $0x2b0] sm:$0xff]   ;;  %v12789_v15 = vld [vmem:[%s14199_s9 + $0xf8] sm:$0xff]   ;;  %v12792_v19 = vld [vmem:[%s14199_s9 + $0x2c0] sm:$0xff]  }
 0x16f   : > { %11471 = vmatprep.subr.bf16.mxu0 %v13621_v0  ;;  %11611 = vmatprep.subr.bf16.mxu1 %v13621_v0  ;;  %v12800_v29 = vld [vmem:[%s14199_s9 + $0x2e0] sm:$0xff]   ;;  %v12802_v31 = vld [vmem:[%s14199_s9 + $0x2e8] sm:$0xff]  }
 0x172   : > { %11472 = vmatpush3.bf16.msra.mxu0 %v12739_v18  ;;  %11612 = vmatpush3.bf16.msra.mxu1 %v12740_v20  ;;  %v14408_v18 = vrot.slane %v14267_v13, 2  ;;  %v12793_v20 = vld [vmem:[%s14199_s9 + $0x108] sm:$0xff]  }
 0x173   : > { %11473 = vmatprep.subr.bf16.mxu0 %v13621_v0  ;;  %11613 = vmatprep.subr.bf16.mxu1 %v13621_v0 }
 0x176   : > { %11474 = vmatpush3.bf16.msra.mxu0 %v12741_v24  ;;  %11614 = vmatpush3.bf16.msra.mxu1 %v12742_v25  ;;  %v12796_v24 = vld [vmem:[%s14199_s9 + $0x2d0] sm:$0xff]   ;;  %v12797_v25 = vld [vmem:[%s14199_s9 + $0x118] sm:$0xff]  }
 0x177   : > { %11479 = vmatprep.subr.bf16.mxu0 %v13621_v0  ;;  %11619 = vmatprep.subr.bf16.mxu1 %v13621_v0 }
 0x179   : > { %11476 = vmatmul.mubr.bf16.vlgmr.msra.gmra.mrb[0].mxu0 %v14285_v26  ;;  %11616 = vmatmul.mubr.bf16.vlgmr.msra.gmra.mrb[0].mxu1 %v14289_v28 }
 0x17a   : > { %11480 = vmatpush3.bf16.msra.mxu0 %v12743_v27  ;;  %11620 = vmatpush3.bf16.msra.mxu1 %v12744_v30  ;;  %v12799_v27 = vld [vmem:[%s14199_s9 + $0x120] sm:$0xff]   ;;  %v12801_v30 = vld [vmem:[%s14199_s9 + $0x128] sm:$0xff]  }
 0x17b   : > { %11481 = vmatprep.subr.bf16.mxu0 %v13621_v0  ;;  %11621 = vmatprep.subr.bf16.mxu1 %v13621_v0 }
 0x17c   : > { %11495 = vmatprep.mubr.msk.bf16.mxu0 %vm13622_vm0, %v13621_v0  ;;  %11635 = vmatprep.mubr.msk.bf16.mxu1 %vm13622_vm0, %v13621_v0 }
 0x17e   : > { %11482 = vmatpush3.bf16.msra.mxu0 %v12745_v33  ;;  %11622 = vmatpush3.bf16.msra.mxu1 %v12746_v34  ;;  %v12803_v33 = vld [vmem:[%s14199_s9 + $0x130] sm:$0xff]  }
 0x17f   : > { %11483 = vmatprep.subr.bf16.mxu0 %v13621_v0  ;;  %11623 = vmatprep.subr.bf16.mxu1 %v13621_v0  ;;  %v12804_v34 = vld [vmem:[%s14199_s9 + $0x2f0] sm:$0xff]  }
 0x182   : > { %11484 = vmatpush3.bf16.msra.mxu0 %v12747_v35  ;;  %11624 = vmatpush3.bf16.msra.mxu1 %v12748_v36  ;;  %v12805_v35 = vld [vmem:[%s14199_s9 + $0x138] sm:$0xff]  }
 0x183   : > { %11485 = vmatprep.subr.bf16.mxu0 %v13621_v0  ;;  %11625 = vmatprep.subr.bf16.mxu1 %v13621_v0  ;;  %v12806_v36 = vld [vmem:[%s14199_s9 + $0x2f8] sm:$0xff]  }
 0x186   : > { %11486 = vmatpush3.bf16.msra.mxu0 %v12749_v37  ;;  %11626 = vmatpush3.bf16.msra.mxu1 %v12750_v38  ;;  %v12807_v37 = vld [vmem:[%s14199_s9 + $0x140] sm:$0xff]  }
 0x187   : > { %11487 = vmatprep.subr.bf16.mxu0 %v13621_v0  ;;  %11627 = vmatprep.subr.bf16.mxu1 %v13621_v0  ;;  %v12808_v38 = vld [vmem:[%s14199_s9 + $0x340] sm:$0xff]  }
 0x18a   : > { %11488 = vmatpush3.bf16.msra.mxu0 %v12751_v39  ;;  %11628 = vmatpush3.bf16.msra.mxu1 %v12752_v40  ;;  %v12809_v39 = vld [vmem:[%s14199_s9 + $0x148] sm:$0xff]  }
 0x18b   : > { %11489 = vmatprep.subr.bf16.mxu0 %v13621_v0  ;;  %11629 = vmatprep.subr.bf16.mxu1 %v13621_v0  ;;  %v12810_v40 = vld [vmem:[%s14199_s9 + $0x348] sm:$0xff]  }
 0x18e   : > { %11490 = vmatpush3.bf16.msra.mxu0 %v12753_v41  ;;  %11630 = vmatpush3.bf16.msra.mxu1 %v12754_v42  ;;  %v12811_v41 = vld [vmem:[%s14199_s9 + $0x150] sm:$0xff]  }
 0x18f   : > { %11491 = vmatprep.subr.bf16.mxu0 %v13621_v0  ;;  %11631 = vmatprep.subr.bf16.mxu1 %v13621_v0  ;;  %v12812_v42 = vld [vmem:[%s14199_s9 + $0x350] sm:$0xff]  }
 0x192   : > { %11492 = vmatpush3.bf16.msra.mxu0 %v12755_v43  ;;  %11632 = vmatpush3.bf16.msra.mxu1 %v12756_v44  ;;  %v12813_v43 = vld [vmem:[%s14199_s9 + $0x158] sm:$0xff]  }
 0x193   : > { %11493 = vmatprep.subr.bf16.mxu0 %v13621_v0  ;;  %11633 = vmatprep.subr.bf16.mxu1 %v13621_v0  ;;  %v12814_v44 = vld [vmem:[%s14199_s9 + $0x358] sm:$0xff]  }
 0x196   : > { %11494 = vmatpush3.bf16.msra.mxu0 %v12757_v45  ;;  %11634 = vmatpush3.bf16.msra.mxu1 %v12758_v46  ;;  %v12815_v45 = vld [vmem:[%s14199_s9 + $0x160] sm:$0xff]  }
 0x197   : > { %11499 = vmatprep.subr.bf16.mxu0 %v13621_v0  ;;  %11639 = vmatprep.subr.bf16.mxu1 %v13621_v0  ;;  %v12816_v46 = vld [vmem:[%s14199_s9 + $0x360] sm:$0xff]  }
 0x199   : > { %11496 = vmatmul.mubr.bf16.vlgmr.msra.gmra.mrb[0].mxu0 %v14267_v13  ;;  %11636 = vmatmul.mubr.bf16.vlgmr.msra.gmra.mrb[0].mxu1 %v14285_v26  ;;  %v12798_v26 = vld [vmem:[%s14199_s9 + $0x2d8] sm:$0xff]  }
 0x19a   : > { %11500 = vmatpush3.bf16.msra.mxu0 %v12759_v47  ;;  %11640 = vmatpush3.bf16.msra.mxu1 %v12760_v48  ;;  %v12817_v47 = vld [vmem:[%s14199_s9 + $0x168] sm:$0xff]  }
 0x19b   : > { %11501 = vmatprep.subr.bf16.mxu0 %v13621_v0  ;;  %11641 = vmatprep.subr.bf16.mxu1 %v13621_v0  ;;  %v12818_v48 = vld [vmem:[%s14199_s9 + $0x368] sm:$0xff]  }
 0x19c   : > { %11515 = vmatprep.mubr.msk.bf16.mxu0 %vm13622_vm0, %v13621_v0  ;;  %11655 = vmatprep.mubr.msk.bf16.mxu1 %vm13622_vm0, %v13621_v0 }
 0x19e   : > { %11502 = vmatpush3.bf16.msra.mxu0 %v12761_v49  ;;  %11642 = vmatpush3.bf16.msra.mxu1 %v12762_v50  ;;  %v12819_v49 = vld [vmem:[%s14199_s9 + $0x170] sm:$0xff]  }
 0x19f   : > { %11503 = vmatprep.subr.bf16.mxu0 %v13621_v0  ;;  %11643 = vmatprep.subr.bf16.mxu1 %v13621_v0  ;;  %v12820_v50 = vld [vmem:[%s14199_s9 + $0x370] sm:$0xff]  }
 0x1a2   : > { %11504 = vmatpush3.bf16.msra.mxu0 %v12763_v51  ;;  %11644 = vmatpush3.bf16.msra.mxu1 %v12764_v52  ;;  %v12821_v51 = vld [vmem:[%s14199_s9 + $0x178] sm:$0xff]  }
 0x1a3   : > { %11505 = vmatprep.subr.bf16.mxu0 %v13621_v0  ;;  %11645 = vmatprep.subr.bf16.mxu1 %v13621_v0  ;;  %v12822_v52 = vld [vmem:[%s14199_s9 + $0x378] sm:$0xff]  }
 0x1a6   : > { %11506 = vmatpush3.bf16.msra.mxu0 %v12765_v53  ;;  %11646 = vmatpush3.bf16.msra.mxu1 %v12766_v54  ;;  %v12823_v53 = vld [vmem:[%s14199_s9 + $0x180] sm:$0xff]  }
 0x1a7   : > { %11507 = vmatprep.subr.bf16.mxu0 %v13621_v0  ;;  %11647 = vmatprep.subr.bf16.mxu1 %v13621_v0  ;;  %v12824_v54 = vld [vmem:[%s14199_s9 + $0x300] sm:$0xff]  }
 0x1aa   : > { %11508 = vmatpush3.bf16.msra.mxu0 %v12767_v55  ;;  %11648 = vmatpush3.bf16.msra.mxu1 %v12768_v56  ;;  %v12825_v55 = vld [vmem:[%s14199_s9 + $0x188] sm:$0xff]  }
 0x1ab   : > { %11509 = vmatprep.subr.bf16.mxu0 %v13621_v0  ;;  %11649 = vmatprep.subr.bf16.mxu1 %v13621_v0  ;;  %v12826_v56 = vld [vmem:[%s14199_s9 + $0x308] sm:$0xff]  }
 0x1ae   : > { %11510 = vmatpush3.bf16.msra.mxu0 %v12769_v57  ;;  %11650 = vmatpush3.bf16.msra.mxu1 %v12770_v58  ;;  %v12827_v57 = vld [vmem:[%s14199_s9 + $0x190] sm:$0xff]  }
 0x1af   : > { %11511 = vmatprep.subr.bf16.mxu0 %v13621_v0  ;;  %11651 = vmatprep.subr.bf16.mxu1 %v13621_v0  ;;  %v12828_v58 = vld [vmem:[%s14199_s9 + $0x310] sm:$0xff]  }
 0x1b2   : > { %11512 = vmatpush3.bf16.msra.mxu0 %v12771_v59  ;;  %11652 = vmatpush3.bf16.msra.mxu1 %v12772_v60  ;;  %v12830_v59 = vld [vmem:[%s14199_s9 + $0x318] sm:$0xff]   ;;  %v12831_v60 = vld [vmem:[%s14199_s9 + $0x1a0] sm:$0xff]  }
 0x1b3   : > { %11513 = vmatprep.subr.bf16.mxu0 %v13621_v0  ;;  %11653 = vmatprep.subr.bf16.mxu1 %v13621_v0 }
 0x1b6   : > { %11514 = vmatpush3.bf16.msra.mxu0 %v12773_v61  ;;  %11654 = vmatpush3.bf16.msra.mxu1 %v12774_v62  ;;  %v12832_v61 = vld [vmem:[%s14199_s9 + $0x320] sm:$0xff]   ;;  %v12833_v62 = vld [vmem:[%s14199_s9 + $0x1a8] sm:$0xff]  }
 0x1b7   : > { %11519 = vmatprep.subr.bf16.mxu0 %v13621_v0  ;;  %11659 = vmatprep.subr.bf16.mxu1 %v13621_v0 }
 0x1b9   : > { %11516 = vmatmul.mubr.bf16.vlgmr.msra.gmra.mrb[0].mxu0 %v14289_v28  ;;  %11656 = vmatmul.mubr.bf16.vlgmr.msra.gmra.mrb[0].mxu1 %v14279_v23 }
 0x1ba   : > { %11520 = vmatpush3.bf16.msra.mxu0 %v12775_v63  ;;  %11660 = vmatpush3.bf16.msra.mxu1 %v12776_v1  ;;  %v12834_v63 = vld [vmem:[%s14199_s9 + $0x328] sm:$0xff]   ;;  %v12835_v1 = vld [vmem:[%s14199_s9 + $0x1b0] sm:$0xff]  }
 0x1bb   : > { %11521 = vmatprep.subr.bf16.mxu0 %v13621_v0  ;;  %11661 = vmatprep.subr.bf16.mxu1 %v13621_v0 }
 0x1bc   : > { %11535 = vmatprep.mubr.msk.bf16.mxu0 %vm13622_vm0, %v13621_v0  ;;  %11675 = vmatprep.mubr.msk.bf16.mxu1 %vm13622_vm0, %v13621_v0 }
 0x1be   : > { %11522 = vmatpush3.bf16.msra.mxu0 %v12777_v2  ;;  %11662 = vmatpush3.bf16.msra.mxu1 %v12778_v3  ;;  %v12836_v2 = vld [vmem:[%s14199_s9 + $0x330] sm:$0xff]   ;;  %v12837_v3 = vld [vmem:[%s14199_s9 + $0x1b8] sm:$0xff]  }
 0x1bf   : > { %11523 = vmatprep.subr.bf16.mxu0 %v13621_v0  ;;  %11663 = vmatprep.subr.bf16.mxu1 %v13621_v0 }
 0x1c2   : > { %11524 = vmatpush3.bf16.msra.mxu0 %v12779_v4  ;;  %11664 = vmatpush3.bf16.msra.mxu1 %v12780_v5  ;;  %v12838_v4 = vld [vmem:[%s14199_s9 + $0x338] sm:$0xff]   ;;  %v1376_v5 = vrot.slane %v14267_v13, 3  ;;  %v12841_v13 = vld [vmem:[%s14199_s9 + $0x388] sm:$0xff]  }
 0x1c3   : > { %11525 = vmatprep.subr.bf16.mxu0 %v13621_v0  ;;  %11665 = vmatprep.subr.bf16.mxu1 %v13621_v0 }
 0x1c6   : > { %11526 = vmatpush3.bf16.msra.mxu0 %v12781_v6  ;;  %11666 = vmatpush3.bf16.msra.mxu1 %v12782_v7  ;;  %v12840_v6 = vld [vmem:[%s14199_s9 + $0x3c0] sm:$0xff]  }
 0x1c7   : > { %11527 = vmatprep.subr.bf16.mxu0 %v13621_v0  ;;  %11667 = vmatprep.subr.bf16.mxu1 %v13621_v0  ;;  %v12839_v7 = vld [vmem:[%s14199_s9 + $0x380] sm:$0xff]  }
 0x1ca   : > { %11528 = vmatpush3.bf16.msra.mxu0 %v12783_v8  ;;  %11668 = vmatpush3.bf16.msra.mxu1 %v12784_v9  ;;  %v12842_v8 = vld [vmem:[%s14199_s9 + $0x3c8] sm:$0xff]   ;;  %v12843_v9 = vld [vmem:[%s14199_s9 + $0x390] sm:$0xff]  }
 0x1cb   : > { %11529 = vmatprep.subr.bf16.mxu0 %v13621_v0  ;;  %11669 = vmatprep.subr.bf16.mxu1 %v13621_v0 }
 0x1ce   : > { %11530 = vmatpush3.bf16.msra.mxu0 %v12785_v10  ;;  %11670 = vmatpush3.bf16.msra.mxu1 %v12786_v11  ;;  %v12846_v10 = vld [vmem:[%s14199_s9 + $0x3d8] sm:$0xff]  }
 0x1cf   : > { %11531 = vmatprep.subr.bf16.mxu0 %v13621_v0  ;;  %11671 = vmatprep.subr.bf16.mxu1 %v13621_v0  ;;  %v12845_v11 = vld [vmem:[%s14199_s9 + $0x398] sm:$0xff]  }
 0x1d2   : > { %11532 = vmatpush3.bf16.msra.mxu0 %v12787_v12  ;;  %11672 = vmatpush3.bf16.msra.mxu1 %v12788_v14  ;;  %v12848_v12 = vld [vmem:[%s14199_s9 + $0x3e0] sm:$0xff]  }
 0x1d3   : > { %11533 = vmatprep.subr.bf16.mxu0 %v13621_v0  ;;  %11673 = vmatprep.subr.bf16.mxu1 %v13621_v0  ;;  %v12847_v14 = vld [vmem:[%s14199_s9 + $0x3a0] sm:$0xff]  }
 0x1d6   : > { %11534 = vmatpush3.bf16.msra.mxu0 %v12789_v15  ;;  %11674 = vmatpush3.bf16.msra.mxu1 %v12790_v16  ;;  %v12850_v15 = vld [vmem:[%s14199_s9 + $0x3e8] sm:$0xff]  }
 0x1d7   : > { %11539 = vmatprep.subr.bf16.mxu0 %v13621_v0  ;;  %11679 = vmatprep.subr.bf16.mxu1 %v13621_v0  ;;  %v12849_v16 = vld [vmem:[%s14199_s9 + $0x3a8] sm:$0xff]  }
 0x1d9   : > { %11536 = vmatmul.mubr.bf16.vlgmr.msra.gmra.mrb[0].mxu0 %v14279_v23  ;;  %11676 = vmatmul.mubr.bf16.vlgmr.msra.gmra.mrb[0].mxu1 %v14408_v18 }
 0x1da   : > { %11540 = vmatpush3.bf16.msra.mxu0 %v12791_v17  ;;  %11680 = vmatpush3.bf16.msra.mxu1 %v12792_v19  ;;  %v12852_v17 = vld [vmem:[%s14199_s9 + $0x3f0] sm:$0xff]  }
 0x1db   : > { %11541 = vmatprep.subr.bf16.mxu0 %v13621_v0  ;;  %11681 = vmatprep.subr.bf16.mxu1 %v13621_v0  ;;  %v12851_v19 = vld [vmem:[%s14199_s9 + $0x3b0] sm:$0xff]  }
 0x1dc   : > { %11695 = vmatprep.mubr.msk.bf16.mxu1 %vm13622_vm0, %v13621_v0  ;;  %11555 = vmatprep.mubr.msk.bf16.mxu0 %vm13622_vm0, %v13621_v0 }
 0x1de   : > { %11542 = vmatpush3.bf16.msra.mxu0 %v12793_v20  ;;  %11682 = vmatpush3.bf16.msra.mxu1 %v12794_v21  ;;  %v12854_v20 = vld [vmem:[%s14199_s9 + $0x3f8] sm:$0xff]  }
 0x1df   : > { %11543 = vmatprep.subr.bf16.mxu0 %v13621_v0  ;;  %11683 = vmatprep.subr.bf16.mxu1 %v13621_v0  ;;  %v12853_v21 = vld [vmem:[%s14199_s9 + $0x3b8] sm:$0xff]  }
 0x1e2   : > { %11544 = vmatpush3.bf16.msra.mxu0 %v12795_v22  ;;  %11684 = vmatpush3.bf16.msra.mxu1 %v12796_v24 }
 0x1e3   : > { %11545 = vmatprep.subr.bf16.mxu0 %v13621_v0  ;;  %11685 = vmatprep.subr.bf16.mxu1 %v13621_v0 }
 0x1e6   : > { %11546 = vmatpush3.bf16.msra.mxu0 %v12797_v25  ;;  %11686 = vmatpush3.bf16.msra.mxu1 %v12798_v26 }
 0x1e7   : > { %11547 = vmatprep.subr.bf16.mxu0 %v13621_v0  ;;  %11687 = vmatprep.subr.bf16.mxu1 %v13621_v0 }
 0x1ea   : > { %11548 = vmatpush3.bf16.msra.mxu0 %v12799_v27  ;;  %11688 = vmatpush3.bf16.msra.mxu1 %v12800_v29 }
 0x1eb   : > { %11549 = vmatprep.subr.bf16.mxu0 %v13621_v0  ;;  %11689 = vmatprep.subr.bf16.mxu1 %v13621_v0 }
 0x1ee   : > { %11550 = vmatpush3.bf16.msra.mxu0 %v12801_v30  ;;  %11690 = vmatpush3.bf16.msra.mxu1 %v12802_v31  ;;  %v12855_v30 = vld [vmem:[%s14579_s8] sm:$0xff]   ;;  %v12856_v31 = vld [vmem:[%s14579_s8 + $0x8] sm:$0xff]  }
 0x1ef   : > { %11551 = vmatprep.subr.bf16.mxu0 %v13621_v0  ;;  %11691 = vmatprep.subr.bf16.mxu1 %v13621_v0 }
 0x1f2   : > { %11552 = vmatpush3.bf16.msra.mxu0 %v12803_v33  ;;  %11692 = vmatpush3.bf16.msra.mxu1 %v12804_v34  ;;  %v12857_v33 = vld [vmem:[%s14579_s8 + $0x10] sm:$0xff]   ;;  %v12858_v34 = vld [vmem:[%s14579_s8 + $0x18] sm:$0xff]  }
 0x1f3   : > { %11553 = vmatprep.subr.bf16.mxu0 %v13621_v0  ;;  %11693 = vmatprep.subr.bf16.mxu1 %v13621_v0 }
 0x1f6   : > { %11554 = vmatpush3.bf16.msra.mxu0 %v12805_v35  ;;  %11694 = vmatpush3.bf16.msra.mxu1 %v12806_v36  ;;  %v12859_v36 = vld [vmem:[%s14579_s8 + $0x20] sm:$0xff]  }
 0x1f7   : > { %11559 = vmatprep.subr.bf16.mxu0 %v13621_v0  ;;  %11699 = vmatprep.subr.bf16.mxu1 %v13621_v0 }
 0x1f9   : > { %11556 = vmatmul.mubr.bf16.vlgmr.msra.gmra.mrb[0].mxu0 %v14408_v18  ;;  %11696 = vmatmul.mubr.bf16.vlgmr.msra.gmra.mrb[0].mxu1 %v14295_v32 }
 0x1fa   : > { %11560 = vmatpush3.bf16.msra.mxu0 %v12807_v37  ;;  %11700 = vmatpush3.bf16.msra.mxu1 %v12808_v38 }
 0x1fb   : > { %11561 = vmatprep.subr.bf16.mxu0 %v13621_v0  ;;  %11701 = vmatprep.subr.bf16.mxu1 %v13621_v0 }
 0x1fc   : > { %11575 = vmatprep.mubr.msk.bf16.mxu0 %vm13622_vm0, %v13621_v0  ;;  %11715 = vmatprep.mubr.msk.bf16.mxu1 %vm13622_vm0, %v13621_v0 }
 0x1fe   : > { %11562 = vmatpush3.bf16.msra.mxu0 %v12809_v39  ;;  %11702 = vmatpush3.bf16.msra.mxu1 %v12810_v40 }
 0x1ff   : > { %11563 = vmatprep.subr.bf16.mxu0 %v13621_v0  ;;  %11703 = vmatprep.subr.bf16.mxu1 %v13621_v0 }
 0x202   : > { %11564 = vmatpush3.bf16.msra.mxu0 %v12811_v41  ;;  %11704 = vmatpush3.bf16.msra.mxu1 %v12812_v42 }
 0x203   : > { %11565 = vmatprep.subr.bf16.mxu0 %v13621_v0  ;;  %11705 = vmatprep.subr.bf16.mxu1 %v13621_v0 }
 0x206   : > { %11566 = vmatpush3.bf16.msra.mxu0 %v12813_v43  ;;  %11706 = vmatpush3.bf16.msra.mxu1 %v12814_v44  ;;  %v12860_v44 = vld [vmem:[%s14579_s8 + $0x28] sm:$0xff]  }
 0x207   : > { %11567 = vmatprep.subr.bf16.mxu0 %v13621_v0  ;;  %11707 = vmatprep.subr.bf16.mxu1 %v13621_v0 }
 0x20a   : > { %11568 = vmatpush3.bf16.msra.mxu0 %v12815_v45  ;;  %11708 = vmatpush3.bf16.msra.mxu1 %v12816_v46  ;;  %v12861_v45 = vld [vmem:[%s14579_s8 + $0x30] sm:$0xff]   ;;  %v12862_v46 = vld [vmem:[%s14579_s8 + $0x38] sm:$0xff]  }
 0x20b   : > { %11569 = vmatprep.subr.bf16.mxu0 %v13621_v0  ;;  %11709 = vmatprep.subr.bf16.mxu1 %v13621_v0 }
 0x20e   : > { %11570 = vmatpush3.bf16.msra.mxu0 %v12817_v47  ;;  %11710 = vmatpush3.bf16.msra.mxu1 %v12818_v48 }
 0x20f   : > { %11571 = vmatprep.subr.bf16.mxu0 %v13621_v0  ;;  %11711 = vmatprep.subr.bf16.mxu1 %v13621_v0 }
 0x212   : > { %11572 = vmatpush3.bf16.msra.mxu0 %v12819_v49  ;;  %11712 = vmatpush3.bf16.msra.mxu1 %v12820_v50 }
 0x213   : > { %11573 = vmatprep.subr.bf16.mxu0 %v13621_v0  ;;  %11713 = vmatprep.subr.bf16.mxu1 %v13621_v0 }
 0x216   : > { %11574 = vmatpush3.bf16.msra.mxu0 %v12821_v51  ;;  %11714 = vmatpush3.bf16.msra.mxu1 %v12822_v52  ;;  %v10329_v51 = vld [vmem:[%s14221_s11] ss:$0 sm:$0xff] }
 0x217   : > { %11579 = vmatprep.subr.bf16.mxu0 %v13621_v0  ;;  %11719 = vmatprep.subr.bf16.mxu1 %v13621_v0 }
 0x219   : > { %11576 = vmatmul.mubr.bf16.vlgmr.msra.gmra.mrb[0].mxu0 %v14295_v32  ;;  %11716 = vmatmul.mubr.bf16.vlgmr.msra.gmra.mrb[4].mxu1 %v14279_v23  ;;  %v12829_v32 = vld [vmem:[%s14199_s9 + $0x198] sm:$0xff]  }
 0x21a   : > { %11580 = vmatpush3.bf16.msra.mxu0 %v12823_v53  ;;  %11720 = vmatpush3.bf16.msra.mxu1 %v12824_v54 }
 0x21b   : > { %11581 = vmatprep.subr.bf16.mxu0 %v13621_v0  ;;  %11721 = vmatprep.subr.bf16.mxu1 %v13621_v0 }
 0x21c   : > { %11595 = vmatprep.mubr.msk.bf16.mxu0 %vm13622_vm0, %v13621_v0  ;;  %11735 = vmatprep.mubr.msk.bf16.mxu1 %vm13622_vm0, %v13621_v0 }
 0x21e   : > { %11582 = vmatpush3.bf16.msra.mxu0 %v12825_v55  ;;  %11722 = vmatpush3.bf16.msra.mxu1 %v12826_v56 }
 0x21f   : > { %11583 = vmatprep.subr.bf16.mxu0 %v13621_v0  ;;  %11723 = vmatprep.subr.bf16.mxu1 %v13621_v0 }
 0x222   : > { %11584 = vmatpush3.bf16.msra.mxu0 %v12827_v57  ;;  %11724 = vmatpush3.bf16.msra.mxu1 %v12828_v58 }
 0x223   : > { %11585 = vmatprep.subr.bf16.mxu0 %v13621_v0  ;;  %11725 = vmatprep.subr.bf16.mxu1 %v13621_v0 }
 0x226   : > { %11586 = vmatpush3.bf16.msra.mxu0 %v12829_v32  ;;  %11726 = vmatpush3.bf16.msra.mxu1 %v12830_v59 }
 0x227   : > { %11587 = vmatprep.subr.bf16.mxu0 %v13621_v0  ;;  %11727 = vmatprep.subr.bf16.mxu1 %v13621_v0 }
 0x22a   : > { %11588 = vmatpush3.bf16.msra.mxu0 %v12831_v60  ;;  %11728 = vmatpush3.bf16.msra.mxu1 %v12832_v61 }
 0x22b   : > { %11589 = vmatprep.subr.bf16.mxu0 %v13621_v0  ;;  %11729 = vmatprep.subr.bf16.mxu1 %v13621_v0 }
 0x22e   : > { %11590 = vmatpush3.bf16.msra.mxu0 %v12833_v62  ;;  %11730 = vmatpush3.bf16.msra.mxu1 %v12834_v63 }
 0x22f   : > { %11591 = vmatprep.subr.bf16.mxu0 %v13621_v0  ;;  %11731 = vmatprep.subr.bf16.mxu1 %v13621_v0 }
 0x232   : > { %11592 = vmatpush3.bf16.msra.mxu0 %v12835_v1  ;;  %11732 = vmatpush3.bf16.msra.mxu1 %v12836_v2  ;;  %v10330_v1 = vld [vmem:[%s14221_s11 + $0x4] ss:$0 sm:$0xff] }
 0x233   : > { %11593 = vmatprep.subr.bf16.mxu0 %v13621_v0  ;;  %11733 = vmatprep.subr.bf16.mxu1 %v13621_v0 }
 0x236   : > { %11594 = vmatpush3.bf16.msra.mxu0 %v12837_v3  ;;  %11734 = vmatpush3.bf16.msra.mxu1 %v12838_v4 }
 0x237   : > { %11759 = vmatprep.subr.bf16.mxu0 %v13621_v0  ;;  %11739 = vmatprep.subr.bf16.mxu1 %v13621_v0 }
 0x239   : > { %11596 = vmatmul.mubr.bf16.vlgmr.msra.gmra.mrb[0].mxu0 %v1376_v5  ;;  %11736 = vmatmul.mubr.bf16.vlgmr.msra.gmra.mrb[4].mxu1 %v14289_v28  ;;  %v12844_v28 = vld [vmem:[%s14199_s9 + $0x3d0] sm:$0xff]   ;;  %s13623_s9 = smov 32  }
 0x23a   : > { %11760 = vmatpush3.bf16.msra.mxu0 %v12840_v6  ;;  %11740 = vmatpush3.bf16.msra.mxu1 %v12839_v7 }
 0x23b   : > { %11761 = vmatprep.subr.bf16.mxu0 %v13621_v0  ;;  %11741 = vmatprep.subr.bf16.mxu1 %v13621_v0 }
 0x23c   : > { %11755 = vmatprep.mubr.msk.bf16.mxu1 %vm13622_vm0, %v13621_v0  ;;  %11775 = vmatprep.mubr.msk.bf16.mxu0 %vm13622_vm0, %v13621_v0 }
 0x23e   : > { %11762 = vmatpush3.bf16.msra.mxu0 %v12842_v8  ;;  %11742 = vmatpush3.bf16.msra.mxu1 %v12841_v13 }
 0x23f   : > { %11763 = vmatprep.subr.bf16.mxu0 %v13621_v0  ;;  %11743 = vmatprep.subr.bf16.mxu1 %v13621_v0 }
 0x242   : > { %11764 = vmatpush3.bf16.msra.mxu0 %v12844_v28  ;;  %11744 = vmatpush3.bf16.msra.mxu1 %v12843_v9  ;;  %v12863_v9 = vld [vmem:[%s14579_s8 + $0x40] sm:$0xff]  }
 0x243   : > { %11765 = vmatprep.subr.bf16.mxu0 %v13621_v0  ;;  %11745 = vmatprep.subr.bf16.mxu1 %v13621_v0 }
 0x246   : > { %11766 = vmatpush3.bf16.msra.mxu0 %v12846_v10  ;;  %11746 = vmatpush3.bf16.msra.mxu1 %v12845_v11  ;;  %v12864_v10 = vld [vmem:[%s14579_s8 + $0x48] sm:$0xff]   ;;  %v12865_v11 = vld [vmem:[%s14579_s8 + $0x50] sm:$0xff]  }
 0x247   : > { %11767 = vmatprep.subr.bf16.mxu0 %v13621_v0  ;;  %11747 = vmatprep.subr.bf16.mxu1 %v13621_v0 }
 0x24a   : > { %11768 = vmatpush3.bf16.msra.mxu0 %v12848_v12  ;;  %11748 = vmatpush3.bf16.msra.mxu1 %v12847_v14  ;;  %v12866_v12 = vld [vmem:[%s14579_s8 + $0x58] sm:$0xff]   ;;  %v12867_v14 = vld [vmem:[%s14579_s8 + $0x60] sm:$0xff]  }
 0x24b   : > { %11769 = vmatprep.subr.bf16.mxu0 %v13621_v0  ;;  %11749 = vmatprep.subr.bf16.mxu1 %v13621_v0 }
 0x24e   : > { %11770 = vmatpush3.bf16.msra.mxu0 %v12850_v15  ;;  %11750 = vmatpush3.bf16.msra.mxu1 %v12849_v16  ;;  %v12868_v15 = vld [vmem:[%s14579_s8 + $0x68] sm:$0xff]   ;;  %v12869_v16 = vld [vmem:[%s14579_s8 + $0x70] sm:$0xff]  }
 0x24f   : > { %11771 = vmatprep.subr.bf16.mxu0 %v13621_v0  ;;  %11751 = vmatprep.subr.bf16.mxu1 %v13621_v0 }
 0x252   : > { %11772 = vmatpush3.bf16.msra.mxu0 %v12852_v17  ;;  %11752 = vmatpush3.bf16.msra.mxu1 %v12851_v19  ;;  %v12870_v17 = vld [vmem:[%s14579_s8 + $0x78] sm:$0xff]  }
 0x253   : > { %11773 = vmatprep.subr.bf16.mxu0 %v13621_v0  ;;  %11753 = vmatprep.subr.bf16.mxu1 %v13621_v0 }
 0x256   : > { %11774 = vmatpush3.bf16.msra.mxu0 %v12854_v20  ;;  %11754 = vmatpush3.bf16.msra.mxu1 %v12853_v21 }
 0x257   : > { %11779 = vmatprep.subr.bf16.mxu0 %v13621_v0  ;;  %11799 = vmatprep.subr.bf16.mxu1 %v13621_v0 }
 0x259   : > { %11776 = vmatmul.mubr.bf16.vlgmr.msra.gmra.mrb[4].mxu0 %v14279_v23  ;;  %11756 = vmatmul.mubr.bf16.vlgmr.msra.gmra.mrb[4].mxu1 %v14408_v18 }
 0x25a   : > { %11795 = vmatprep.mubr.msk.bf16.mxu0 %vm13622_vm0, %v13621_v0  ;;  %11815 = vmatprep.mubr.msk.bf16.mxu1 %vm13622_vm0, %v13621_v0 }
 0x25b   : > { %11780 = vmatpush3.bf16.msra.mxu0 %v12855_v30  ;;  %11800 = vmatpush3.bf16.msra.mxu1 %v12863_v9  ;;  %v12898_v9 = vld [vmem:[%s14207_s24 + $0x98] ss:$12 sps:$4 sm:$0xff]  }
 0x25c   : > { %11781 = vmatprep.subr.bf16.mxu0 %v13621_v0  ;;  %11801 = vmatprep.subr.bf16.mxu1 %v13621_v0 }
 0x25f   : > { %11782 = vmatpush3.bf16.msra.mxu0 %v12856_v31  ;;  %11802 = vmatpush3.bf16.msra.mxu1 %v12864_v10  ;;  %v12901_v10 = vld [vmem:[%s14207_s24 + $0xac] ss:$12 sps:$4 sm:$0xff]  }
 0x260   : > { %11783 = vmatprep.subr.bf16.mxu0 %v13621_v0  ;;  %11803 = vmatprep.subr.bf16.mxu1 %v13621_v0 }
 0x263   : > { %11784 = vmatpush3.bf16.msra.mxu0 %v12857_v33  ;;  %11804 = vmatpush3.bf16.msra.mxu1 %v12865_v11  ;;  %v12899_v11 = vld [vmem:[%s14207_s24 + $0xa8] ss:$12 sps:$4 sm:$0xff]  }
 0x264   : > { %11785 = vmatprep.subr.bf16.mxu0 %v13621_v0  ;;  %11805 = vmatprep.subr.bf16.mxu1 %v13621_v0 }
 0x267   : > { %11786 = vmatpush3.bf16.msra.mxu0 %v12858_v34  ;;  %11806 = vmatpush3.bf16.msra.mxu1 %v12866_v12  ;;  %v12902_v12 = vld [vmem:[%s14207_s24 + $0xb0] ss:$12 sps:$4 sm:$0xff]  }
 0x268   : > { %11787 = vmatprep.subr.bf16.mxu0 %v13621_v0  ;;  %11807 = vmatprep.subr.bf16.mxu1 %v13621_v0 }
 0x26b   : > { %11788 = vmatpush3.bf16.msra.mxu0 %v12859_v36  ;;  %11808 = vmatpush3.bf16.msra.mxu1 %v12867_v14 }
 0x26c   : > { %11789 = vmatprep.subr.bf16.mxu0 %v13621_v0  ;;  %11809 = vmatprep.subr.bf16.mxu1 %v13621_v0 }
 0x26f   : > { %11790 = vmatpush3.bf16.msra.mxu0 %v12860_v44  ;;  %11810 = vmatpush3.bf16.msra.mxu1 %v12868_v15  ;;  %v10357_v44 = vld [vmem:[%s14221_s11 + $0x5] ss:$0 sm:$0xff] }
 0x270   : > { %11791 = vmatprep.subr.bf16.mxu0 %v13621_v0  ;;  %11811 = vmatprep.subr.bf16.mxu1 %v13621_v0 }
 0x273   : > { %11792 = vmatpush3.bf16.msra.mxu0 %v12861_v45  ;;  %11812 = vmatpush3.bf16.msra.mxu1 %v12869_v16 }
 0x274   : > { %11793 = vmatprep.subr.bf16.mxu0 %v13621_v0  ;;  %11813 = vmatprep.subr.bf16.mxu1 %v13621_v0 }
 0x277   : > { %11794 = vmatpush3.bf16.msra.mxu0 %v12862_v46  ;;  %11814 = vmatpush3.bf16.msra.mxu1 %v12870_v17 }
 0x278   : > { %11819 = vmatprep.subr.bf16.mxu1 %v13621_v0 }
 0x2cc   : > { %v14569_v22 = vpop.f32.mrb[0].mxu1 }
 0x2cd   : > { %2455 = vrot.lane.b32.xlu0 %v14569_v22, %s13623_s9  ;;  %v11697_v24 = vpop.f32.mrb[1].mxu1 }
 0x2ce   : > { %v1991_v25 = vpop.f32.mrb[2].mxu1 }
 0x2cf   : > { %v11698_v26 = vpop.f32.mrb[3].mxu1  ;;  %v10339_v25 = vld [vmem:[%s14221_s11 + $0xc] ss:$0 sm:$0xff] }
 0x30c   : > { %v14573_v27 = vpop.f32.mrb[0].mxu0 }
 0x30d   : > { %v11597_v23 = vpop.f32.mrb[1].mxu0 }
 0x30e   : > { %v1463_v29 = vpop.f32.mrb[2].mxu0  ;;  %v10340_v23 = vld [vmem:[%s14221_s11 + $0x14] ss:$0 sm:$0xff] }
 0x30f   : > { %v11598_v18 = vpop.f32.mrb[3].mxu0 }
 0x32c   : > { %v14588_v35 = vpop.f32.mrb[4].mxu0  ;;  %v14591_v37 = vpop.f32.mrb[4].mxu1 }
 0x32d   : > { %v11777_v38 = vpop.f32.mrb[5].mxu0  ;;  %2463 = vrot.lane.b32.xlu1 %v14588_v35, %s13624_s2  ;;  %2459 = vrot.lane.b32.xlu0 %v14591_v37, %s13625_s29  ;;  %v11757_v39 = vpop.f32.mrb[5].mxu1 }
 0x32e   : > { %v2413_v40 = vpop.f32.mrb[6].mxu0  ;;  %v2307_v41 = vpop.f32.mrb[6].mxu1 }
 0x32f   : > { %v11778_v42 = vpop.f32.mrb[7].mxu0  ;;  %v11758_v43 = vpop.f32.mrb[7].mxu1 }
 0x33f   : > { %v2456_v47 = vpop.permute.xlu0 %2455 }
 0x340   : > { %v2467_v49 = vsel %vm2466_vm1, %v14573_v27, %v2456_v47 }
 0x39f   : > { %v2464_v48 = vpop.permute.xlu1 %2463  ;;  %v2460_v50 = vpop.permute.xlu0 %2459 }
 0x3a0   : > { %v2469_v52 = vsel %vm2468_vm2, %v2467_v49, %v2460_v50 }
 0x3a1   : > { %v2471_v53 = vsel %vm2470_vm3, %v2469_v52, %v2464_v48 }
 0x3a2   : > { %v2477_v54 = vadd.f32 %v10329_v51, %v2471_v53 }
 0x3a4   : > { %v2479_v55 = vmul.f32 0.044715, %v2477_v54  ;;  %v2478_v60 = vmul.f32 0.5, %v2477_v54 }
 0x3a6   : > { %v2480_v56 = vmul.f32 %v2479_v55, %v2477_v54  ;;  %v12871_v55 = vld [vmem:[%s14207_s24] ss:$12 sps:$4 sm:$0xff]  }
 0x3a8   : > { %v2481_v57 = vmul.f32 %v2480_v56, %v2477_v54  ;;  %v12874_v56 = vld [vmem:[%s14207_s24 + $0x8] ss:$12 sps:$4 sm:$0xff]  }
 0x3aa   : > { %v2482_v58 = vadd.f32 %v2481_v57, %v2477_v54  ;;  %v12873_v54 = vld [vmem:[%s14207_s24 + $0x4] ss:$12 sps:$4 sm:$0xff]  }
 0x3ab   : > { %2936 = vmatprep.subr.bf16.mxu0 %v12873_v54  ;;  %v12875_v57 = vld [vmem:[%s14207_s24 + $0x18] ss:$12 sps:$4 sm:$0xff]  }
 0x3ac   : > { %v2483_v32 = vmul.f32 0.7978846, %v2482_v58  ;;  %v12877_v58 = vld [vmem:[%s14207_s24 + $0x1c] ss:$12 sps:$4 sm:$0xff]  }
 0x3ae   : > { %13139 = vtanh.f32 %v2483_v32  ;;  %v12878_v32 = vld [vmem:[%s14207_s24 + $0x20] ss:$12 sps:$4 sm:$0xff]  }
 0x3b8   : > { %v13140_v59 = vpop.eup %13139 }
 0x3b9   : > { %v2485_v61 = vadd.f32 1.0, %v13140_v59  ;;  %v12881_v59 = vld [vmem:[%s14207_s24 + $0x34] ss:$12 sps:$4 sm:$0xff]  }
 0x3bb   : > { %v2486_v62 = vmul.f32 %v2485_v61, %v2478_v60  ;;  %v12879_v60 = vld [vmem:[%s14207_s24 + $0x30] ss:$12 sps:$4 sm:$0xff]   ;;  %v12882_v61 = vld [vmem:[%s14207_s24 + $0x38] ss:$12 sps:$4 sm:$0xff]  }
 0x3bd   : > { %v2487_v63 = vpack.c.bf16 %v2486_v62, %v2486_v62 }
 0x3bf   : > { %11796 = vmatmul.mubr.bf16.vlgmr.msra.gmra.mrb[8].mxu0 %v2487_v63  ;;  %v12883_v63 = vld [vmem:[%s14207_s24 + $0x48] ss:$12 sps:$4 sm:$0xff]  }
 0x3c0   : > { %2937 = vmatpush1.bf16.msra.mxu0 %v12871_v55 }
 0x3c1   : > { %2938 = vmatprep.subr.bf16.mxu0 %v12877_v58  ;;  %v14719_v58 = vld [vmem:[%s14716_s3] sm:$0x1] }
 0x3c2   : > { %vm704_vm4 = vcmp.gt.f32.partialorder %v14719_v58, 0.5 }
 0x3c4   : > { %2939 = vmatpush1.bf16.msra.mxu0 %v12875_v57  ;;  %v3129_v57 = vlaneseq }
 0x3c5   : > { %2940 = vmatprep.subr.bf16.mxu0 %v12881_v59 }
 0x3c8   : > { %2941 = vmatpush1.bf16.msra.mxu0 %v12879_v60 }
 0x492   : > { %v2591_v2 = vpop.f32.mrb[8].mxu0 }
 0x493   : > { %v2592_v3 = vadd.f32 %v10330_v1, %v2591_v2  ;;  %v11797_v4 = vpop.f32.mrb[9].mxu0  ;;  %v12886_v1 = vld [vmem:[%s14207_s24 + $0x50] ss:$12 sps:$4 sm:$0xff]  }
 0x494   : > { %v2594_v5 = vpop.f32.mrb[10].mxu0  ;;  %v12889_v2 = vld [vmem:[%s14207_s24 + $0x64] ss:$12 sps:$4 sm:$0xff]   ;;  %v12887_v4 = vld [vmem:[%s14207_s24 + $0x60] ss:$12 sps:$4 sm:$0xff]  }
 0x495   : > { %2599 = vadd.xlane.f32.xlu1 %v2592_v3  ;;  %v11798_v6 = vpop.f32.mrb[11].mxu0  ;;  %v12890_v5 = vld [vmem:[%s14207_s24 + $0x68] ss:$12 sps:$4 sm:$0xff]  }
 0x496   : > { %v12893_v6 = vld [vmem:[%s14207_s24 + $0x7c] ss:$12 sps:$4 sm:$0xff]  }
 0x522   : > { %v2600_v7 = vpop.xlane.xlu1 %2599 }
 0x523   : > { %v2602_v8 = vmul.f32 0.0078125, %v2600_v7  ;;  %v12891_v7 = vld [vmem:[%s14207_s24 + $0x78] ss:$12 sps:$4 sm:$0xff]  }
 0x525   : > { %v2603_v13 = vsub.f32 %v2592_v3, %v2602_v8  ;;  %v13626_v3 = vmov 0   ;;  %v12894_v8 = vld [vmem:[%s14207_s24 + $0x80] ss:$12 sps:$4 sm:$0xff]  }
 0x526   : > { %2968 = vmatprep.mubr.bf16.mxu0 %v13626_v3  ;;  %v3128_v60 = vsel %vm704_vm4, 1, %v13626_v3 }
 0x527   : > { %v2604_v28 = vmul.f32 %v2603_v13, %v2603_v13 }
 0x529   : > { %2605 = vadd.xlane.f32.xlu0 %v2604_v28  ;;  %v12895_v28 = vld [vmem:[%s14207_s24 + $0x90] ss:$12 sps:$4 sm:$0xff]  }
 0x5b6   : > { %v2606_v19 = vpop.xlane.xlu0 %2605 }
 0x5b7   : > { %v2607_v20 = vmul.f32 0.0078125, %v2606_v19  ;;  %v10366_v19 = vld [vmem:[%s14221_s11 + $0xd] ss:$0 sm:$0xff] }
 0x5b9   : > { %v2608_v21 = vadd.f32 1e-05, %v2607_v20 }
 0x5bb   : > { %13141 = vrsqrt.f32 %v2608_v21  ;;  %v10367_v21 = vld [vmem:[%s14221_s11 + $0x15] ss:$0 sm:$0xff] }
 0x5c5   : > { %v13142_v24 = vpop.eup %13141 }
 0x5c6   : > { %v2610_v26 = vmul.f32 %v13142_v24, %v2603_v13  ;;  %v12897_v13 = vld [vmem:[%s14207_s24 + $0x94] ss:$12 sps:$4 sm:$0xff]  }
 0x5c8   : > { %v2615_v29 = vmul.f32 %v10339_v25, %v2610_v26 }
 0x5ca   : > { %v2620_v18 = vadd.f32 %v10340_v23, %v2615_v29 }
 0x5cc   : > { %v2622_v30 = vmul.f32 0.044715, %v2620_v18  ;;  %v2621_v39 = vmul.f32 0.5, %v2620_v18 }
 0x5ce   : > { %v2623_v31 = vmul.f32 %v2622_v30, %v2620_v18 }
 0x5d0   : > { %v2624_v33 = vmul.f32 %v2623_v31, %v2620_v18 }
 0x5d2   : > { %v2625_v34 = vadd.f32 %v2624_v33, %v2620_v18 }
 0x5d4   : > { %v2626_v36 = vmul.f32 0.7978846, %v2625_v34 }
 0x5d6   : > { %13143 = vtanh.f32 %v2626_v36 }
 0x5e0   : > { %v13144_v38 = vpop.eup %13143 }
 0x5e1   : > { %v2628_v40 = vadd.f32 1.0, %v13144_v38 }
 0x5e3   : > { %v2629_v41 = vmul.f32 %v2628_v40, %v2621_v39  ;;  %v10392_v40 = vld [vmem:[%s14221_s11 + $0x1c] ss:$0 sm:$0xff] }
 0x5e5   : > { %v14628_v42 = vadd.f32 %v2629_v41, %v2486_v62  ;;  %v12885_v62 = vld [vmem:[%s14207_s24 + $0x4c] ss:$12 sps:$4 sm:$0xff]   ;;  %v10394_v41 = vld [vmem:[%s14221_s11 + $0x1e] ss:$0 sm:$0xff] }
 0x5e6   : > { %2942 = vmatprep.subr.bf16.mxu0 %v12885_v62 }
 0x5e7   : > { %v2631_v43 = vpack.c.bf16 %v14628_v42, %v14628_v42  ;;  %2943 = vmatpush1.bf16.msra.mxu0 %v12883_v63 }
 0x5e8   : > { %2944 = vmatprep.subr.bf16.mxu0 %v12889_v2 }
 0x5e9   : > { %11816 = vmatmul.mubr.bf16.vlgmr.msra.gmra.mrb[8].mxu1 %v2631_v43  ;;  %v10393_v43 = vld [vmem:[%s14221_s11 + $0x1d] ss:$0 sm:$0xff] }
 0x5ea   : > { %11835 = vmatprep.mubr.msk.bf16.mxu1 %vm13622_vm0, %v13621_v0  ;;  %11820 = vmatpush3.bf16.msra.mxu1 %v12874_v56 }
 0x5eb   : > { %11821 = vmatprep.subr.bf16.mxu1 %v13621_v0  ;;  %2945 = vmatpush1.bf16.msra.mxu0 %v12887_v4 }
 0x5ec   : > { %2946 = vmatprep.subr.bf16.mxu0 %v12893_v6 }
 0x5ee   : > { %11822 = vmatpush3.bf16.msra.mxu1 %v12878_v32  ;;  %v3130_v32 = vshrl.u32 %v3129_v57, 7 }
 0x5ef   : > { %11823 = vmatprep.subr.bf16.mxu1 %v13621_v0  ;;  %2947 = vmatpush1.bf16.msra.mxu0 %v12891_v7 }
 0x5f0   : > { %2948 = vmatprep.subr.bf16.mxu0 %v12897_v13  ;;  %v3131_v59 = vsub.s32 0, %v3130_v32 }
 0x5f2   : > { %11824 = vmatpush3.bf16.msra.mxu1 %v12882_v61  ;;  %v14723_v61 = vrot.slane %v3128_v60, %v3131_v59 }
 0x5f3   : > { %11825 = vmatprep.subr.bf16.mxu1 %v13621_v0  ;;  %2949 = vmatpush1.bf16.msra.mxu0 %v12895_v28 }
 0x5f4   : > { %2950 = vmatprep.subr.bf16.mxu0 %v12901_v10  ;;  %vm3133_vm5 = vcmp.eq.s32.totalorder %v14723_v61, 1 }
 0x5f6   : > { %11826 = vmatpush3.bf16.msra.mxu1 %v12886_v1 }
 0x5f7   : > { %11827 = vmatprep.subr.bf16.mxu1 %v13621_v0  ;;  %2951 = vmatpush1.bf16.msra.mxu0 %v12899_v11 }
 0x5f8   : > { %11839 = vmatprep.subr.mxu0 %v13621_v0 }
 0x5fa   : > { %11828 = vmatpush3.bf16.msra.mxu1 %v12890_v5 }
 0x5fb   : > { %11829 = vmatprep.subr.bf16.mxu1 %v13621_v0 }
 0x5fe   : > { %11830 = vmatpush3.bf16.msra.mxu1 %v12894_v8 }
 0x5ff   : > { %11831 = vmatprep.subr.bf16.mxu1 %v13621_v0 }
 0x602   : > { %11832 = vmatpush3.bf16.msra.mxu1 %v12898_v9 }
 0x603   : > { %11833 = vmatprep.subr.bf16.mxu1 %v13621_v0 }
 0x606   : > { %11834 = vmatpush3.bf16.msra.mxu1 %v12902_v12 }
 0x607   : > { %11844 = vmatprep.subr.mxu1 %v13621_v0 }
 0x6bc   : > { %v2736_v45 = vpop.f32.mrb[8].mxu1 }
 0x6bd   : > { %v2737_v46 = vadd.f32 %v10357_v44, %v2736_v45  ;;  %v11817_v47 = vpop.f32.mrb[9].mxu1 }
 0x6be   : > { %v2739_v48 = vpop.f32.mrb[10].mxu1 }
 0x6bf   : > { %2744 = vadd.xlane.f32.xlu0 %v2737_v46  ;;  %v11818_v49 = vpop.f32.mrb[11].mxu1 }
 0x74c   : > { %v2745_v50 = vpop.xlane.xlu0 %2744 }
 0x74d   : > { %v2746_v51 = vmul.f32 0.0078125, %v2745_v50 }
 0x74f   : > { %v14635_v52 = vsub.f32 %v2737_v46, %v2746_v51 }
 0x751   : > { %v2748_v53 = vmul.f32 %v14635_v52, %v14635_v52 }
 0x753   : > { %2749 = vadd.xlane.f32.xlu1 %v2748_v53 }
 0x7e0   : > { %v2750_v14 = vpop.xlane.xlu1 %2749 }
 0x7e1   : > { %v2751_v15 = vmul.f32 0.0078125, %v2750_v14 }
 0x7e3   : > { %v2752_v16 = vadd.f32 1e-05, %v2751_v15 }
 0x7e5   : > { %13145 = vrsqrt.f32 %v2752_v16 }
 0x7ef   : > { %v13146_v17 = vpop.eup %13145 }
 0x7f0   : > { %v2754_v20 = vmul.f32 %v13146_v17, %v14635_v52 }
 0x7f2   : > { %v2759_v24 = vmul.f32 %v10366_v19, %v2754_v20 }
 0x7f4   : > { %v2764_v25 = vadd.f32 %v10367_v21, %v2759_v24  ;;  %v12905_v24 = vld [vmem:[%s14214_s18 + $0x10] sm:$0xff]  }
 0x7f6   : > { %v2766_v26 = vmul.f32 0.044715, %v2764_v25  ;;  %v2765_v33 = vmul.f32 0.5, %v2764_v25 }
 0x7f8   : > { %v2767_v23 = vmul.f32 %v2766_v26, %v2764_v25 }
 0x7fa   : > { %v2768_v29 = vmul.f32 %v2767_v23, %v2764_v25 }
 0x7fc   : > { %v2769_v18 = vadd.f32 %v2768_v29, %v2764_v25  ;;  %v12906_v25 = vld [vmem:[%s14214_s18 + $0x18] sm:$0xff]   ;;  %v12903_v29 = vld [vmem:[%s14214_s18] sm:$0xff]  }
 0x7fe   : > { %v2770_v30 = vmul.f32 0.7978846, %v2769_v18 }
 0x800   : > { %13147 = vtanh.f32 %v2770_v30  ;;  %v12904_v30 = vld [vmem:[%s14214_s18 + $0x8] sm:$0xff]  }
 0x80a   : > { %v13148_v31 = vpop.eup %13147 }
 0x80b   : > { %v2772_v34 = vadd.f32 1.0, %v13148_v31 }
 0x80d   : > { %v2773_v36 = vmul.f32 %v2772_v34, %v2765_v33 }
 0x80f   : > { %v14677_v38 = vadd.f32 %v2773_v36, %v14628_v42 }
 0x811   : > { %v2775_v39 = vpack.c.bf16 %v14677_v38, %v14677_v38 }
 0x813   : > { %2969 = vmatmul.mubr.bf16.vlgmr.msra.gmra.mrb[12].mxu0 %v2775_v39  ;;  %11836 = vmatmul.mubr.bf16.vlgmr.msra.gmra.mrb[12].mxu1 %v2775_v39 }
 0x814   : > { %11841 = vmatprep.mubr.msk.f32.mxu0 %vm13622_vm0, %v13621_v0  ;;  %11846 = vmatprep.mubr.msk.f32.mxu1 %vm13622_vm0, %v13621_v0 }
 0x8e6   : > { %v2970_v44 = vpop.f32.mrb[12].mxu0  ;;  %v3011_v45 = vpop.f32.mrb[12].mxu1 }
 0x8e7   : > { %v3022_v46 = vadd.f32 %v10392_v40, %v2970_v44  ;;  %v14688_v47 = vadd.f32 %v10394_v41, %v3011_v45  ;;  %v2972_v42 = vpop.f32.mrb[13].mxu0  ;;  %v11837_v48 = vpop.f32.mrb[13].mxu1 }
 0x8e8   : > { %v14690_v49 = vadd.f32 %v10393_v43, %v2972_v42  ;;  %v2974_v50 = vpop.f32.mrb[14].mxu0  ;;  %v3014_v51 = vpop.f32.mrb[14].mxu1 }
 0x8e9   : > { %v14692_v52 = vmul.f32 0.17677669, %v3022_v46  ;;  %v2975_v53 = vpop.f32.mrb[15].mxu0  ;;  %v11838_v54 = vpop.f32.mrb[15].mxu1  ;;  %11845 = vmatpush3.msra.mxu1 %v14688_v47 }
 0x8ea   : > { %3223 = vrot.lane.b32.xlu0 %v14690_v49, %s13624_s2  ;;  %11840 = vmatpush3.xpose.msk.msra.mxu0 %vm2466_vm1, %v14690_v49 }
 0x8eb   : > { %3221 = vrot.lane.b32.xlu1 %v14692_v52, %s13624_s2  ;;  %11849 = vmatprep.subr.mxu0 %v13621_v0 }
 0x8ec   : > { %11854 = vmatprep.subr.mxu1 %v13621_v0 }
 0x8ed   : > { %11842 = vmatmul.mubr.msk.f32.vlgmr.msra.gmra.mrb[16].mxu0 %vm2466_vm1, %v14692_v52 }
 0x8ee   : > { %11851 = vmatprep.mubr.msk.f32.mxu0 %vm13622_vm0, %v13621_v0 }
 0x95c   : > { %v3224_v55 = vpop.permute.xlu0 %3223 }
 0x95d   : > { %11850 = vmatpush3.xpose.msk.msra.mxu0 %vm2466_vm1, %v3224_v55  ;;  %v3222_v56 = vpop.permute.xlu1 %3221 }
 0x95e   : > { %11859 = vmatprep.subr.bf16.mxu0 %v13621_v0 }
 0x960   : > { %11852 = vmatmul.mubr.msk.f32.vlgmr.msra.gmra.mrb[18].mxu0 %vm2466_vm1, %v3222_v56 }
 0x961   : > { %11863 = vmatprep.mubr.msk.bf16.mxu0 %vm13622_vm0, %v13621_v0  ;;  %11860 = vmatpush3.bf16.msra.mxu0 %v12905_v24  ;;  %v12910_v24 = vld [vmem:[%s14214_s18 + $0x38] sm:$0xff]  }
 0x962   : > { %11861 = vmatprep.subr.bf16.mxu0 %v13621_v0 }
 0x965   : > { %11862 = vmatpush3.bf16.msra.mxu0 %v12906_v25 }
 0x966   : > { %11875 = vmatprep.subr.mxu0 %v13621_v0 }
 0x9c0   : > { %v3124_v62 = vpop.f32.mrb[16].mxu0 }
 0x9c1   : > { %v3134_v63 = vsel %vm3133_vm5, %v3124_v62, -1e+30  ;;  %v11843_v1 = vpop.f32.mrb[17].mxu0 }
 0x9c2   : > { %v3136_v2 = vsel %vm3135_vm6, %v3134_v63, -inf }
 0x9c3   : > { %3137 = vmax.xlane.f32.xlu1 %v3136_v2 }
 0xa33   : > { %v3295_v4 = vpop.f32.mrb[18].mxu0 }
 0xa34   : > { %v3299_v5 = vsel %vm3133_vm5, %v3295_v4, -1e+30  ;;  %v11853_v6 = vpop.f32.mrb[19].mxu0  ;;  %v12907_v4 = vld [vmem:[%s14214_s18 + $0x20] sm:$0xff]  }
 0xa35   : > { %v3300_v7 = vsel %vm3135_vm6, %v3299_v5, -inf }
 0xa36   : > { %3301 = vmax.xlane.f32.xlu0 %v3300_v7 }
 0xa50   : > { %v3138_v8 = vpop.xlane.xlu1 %3137 }
 0xa51   : > { %v3139_v13 = vsub.f32 %v3134_v63, %v3138_v8  ;;  %v12908_v8 = vld [vmem:[%s14214_s18 + $0x28] sm:$0xff]  }
 0xa53   : > { %v3140_v28 = vmul.f32 1.442695, %v3139_v13 }
 0xa55   : > { %13149 = vpow2.f32 %v3140_v28 }
 0xa5f   : > { %v13150_v9 = vpop.eup %13149 }
 0xa60   : > { %v3142_v10 = vsel %vm3135_vm6, %v13150_v9, 0.0 }
 0xa61   : > { %3143 = vadd.xlane.f32.xlu0 %v3142_v10 }
 0xa77   : > { %3312 = vrot.lane.b32.xlu0 %v14688_v47, %s13624_s2 }
 0xac3   : > { %v3302_v11 = vpop.xlane.xlu0 %3301 }
 0xac4   : > { %v3303_v12 = vsub.f32 %v3299_v5, %v3302_v11 }
 0xac6   : > { %v3304_v14 = vmul.f32 1.442695, %v3303_v12 }
 0xac8   : > { %13151 = vpow2.f32 %v3304_v14 }
 0xad2   : > { %v13152_v15 = vpop.eup %13151 }
 0xad3   : > { %v3306_v16 = vsel %vm3135_vm6, %v13152_v15, 0.0 }
 0xad4   : > { %3307 = vadd.xlane.f32.xlu1 %v3306_v16 }
 0xae5   : > { %3501 = vrot.lane.b32.xlu1 %v14690_v49, %s13625_s29 }
 0xae9   : > { %3499 = vrot.lane.b32.xlu1 %v14692_v52, %s13625_s29 }
 0xaee   : > { %v3144_v17 = vpop.xlane.xlu0 %3143 }
 0xaef   : > { %13153 = vrcp.f32 %v3144_v17 }
 0xaf2   : > { %v3313_v21 = vpop.permute.xlu0 %3312 }
 0xaf9   : > { %v13154_v19 = vpop.eup %13153 }
 0xafa   : > { %v3146_v20 = vmul.f32 %v13154_v19, %v13150_v9 }
 0xafc   : > { %11847 = vmatmul.mubr.msk.f32.vlgmr.msra.gmra.mrb[16].mxu1 %vm3135_vm6, %v3146_v20 }
 0xafd   : > { %11855 = vmatpush3.msra.mxu1 %v3313_v21  ;;  %11856 = vmatprep.mubr.msk.f32.mxu1 %vm13622_vm0, %v13621_v0  ;;  %v12909_v21 = vld [vmem:[%s14214_s18 + $0x30] sm:$0xff]  }
 0xafe   : > { %11867 = vmatprep.subr.bf16.mxu1 %v13621_v0 }
 0xb61   : > { %v3308_v26 = vpop.xlane.xlu1 %3307 }
 0xb62   : > { %13155 = vrcp.f32 %v3308_v26 }
 0xb65   : > { %v3502_v41 = vpop.permute.xlu1 %3501 }
 0xb69   : > { %v3500_v43 = vpop.permute.xlu1 %3499 }
 0xb6c   : > { %v13156_v23 = vpop.eup %13155 }
 0xb6d   : > { %v3310_v18 = vmul.f32 %v13156_v23, %v13152_v15 }
 0xb6f   : > { %11857 = vmatmul.mubr.msk.f32.vlgmr.msra.gmra.mrb[18].mxu1 %vm3135_vm6, %v3310_v18 }
 0xb70   : > { %11868 = vmatpush3.bf16.msra.mxu1 %v12903_v29  ;;  %11871 = vmatprep.mubr.msk.bf16.mxu1 %vm13622_vm0, %v13621_v0 }
 0xb71   : > { %11869 = vmatprep.subr.bf16.mxu1 %v13621_v0 }
 0xb74   : > { %11870 = vmatpush3.bf16.msra.mxu1 %v12904_v30 }
 0xb75   : > { %11880 = vmatprep.subr.mxu1 %v13621_v0 }
 0xbcf   : > { %v3216_v31 = vpop.f32.mrb[16].mxu1 }
 0xbd0   : > { %v3220_v33 = vpack.c.bf16 %v3216_v31, %v3216_v31  ;;  %v11848_v34 = vpop.f32.mrb[17].mxu1 }
 0xbd2   : > { %11872 = vmatmul.mubr.msk.bf16.vlgmr.msra.gmra.mrb[20].mxu1 %vm2466_vm1, %v3220_v33 }
 0xbd3   : > { %11882 = vmatprep.mubr.msk.f32.mxu1 %vm13622_vm0, %v13621_v0 }
 0xc42   : > { %v3384_v36 = vpop.f32.mrb[18].mxu1 }
 0xc43   : > { %v3388_v39 = vpack.c.bf16 %v3384_v36, %v3384_v36  ;;  %v11858_v40 = vpop.f32.mrb[19].mxu1 }
 0xc45   : > { %11864 = vmatmul.mubr.msk.bf16.vlgmr.msra.gmra.mrb[20].mxu0 %vm2466_vm1, %v3388_v39 }
 0xc46   : > { %11876 = vmatpush3.xpose.msk.msra.mxu0 %vm2466_vm1, %v3502_v41  ;;  %11877 = vmatprep.mubr.msk.f32.mxu0 %vm13622_vm0, %v13621_v0 }
 0xc47   : > { %11885 = vmatprep.subr.bf16.mxu0 %v13621_v0 }
 0xc4d   : > { %11878 = vmatmul.mubr.msk.f32.vlgmr.msra.gmra.mrb[24].mxu0 %vm2466_vm1, %v3500_v43  ;;  %v10431_v43 = vld [vmem:[%s14221_s11 + $0x1] ss:$0 sm:$0xff] }
 0xc4e   : > { %11889 = vmatprep.mubr.msk.bf16.mxu0 %vm13622_vm0, %v13621_v0  ;;  %11886 = vmatpush3.bf16.msra.mxu0 %v12907_v4 }
 0xc4f   : > { %11887 = vmatprep.subr.bf16.mxu0 %v13621_v0 }
 0xc52   : > { %11888 = vmatpush3.bf16.msra.mxu0 %v12908_v8 }
 0xc53   : > { %11903 = vmatprep.subr.bf16.mxu0 %v13621_v0 }
 0xca5   : > { %v3493_v44 = vpop.f32.mrb[20].mxu1 }
 0xca6   : > { %v11873_v45 = vpop.f32.mrb[21].mxu1 }
 0xca7   : > { %v3496_v46 = vpop.f32.mrb[22].mxu1 }
 0xca8   : > { %v11874_v42 = vpop.f32.mrb[23].mxu1 }
 0xd18   : > { %v3438_v48 = vpop.f32.mrb[20].mxu0 }
 0xd19   : > { %v14766_v50 = vadd.f32 %v3493_v44, %v3438_v48  ;;  %v11865_v51 = vpop.f32.mrb[21].mxu0 }
 0xd1a   : > { %v3441_v53 = vpop.f32.mrb[22].mxu0  ;;  %v12911_v51 = vld [vmem:[%s14579_s8 + $0x80] sm:$0xff]  }
 0xd1b   : > { %v11866_v54 = vpop.f32.mrb[23].mxu0 }
 0xd20   : > { %v3573_v55 = vpop.f32.mrb[24].mxu0 }
 0xd21   : > { %v3577_v56 = vsel %vm3133_vm5, %v3573_v55, -1e+30  ;;  %v11879_v57 = vpop.f32.mrb[25].mxu0  ;;  %v12912_v55 = vld [vmem:[%s14579_s8 + $0x88] sm:$0xff]  }
 0xd22   : > { %v3578_v32 = vsel %vm3135_vm6, %v3577_v56, -inf  ;;  %v12913_v57 = vld [vmem:[%s14579_s8 + $0x90] sm:$0xff]  }
 0xd23   : > { %3579 = vmax.xlane.f32.xlu0 %v3578_v32 }
 0xd39   : > { %3589 = vrot.lane.b32.xlu0 %v14688_v47, %s13625_s29 }
 0xd3d   : > { %3722 = vrot.lane.b32.xlu0 %v14692_v52, %s13623_s9 }
 0xdb0   : > { %v3580_v59 = vpop.xlane.xlu0 %3579 }
 0xdb1   : > { %v3581_v60 = vsub.f32 %v3577_v56, %v3580_v59  ;;  %v12914_v59 = vld [vmem:[%s14579_s8 + $0x98] sm:$0xff]  }
 0xdb3   : > { %v3582_v62 = vmul.f32 1.442695, %v3581_v60  ;;  %v12915_v60 = vld [vmem:[%s14579_s8 + $0xa0] sm:$0xff]  }
 0xdb4   : > { %v3590_v63 = vpop.permute.xlu0 %3589 }
 0xdb5   : > { %13157 = vpow2.f32 %v3582_v62  ;;  %11881 = vmatpush3.msra.mxu1 %v3590_v63  ;;  %v12916_v62 = vld [vmem:[%s14579_s8 + $0xa8] sm:$0xff]  }
 0xdb6   : > { %11893 = vmatprep.subr.mxu1 %v13621_v0 }
 0xdbf   : > { %v13158_v1 = vpop.eup %13157 }
 0xdc0   : > { %v3584_v2 = vsel %vm3135_vm6, %v13158_v1, 0.0 }
 0xdc1   : > { %3585 = vadd.xlane.f32.xlu1 %v3584_v2 }
 0xdd2   : > { %3724 = vrot.lane.b32.xlu1 %v14690_v49, %s13623_s9  ;;  %v3723_v49 = vpop.permute.xlu0 %3722 }
 0xe4e   : > { %v3586_v52 = vpop.xlane.xlu1 %3585 }
 0xe4f   : > { %13159 = vrcp.f32 %v3586_v52  ;;  %v12918_v52 = vld [vmem:[%s14579_s8 + $0xb8] sm:$0xff]  }
 0xe52   : > { %v3725_v7 = vpop.permute.xlu1 %3724 }
 0xe59   : > { %v13160_v5 = vpop.eup %13159 }
 0xe5a   : > { %v3588_v6 = vmul.f32 %v13160_v5, %v13158_v1  ;;  %v12917_v1 = vld [vmem:[%s14579_s8 + $0xb0] sm:$0xff]  }
 0xe5c   : > { %11883 = vmatmul.mubr.msk.f32.vlgmr.msra.gmra.mrb[24].mxu1 %vm3135_vm6, %v3588_v6 }
 0xe5d   : > { %11894 = vmatpush3.xpose.msk.msra.mxu1 %vm2466_vm1, %v3725_v7  ;;  %11895 = vmatprep.mubr.msk.f32.mxu1 %vm13622_vm0, %v13621_v0 }
 0xe5e   : > { %11898 = vmatprep.subr.mxu1 %v13621_v0 }
 0xe60   : > { %11896 = vmatmul.mubr.msk.f32.vlgmr.msra.gmra.mrb[26].mxu1 %vm2466_vm1, %v3723_v49  ;;  %v10419_v49 = vld [vmem:[%s14221_s11 + $0x28] ss:$0 sm:$0xff] }
 0xe61   : > { %11900 = vmatprep.mubr.msk.f32.mxu1 %vm13622_vm0, %v13621_v0 }
 0xf2f   : > { %v3661_v13 = vpop.f32.mrb[24].mxu1 }
 0xf30   : > { %v3665_v28 = vpack.c.bf16 %v3661_v13, %v3661_v13  ;;  %v11884_v9 = vpop.f32.mrb[25].mxu1 }
 0xf32   : > { %11890 = vmatmul.mubr.msk.bf16.vlgmr.msra.gmra.mrb[28].mxu0 %vm2466_vm1, %v3665_v28 }
 0xf33   : > { %v3796_v10 = vpop.f32.mrb[26].mxu1  ;;  %11907 = vmatprep.mubr.msk.bf16.mxu0 %vm13622_vm0, %v13621_v0  ;;  %11904 = vmatpush3.bf16.msra.mxu0 %v12909_v21 }
 0xf34   : > { %v3800_v11 = vsel %vm3133_vm5, %v3796_v10, -1e+30  ;;  %v11897_v12 = vpop.f32.mrb[27].mxu1  ;;  %11905 = vmatprep.subr.bf16.mxu0 %v13621_v0 }
 0xf35   : > { %v3801_v14 = vsel %vm3135_vm6, %v3800_v11, -inf }
 0xf36   : > { %3802 = vmax.xlane.f32.xlu1 %v3801_v14 }
 0xf37   : > { %11906 = vmatpush3.bf16.msra.mxu0 %v12910_v24  ;;  %v10448_v24 = vld [vmem:[%s14221_s11 + $0x6] ss:$0 sm:$0xff] }
 0xf38   : > { %11936 = vmatprep.subr.bf16.mxu0 %v13621_v0 }
 0xf47   : > { %4157 = vrot.lane.b32.xlu1 %v14573_v27, %s13624_s2 }
 0xf4b   : > { %4160 = vrot.lane.b32.xlu1 %v14591_v37, %s13623_s9 }
 0xfc3   : > { %v3803_v15 = vpop.xlane.xlu1 %3802 }
 0xfc4   : > { %v3804_v16 = vsub.f32 %v3800_v11, %v3803_v15 }
 0xfc6   : > { %v3805_v17 = vmul.f32 1.442695, %v3804_v16 }
 0xfc7   : > { %v4158_v34 = vpop.permute.xlu1 %4157 }
 0xfc8   : > { %13161 = vpow2.f32 %v3805_v17  ;;  %v4166_v40 = vsel %vm2466_vm1, %v4158_v34, %v14569_v22  ;;  %v10420_v34 = vld [vmem:[%s14221_s11 + $0x2c] ss:$0 sm:$0xff] }
 0xfcb   : > { %v4161_v36 = vpop.permute.xlu1 %4160 }
 0xfcc   : > { %v4167_v41 = vsel %vm2468_vm2, %v4166_v40, %v4161_v36 }
 0xfd2   : > { %v13162_v19 = vpop.eup %13161 }
 0xfd3   : > { %v3807_v20 = vsel %vm3135_vm6, %v13162_v19, 0.0 }
 0xfd4   : > { %3808 = vadd.xlane.f32.xlu0 %v3807_v20 }
 0xfea   : > { %3812 = vrot.lane.b32.xlu0 %v14688_v47, %s13623_s9 }
 0xfee   : > { %4163 = vrot.lane.b32.xlu0 %v14588_v35, %s13625_s29 }
0x1005   : > { %v3715_v25 = vpop.f32.mrb[28].mxu0 }
0x1006   : > { %v14811_v26 = vadd.f32 %v3715_v25, %v14766_v50  ;;  %v11891_v23 = vpop.f32.mrb[29].mxu0 }
0x1007   : > { %v3718_v29 = vpop.f32.mrb[30].mxu0 }
0x1008   : > { %v11892_v18 = vpop.f32.mrb[31].mxu0 }
0x1061   : > { %v3809_v47 = vpop.xlane.xlu0 %3808 }
0x1062   : > { %13163 = vrcp.f32 %v3809_v47 }
0x1065   : > { %v3813_v30 = vpop.permute.xlu0 %3812 }
0x1066   : > { %11899 = vmatpush3.msra.mxu1 %v3813_v30 }
0x1067   : > { %11911 = vmatprep.subr.mxu1 %v13621_v0 }
0x1069   : > { %v4164_v39 = vpop.permute.xlu0 %4163 }
0x106a   : > { %v4168_v44 = vsel %vm2470_vm3, %v4167_v41, %v4164_v39  ;;  %v10421_v39 = vld [vmem:[%s14221_s11 + $0x30] ss:$0 sm:$0xff] }
0x106b   : > { %v4174_v45 = vadd.f32 %v10431_v43, %v4168_v44  ;;  %v12920_v43 = vld [vmem:[%s14861_s21 + $0x8] sm:$0xff]   ;;  %v12921_v44 = vld [vmem:[%s14861_s21 + $0x10] sm:$0xff]  }
0x106c   : > { %v13164_v31 = vpop.eup %13163 }
0x106d   : > { %v3811_v33 = vmul.f32 %v13164_v31, %v13162_v19  ;;  %v4176_v46 = vmul.f32 0.044715, %v4174_v45  ;;  %v4175_v4 = vmul.f32 0.5, %v4174_v45 }
0x106f   : > { %11901 = vmatmul.mubr.msk.f32.vlgmr.msra.gmra.mrb[28].mxu1 %vm3135_vm6, %v3811_v33  ;;  %v4177_v42 = vmul.f32 %v4176_v46, %v4174_v45  ;;  %v12923_v46 = vld [vmem:[%s14861_s21 + $0x20] sm:$0xff]  }
0x1070   : > { %11913 = vmatprep.mubr.msk.f32.mxu1 %vm13622_vm0, %v13621_v0 }
0x1071   : > { %v4178_v48 = vmul.f32 %v4177_v42, %v4174_v45  ;;  %v12924_v42 = vld [vmem:[%s14861_s21 + $0x28] sm:$0xff]  }
0x1073   : > { %v4179_v56 = vadd.f32 %v4178_v48, %v4174_v45  ;;  %v12922_v45 = vld [vmem:[%s14861_s21 + $0x18] sm:$0xff]   ;;  %v12925_v48 = vld [vmem:[%s14861_s21 + $0x30] sm:$0xff]  }
0x1075   : > { %v4180_v32 = vmul.f32 0.7978846, %v4179_v56 }
0x1077   : > { %13165 = vtanh.f32 %v4180_v32 }
0x1081   : > { %v13166_v63 = vpop.eup %13165 }
0x1082   : > { %v4182_v2 = vadd.f32 1.0, %v13166_v63 }
0x1084   : > { %v14840_v5 = vmul.f32 %v4182_v2, %v4175_v4 }
0x1086   : > { %v4184_v6 = vpack.c.bf16 %v14840_v5, %v14840_v5 }
0x1142   : > { %v3884_v50 = vpop.f32.mrb[28].mxu1 }
0x1143   : > { %v3888_v53 = vpack.c.bf16 %v3884_v50, %v3884_v50  ;;  %v11902_v54 = vpop.f32.mrb[29].mxu1  ;;  %v12926_v50 = vld [vmem:[%s14861_s21 + $0x38] sm:$0xff]  }
0x1145   : > { %11908 = vmatmul.mubr.msk.bf16.vlgmr.msra.gmra.mrb[32].mxu0 %vm2466_vm1, %v3888_v53 }
0x1146   : > { %11937 = vmatpush3.bf16.msra.mxu0 %v12911_v51  ;;  %11952 = vmatprep.mubr.msk.bf16.mxu0 %vm13622_vm0, %v13621_v0 }
0x1147   : > { %11938 = vmatprep.subr.bf16.mxu0 %v13621_v0 }
0x114a   : > { %11939 = vmatpush3.bf16.msra.mxu0 %v12912_v55 }
0x114b   : > { %11940 = vmatprep.subr.bf16.mxu0 %v13621_v0 }
0x114e   : > { %11941 = vmatpush3.bf16.msra.mxu0 %v12913_v57  ;;  %v10457_v57 = vld [vmem:[%s14221_s11 + $0xe] ss:$0 sm:$0xff] }
0x114f   : > { %11942 = vmatprep.subr.bf16.mxu0 %v13621_v0 }
0x1152   : > { %11943 = vmatpush3.bf16.msra.mxu0 %v12914_v59 }
0x1153   : > { %11944 = vmatprep.subr.bf16.mxu0 %v13621_v0 }
0x1156   : > { %11945 = vmatpush3.bf16.msra.mxu0 %v12915_v60  ;;  %v10458_v60 = vld [vmem:[%s14221_s11 + $0x16] ss:$0 sm:$0xff] }
0x1157   : > { %11946 = vmatprep.subr.bf16.mxu0 %v13621_v0 }
0x115a   : > { %11947 = vmatpush3.bf16.msra.mxu0 %v12916_v62 }
0x115b   : > { %11948 = vmatprep.subr.bf16.mxu0 %v13621_v0 }
0x115e   : > { %11949 = vmatpush3.bf16.msra.mxu0 %v12917_v1 }
0x115f   : > { %11950 = vmatprep.subr.bf16.mxu0 %v13621_v0 }
0x1162   : > { %11951 = vmatpush3.bf16.msra.mxu0 %v12918_v52 }
0x1165   : > { %11953 = vmatmul.mubr.bf16.vlgmr.msra.gmra.mrb[36].mxu0 %v4184_v6 }
0x1166   : > { %4666 = vmatprep.mubr.bf16.mxu0 %v13626_v3 }
0x1218   : > { %v3938_v7 = vpop.f32.mrb[32].mxu0 }
0x1219   : > { %v3944_v8 = vadd.f32 %v3938_v7, %v14811_v26  ;;  %v11909_v13 = vpop.f32.mrb[33].mxu0  ;;  %v2417_v26 = vsel %vm2416_vm7, %v14719_v58, 0.0 }
0x121a   : > { %v3941_v28 = vpop.f32.mrb[34].mxu0 }
0x121b   : > { %v3950_v9 = vadd.f32 %v10419_v49, %v3944_v8  ;;  %v11910_v10 = vpop.f32.mrb[35].mxu0  ;;  %v12927_v8 = vld [vmem:[%s14579_s8 + $0xc0] sm:$0xff]  }
0x121d   : > { %v3951_v11 = vadd.f32 %v3950_v9, %v14677_v38  ;;  %v12928_v9 = vld [vmem:[%s14579_s8 + $0xc8] sm:$0xff]  }
0x121f   : > { %3954 = vadd.xlane.f32.xlu1 %v3951_v11 }
0x1238   : > { %v4289_v12 = vpop.f32.mrb[36].mxu0 }
0x1239   : > { %v11954_v14 = vpop.f32.mrb[37].mxu0  ;;  %v4290_v25 = vadd.f32 %v10448_v24, %v4289_v12  ;;  %v12930_v12 = vld [vmem:[%s14579_s8 + $0xd8] sm:$0xff]  }
0x123a   : > { %v4292_v15 = vpop.f32.mrb[38].mxu0  ;;  %v12931_v14 = vld [vmem:[%s14579_s8 + $0xe0] sm:$0xff]   ;;  %v12934_v24 = vld [vmem:[%s14579_s8 + $0xf8] sm:$0xff]  }
0x123b   : > { %v11955_v16 = vpop.f32.mrb[39].mxu0 }
0x123c   : > { %v12932_v16 = vld [vmem:[%s14579_s8 + $0xe8] sm:$0xff]  }
0x12ac   : > { %v3955_v17 = vpop.xlane.xlu1 %3954 }
0x12ad   : > { %v3956_v19 = vmul.f32 0.0078125, %v3955_v17 }
0x12af   : > { %v3957_v20 = vsub.f32 %v3951_v11, %v3956_v19  ;;  %v12929_v11 = vld [vmem:[%s14579_s8 + $0xd0] sm:$0xff]  }
0x12b1   : > { %v3958_v21 = vmul.f32 %v3957_v20, %v3957_v20 }
0x12b3   : > { %3959 = vadd.xlane.f32.xlu0 %v3958_v21 }
0x12b7   : > { %4297 = vadd.xlane.f32.xlu0 %v4290_v25 }
0x12bb   : > { %2418 = vadd.xlane.f32.xlu0 %v2417_v26 }
0x1340   : > { %v3960_v38 = vpop.xlane.xlu0 %3959 }
0x1341   : > { %v3961_v23 = vmul.f32 0.0078125, %v3960_v38 }
0x1343   : > { %v3962_v29 = vadd.f32 1e-05, %v3961_v23 }
0x1344   : > { %v4298_v18 = vpop.xlane.xlu0 %4297 }
0x1345   : > { %13167 = vrsqrt.f32 %v3962_v29  ;;  %v4299_v47 = vmul.f32 0.0078125, %v4298_v18 }
0x1347   : > { %v4300_v30 = vsub.f32 %v4290_v25, %v4299_v47 }
0x1348   : > { %v2419_v32 = vpop.xlane.xlu0 %2418 }
0x1349   : > { %v4301_v31 = vmul.f32 %v4300_v30, %v4300_v30  ;;  %v2420_v62 = vmax.f32 %v2419_v32, 1e-09  ;;  %v12954_v32 = vld [vmem:[%s14207_s24 + $0x128] ss:$12 sps:$4 sm:$0xff]  }
0x134b   : > { %4302 = vadd.xlane.f32.xlu1 %v4301_v31 }
0x134f   : > { %v13168_v33 = vpop.eup %13167 }
0x1350   : > { %v3964_v36 = vmul.f32 %v13168_v33, %v3957_v20  ;;  %v12933_v20 = vld [vmem:[%s14579_s8 + $0xf0] sm:$0xff]  }
0x1352   : > { %v3969_v40 = vmul.f32 %v10420_v34, %v3964_v36 }
0x1354   : > { %v3974_v41 = vadd.f32 %v10421_v39, %v3969_v40 }
0x1356   : > { %11912 = vmatpush3.msra.mxu1 %v3974_v41 }
0x1357   : > { %11914 = vmatmul.mubr.msk.f32.vlgmr.msra.gmra.mrb[30].mxu1 %vm3135_vm6, %v14719_v58  ;;  %11916 = vmatprep.subr.bf16.mxu1 %v13621_v0  ;;  %v12919_v58 = vld [vmem:[%s14861_s21] sm:$0xff]  }
0x1358   : > { %11932 = vmatprep.mubr.msk.bf16.mxu1 %vm13622_vm0, %v13621_v0  ;;  %11917 = vmatpush3.bf16.msra.mxu1 %v12919_v58  ;;  %v12937_v58 = vld [vmem:[%s14207_s24 + $0xc4] ss:$12 sps:$4 sm:$0xff]  }
0x1359   : > { %11918 = vmatprep.subr.bf16.mxu1 %v13621_v0  ;;  %4634 = vmatprep.subr.bf16.mxu0 %v12937_v58  ;;  %v10544_v58 = vld [vmem:[%s14221_s11 + $0x21] ss:$0 sm:$0xff] }
0x135c   : > { %11919 = vmatpush3.bf16.msra.mxu1 %v12920_v43  ;;  %v12935_v43 = vld [vmem:[%s14207_s24 + $0xc0] ss:$12 sps:$4 sm:$0xff]  }
0x135d   : > { %11920 = vmatprep.subr.bf16.mxu1 %v13621_v0  ;;  %4635 = vmatpush1.bf16.msra.mxu0 %v12935_v43 }
0x1360   : > { %11921 = vmatpush3.bf16.msra.mxu1 %v12921_v44  ;;  %v12938_v44 = vld [vmem:[%s14207_s24 + $0xc8] ss:$12 sps:$4 sm:$0xff]  }
0x1361   : > { %11922 = vmatprep.subr.bf16.mxu1 %v13621_v0 }
0x1364   : > { %11923 = vmatpush3.bf16.msra.mxu1 %v12922_v45  ;;  %v12939_v45 = vld [vmem:[%s14207_s24 + $0xd8] ss:$12 sps:$4 sm:$0xff]  }
0x1365   : > { %11924 = vmatprep.subr.bf16.mxu1 %v13621_v0 }
0x1368   : > { %11925 = vmatpush3.bf16.msra.mxu1 %v12923_v46  ;;  %v12941_v46 = vld [vmem:[%s14207_s24 + $0xdc] ss:$12 sps:$4 sm:$0xff]  }
0x1369   : > { %11926 = vmatprep.subr.bf16.mxu1 %v13621_v0  ;;  %4636 = vmatprep.subr.bf16.mxu0 %v12941_v46 }
0x136a   : > { %4637 = vmatpush1.bf16.msra.mxu0 %v12939_v45 }
0x136c   : > { %11927 = vmatpush3.bf16.msra.mxu1 %v12924_v42  ;;  %v12942_v42 = vld [vmem:[%s14207_s24 + $0xe0] ss:$12 sps:$4 sm:$0xff]  }
0x136d   : > { %11928 = vmatprep.subr.bf16.mxu1 %v13621_v0 }
0x1370   : > { %11929 = vmatpush3.bf16.msra.mxu1 %v12925_v48  ;;  %v12945_v48 = vld [vmem:[%s14207_s24 + $0xf4] ss:$12 sps:$4 sm:$0xff]  }
0x1371   : > { %11930 = vmatprep.subr.bf16.mxu1 %v13621_v0  ;;  %4638 = vmatprep.subr.bf16.mxu0 %v12945_v48 }
0x1374   : > { %11931 = vmatpush3.bf16.msra.mxu1 %v12926_v50  ;;  %v12943_v50 = vld [vmem:[%s14207_s24 + $0xf0] ss:$12 sps:$4 sm:$0xff]  }
0x1375   : > { %11956 = vmatprep.subr.bf16.mxu1 %v13621_v0  ;;  %4639 = vmatpush1.bf16.msra.mxu0 %v12943_v50 }
0x13d8   : > { %v4303_v51 = vpop.xlane.xlu1 %4302 }
0x13d9   : > { %v4304_v53 = vmul.f32 0.0078125, %v4303_v51  ;;  %v12946_v51 = vld [vmem:[%s14207_s24 + $0xf8] ss:$12 sps:$4 sm:$0xff]  }
0x13db   : > { %v4305_v54 = vadd.f32 1e-05, %v4304_v53  ;;  %v12949_v53 = vld [vmem:[%s14207_s24 + $0x10c] ss:$12 sps:$4 sm:$0xff]  }
0x13dc   : > { %4640 = vmatprep.subr.bf16.mxu0 %v12949_v53 }
0x13dd   : > { %13169 = vrsqrt.f32 %v4305_v54  ;;  %v12947_v54 = vld [vmem:[%s14207_s24 + $0x108] ss:$12 sps:$4 sm:$0xff]  }
0x13de   : > { %13171 = vrcp.f32 %v2420_v62  ;;  %4641 = vmatpush1.bf16.msra.mxu0 %v12947_v54  ;;  %v12958_v62 = vld [vmem:[%s14207_s24 + $0x140] ss:$12 sps:$4 sm:$0xff]  }
0x13e7   : > { %v13170_v55 = vpop.eup %13169 }
0x13e8   : > { %v4307_v56 = vmul.f32 %v13170_v55, %v4300_v30  ;;  %v14881_v4 = vpop.eup %13171  ;;  %v12950_v55 = vld [vmem:[%s14207_s24 + $0x110] ss:$12 sps:$4 sm:$0xff]  }
0x13ea   : > { %v4312_v59 = vmul.f32 %v10457_v57, %v4307_v56  ;;  %v12953_v56 = vld [vmem:[%s14207_s24 + $0x124] ss:$12 sps:$4 sm:$0xff]   ;;  %v12951_v57 = vld [vmem:[%s14207_s24 + $0x120] ss:$12 sps:$4 sm:$0xff]  }
0x13eb   : > { %4642 = vmatprep.subr.bf16.mxu0 %v12953_v56 }
0x13ec   : > { %v4317_v63 = vadd.f32 %v10458_v60, %v4312_v59  ;;  %v12957_v59 = vld [vmem:[%s14207_s24 + $0x13c] ss:$12 sps:$4 sm:$0xff]   ;;  %4643 = vmatpush1.bf16.msra.mxu0 %v12951_v57  ;;  %v12955_v60 = vld [vmem:[%s14207_s24 + $0x138] ss:$12 sps:$4 sm:$0xff]  }
0x13ed   : > { %4644 = vmatprep.subr.bf16.mxu0 %v12957_v59 }
0x13ee   : > { %v4319_v1 = vmul.f32 0.044715, %v4317_v63  ;;  %v4318_v19 = vmul.f32 0.5, %v4317_v63 }
0x13f0   : > { %v4320_v2 = vmul.f32 %v4319_v1, %v4317_v63  ;;  %4645 = vmatpush1.bf16.msra.mxu0 %v12955_v60  ;;  %v12959_v1 = vld [vmem:[%s14207_s24 + $0x150] ss:$12 sps:$4 sm:$0xff]  }
0x13f2   : > { %v4321_v52 = vmul.f32 %v4320_v2, %v4317_v63  ;;  %v12962_v2 = vld [vmem:[%s14207_s24 + $0x158] ss:$12 sps:$4 sm:$0xff]  }
0x13f4   : > { %v4322_v13 = vadd.f32 %v4321_v52, %v4317_v63  ;;  %v12961_v63 = vld [vmem:[%s14207_s24 + $0x154] ss:$12 sps:$4 sm:$0xff]   ;;  %v12965_v52 = vld [vmem:[%s14207_s24 + $0x16c] ss:$12 sps:$4 sm:$0xff]  }
0x13f5   : > { %4646 = vmatprep.subr.bf16.mxu0 %v12961_v63 }
0x13f6   : > { %v4323_v10 = vmul.f32 0.7978846, %v4322_v13  ;;  %4647 = vmatpush1.bf16.msra.mxu0 %v12959_v1 }
0x13f7   : > { %4648 = vmatprep.subr.bf16.mxu0 %v12965_v52 }
0x13f8   : > { %13173 = vtanh.f32 %v4323_v10 }
0x1402   : > { %v13174_v15 = vpop.eup %13173 }
0x1403   : > { %v4325_v17 = vadd.f32 1.0, %v13174_v15 }
0x1405   : > { %v4326_v21 = vmul.f32 %v4325_v17, %v4318_v19 }
0x1407   : > { %v14902_v25 = vadd.f32 %v4326_v21, %v14840_v5  ;;  %v10475_v5 = vld [vmem:[%s14221_s11 + $0x7] ss:$0 sm:$0xff] }
0x1409   : > { %v4328_v26 = vpack.c.bf16 %v14902_v25, %v14902_v25 }
0x142a   : > { %v4044_v6 = vpop.f32.mrb[30].mxu1 }
0x142b   : > { %v4048_v7 = vmul.f32 %v14881_v4, %v4044_v6  ;;  %v11915_v49 = vpop.f32.mrb[31].mxu1  ;;  %v12963_v6 = vld [vmem:[%s14207_s24 + $0x168] ss:$12 sps:$4 sm:$0xff]  }
0x142c   : > { %4649 = vmatpush1.bf16.msra.mxu0 %v12963_v6 }
0x142d   : > { %v4049_v28 = vpack.c.bf16 %v4048_v7, %v4048_v7  ;;  %v12966_v7 = vld [vmem:[%s14207_s24 + $0x170] ss:$12 sps:$4 sm:$0xff]   ;;  %11996 = vmatprep.subr.mxu0 %v13621_v0 }
0x142f   : > { %11933 = vmatmul.mubr.bf16.vlgmr.msra.gmra.mrb[32].mxu1 %v4049_v28 }
0x1430   : > { %11957 = vmatpush3.bf16.msra.mxu1 %v12927_v8  ;;  %11972 = vmatprep.mubr.msk.bf16.mxu1 %vm13622_vm0, %v13621_v0 }
0x1431   : > { %11958 = vmatprep.subr.bf16.mxu1 %v13621_v0 }
0x1434   : > { %11959 = vmatpush3.bf16.msra.mxu1 %v12928_v9  ;;  %v10484_v9 = vld [vmem:[%s14221_s11 + $0xf] ss:$0 sm:$0xff] }
0x1435   : > { %11960 = vmatprep.subr.bf16.mxu1 %v13621_v0 }
0x1438   : > { %11961 = vmatpush3.bf16.msra.mxu1 %v12929_v11  ;;  %v10485_v11 = vld [vmem:[%s14221_s11 + $0x17] ss:$0 sm:$0xff] }
0x1439   : > { %11962 = vmatprep.subr.bf16.mxu1 %v13621_v0 }
0x143c   : > { %11963 = vmatpush3.bf16.msra.mxu1 %v12930_v12 }
0x143d   : > { %11964 = vmatprep.subr.bf16.mxu1 %v13621_v0 }
0x1440   : > { %11965 = vmatpush3.bf16.msra.mxu1 %v12931_v14 }
0x1441   : > { %11966 = vmatprep.subr.bf16.mxu1 %v13621_v0 }
0x1444   : > { %11967 = vmatpush3.bf16.msra.mxu1 %v12932_v16 }
0x1445   : > { %11968 = vmatprep.subr.bf16.mxu1 %v13621_v0 }
0x1448   : > { %11969 = vmatpush3.bf16.msra.mxu1 %v12933_v20 }
0x1449   : > { %11970 = vmatprep.subr.bf16.mxu1 %v13621_v0 }
0x144c   : > { %11971 = vmatpush3.bf16.msra.mxu1 %v12934_v24 }
0x144d   : > { %11976 = vmatprep.subr.bf16.mxu1 %v13621_v0 }
0x144f   : > { %11973 = vmatmul.mubr.bf16.vlgmr.msra.gmra.mrb[36].mxu1 %v4328_v26 }
0x1450   : > { %11992 = vmatprep.mubr.msk.bf16.mxu1 %vm13622_vm0, %v13621_v0  ;;  %11977 = vmatpush3.bf16.msra.mxu1 %v12938_v44 }
0x1451   : > { %11978 = vmatprep.subr.bf16.mxu1 %v13621_v0 }
0x1454   : > { %11979 = vmatpush3.bf16.msra.mxu1 %v12942_v42 }
0x1455   : > { %11980 = vmatprep.subr.bf16.mxu1 %v13621_v0 }
0x1458   : > { %11981 = vmatpush3.bf16.msra.mxu1 %v12946_v51 }
0x1459   : > { %11982 = vmatprep.subr.bf16.mxu1 %v13621_v0 }
0x145c   : > { %11983 = vmatpush3.bf16.msra.mxu1 %v12950_v55 }
0x145d   : > { %11984 = vmatprep.subr.bf16.mxu1 %v13621_v0 }
0x1460   : > { %11985 = vmatpush3.bf16.msra.mxu1 %v12954_v32 }
0x1461   : > { %11986 = vmatprep.subr.bf16.mxu1 %v13621_v0 }
0x1464   : > { %11987 = vmatpush3.bf16.msra.mxu1 %v12958_v62 }
0x1465   : > { %11988 = vmatprep.subr.bf16.mxu1 %v13621_v0 }
0x1468   : > { %11989 = vmatpush3.bf16.msra.mxu1 %v12962_v2 }
0x1469   : > { %11990 = vmatprep.subr.bf16.mxu1 %v13621_v0 }
0x146c   : > { %11991 = vmatpush3.bf16.msra.mxu1 %v12966_v7 }
0x146d   : > { %12032 = vmatprep.subr.mxu1 %v13621_v0 }
0x1502   : > { %v14909_v38 = vpop.f32.mrb[32].mxu1 }
0x1503   : > { %v11934_v23 = vpop.f32.mrb[33].mxu1 }
0x1504   : > { %v4152_v29 = vpop.f32.mrb[34].mxu1 }
0x1505   : > { %v11935_v18 = vpop.f32.mrb[35].mxu1 }
0x1522   : > { %v4433_v47 = vpop.f32.mrb[36].mxu1 }
0x1523   : > { %v4434_v30 = vadd.f32 %v10475_v5, %v4433_v47  ;;  %v11974_v31 = vpop.f32.mrb[37].mxu1  ;;  %v10542_v5 = vld [vmem:[%s14221_s11 + $0x1f] ss:$0 sm:$0xff]  ;;  %v10543_v47 = vld [vmem:[%s14221_s11 + $0x20] ss:$0 sm:$0xff] }
0x1524   : > { %v4436_v33 = vpop.f32.mrb[38].mxu1 }
0x1525   : > { %4441 = vadd.xlane.f32.xlu1 %v4434_v30  ;;  %v11975_v34 = vpop.f32.mrb[39].mxu1 }
0x15b2   : > { %v4442_v36 = vpop.xlane.xlu1 %4441 }
0x15b3   : > { %v4443_v39 = vmul.f32 0.0078125, %v4442_v36 }
0x15b5   : > { %v14912_v40 = vsub.f32 %v4434_v30, %v4443_v39 }
0x15b7   : > { %v4445_v41 = vmul.f32 %v14912_v40, %v14912_v40 }
0x15b9   : > { %4446 = vadd.xlane.f32.xlu0 %v4445_v41 }
0x1646   : > { %v4447_v49 = vpop.xlane.xlu0 %4446 }
0x1647   : > { %v4448_v8 = vmul.f32 0.0078125, %v4447_v49 }
0x1649   : > { %v4449_v13 = vadd.f32 1e-05, %v4448_v8 }
0x164b   : > { %13175 = vrsqrt.f32 %v4449_v13 }
0x1655   : > { %v13176_v28 = vpop.eup %13175 }
0x1656   : > { %v4451_v10 = vmul.f32 %v13176_v28, %v14912_v40 }
0x1658   : > { %v4456_v12 = vmul.f32 %v10484_v9, %v4451_v10 }
0x165a   : > { %v4461_v14 = vadd.f32 %v10485_v11, %v4456_v12 }
0x165c   : > { %v4463_v15 = vmul.f32 0.044715, %v4461_v14  ;;  %v4462_v24 = vmul.f32 0.5, %v4461_v14 }
0x165e   : > { %v4464_v16 = vmul.f32 %v4463_v15, %v4461_v14 }
0x1660   : > { %v4465_v17 = vmul.f32 %v4464_v16, %v4461_v14 }
0x1662   : > { %v4466_v19 = vadd.f32 %v4465_v17, %v4461_v14 }
0x1664   : > { %v4467_v20 = vmul.f32 0.7978846, %v4466_v19 }
0x1666   : > { %13177 = vtanh.f32 %v4467_v20 }
0x1670   : > { %v13178_v21 = vpop.eup %13177 }
0x1671   : > { %v4469_v26 = vadd.f32 1.0, %v13178_v21 }
0x1673   : > { %v4470_v23 = vmul.f32 %v4469_v26, %v4462_v24 }
0x1675   : > { %v14953_v29 = vadd.f32 %v4470_v23, %v14902_v25 }
0x1677   : > { %v4472_v18 = vpack.c.bf16 %v14953_v29, %v14953_v29 }
0x1679   : > { %4667 = vmatmul.mubr.bf16.vlgmr.msra.gmra.mrb[40].mxu0 %v4472_v18  ;;  %11993 = vmatmul.mubr.bf16.vlgmr.msra.gmra.mrb[40].mxu1 %v4472_v18 }
0x167a   : > { %11998 = vmatprep.mubr.msk.f32.mxu0 %vm13622_vm0, %v13621_v0  ;;  %12034 = vmatprep.mubr.msk.f32.mxu1 %vm13622_vm0, %v13621_v0 }
0x174c   : > { %v4668_v30 = vpop.f32.mrb[40].mxu0  ;;  %v4709_v31 = vpop.f32.mrb[40].mxu1 }
0x174d   : > { %v4720_v33 = vadd.f32 %v10542_v5, %v4668_v30  ;;  %v4670_v34 = vpop.f32.mrb[41].mxu0  ;;  %v11994_v25 = vpop.f32.mrb[41].mxu1  ;;  %v14968_v45 = vadd.f32 %v10544_v58, %v4709_v31 }
0x174e   : > { %v4726_v36 = vadd.f32 %v10543_v47, %v4670_v34  ;;  %v4672_v39 = vpop.f32.mrb[42].mxu0  ;;  %v4712_v40 = vpop.f32.mrb[42].mxu1 }
0x174f   : > { %v4750_v41 = vmul.f32 0.17677669, %v4720_v33  ;;  %v4673_v43 = vpop.f32.mrb[43].mxu0  ;;  %v11995_v44 = vpop.f32.mrb[43].mxu1 }
0x1750   : > { %5193 = vrot.lane.b32.xlu1 %v4726_v36, %s13625_s29  ;;  %11997 = vmatpush3.xpose.msk.msra.mxu0 %vm2466_vm1, %v4726_v36 }
0x1751   : > { %5191 = vrot.lane.b32.xlu0 %v4750_v41, %s13625_s29  ;;  %12001 = vmatprep.subr.mxu0 %v13621_v0 }
0x1753   : > { %11999 = vmatmul.mubr.msk.f32.vlgmr.msra.gmra.mrb[26].mxu0 %vm2466_vm1, %v4750_v41 }
0x1754   : > { %12002 = vmatpush3.msra.mxu0 %v14968_v45  ;;  %12003 = vmatprep.mubr.msk.f32.mxu0 %vm13622_vm0, %v13621_v0 }
0x1755   : > { %12006 = vmatprep.subr.mxu0 %v13621_v0 }
0x17c2   : > { %v5194_v46 = vpop.permute.xlu1 %5193 }
0x17c3   : > { %12033 = vmatpush3.xpose.msk.msra.mxu1 %vm2466_vm1, %v5194_v46  ;;  %v5192_v42 = vpop.permute.xlu0 %5191 }
0x17c4   : > { %12037 = vmatprep.subr.mxu1 %v13621_v0 }
0x17c6   : > { %12035 = vmatmul.mubr.msk.f32.vlgmr.msra.gmra.mrb[44].mxu1 %vm2466_vm1, %v5192_v42 }
0x17c7   : > { %12039 = vmatprep.mubr.msk.f32.mxu1 %vm13622_vm0, %v13621_v0 }
0x1826   : > { %v4823_v48 = vpop.f32.mrb[26].mxu0 }
0x1827   : > { %v4827_v50 = vsel %vm3133_vm5, %v4823_v48, -1e+30  ;;  %v12000_v51 = vpop.f32.mrb[27].mxu0 }
0x1828   : > { %v4828_v53 = vsel %vm3135_vm6, %v4827_v50, -inf }
0x1829   : > { %4829 = vmax.xlane.f32.xlu1 %v4828_v53  ;;  %v12968_v53 = vld [vmem:[%s14214_s18 + $0x58] sm:$0xff]  }
0x1899   : > { %v5265_v54 = vpop.f32.mrb[44].mxu1 }
0x189a   : > { %v5269_v55 = vsel %vm3133_vm5, %v5265_v54, -1e+30  ;;  %v12036_v56 = vpop.f32.mrb[45].mxu1 }
0x189b   : > { %v5270_v57 = vsel %vm3135_vm6, %v5269_v55, -inf }
0x189c   : > { %5271 = vmax.xlane.f32.xlu0 %v5270_v57 }
0x18b2   : > { %4913 = vrot.lane.b32.xlu0 %v4750_v41, %s13624_s2 }
0x18b6   : > { %v4830_v32 = vpop.xlane.xlu1 %4829 }
0x18b7   : > { %v4831_v59 = vsub.f32 %v4827_v50, %v4830_v32  ;;  %v12967_v50 = vld [vmem:[%s14214_s18 + $0x50] sm:$0xff]   ;;  %v12969_v32 = vld [vmem:[%s14214_s18 + $0x40] sm:$0xff]  }
0x18b9   : > { %v4832_v60 = vmul.f32 1.442695, %v4831_v59 }
0x18bb   : > { %13179 = vpow2.f32 %v4832_v60 }
0x18c5   : > { %v13180_v62 = vpop.eup %13179 }
0x18c6   : > { %v4834_v63 = vsel %vm3135_vm6, %v13180_v62, 0.0 }
0x18c7   : > { %4835 = vadd.xlane.f32.xlu1 %v4834_v63  ;;  %v12971_v63 = vld [vmem:[%s14214_s18 + $0x60] sm:$0xff]  }
0x18d8   : > { %4915 = vrot.lane.b32.xlu1 %v4726_v36, %s13624_s2 }
0x18dc   : > { %5281 = vrot.lane.b32.xlu1 %v14968_v45, %s13625_s29 }
0x18e0   : > { %5416 = vrot.lane.b32.xlu1 %v4726_v36, %s13623_s9 }
0x1929   : > { %v5272_v1 = vpop.xlane.xlu0 %5271 }
0x192a   : > { %v5273_v2 = vsub.f32 %v5269_v55, %v5272_v1 }
0x192c   : > { %v5274_v52 = vmul.f32 1.442695, %v5273_v2  ;;  %v12972_v2 = vld [vmem:[%s14214_s18 + $0x68] sm:$0xff]  }
0x192d   : > { %v4914_v10 = vpop.permute.xlu0 %4913 }
0x192e   : > { %13181 = vpow2.f32 %v5274_v52  ;;  %v12973_v52 = vld [vmem:[%s14214_s18 + $0x70] sm:$0xff]  }
0x1938   : > { %v13182_v6 = vpop.eup %13181 }
0x1939   : > { %v5276_v7 = vsel %vm3135_vm6, %v13182_v6, 0.0 }
0x193a   : > { %5277 = vadd.xlane.f32.xlu0 %v5276_v7  ;;  %v12974_v7 = vld [vmem:[%s14214_s18 + $0x78] sm:$0xff]  }
0x1950   : > { %5414 = vrot.lane.b32.xlu0 %v4750_v41, %s13623_s9 }
0x1954   : > { %v4836_v49 = vpop.xlane.xlu1 %4835 }
0x1955   : > { %13183 = vrcp.f32 %v4836_v49 }
0x1958   : > { %v4916_v8 = vpop.permute.xlu1 %4915 }
0x195c   : > { %v5282_v13 = vpop.permute.xlu1 %5281 }
0x195d   : > { %12038 = vmatpush3.msra.mxu1 %v5282_v13 }
0x195e   : > { %12050 = vmatprep.subr.mxu1 %v13621_v0 }
0x195f   : > { %v13184_v28 = vpop.eup %13183 }
0x1960   : > { %v4838_v9 = vmul.f32 %v13184_v28, %v13180_v62  ;;  %v5417_v15 = vpop.permute.xlu1 %5416  ;;  %v12970_v62 = vld [vmem:[%s14214_s18 + $0x48] sm:$0xff]  }
0x1962   : > { %12004 = vmatmul.mubr.msk.f32.vlgmr.msra.gmra.mrb[44].mxu0 %vm3135_vm6, %v4838_v9 }
0x1963   : > { %12007 = vmatpush3.xpose.msk.msra.mxu0 %vm2466_vm1, %v4916_v8  ;;  %12008 = vmatprep.mubr.msk.f32.mxu0 %vm13622_vm0, %v13621_v0 }
0x1964   : > { %12011 = vmatprep.subr.mxu0 %v13621_v0 }
0x1966   : > { %12009 = vmatmul.mubr.msk.f32.vlgmr.msra.gmra.mrb[46].mxu0 %vm2466_vm1, %v4914_v10 }
0x1967   : > { %12013 = vmatprep.mubr.msk.f32.mxu0 %vm13622_vm0, %v13621_v0 }
0x19c7   : > { %v5278_v11 = vpop.xlane.xlu0 %5277 }
0x19c8   : > { %13185 = vrcp.f32 %v5278_v11 }
0x19cb   : > { %v5415_v16 = vpop.permute.xlu0 %5414 }
0x19d2   : > { %v13186_v12 = vpop.eup %13185 }
0x19d3   : > { %v5280_v14 = vmul.f32 %v13186_v12, %v13182_v6 }
0x19d5   : > { %12040 = vmatmul.mubr.msk.f32.vlgmr.msra.gmra.mrb[46].mxu1 %vm3135_vm6, %v5280_v14 }
0x19d6   : > { %12051 = vmatpush3.xpose.msk.msra.mxu1 %vm2466_vm1, %v5417_v15  ;;  %12052 = vmatprep.mubr.msk.f32.mxu1 %vm13622_vm0, %v13621_v0 }
0x19d7   : > { %12055 = vmatprep.subr.mxu1 %v13621_v0 }
0x19d9   : > { %12053 = vmatmul.mubr.msk.f32.vlgmr.msra.gmra.mrb[48].mxu1 %vm2466_vm1, %v5415_v16 }
0x19da   : > { %12057 = vmatprep.mubr.msk.f32.mxu1 %vm13622_vm0, %v13621_v0 }
0x1a35   : > { %v15011_v17 = vpop.f32.mrb[44].mxu0 }
0x1a36   : > { %v12005_v19 = vpop.f32.mrb[45].mxu0  ;;  %v4912_v1 = vpack.c.bf16 %v15011_v17, %v15011_v17 }
0x1a39   : > { %v4987_v20 = vpop.f32.mrb[46].mxu0 }
0x1a3a   : > { %v4991_v21 = vsel %vm3133_vm5, %v4987_v20, -1e+30  ;;  %v12010_v24 = vpop.f32.mrb[47].mxu0 }
0x1a3b   : > { %v4992_v26 = vsel %vm3135_vm6, %v4991_v21, -inf }
0x1a3c   : > { %4993 = vmax.xlane.f32.xlu1 %v4992_v26 }
0x1aa8   : > { %v15016_v23 = vpop.f32.mrb[46].mxu1 }
0x1aa9   : > { %v12041_v18 = vpop.f32.mrb[47].mxu1  ;;  %v5357_v6 = vpack.c.bf16 %v15016_v23, %v15016_v23 }
0x1aaa   : > { %v10585_v18 = vld [vmem:[%s14221_s11 + $0x29] ss:$0 sm:$0xff] }
0x1aac   : > { %v5488_v5 = vpop.f32.mrb[48].mxu1 }
0x1aad   : > { %v5492_v47 = vsel %vm3133_vm5, %v5488_v5, -1e+30  ;;  %v12054_v30 = vpop.f32.mrb[49].mxu1 }
0x1aae   : > { %v5493_v31 = vsel %vm3135_vm6, %v5492_v47, -inf }
0x1aaf   : > { %5494 = vmax.xlane.f32.xlu0 %v5493_v31 }
0x1ac9   : > { %v4994_v33 = vpop.xlane.xlu1 %4993 }
0x1aca   : > { %v4995_v34 = vsub.f32 %v4991_v21, %v4994_v33 }
0x1acc   : > { %v4996_v25 = vmul.f32 1.442695, %v4995_v34 }
0x1ace   : > { %13187 = vpow2.f32 %v4996_v25 }
0x1ad8   : > { %v13188_v36 = vpop.eup %13187 }
0x1ad9   : > { %v4998_v39 = vsel %vm3135_vm6, %v13188_v36, 0.0 }
0x1ada   : > { %4999 = vadd.xlane.f32.xlu0 %v4998_v39 }
0x1af0   : > { %5004 = vrot.lane.b32.xlu0 %v14968_v45, %s13624_s2 }
0x1b3c   : > { %v5495_v40 = vpop.xlane.xlu0 %5494 }
0x1b3d   : > { %v5496_v41 = vsub.f32 %v5492_v47, %v5495_v40 }
0x1b3f   : > { %v5497_v58 = vmul.f32 1.442695, %v5496_v41  ;;  %v12975_v41 = vld [vmem:[%s14861_s21 + $0x40] sm:$0xff]  }
0x1b41   : > { %13189 = vpow2.f32 %v5497_v58  ;;  %v12977_v58 = vld [vmem:[%s14861_s21 + $0x50] sm:$0xff]  }
0x1b4b   : > { %v13190_v43 = vpop.eup %13189 }
0x1b4c   : > { %v5499_v44 = vsel %vm3135_vm6, %v13190_v43, 0.0 }
0x1b4d   : > { %5500 = vadd.xlane.f32.xlu1 %v5499_v44  ;;  %v12979_v44 = vld [vmem:[%s14861_s21 + $0x60] sm:$0xff]  }
0x1b5e   : > { %5504 = vrot.lane.b32.xlu1 %v14968_v45, %s13623_s9 }
0x1b67   : > { %v5000_v46 = vpop.xlane.xlu0 %4999 }
0x1b68   : > { %13191 = vrcp.f32 %v5000_v46  ;;  %v12980_v46 = vld [vmem:[%s14861_s21 + $0x68] sm:$0xff]  }
0x1b6b   : > { %v5005_v42 = vpop.permute.xlu0 %5004 }
0x1b6c   : > { %12012 = vmatpush3.msra.mxu0 %v5005_v42  ;;  %v12981_v42 = vld [vmem:[%s14861_s21 + $0x70] sm:$0xff]  }
0x1b6d   : > { %12016 = vmatprep.subr.bf16.mxu0 %v13621_v0 }
0x1b72   : > { %v13192_v48 = vpop.eup %13191 }
0x1b73   : > { %v5002_v51 = vmul.f32 %v13192_v48, %v13188_v36 }
0x1b75   : > { %12014 = vmatmul.mubr.msk.f32.vlgmr.msra.gmra.mrb[48].mxu0 %vm3135_vm6, %v5002_v51 }
0x1b76   : > { %12017 = vmatpush3.bf16.msra.mxu0 %v12967_v50  ;;  %12020 = vmatprep.mubr.msk.bf16.mxu0 %vm13622_vm0, %v13621_v0 }
0x1b77   : > { %12018 = vmatprep.subr.bf16.mxu0 %v13621_v0 }
0x1b7a   : > { %12019 = vmatpush3.bf16.msra.mxu0 %v12968_v53 }
0x1b7b   : > { %12024 = vmatprep.subr.bf16.mxu0 %v13621_v0 }
0x1bda   : > { %v5501_v45 = vpop.xlane.xlu1 %5500 }
0x1bdb   : > { %13193 = vrcp.f32 %v5501_v45  ;;  %v10586_v45 = vld [vmem:[%s14221_s11 + $0x2d] ss:$0 sm:$0xff] }
0x1bde   : > { %v5505_v54 = vpop.permute.xlu1 %5504 }
0x1bdf   : > { %12056 = vmatpush3.msra.mxu1 %v5505_v54 }
0x1be0   : > { %12068 = vmatprep.subr.mxu1 %v13621_v0 }
0x1be5   : > { %v13194_v55 = vpop.eup %13193 }
0x1be6   : > { %v5503_v56 = vmul.f32 %v13194_v55, %v13190_v43  ;;  %v12978_v43 = vld [vmem:[%s14861_s21 + $0x58] sm:$0xff]   ;;  %v10587_v55 = vld [vmem:[%s14221_s11 + $0x31] ss:$0 sm:$0xff] }
0x1be8   : > { %12058 = vmatmul.mubr.msk.f32.vlgmr.msra.gmra.mrb[50].mxu1 %vm3135_vm6, %v5503_v56 }
0x1be9   : > { %12070 = vmatprep.mubr.msk.f32.mxu1 %vm13622_vm0, %v13621_v0 }
0x1c48   : > { %v5076_v57 = vpop.f32.mrb[48].mxu0 }
0x1c49   : > { %v5080_v59 = vpack.c.bf16 %v5076_v57, %v5076_v57  ;;  %v12015_v60 = vpop.f32.mrb[49].mxu0 }
0x1c4b   : > { %12021 = vmatmul.mubr.msk.bf16.vlgmr.msra.gmra.mrb[52].mxu0 %vm2466_vm1, %v5080_v59  ;;  %v12982_v59 = vld [vmem:[%s14861_s21 + $0x78] sm:$0xff]  }
0x1c4c   : > { %12025 = vmatpush3.bf16.msra.mxu0 %v12969_v32  ;;  %12028 = vmatprep.mubr.msk.bf16.mxu0 %vm13622_vm0, %v13621_v0  ;;  %v15092_v32 = vld [vmem:[%s14716_s3] sm:$0x1] }
0x1c4d   : > { %12026 = vmatprep.subr.bf16.mxu0 %v13621_v0 }
0x1c50   : > { %12027 = vmatpush3.bf16.msra.mxu0 %v12970_v62 }
0x1c51   : > { %12042 = vmatprep.subr.bf16.mxu0 %v13621_v0 }
0x1c53   : > { %12029 = vmatmul.mubr.msk.bf16.vlgmr.msra.gmra.mrb[56].mxu0 %vm2466_vm1, %v4912_v1 }
0x1c54   : > { %12043 = vmatpush3.bf16.msra.mxu0 %v12971_v63  ;;  %12046 = vmatprep.mubr.msk.bf16.mxu0 %vm13622_vm0, %v13621_v0 }
0x1c55   : > { %12044 = vmatprep.subr.bf16.mxu0 %v13621_v0 }
0x1c58   : > { %12045 = vmatpush3.bf16.msra.mxu0 %v12972_v2 }
0x1c59   : > { %12060 = vmatprep.subr.bf16.mxu0 %v13621_v0 }
0x1c5b   : > { %12047 = vmatmul.mubr.msk.bf16.vlgmr.msra.gmra.mrb[60].mxu0 %vm2466_vm1, %v5357_v6 }
0x1c5c   : > { %12061 = vmatpush3.bf16.msra.mxu0 %v12973_v52  ;;  %12064 = vmatprep.mubr.msk.bf16.mxu0 %vm13622_vm0, %v13621_v0  ;;  %v10623_v52 = vld [vmem:[%s14221_s11 + $0x2] ss:$0 sm:$0xff] }
0x1c5d   : > { %12062 = vmatprep.subr.bf16.mxu0 %v13621_v0 }
0x1c60   : > { %12063 = vmatpush3.bf16.msra.mxu0 %v12974_v7 }
0x1c61   : > { %12073 = vmatprep.subr.bf16.mxu0 %v13621_v0 }
0x1cbb   : > { %v5576_v49 = vpop.f32.mrb[50].mxu1 }
0x1cbc   : > { %v5580_v8 = vpack.c.bf16 %v5576_v49, %v5576_v49  ;;  %v12059_v13 = vpop.f32.mrb[51].mxu1 }
0x1cbe   : > { %12065 = vmatmul.mubr.msk.bf16.vlgmr.msra.gmra.mrb[64].mxu0 %vm2466_vm1, %v5580_v8 }
0x1cbf   : > { %12089 = vmatprep.mubr.msk.bf16.mxu0 %vm13622_vm0, %v13621_v0  ;;  %12074 = vmatpush3.bf16.msra.mxu0 %v12975_v41 }
0x1cc0   : > { %12075 = vmatprep.subr.bf16.mxu0 %v13621_v0 }
0x1d1e   : > { %v5130_v28 = vpop.f32.mrb[52].mxu0 }
0x1d1f   : > { %v12022_v9 = vpop.f32.mrb[53].mxu0 }
0x1d20   : > { %v5133_v10 = vpop.f32.mrb[54].mxu0 }
0x1d21   : > { %v12023_v11 = vpop.f32.mrb[55].mxu0  ;;  %v12983_v10 = vld [vmem:[%s14579_s8 + $0x100] sm:$0xff]  }
0x1d26   : > { %v5185_v12 = vpop.f32.mrb[56].mxu0 }
0x1d27   : > { %v5186_v14 = vadd.f32 %v5185_v12, %v5130_v28  ;;  %v12030_v15 = vpop.f32.mrb[57].mxu0 }
0x1d28   : > { %v5188_v16 = vpop.f32.mrb[58].mxu0 }
0x1d29   : > { %v12031_v17 = vpop.f32.mrb[59].mxu0  ;;  %v12985_v16 = vld [vmem:[%s14579_s8 + $0x110] sm:$0xff]  }
0x1d2e   : > { %v5407_v19 = vpop.f32.mrb[60].mxu0 }
0x1d2f   : > { %v5413_v20 = vadd.f32 %v5407_v19, %v5186_v14  ;;  %v12048_v21 = vpop.f32.mrb[61].mxu0  ;;  %v12984_v14 = vld [vmem:[%s14579_s8 + $0x108] sm:$0xff]   ;;  %v12986_v19 = vld [vmem:[%s14579_s8 + $0x118] sm:$0xff]  }
0x1d30   : > { %v5410_v24 = vpop.f32.mrb[62].mxu0  ;;  %v12988_v21 = vld [vmem:[%s14579_s8 + $0x128] sm:$0xff]  }
0x1d31   : > { %v12049_v26 = vpop.f32.mrb[63].mxu0 }
0x1d32   : > { %v12989_v26 = vld [vmem:[%s14579_s8 + $0x130] sm:$0xff]  }
0x1d91   : > { %v5630_v23 = vpop.f32.mrb[64].mxu0 }
0x1d92   : > { %v5636_v5 = vadd.f32 %v5630_v23, %v5413_v20  ;;  %v12066_v47 = vpop.f32.mrb[65].mxu0  ;;  %v12987_v20 = vld [vmem:[%s14579_s8 + $0x120] sm:$0xff]  }
0x1d93   : > { %v5633_v30 = vpop.f32.mrb[66].mxu0 }
0x1d94   : > { %v5642_v31 = vadd.f32 %v10585_v18, %v5636_v5  ;;  %v12067_v33 = vpop.f32.mrb[67].mxu0  ;;  %v12990_v5 = vld [vmem:[%s14579_s8 + $0x138] sm:$0xff]  }
0x1d95   : > { %v12992_v33 = vld [vmem:[#allocation11 + $0x28] sm:$0xff]  }
0x1d96   : > { %v5643_v34 = vadd.f32 %v5642_v31, %v14953_v29  ;;  %v12976_v29 = vld [vmem:[%s14861_s21 + $0x48] sm:$0xff]   ;;  %v12991_v31 = vld [vmem:[#allocation11 + $0x20] sm:$0xff]  }
0x1d97   : > { %12076 = vmatpush3.bf16.msra.mxu0 %v12976_v29 }
0x1d98   : > { %5646 = vadd.xlane.f32.xlu1 %v5643_v34  ;;  %12077 = vmatprep.subr.bf16.mxu0 %v13621_v0 }
0x1d9b   : > { %12078 = vmatpush3.bf16.msra.mxu0 %v12977_v58 }
0x1d9c   : > { %12079 = vmatprep.subr.bf16.mxu0 %v13621_v0 }
0x1d9f   : > { %12080 = vmatpush3.bf16.msra.mxu0 %v12978_v43 }
0x1da0   : > { %12081 = vmatprep.subr.bf16.mxu0 %v13621_v0 }
0x1da3   : > { %12082 = vmatpush3.bf16.msra.mxu0 %v12979_v44 }
0x1da4   : > { %12083 = vmatprep.subr.bf16.mxu0 %v13621_v0 }
0x1da7   : > { %12084 = vmatpush3.bf16.msra.mxu0 %v12980_v46  ;;  %v12993_v46 = vld [vmem:[#allocation11 + $0x30] sm:$0xff]  }
0x1da8   : > { %12085 = vmatprep.subr.bf16.mxu0 %v13621_v0 }
0x1da9   : > { %5986 = vrot.lane.b32.xlu1 %v14569_v22, %s13624_s2 }
0x1dab   : > { %12086 = vmatpush3.bf16.msra.mxu0 %v12981_v42  ;;  %v12994_v42 = vld [vmem:[#allocation11 + $0x38] sm:$0xff]  }
0x1dac   : > { %12087 = vmatprep.subr.bf16.mxu0 %v13621_v0 }
0x1dad   : > { %5989 = vrot.lane.b32.xlu1 %v14588_v35, %s13623_s9 }
0x1daf   : > { %12088 = vmatpush3.bf16.msra.mxu0 %v12982_v59  ;;  %v12996_v59 = vld [vmem:[#allocation11 + $0x8] sm:$0xff]  }
0x1db0   : > { %12117 = vmatprep.subr.bf16.mxu0 %v13621_v0 }
0x1e25   : > { %v5647_v25 = vpop.xlane.xlu1 %5646 }
0x1e26   : > { %v5648_v36 = vmul.f32 0.0078125, %v5647_v25 }
0x1e28   : > { %v5649_v39 = vsub.f32 %v5643_v34, %v5648_v36 }
0x1e29   : > { %v5987_v62 = vpop.permute.xlu1 %5986 }
0x1e2a   : > { %v5650_v40 = vmul.f32 %v5649_v39, %v5649_v39 }
0x1e2c   : > { %5651 = vadd.xlane.f32.xlu0 %v5650_v40  ;;  %v10640_v40 = vld [vmem:[%s14221_s11 + $0x8] ss:$0 sm:$0xff] }
0x1e2d   : > { %v5990_v2 = vpop.permute.xlu1 %5989 }
0x1e42   : > { %5983 = vrot.lane.b32.xlu0 %v14573_v27, %s13625_s29 }
0x1eb9   : > { %v5652_v48 = vpop.xlane.xlu0 %5651 }
0x1eba   : > { %v5653_v50 = vmul.f32 0.0078125, %v5652_v48  ;;  %v4066_v48 = vld [vmem:[%s14221_s11 + $0x34] sm:$0x1] }
0x1ebc   : > { %v5654_v51 = vadd.f32 1e-05, %v5653_v50 }
0x1ebd   : > { %v5984_v60 = vpop.permute.xlu0 %5983 }
0x1ebe   : > { %13195 = vrsqrt.f32 %v5654_v51  ;;  %v5992_v63 = vsel %vm2466_vm1, %v5984_v60, %v5987_v62  ;;  %v12997_v60 = vld [vmem:[#allocation11 + $0x10] sm:$0xff]   ;;  %v12998_v62 = vld [vmem:[#allocation11 + $0x18] sm:$0xff]  }
0x1ebf   : > { %v5993_v1 = vsel %vm2468_vm2, %v5992_v63, %v14591_v37  ;;  %v4150_v63 = vadd.f32 %v14909_v38, %v4066_v48  ;;  %v13001_v38 = vld [vmem:[%s14579_s8 + $0x150] sm:$0xff]  }
0x1ec0   : > { %v5994_v6 = vsel %vm2470_vm3, %v5993_v1, %v5990_v2  ;;  %v12999_v2 = vld [vmem:[%s14579_s8 + $0x140] sm:$0xff]  }
0x1ec1   : > { %v6000_v7 = vadd.f32 %v10623_v52, %v5994_v6  ;;  %v4155_v1 = vpack.c.bf16 %v4150_v63, %v4150_v63  ;;  %v13000_v52 = vld [vmem:[%s14579_s8 + $0x148] sm:$0xff]   ;;  %v13002_v6 = vld [vmem:[%s14579_s8 + $0x158] sm:$0xff]   ;;  %v13017_v63 = vld [vmem:[%s14207_s24 + $0x1b4] ss:$12 sps:$4 sm:$0xff]  }
0x1ec3   : > { %v6002_v49 = vmul.f32 0.044715, %v6000_v7  ;;  %v6001_v18 = vmul.f32 0.5, %v6000_v7 }
0x1ec5   : > { %v6003_v8 = vmul.f32 %v6002_v49, %v6000_v7  ;;  %v13004_v49 = vld [vmem:[%s14579_s8 + $0x168] sm:$0xff]  }
0x1ec7   : > { %v6004_v11 = vmul.f32 %v6003_v8, %v6000_v7  ;;  %v13005_v8 = vld [vmem:[%s14579_s8 + $0x170] sm:$0xff]  }
0x1ec8   : > { %v13196_v53 = vpop.eup %13195 }
0x1ec9   : > { %v5656_v54 = vmul.f32 %v13196_v53, %v5649_v39  ;;  %v6005_v15 = vadd.f32 %v6004_v11, %v6000_v7  ;;  %v13003_v7 = vld [vmem:[%s14579_s8 + $0x160] sm:$0xff]  }
0x1ecb   : > { %v5661_v56 = vmul.f32 %v10586_v45, %v5656_v54  ;;  %v6006_v17 = vmul.f32 0.7978846, %v6005_v15  ;;  %v10650_v15 = vld [vmem:[%s14221_s11 + $0x18] ss:$0 sm:$0xff] }
0x1ecd   : > { %v5666_v57 = vadd.f32 %v10587_v55, %v5661_v56  ;;  %13197 = vtanh.f32 %v6006_v17  ;;  %v12995_v56 = vld [vmem:[#allocation11] sm:$0xff]  }
0x1ecf   : > { %12069 = vmatpush3.msra.mxu1 %v5666_v57 }
0x1ed0   : > { %12071 = vmatmul.mubr.msk.f32.vlgmr.msra.gmra.mrb[52].mxu1 %vm3135_vm6, %v15092_v32  ;;  %12093 = vmatprep.subr.bf16.mxu1 %v13621_v0 }
0x1ed1   : > { %12101 = vmatprep.mubr.msk.bf16.mxu1 %vm13622_vm0, %v13621_v0  ;;  %12094 = vmatpush3.bf16.msra.mxu1 %v12991_v31 }
0x1ed2   : > { %12095 = vmatprep.subr.bf16.mxu1 %v13621_v0 }
0x1ed5   : > { %12096 = vmatpush3.bf16.msra.mxu1 %v12992_v33 }
0x1ed6   : > { %12097 = vmatprep.subr.bf16.mxu1 %v13621_v0 }
0x1ed7   : > { %v13198_v24 = vpop.eup %13197 }
0x1ed8   : > { %v6008_v23 = vadd.f32 1.0, %v13198_v24 }
0x1ed9   : > { %12098 = vmatpush3.bf16.msra.mxu1 %v12993_v46 }
0x1eda   : > { %v15124_v47 = vmul.f32 %v6008_v23, %v6001_v18  ;;  %12099 = vmatprep.subr.bf16.mxu1 %v13621_v0 }
0x1edc   : > { %v6010_v30 = vpack.c.bf16 %v15124_v47, %v15124_v47 }
0x1edd   : > { %12100 = vmatpush3.bf16.msra.mxu1 %v12994_v42 }
0x1ede   : > { %12105 = vmatprep.subr.bf16.mxu1 %v13621_v0 }
0x1fa3   : > { %v5733_v13 = vpop.f32.mrb[52].mxu1 }
0x1fa4   : > { %v5737_v28 = vmul.f32 %v14881_v4, %v5733_v13  ;;  %v12072_v9 = vpop.f32.mrb[53].mxu1  ;;  %v13006_v13 = vld [vmem:[%s14579_s8 + $0x178] sm:$0xff]  }
0x1fa6   : > { %v5738_v12 = vpack.c.bf16 %v5737_v28, %v5737_v28 }
0x1fa8   : > { %12090 = vmatmul.mubr.bf16.vlgmr.msra.gmra.mrb[68].mxu0 %v5738_v12  ;;  %v10649_v12 = vld [vmem:[%s14221_s11 + $0x10] ss:$0 sm:$0xff] }
0x1fa9   : > { %12118 = vmatpush3.bf16.msra.mxu0 %v12983_v10  ;;  %12133 = vmatprep.mubr.msk.bf16.mxu0 %vm13622_vm0, %v13621_v0 }
0x1faa   : > { %12119 = vmatprep.subr.bf16.mxu0 %v13621_v0 }
0x1fad   : > { %12120 = vmatpush3.bf16.msra.mxu0 %v12984_v14 }
0x1fae   : > { %12121 = vmatprep.subr.bf16.mxu0 %v13621_v0 }
0x1fb1   : > { %12122 = vmatpush3.bf16.msra.mxu0 %v12985_v16 }
0x1fb2   : > { %12123 = vmatprep.subr.bf16.mxu0 %v13621_v0 }
0x1fb5   : > { %12124 = vmatpush3.bf16.msra.mxu0 %v12986_v19 }
0x1fb6   : > { %12125 = vmatprep.subr.bf16.mxu0 %v13621_v0 }
0x1fb9   : > { %12126 = vmatpush3.bf16.msra.mxu0 %v12987_v20 }
0x1fba   : > { %12127 = vmatprep.subr.bf16.mxu0 %v13621_v0 }
0x1fbd   : > { %12128 = vmatpush3.bf16.msra.mxu0 %v12988_v21 }
0x1fbe   : > { %12129 = vmatprep.subr.bf16.mxu0 %v13621_v0 }
0x1fc1   : > { %12130 = vmatpush3.bf16.msra.mxu0 %v12989_v26 }
0x1fc2   : > { %12131 = vmatprep.subr.bf16.mxu0 %v13621_v0 }
0x1fc5   : > { %12132 = vmatpush3.bf16.msra.mxu0 %v12990_v5 }
0x1fc8   : > { %12134 = vmatmul.mubr.bf16.vlgmr.msra.gmra.mrb[72].mxu0 %v6010_v30 }
0x1fc9   : > { %6492 = vmatprep.mubr.bf16.mxu0 %v13626_v3 }
0x207b   : > { %v5842_v34 = vpop.f32.mrb[68].mxu0 }
0x207c   : > { %v12091_v25 = vpop.f32.mrb[69].mxu0 }
0x207d   : > { %v5845_v36 = vpop.f32.mrb[70].mxu0 }
0x207e   : > { %v12092_v39 = vpop.f32.mrb[71].mxu0 }
0x209b   : > { %v6115_v41 = vpop.f32.mrb[72].mxu0 }
0x209c   : > { %v6116_v29 = vadd.f32 %v10640_v40, %v6115_v41  ;;  %v12135_v58 = vpop.f32.mrb[73].mxu0 }
0x209d   : > { %v6118_v43 = vpop.f32.mrb[74].mxu0 }
0x209e   : > { %6123 = vadd.xlane.f32.xlu0 %v6116_v29  ;;  %v12136_v44 = vpop.f32.mrb[75].mxu0  ;;  %v10667_v43 = vld [vmem:[%s14221_s11 + $0x9] ss:$0 sm:$0xff] }
0x20b4   : > { %5805 = vrot.lane.b32.xlu0 %v4066_v48, %s13625_s29 }
0x212b   : > { %v6124_v50 = vpop.xlane.xlu0 %6123 }
0x212c   : > { %v6125_v51 = vmul.f32 0.0078125, %v6124_v50 }
0x212e   : > { %v6126_v53 = vsub.f32 %v6116_v29, %v6125_v51 }
0x212f   : > { %v5806_v45 = vpop.permute.xlu0 %5805 }
0x2130   : > { %v5843_v54 = vadd.f32 %v5842_v34, %v5806_v45  ;;  %v6127_v55 = vmul.f32 %v6126_v53, %v6126_v53 }
0x2132   : > { %v5848_v57 = vpack.c.bf16 %v5843_v54, %v5843_v54  ;;  %6128 = vadd.xlane.f32.xlu1 %v6127_v55  ;;  %v13009_v55 = vld [vmem:[%s14207_s24 + $0x184] ss:$12 sps:$4 sm:$0xff]  }
0x2133   : > { %6460 = vmatprep.subr.bf16.mxu0 %v13009_v55 }
0x2134   : > { %12102 = vmatmul.mubr.msk.bf16.vlgmr.msra.gmra.mrb[56].mxu1 %vm2468_vm2, %v5848_v57  ;;  %v13010_v57 = vld [vmem:[%s14207_s24 + $0x188] ss:$12 sps:$4 sm:$0xff]  }
0x2135   : > { %12106 = vmatpush3.bf16.msra.mxu1 %v12995_v56  ;;  %12113 = vmatprep.mubr.msk.bf16.mxu1 %vm13622_vm0, %v13621_v0  ;;  %v13007_v56 = vld [vmem:[%s14207_s24 + $0x180] ss:$12 sps:$4 sm:$0xff]  }
0x2136   : > { %12107 = vmatprep.subr.bf16.mxu1 %v13621_v0  ;;  %6461 = vmatpush1.bf16.msra.mxu0 %v13007_v56 }
0x2139   : > { %12108 = vmatpush3.bf16.msra.mxu1 %v12996_v59  ;;  %v13013_v59 = vld [vmem:[%s14207_s24 + $0x19c] ss:$12 sps:$4 sm:$0xff]  }
0x213a   : > { %12109 = vmatprep.subr.bf16.mxu1 %v13621_v0  ;;  %6462 = vmatprep.subr.bf16.mxu0 %v13013_v59 }
0x213d   : > { %12110 = vmatpush3.bf16.msra.mxu1 %v12997_v60  ;;  %v13011_v60 = vld [vmem:[%s14207_s24 + $0x198] ss:$12 sps:$4 sm:$0xff]  }
0x213e   : > { %12111 = vmatprep.subr.bf16.mxu1 %v13621_v0  ;;  %6463 = vmatpush1.bf16.msra.mxu0 %v13011_v60 }
0x213f   : > { %6464 = vmatprep.subr.bf16.mxu0 %v13017_v63 }
0x2141   : > { %12112 = vmatpush3.bf16.msra.mxu1 %v12998_v62  ;;  %v13014_v62 = vld [vmem:[%s14207_s24 + $0x1a0] ss:$12 sps:$4 sm:$0xff]  }
0x2142   : > { %12137 = vmatprep.subr.bf16.mxu1 %v13621_v0 }
0x2144   : > { %12114 = vmatmul.mubr.msk.bf16.vlgmr.msra.gmra.mrb[60].mxu1 %vm2468_vm2, %v4155_v1  ;;  %v13015_v1 = vld [vmem:[%s14207_s24 + $0x1b0] ss:$12 sps:$4 sm:$0xff]  }
0x2145   : > { %12153 = vmatprep.mubr.msk.bf16.mxu1 %vm13622_vm0, %v13621_v0  ;;  %12138 = vmatpush3.bf16.msra.mxu1 %v12999_v2  ;;  %v13018_v2 = vld [vmem:[%s14207_s24 + $0x1b8] ss:$12 sps:$4 sm:$0xff]  }
0x2146   : > { %12139 = vmatprep.subr.bf16.mxu1 %v13621_v0  ;;  %6465 = vmatpush1.bf16.msra.mxu0 %v13015_v1 }
0x2149   : > { %12140 = vmatpush3.bf16.msra.mxu1 %v13000_v52  ;;  %v13021_v52 = vld [vmem:[%s14207_s24 + $0x1cc] ss:$12 sps:$4 sm:$0xff]  }
0x214a   : > { %12141 = vmatprep.subr.bf16.mxu1 %v13621_v0  ;;  %6466 = vmatprep.subr.bf16.mxu0 %v13021_v52 }
0x214d   : > { %12142 = vmatpush3.bf16.msra.mxu1 %v13001_v38  ;;  %v13019_v38 = vld [vmem:[%s14207_s24 + $0x1c8] ss:$12 sps:$4 sm:$0xff]  }
0x214e   : > { %12143 = vmatprep.subr.bf16.mxu1 %v13621_v0  ;;  %6467 = vmatpush1.bf16.msra.mxu0 %v13019_v38 }
0x2151   : > { %12144 = vmatpush3.bf16.msra.mxu1 %v13002_v6  ;;  %v13022_v6 = vld [vmem:[%s14207_s24 + $0x1d0] ss:$12 sps:$4 sm:$0xff]  }
0x2152   : > { %12145 = vmatprep.subr.bf16.mxu1 %v13621_v0 }
0x2155   : > { %12146 = vmatpush3.bf16.msra.mxu1 %v13003_v7  ;;  %v13025_v7 = vld [vmem:[%s14207_s24 + $0x1e4] ss:$12 sps:$4 sm:$0xff]  }
0x2156   : > { %12147 = vmatprep.subr.bf16.mxu1 %v13621_v0  ;;  %6468 = vmatprep.subr.bf16.mxu0 %v13025_v7 }
0x2159   : > { %12148 = vmatpush3.bf16.msra.mxu1 %v13004_v49  ;;  %v13023_v49 = vld [vmem:[%s14207_s24 + $0x1e0] ss:$12 sps:$4 sm:$0xff]  }
0x215a   : > { %12149 = vmatprep.subr.bf16.mxu1 %v13621_v0  ;;  %6469 = vmatpush1.bf16.msra.mxu0 %v13023_v49 }
0x215d   : > { %12150 = vmatpush3.bf16.msra.mxu1 %v13005_v8  ;;  %v13026_v8 = vld [vmem:[%s14207_s24 + $0x1e8] ss:$12 sps:$4 sm:$0xff]  }
0x215e   : > { %12151 = vmatprep.subr.bf16.mxu1 %v13621_v0 }
0x2161   : > { %12152 = vmatpush3.bf16.msra.mxu1 %v13006_v13  ;;  %v13029_v13 = vld [vmem:[%s14207_s24 + $0x1fc] ss:$12 sps:$4 sm:$0xff]  }
0x2162   : > { %12157 = vmatprep.subr.bf16.mxu1 %v13621_v0  ;;  %6470 = vmatprep.subr.bf16.mxu0 %v13029_v13 }
0x21bf   : > { %v6129_v28 = vpop.xlane.xlu1 %6128 }
0x21c0   : > { %v6130_v9 = vmul.f32 0.0078125, %v6129_v28  ;;  %v13027_v28 = vld [vmem:[%s14207_s24 + $0x1f8] ss:$12 sps:$4 sm:$0xff]  }
0x21c1   : > { %6471 = vmatpush1.bf16.msra.mxu0 %v13027_v28 }
0x21c2   : > { %v6131_v10 = vadd.f32 1e-05, %v6130_v9  ;;  %v13030_v9 = vld [vmem:[%s14207_s24 + $0x200] ss:$12 sps:$4 sm:$0xff]  }
0x21c4   : > { %13199 = vrsqrt.f32 %v6131_v10  ;;  %v13033_v10 = vld [vmem:[%s14207_s24 + $0x214] ss:$12 sps:$4 sm:$0xff]  }
0x21c5   : > { %6472 = vmatprep.subr.bf16.mxu0 %v13033_v10 }
0x21ce   : > { %v13200_v11 = vpop.eup %13199 }
0x21cf   : > { %v6133_v14 = vmul.f32 %v13200_v11, %v6126_v53  ;;  %v13031_v11 = vld [vmem:[%s14207_s24 + $0x210] ss:$12 sps:$4 sm:$0xff]  }
0x21d0   : > { %6473 = vmatpush1.bf16.msra.mxu0 %v13031_v11 }
0x21d1   : > { %v6138_v16 = vmul.f32 %v10649_v12, %v6133_v14  ;;  %v13034_v12 = vld [vmem:[%s14207_s24 + $0x218] ss:$12 sps:$4 sm:$0xff]  }
0x21d2   : > { %v13037_v14 = vld [vmem:[%s14207_s24 + $0x22c] ss:$12 sps:$4 sm:$0xff]  }
0x21d3   : > { %v6143_v17 = vadd.f32 %v10650_v15, %v6138_v16  ;;  %v13035_v15 = vld [vmem:[%s14207_s24 + $0x228] ss:$12 sps:$4 sm:$0xff]   ;;  %v13038_v16 = vld [vmem:[%s14207_s24 + $0x230] ss:$12 sps:$4 sm:$0xff]   ;;  %6474 = vmatprep.subr.bf16.mxu0 %v13037_v14 }
0x21d4   : > { %6475 = vmatpush1.bf16.msra.mxu0 %v13035_v15 }
0x21d5   : > { %v6145_v19 = vmul.f32 0.044715, %v6143_v17  ;;  %v6144_v18 = vmul.f32 0.5, %v6143_v17  ;;  %12177 = vmatprep.subr.mxu0 %v13621_v0 }
0x21d7   : > { %v6146_v20 = vmul.f32 %v6145_v19, %v6143_v17 }
0x21d9   : > { %v6147_v21 = vmul.f32 %v6146_v20, %v6143_v17 }
0x21db   : > { %v6148_v24 = vadd.f32 %v6147_v21, %v6143_v17 }
0x21dd   : > { %v6149_v26 = vmul.f32 0.7978846, %v6148_v24  ;;  %v10676_v24 = vld [vmem:[%s14221_s11 + $0x11] ss:$0 sm:$0xff] }
0x21df   : > { %13201 = vtanh.f32 %v6149_v26 }
0x21e9   : > { %v13202_v23 = vpop.eup %13201 }
0x21ea   : > { %v6151_v5 = vadd.f32 1.0, %v13202_v23  ;;  %v10677_v23 = vld [vmem:[%s14221_s11 + $0x19] ss:$0 sm:$0xff] }
0x21ec   : > { %v6152_v30 = vmul.f32 %v6151_v5, %v6144_v18 }
0x21ee   : > { %v15166_v31 = vadd.f32 %v6152_v30, %v15124_v47 }
0x21f0   : > { %v6154_v33 = vpack.c.bf16 %v15166_v31, %v15166_v31 }
0x21f2   : > { %12154 = vmatmul.mubr.bf16.vlgmr.msra.gmra.mrb[64].mxu1 %v6154_v33 }
0x21f3   : > { %12173 = vmatprep.mubr.msk.bf16.mxu1 %vm13622_vm0, %v13621_v0  ;;  %12158 = vmatpush3.bf16.msra.mxu1 %v13010_v57 }
0x21f4   : > { %12159 = vmatprep.subr.bf16.mxu1 %v13621_v0 }
0x21f7   : > { %12160 = vmatpush3.bf16.msra.mxu1 %v13014_v62 }
0x21f8   : > { %12161 = vmatprep.subr.bf16.mxu1 %v13621_v0 }
0x21fb   : > { %12162 = vmatpush3.bf16.msra.mxu1 %v13018_v2 }
0x21fc   : > { %12163 = vmatprep.subr.bf16.mxu1 %v13621_v0 }
0x21ff   : > { %12164 = vmatpush3.bf16.msra.mxu1 %v13022_v6 }
0x2200   : > { %12165 = vmatprep.subr.bf16.mxu1 %v13621_v0 }
0x2203   : > { %12166 = vmatpush3.bf16.msra.mxu1 %v13026_v8 }
0x2204   : > { %12167 = vmatprep.subr.bf16.mxu1 %v13621_v0 }
0x2207   : > { %v5910_v34 = vpop.f32.mrb[56].mxu1  ;;  %12168 = vmatpush3.bf16.msra.mxu1 %v13030_v9 }
0x2208   : > { %v12103_v25 = vpop.f32.mrb[57].mxu1  ;;  %12169 = vmatprep.subr.bf16.mxu1 %v13621_v0 }
0x2209   : > { %v5913_v36 = vpop.f32.mrb[58].mxu1 }
0x220a   : > { %v12104_v39 = vpop.f32.mrb[59].mxu1 }
0x220b   : > { %12170 = vmatpush3.bf16.msra.mxu1 %v13034_v12 }
0x220c   : > { %12171 = vmatprep.subr.bf16.mxu1 %v13621_v0 }
0x220f   : > { %12172 = vmatpush3.bf16.msra.mxu1 %v13038_v16 }
0x2210   : > { %12182 = vmatprep.subr.mxu1 %v13621_v0 }
0x2217   : > { %v5977_v40 = vpop.f32.mrb[60].mxu1 }
0x2218   : > { %v15172_v41 = vadd.f32 %v5977_v40, %v5910_v34  ;;  %v12115_v29 = vpop.f32.mrb[61].mxu1 }
0x2219   : > { %v5980_v58 = vpop.f32.mrb[62].mxu1 }
0x221a   : > { %v12116_v47 = vpop.f32.mrb[63].mxu1 }
0x22c5   : > { %v6259_v44 = vpop.f32.mrb[64].mxu1 }
0x22c6   : > { %v6260_v46 = vadd.f32 %v10667_v43, %v6259_v44  ;;  %v12155_v42 = vpop.f32.mrb[65].mxu1  ;;  %v10734_v44 = vld [vmem:[%s14221_s11 + $0x22] ss:$0 sm:$0xff] }
0x22c7   : > { %v6262_v48 = vpop.f32.mrb[66].mxu1  ;;  %v10735_v42 = vld [vmem:[%s14221_s11 + $0x23] ss:$0 sm:$0xff] }
0x22c8   : > { %6267 = vadd.xlane.f32.xlu1 %v6260_v46  ;;  %v12156_v50 = vpop.f32.mrb[67].mxu1 }
0x2355   : > { %v6268_v51 = vpop.xlane.xlu1 %6267 }
0x2356   : > { %v6269_v53 = vmul.f32 0.0078125, %v6268_v51 }
0x2358   : > { %v15175_v45 = vsub.f32 %v6260_v46, %v6269_v53  ;;  %v10736_v46 = vld [vmem:[%s14221_s11 + $0x24] ss:$0 sm:$0xff] }
0x235a   : > { %v6271_v54 = vmul.f32 %v15175_v45, %v15175_v45 }
0x235c   : > { %6272 = vadd.xlane.f32.xlu1 %v6271_v54 }
0x23e9   : > { %v6273_v17 = vpop.xlane.xlu1 %6272 }
0x23ea   : > { %v6274_v19 = vmul.f32 0.0078125, %v6273_v17 }
0x23ec   : > { %v6275_v20 = vadd.f32 1e-05, %v6274_v19 }
0x23ee   : > { %13203 = vrsqrt.f32 %v6275_v20 }
0x23f8   : > { %v13204_v21 = vpop.eup %13203 }
0x23f9   : > { %v6277_v26 = vmul.f32 %v13204_v21, %v15175_v45 }
0x23fb   : > { %v6282_v18 = vmul.f32 %v10676_v24, %v6277_v26  ;;  %v13041_v24 = vld [vmem:[%s14214_s18 + $0x90] sm:$0xff]   ;;  %v13042_v26 = vld [vmem:[%s14214_s18 + $0x98] sm:$0xff]  }
0x23fd   : > { %v6287_v5 = vadd.f32 %v10677_v23, %v6282_v18 }
0x23ff   : > { %v6289_v30 = vmul.f32 0.044715, %v6287_v5  ;;  %v6288_v40 = vmul.f32 0.5, %v6287_v5 }
0x2401   : > { %v6290_v33 = vmul.f32 %v6289_v30, %v6287_v5  ;;  %v13039_v30 = vld [vmem:[%s14214_s18 + $0x80] sm:$0xff]  }
0x2403   : > { %v6291_v34 = vmul.f32 %v6290_v33, %v6287_v5 }
0x2405   : > { %v6292_v25 = vadd.f32 %v6291_v34, %v6287_v5  ;;  %v13040_v34 = vld [vmem:[%s14214_s18 + $0x88] sm:$0xff]  }
0x2407   : > { %v6293_v36 = vmul.f32 0.7978846, %v6292_v25 }
0x2409   : > { %13205 = vtanh.f32 %v6293_v36 }
0x2413   : > { %v13206_v39 = vpop.eup %13205 }
0x2414   : > { %v6295_v29 = vadd.f32 1.0, %v13206_v39 }
0x2416   : > { %v6296_v58 = vmul.f32 %v6295_v29, %v6288_v40 }
0x2418   : > { %v15216_v47 = vadd.f32 %v6296_v58, %v15166_v31 }
0x241a   : > { %v6298_v43 = vpack.c.bf16 %v15216_v47, %v15216_v47 }
0x241c   : > { %6493 = vmatmul.mubr.bf16.vlgmr.msra.gmra.mrb[76].mxu0 %v6298_v43  ;;  %12174 = vmatmul.mubr.bf16.vlgmr.msra.gmra.mrb[68].mxu1 %v6298_v43 }
0x241d   : > { %12179 = vmatprep.mubr.msk.f32.mxu0 %vm13622_vm0, %v13621_v0  ;;  %12184 = vmatprep.mubr.msk.f32.mxu1 %vm13622_vm0, %v13621_v0 }
0x24ef   : > { %v6494_v48 = vpop.f32.mrb[76].mxu0  ;;  %v6535_v50 = vpop.f32.mrb[68].mxu1 }
0x24f0   : > { %v6546_v51 = vadd.f32 %v10734_v44, %v6494_v48  ;;  %v15227_v53 = vadd.f32 %v10736_v46, %v6535_v50  ;;  %v6496_v31 = vpop.f32.mrb[77].mxu0  ;;  %v12175_v45 = vpop.f32.mrb[69].mxu1 }
0x24f1   : > { %v15229_v54 = vadd.f32 %v10735_v42, %v6496_v31  ;;  %v6498_v55 = vpop.f32.mrb[78].mxu0  ;;  %v6538_v56 = vpop.f32.mrb[70].mxu1 }
0x24f2   : > { %v15231_v57 = vmul.f32 0.17677669, %v6546_v51  ;;  %v6499_v59 = vpop.f32.mrb[79].mxu0  ;;  %v12176_v60 = vpop.f32.mrb[71].mxu1  ;;  %12183 = vmatpush3.msra.mxu1 %v15227_v53 }
0x24f3   : > { %6741 = vrot.lane.b32.xlu1 %v15229_v54, %s13624_s2  ;;  %12178 = vmatpush3.xpose.msk.msra.mxu0 %vm2466_vm1, %v15229_v54 }
0x24f4   : > { %6739 = vrot.lane.b32.xlu0 %v15231_v57, %s13624_s2  ;;  %12187 = vmatprep.subr.mxu0 %v13621_v0 }
0x24f5   : > { %12192 = vmatprep.subr.mxu1 %v13621_v0 }
0x24f6   : > { %12180 = vmatmul.mubr.msk.f32.vlgmr.msra.gmra.mrb[50].mxu0 %vm2466_vm1, %v15231_v57 }
0x24f7   : > { %12189 = vmatprep.mubr.msk.f32.mxu0 %vm13622_vm0, %v13621_v0 }
0x2565   : > { %v6742_v62 = vpop.permute.xlu1 %6741 }
0x2566   : > { %12188 = vmatpush3.xpose.msk.msra.mxu0 %vm2466_vm1, %v6742_v62  ;;  %v6740_v63 = vpop.permute.xlu0 %6739 }
0x2567   : > { %12197 = vmatprep.subr.bf16.mxu0 %v13621_v0 }
0x2569   : > { %12190 = vmatmul.mubr.msk.f32.vlgmr.msra.gmra.mrb[80].mxu0 %vm2466_vm1, %v6740_v63 }
0x256a   : > { %12201 = vmatprep.mubr.msk.bf16.mxu0 %vm13622_vm0, %v13621_v0  ;;  %12198 = vmatpush3.bf16.msra.mxu0 %v13041_v24 }
0x256b   : > { %12199 = vmatprep.subr.bf16.mxu0 %v13621_v0 }
0x256e   : > { %12200 = vmatpush3.bf16.msra.mxu0 %v13042_v26 }
0x256f   : > { %12213 = vmatprep.subr.mxu0 %v13621_v0 }
0x25c9   : > { %v6649_v1 = vpop.f32.mrb[50].mxu0 }
0x25ca   : > { %v6653_v2 = vsel %vm3133_vm5, %v6649_v1, -1e+30  ;;  %v12181_v52 = vpop.f32.mrb[51].mxu0 }
0x25cb   : > { %v6654_v38 = vsel %vm3135_vm6, %v6653_v2, -inf }
0x25cc   : > { %6655 = vmax.xlane.f32.xlu0 %v6654_v38 }
0x263c   : > { %v6813_v6 = vpop.f32.mrb[80].mxu0 }
0x263d   : > { %v6817_v7 = vsel %vm3133_vm5, %v6813_v6, -1e+30  ;;  %v12191_v49 = vpop.f32.mrb[81].mxu0 }
0x263e   : > { %v6818_v8 = vsel %vm3135_vm6, %v6817_v7, -inf  ;;  %v13043_v49 = vld [vmem:[%s14214_s18 + $0xa0] sm:$0xff]  }
0x263f   : > { %6819 = vmax.xlane.f32.xlu1 %v6818_v8 }
0x2650   : > { %7019 = vrot.lane.b32.xlu1 %v15229_v54, %s13625_s29 }
0x2654   : > { %7017 = vrot.lane.b32.xlu1 %v15231_v57, %s13625_s29 }
0x2659   : > { %v6656_v13 = vpop.xlane.xlu0 %6655 }
0x265a   : > { %v6657_v28 = vsub.f32 %v6653_v2, %v6656_v13 }
0x265c   : > { %v6658_v9 = vmul.f32 1.442695, %v6657_v28 }
0x265e   : > { %13207 = vpow2.f32 %v6658_v9  ;;  %v13044_v9 = vld [vmem:[%s14214_s18 + $0xa8] sm:$0xff]  }
0x2668   : > { %v13208_v10 = vpop.eup %13207 }
0x2669   : > { %v6660_v11 = vsel %vm3135_vm6, %v13208_v10, 0.0 }
0x266a   : > { %6661 = vadd.xlane.f32.xlu0 %v6660_v11 }
0x26cc   : > { %v6820_v12 = vpop.xlane.xlu1 %6819 }
0x26cd   : > { %v6821_v14 = vsub.f32 %v6817_v7, %v6820_v12 }
0x26cf   : > { %v6822_v15 = vmul.f32 1.442695, %v6821_v14 }
0x26d0   : > { %v7020_v43 = vpop.permute.xlu1 %7019 }
0x26d1   : > { %13209 = vpow2.f32 %v6822_v15 }
0x26d4   : > { %v7018_v44 = vpop.permute.xlu1 %7017 }
0x26db   : > { %v13210_v16 = vpop.eup %13209 }
0x26dc   : > { %v6824_v17 = vsel %vm3135_vm6, %v13210_v16, 0.0 }
0x26dd   : > { %6825 = vadd.xlane.f32.xlu0 %v6824_v17 }
0x26f3   : > { %6830 = vrot.lane.b32.xlu0 %v15227_v53, %s13624_s2 }
0x26f7   : > { %v6662_v19 = vpop.xlane.xlu0 %6661 }
0x26f8   : > { %13211 = vrcp.f32 %v6662_v19 }
0x2702   : > { %v13212_v20 = vpop.eup %13211 }
0x2703   : > { %v6664_v21 = vmul.f32 %v13212_v20, %v13208_v10 }
0x2705   : > { %12185 = vmatmul.mubr.msk.f32.vlgmr.msra.gmra.mrb[54].mxu1 %vm3135_vm6, %v6664_v21 }
0x2706   : > { %12194 = vmatprep.mubr.msk.f32.mxu1 %vm13622_vm0, %v13621_v0 }
0x276a   : > { %v6826_v23 = vpop.xlane.xlu0 %6825 }
0x276b   : > { %13213 = vrcp.f32 %v6826_v23  ;;  %v13045_v23 = vld [vmem:[%s14214_s18 + $0xb0] sm:$0xff]  }
0x276e   : > { %v6831_v18 = vpop.permute.xlu0 %6830 }
0x276f   : > { %12193 = vmatpush3.msra.mxu1 %v6831_v18 }
0x2770   : > { %12205 = vmatprep.subr.bf16.mxu1 %v13621_v0 }
0x2775   : > { %v13214_v5 = vpop.eup %13213 }
0x2776   : > { %v6828_v33 = vmul.f32 %v13214_v5, %v13210_v16 }
0x2778   : > { %12195 = vmatmul.mubr.msk.f32.vlgmr.msra.gmra.mrb[72].mxu1 %vm3135_vm6, %v6828_v33 }
0x2779   : > { %12206 = vmatpush3.bf16.msra.mxu1 %v13039_v30  ;;  %12209 = vmatprep.mubr.msk.bf16.mxu1 %vm13622_vm0, %v13621_v0 }
0x277a   : > { %12207 = vmatprep.subr.bf16.mxu1 %v13621_v0 }
0x277d   : > { %12208 = vmatpush3.bf16.msra.mxu1 %v13040_v34 }
0x277e   : > { %12218 = vmatprep.subr.mxu1 %v13621_v0 }
0x27d8   : > { %v6734_v25 = vpop.f32.mrb[54].mxu1 }
0x27d9   : > { %v6738_v36 = vpack.c.bf16 %v6734_v25, %v6734_v25  ;;  %v12186_v39 = vpop.f32.mrb[55].mxu1 }
0x27db   : > { %12210 = vmatmul.mubr.msk.bf16.vlgmr.msra.gmra.mrb[76].mxu1 %vm2466_vm1, %v6738_v36 }
0x27dc   : > { %12220 = vmatprep.mubr.msk.f32.mxu1 %vm13622_vm0, %v13621_v0 }
0x284b   : > { %v6902_v40 = vpop.f32.mrb[72].mxu1 }
0x284c   : > { %v6906_v29 = vpack.c.bf16 %v6902_v40, %v6902_v40  ;;  %v12196_v58 = vpop.f32.mrb[73].mxu1 }
0x284e   : > { %12202 = vmatmul.mubr.msk.bf16.vlgmr.msra.gmra.mrb[84].mxu0 %vm2466_vm1, %v6906_v29 }
0x284f   : > { %12214 = vmatpush3.xpose.msk.msra.mxu0 %vm2466_vm1, %v7020_v43  ;;  %12215 = vmatprep.mubr.msk.f32.mxu0 %vm13622_vm0, %v13621_v0  ;;  %v10777_v43 = vld [vmem:[%s14221_s11 + $0x2a] ss:$0 sm:$0xff] }
0x2850   : > { %12223 = vmatprep.subr.bf16.mxu0 %v13621_v0 }
0x2856   : > { %12216 = vmatmul.mubr.msk.f32.vlgmr.msra.gmra.mrb[82].mxu0 %vm2466_vm1, %v7018_v44 }
0x2857   : > { %12227 = vmatprep.mubr.msk.bf16.mxu0 %vm13622_vm0, %v13621_v0  ;;  %12224 = vmatpush3.bf16.msra.mxu0 %v13043_v49  ;;  %v13050_v49 = vld [vmem:[%s14861_s21 + $0x98] sm:$0xff]  }
0x2858   : > { %12225 = vmatprep.subr.bf16.mxu0 %v13621_v0 }
0x285b   : > { %12226 = vmatpush3.bf16.msra.mxu0 %v13044_v9  ;;  %v13057_v9 = vld [vmem:[#allocation11 + $0x50] sm:$0xff]  }
0x285c   : > { %12241 = vmatprep.subr.bf16.mxu0 %v13621_v0 }
0x28ae   : > { %v7011_v46 = vpop.f32.mrb[76].mxu1 }
0x28af   : > { %v12211_v42 = vpop.f32.mrb[77].mxu1 }
0x28b0   : > { %v7014_v48 = vpop.f32.mrb[78].mxu1 }
0x28b1   : > { %v12212_v50 = vpop.f32.mrb[79].mxu1 }
0x2921   : > { %v6956_v51 = vpop.f32.mrb[84].mxu0 }
0x2922   : > { %v15291_v31 = vadd.f32 %v7011_v46, %v6956_v51  ;;  %v12203_v45 = vpop.f32.mrb[85].mxu0 }
0x2923   : > { %v6959_v55 = vpop.f32.mrb[86].mxu0 }
0x2924   : > { %v12204_v56 = vpop.f32.mrb[87].mxu0 }
0x2929   : > { %v7091_v59 = vpop.f32.mrb[82].mxu0 }
0x292a   : > { %v7095_v60 = vsel %vm3133_vm5, %v7091_v59, -1e+30  ;;  %v12217_v62 = vpop.f32.mrb[83].mxu0 }
0x292b   : > { %v7096_v63 = vsel %vm3135_vm6, %v7095_v60, -inf }
0x292c   : > { %7097 = vmax.xlane.f32.xlu0 %v7096_v63 }
0x2942   : > { %7107 = vrot.lane.b32.xlu0 %v15227_v53, %s13625_s29 }
0x2946   : > { %7240 = vrot.lane.b32.xlu0 %v15231_v57, %s13623_s9 }
0x29b9   : > { %v7098_v1 = vpop.xlane.xlu0 %7097 }
0x29ba   : > { %v7099_v2 = vsub.f32 %v7095_v60, %v7098_v1  ;;  %v10778_v1 = vld [vmem:[%s14221_s11 + $0x2e] ss:$0 sm:$0xff] }
0x29bc   : > { %v7100_v52 = vmul.f32 1.442695, %v7099_v2 }
0x29bd   : > { %v7108_v38 = vpop.permute.xlu0 %7107 }
0x29be   : > { %13215 = vpow2.f32 %v7100_v52  ;;  %12219 = vmatpush3.msra.mxu1 %v7108_v38 }
0x29bf   : > { %12231 = vmatprep.subr.mxu1 %v13621_v0 }
0x29c8   : > { %v13216_v6 = vpop.eup %13215 }
0x29c9   : > { %v7102_v7 = vsel %vm3135_vm6, %v13216_v6, 0.0 }
0x29ca   : > { %7103 = vadd.xlane.f32.xlu1 %v7102_v7  ;;  %v13049_v7 = vld [vmem:[%s14861_s21 + $0x90] sm:$0xff]  }
0x29db   : > { %7242 = vrot.lane.b32.xlu1 %v15229_v54, %s13623_s9  ;;  %v7241_v54 = vpop.permute.xlu0 %7240 }
0x2a57   : > { %v7104_v57 = vpop.xlane.xlu1 %7103 }
0x2a58   : > { %13217 = vrcp.f32 %v7104_v57  ;;  %v13052_v57 = vld [vmem:[%s14861_s21 + $0xa8] sm:$0xff]  }
0x2a5b   : > { %v7243_v28 = vpop.permute.xlu1 %7242 }
0x2a62   : > { %v13218_v8 = vpop.eup %13217 }
0x2a63   : > { %v7106_v13 = vmul.f32 %v13218_v8, %v13216_v6  ;;  %v13047_v6 = vld [vmem:[%s14861_s21 + $0x80] sm:$0xff]   ;;  %v13053_v8 = vld [vmem:[%s14861_s21 + $0xb0] sm:$0xff]  }
0x2a65   : > { %12221 = vmatmul.mubr.msk.f32.vlgmr.msra.gmra.mrb[74].mxu1 %vm3135_vm6, %v7106_v13  ;;  %v13054_v13 = vld [vmem:[%s14861_s21 + $0xb8] sm:$0xff]  }
0x2a66   : > { %12232 = vmatpush3.xpose.msk.msra.mxu1 %vm2466_vm1, %v7243_v28  ;;  %12233 = vmatprep.mubr.msk.f32.mxu1 %vm13622_vm0, %v13621_v0  ;;  %v13055_v28 = vld [vmem:[#allocation11 + $0x40] sm:$0xff]  }
0x2a67   : > { %12236 = vmatprep.subr.mxu1 %v13621_v0 }
0x2a69   : > { %12234 = vmatmul.mubr.msk.f32.vlgmr.msra.gmra.mrb[80].mxu1 %vm2466_vm1, %v7241_v54  ;;  %v13056_v54 = vld [vmem:[#allocation11 + $0x48] sm:$0xff]  }
0x2a6a   : > { %12238 = vmatprep.mubr.msk.f32.mxu1 %vm13622_vm0, %v13621_v0 }
0x2b38   : > { %v7179_v10 = vpop.f32.mrb[74].mxu1 }
0x2b39   : > { %v7183_v11 = vpack.c.bf16 %v7179_v10, %v7179_v10  ;;  %v12222_v12 = vpop.f32.mrb[75].mxu1 }
0x2b3b   : > { %12228 = vmatmul.mubr.msk.bf16.vlgmr.msra.gmra.mrb[88].mxu0 %vm2466_vm1, %v7183_v11 }
0x2b3c   : > { %v7314_v14 = vpop.f32.mrb[80].mxu1  ;;  %12245 = vmatprep.mubr.msk.bf16.mxu0 %vm13622_vm0, %v13621_v0  ;;  %12242 = vmatpush3.bf16.msra.mxu0 %v13045_v23 }
0x2b3d   : > { %v7318_v15 = vsel %vm3133_vm5, %v7314_v14, -1e+30  ;;  %v12235_v16 = vpop.f32.mrb[81].mxu1  ;;  %12243 = vmatprep.subr.bf16.mxu0 %v13621_v0 }
0x2b3e   : > { %v7319_v17 = vsel %vm3135_vm6, %v7318_v15, -inf }
0x2b3f   : > { %7320 = vmax.xlane.f32.xlu1 %v7319_v17 }
0x2bcc   : > { %v7321_v19 = vpop.xlane.xlu1 %7320 }
0x2bcd   : > { %v7322_v20 = vsub.f32 %v7318_v15, %v7321_v19  ;;  %v13058_v15 = vld [vmem:[#allocation11 + $0x58] sm:$0xff]  }
0x2bcf   : > { %v7323_v21 = vmul.f32 1.442695, %v7322_v20 }
0x2bd1   : > { %13219 = vpow2.f32 %v7323_v21 }
0x2bdb   : > { %v13220_v24 = vpop.eup %13219 }
0x2bdc   : > { %v7325_v26 = vsel %vm3135_vm6, %v13220_v24, 0.0 }
0x2bdd   : > { %7326 = vadd.xlane.f32.xlu0 %v7325_v26 }
0x2bf3   : > { %7330 = vrot.lane.b32.xlu0 %v15227_v53, %s13623_s9 }
0x2bf7   : > { %7743 = vrot.lane.b32.xlu0 %v14569_v22, %s13625_s29 }
0x2bfb   : > { %7746 = vrot.lane.b32.xlu0 %v14591_v37, %s13624_s2  ;;  %v13046_v37 = vld [vmem:[%s14214_s18 + $0xb8] sm:$0xff]  }
0x2bfc   : > { %12244 = vmatpush3.bf16.msra.mxu0 %v13046_v37 }
0x2bfd   : > { %12274 = vmatprep.subr.bf16.mxu0 %v13621_v0 }
0x2c0e   : > { %v7233_v18 = vpop.f32.mrb[88].mxu0 }
0x2c0f   : > { %v7239_v5 = vadd.f32 %v7233_v18, %v15291_v31  ;;  %v12229_v30 = vpop.f32.mrb[89].mxu0 }
0x2c10   : > { %v7236_v33 = vpop.f32.mrb[90].mxu0 }
0x2c11   : > { %v12230_v34 = vpop.f32.mrb[91].mxu0 }
0x2c6a   : > { %v7327_v25 = vpop.xlane.xlu0 %7326 }
0x2c6b   : > { %13221 = vrcp.f32 %v7327_v25 }
0x2c6e   : > { %v7331_v53 = vpop.permute.xlu0 %7330 }
0x2c6f   : > { %12237 = vmatpush3.msra.mxu1 %v7331_v53 }
0x2c70   : > { %12249 = vmatprep.subr.mxu1 %v13621_v0 }
0x2c72   : > { %v7744_v16 = vpop.permute.xlu0 %7743 }
0x2c75   : > { %v13222_v22 = vpop.eup %13221 }
0x2c76   : > { %v7329_v36 = vmul.f32 %v13222_v22, %v13220_v24  ;;  %v7747_v20 = vpop.permute.xlu0 %7746  ;;  %v10810_v24 = vld [vmem:[%s14221_s11 + $0x3] ss:$0 sm:$0xff] }
0x2c77   : > { %v13059_v22 = vld [vmem:[%s14579_s8 + $0x180] sm:$0xff]  }
0x2c78   : > { %12239 = vmatmul.mubr.msk.f32.vlgmr.msra.gmra.mrb[82].mxu1 %vm3135_vm6, %v7329_v36 }
0x2c79   : > { %12251 = vmatprep.mubr.msk.f32.mxu1 %vm13622_vm0, %v13621_v0 }
0x2d4b   : > { %v7402_v39 = vpop.f32.mrb[82].mxu1 }
0x2d4c   : > { %v7406_v40 = vpack.c.bf16 %v7402_v39, %v7402_v39  ;;  %v12240_v29 = vpop.f32.mrb[83].mxu1 }
0x2d4d   : > { %v13061_v29 = vld [vmem:[%s14579_s8 + $0x190] sm:$0xff]  }
0x2d4e   : > { %12246 = vmatmul.mubr.msk.bf16.vlgmr.msra.gmra.mrb[92].mxu0 %vm2466_vm1, %v7406_v40 }
0x2d4f   : > { %12282 = vmatprep.mubr.msk.bf16.mxu0 %vm13622_vm0, %v13621_v0  ;;  %12275 = vmatpush3.bf16.msra.mxu0 %v13055_v28  ;;  %v13072_v28 = vld [vmem:[%s14579_s8 + $0x1e8] sm:$0xff]  }
0x2d50   : > { %12276 = vmatprep.subr.bf16.mxu0 %v13621_v0 }
0x2d53   : > { %12277 = vmatpush3.bf16.msra.mxu0 %v13056_v54  ;;  %v13073_v54 = vld [vmem:[%s14579_s8 + $0x1f0] sm:$0xff]  }
0x2d54   : > { %12278 = vmatprep.subr.bf16.mxu0 %v13621_v0 }
0x2d57   : > { %12279 = vmatpush3.bf16.msra.mxu0 %v13057_v9  ;;  %v13074_v9 = vld [vmem:[%s14579_s8 + $0x1f8] sm:$0xff]  }
0x2d58   : > { %12280 = vmatprep.subr.bf16.mxu0 %v13621_v0 }
0x2d5b   : > { %12281 = vmatpush3.bf16.msra.mxu0 %v13058_v15  ;;  %v10836_v15 = vld [vmem:[%s14221_s11 + $0x12] ss:$0 sm:$0xff] }
0x2d5c   : > { %12286 = vmatprep.subr.bf16.mxu0 %v13621_v0 }
0x2e21   : > { %v7456_v58 = vpop.f32.mrb[92].mxu0 }
0x2e22   : > { %v7462_v44 = vadd.f32 %v7456_v58, %v7239_v5  ;;  %v12247_v46 = vpop.f32.mrb[93].mxu0  ;;  %v15381_v5 = vld [vmem:[%s14221_s11 + $0x35] sm:$0x1] }
0x2e23   : > { %v7459_v42 = vpop.f32.mrb[94].mxu0  ;;  %v13064_v46 = vld [vmem:[%s14579_s8 + $0x1a8] sm:$0xff]  }
0x2e24   : > { %v7468_v48 = vadd.f32 %v10777_v43, %v7462_v44  ;;  %v12248_v50 = vpop.f32.mrb[95].mxu0  ;;  %v13062_v43 = vld [vmem:[%s14579_s8 + $0x198] sm:$0xff]   ;;  %v13063_v44 = vld [vmem:[%s14579_s8 + $0x1a0] sm:$0xff]  }
0x2e26   : > { %v7469_v51 = vadd.f32 %v7468_v48, %v15216_v47  ;;  %v10779_v47 = vld [vmem:[%s14221_s11 + $0x32] ss:$0 sm:$0xff] }
0x2e27   : > { %v13065_v48 = vld [vmem:[%s14579_s8 + $0x1b0] sm:$0xff]  }
0x2e28   : > { %7472 = vadd.xlane.f32.xlu1 %v7469_v51 }
0x2eb5   : > { %v7473_v31 = vpop.xlane.xlu1 %7472 }
0x2eb6   : > { %v7474_v45 = vmul.f32 0.0078125, %v7473_v31  ;;  %v13066_v31 = vld [vmem:[%s14579_s8 + $0x1b8] sm:$0xff]  }
0x2eb8   : > { %v7475_v55 = vsub.f32 %v7469_v51, %v7474_v45 }
0x2eba   : > { %v7476_v56 = vmul.f32 %v7475_v55, %v7475_v55 }
0x2ebc   : > { %7477 = vadd.xlane.f32.xlu1 %v7476_v56 }
0x2ecd   : > { %7740 = vrot.lane.b32.xlu1 %v14573_v27, %s13623_s9  ;;  %v13048_v27 = vld [vmem:[%s14861_s21 + $0x88] sm:$0xff]  }
0x2f49   : > { %v7478_v59 = vpop.xlane.xlu1 %7477 }
0x2f4a   : > { %v7479_v60 = vmul.f32 0.0078125, %v7478_v59 }
0x2f4c   : > { %v7480_v62 = vadd.f32 1e-05, %v7479_v60 }
0x2f4d   : > { %v7741_v17 = vpop.permute.xlu1 %7740 }
0x2f4e   : > { %13223 = vrsqrt.f32 %v7480_v62  ;;  %v7749_v19 = vsel %vm2466_vm1, %v7741_v17, %v7744_v16  ;;  %v10837_v17 = vld [vmem:[%s14221_s11 + $0x1a] ss:$0 sm:$0xff] }
0x2f4f   : > { %v7750_v21 = vsel %vm2468_vm2, %v7749_v19, %v7747_v20 }
0x2f50   : > { %v7751_v26 = vsel %vm2470_vm3, %v7750_v21, %v14588_v35  ;;  %v13060_v35 = vld [vmem:[%s14579_s8 + $0x188] sm:$0xff]  }
0x2f51   : > { %v7757_v23 = vadd.f32 %v10810_v24, %v7751_v26 }
0x2f53   : > { %v7759_v18 = vmul.f32 0.044715, %v7757_v23  ;;  %v7758_v51 = vmul.f32 0.5, %v7757_v23 }
0x2f55   : > { %v7760_v30 = vmul.f32 %v7759_v18, %v7757_v23 }
0x2f57   : > { %v7761_v36 = vmul.f32 %v7760_v30, %v7757_v23 }
0x2f58   : > { %v13224_v63 = vpop.eup %13223 }
0x2f59   : > { %v7482_v2 = vmul.f32 %v13224_v63, %v7475_v55  ;;  %v7762_v40 = vadd.f32 %v7761_v36, %v7757_v23  ;;  %v10854_v36 = vld [vmem:[%s14221_s11 + $0xb] ss:$0 sm:$0xff] }
0x2f5b   : > { %v7487_v52 = vmul.f32 %v10778_v1, %v7482_v2  ;;  %v7763_v58 = vmul.f32 0.7978846, %v7762_v40  ;;  %v10827_v1 = vld [vmem:[%s14221_s11 + $0xa] ss:$0 sm:$0xff] }
0x2f5d   : > { %v7492_v38 = vadd.f32 %v10779_v47, %v7487_v52  ;;  %13225 = vtanh.f32 %v7763_v58 }
0x2f5f   : > { %12250 = vmatpush3.msra.mxu1 %v7492_v38 }
0x2f60   : > { %12252 = vmatmul.mubr.msk.f32.vlgmr.msra.gmra.mrb[84].mxu1 %vm3135_vm6, %v15092_v32  ;;  %12254 = vmatprep.subr.bf16.mxu1 %v13621_v0  ;;  %v13051_v32 = vld [vmem:[%s14861_s21 + $0xa0] sm:$0xff]  }
0x2f61   : > { %12255 = vmatpush3.bf16.msra.mxu1 %v13047_v6  ;;  %12270 = vmatprep.mubr.msk.bf16.mxu1 %vm13622_vm0, %v13621_v0 }
0x2f62   : > { %12256 = vmatprep.subr.bf16.mxu1 %v13621_v0 }
0x2f65   : > { %12257 = vmatpush3.bf16.msra.mxu1 %v13048_v27 }
0x2f66   : > { %12258 = vmatprep.subr.bf16.mxu1 %v13621_v0 }
0x2f67   : > { %v13226_v42 = vpop.eup %13225 }
0x2f68   : > { %v7765_v50 = vadd.f32 1.0, %v13226_v42  ;;  %v13077_v42 = vld [vmem:[%s14207_s24 + $0x244] ss:$12 sps:$4 sm:$0xff]  }
0x2f69   : > { %12259 = vmatpush3.bf16.msra.mxu1 %v13049_v7 }
0x2f6a   : > { %12260 = vmatprep.subr.bf16.mxu1 %v13621_v0  ;;  %v15402_v45 = vmul.f32 %v7765_v50, %v7758_v51  ;;  %v13078_v50 = vld [vmem:[%s14207_s24 + $0x248] ss:$12 sps:$4 sm:$0xff]   ;;  %v13079_v51 = vld [vmem:[%s14207_s24 + $0x258] ss:$12 sps:$4 sm:$0xff]  }
0x2f6c   : > { %v7767_v55 = vpack.c.bf16 %v15402_v45, %v15402_v45 }
0x2f6d   : > { %12261 = vmatpush3.bf16.msra.mxu1 %v13050_v49  ;;  %v13067_v49 = vld [vmem:[%s14579_s8 + $0x1c0] sm:$0xff]  }
0x2f6e   : > { %12262 = vmatprep.subr.bf16.mxu1 %v13621_v0 }
0x2f71   : > { %12263 = vmatpush3.bf16.msra.mxu1 %v13051_v32  ;;  %v13068_v32 = vld [vmem:[%s14579_s8 + $0x1c8] sm:$0xff]  }
0x2f72   : > { %12264 = vmatprep.subr.bf16.mxu1 %v13621_v0 }
0x2f75   : > { %12265 = vmatpush3.bf16.msra.mxu1 %v13052_v57  ;;  %v13069_v57 = vld [vmem:[%s14579_s8 + $0x1d0] sm:$0xff]  }
0x2f76   : > { %12266 = vmatprep.subr.bf16.mxu1 %v13621_v0 }
0x2f79   : > { %12267 = vmatpush3.bf16.msra.mxu1 %v13053_v8  ;;  %v13070_v8 = vld [vmem:[%s14579_s8 + $0x1d8] sm:$0xff]  }
0x2f7a   : > { %12268 = vmatprep.subr.bf16.mxu1 %v13621_v0 }
0x2f7d   : > { %12269 = vmatpush3.bf16.msra.mxu1 %v13054_v13  ;;  %v13071_v13 = vld [vmem:[%s14579_s8 + $0x1e0] sm:$0xff]  }
0x2f7e   : > { %12306 = vmatprep.subr.bf16.mxu1 %v13621_v0 }
0x3033   : > { %v7559_v10 = vpop.f32.mrb[84].mxu1 }
0x3034   : > { %v7563_v11 = vmul.f32 %v14881_v4, %v7559_v10  ;;  %v12253_v12 = vpop.f32.mrb[85].mxu1 }
0x3036   : > { %v7564_v14 = vpack.c.bf16 %v7563_v11, %v7563_v11 }
0x3038   : > { %12271 = vmatmul.mubr.bf16.vlgmr.msra.gmra.mrb[88].mxu1 %v7564_v14 }
0x3039   : > { %12322 = vmatprep.mubr.msk.bf16.mxu1 %vm13622_vm0, %v13621_v0  ;;  %12307 = vmatpush3.bf16.msra.mxu1 %v13067_v49  ;;  %v13105_v49 = vld [vmem:[%s14207_s24 + $0x2ec] ss:$12 sps:$4 sm:$0xff]  }
0x303a   : > { %12308 = vmatprep.subr.bf16.mxu1 %v13621_v0 }
0x303d   : > { %12309 = vmatpush3.bf16.msra.mxu1 %v13068_v32  ;;  %v13103_v32 = vld [vmem:[%s14207_s24 + $0x2e8] ss:$12 sps:$4 sm:$0xff]  }
0x303e   : > { %12310 = vmatprep.subr.bf16.mxu1 %v13621_v0 }
0x3041   : > { %12311 = vmatpush3.bf16.msra.mxu1 %v13069_v57  ;;  %v13106_v57 = vld [vmem:[%s14207_s24 + $0x2f0] ss:$12 sps:$4 sm:$0xff]  }
0x3042   : > { %12312 = vmatprep.subr.bf16.mxu1 %v13621_v0 }
0x3045   : > { %12313 = vmatpush3.bf16.msra.mxu1 %v13070_v8 }
0x3046   : > { %12314 = vmatprep.subr.bf16.mxu1 %v13621_v0 }
0x3049   : > { %12315 = vmatpush3.bf16.msra.mxu1 %v13071_v13 }
0x304a   : > { %12316 = vmatprep.subr.bf16.mxu1 %v13621_v0 }
0x304d   : > { %12317 = vmatpush3.bf16.msra.mxu1 %v13072_v28 }
0x304e   : > { %12318 = vmatprep.subr.bf16.mxu1 %v13621_v0 }
0x3051   : > { %12319 = vmatpush3.bf16.msra.mxu1 %v13073_v54 }
0x3052   : > { %12320 = vmatprep.subr.bf16.mxu1 %v13621_v0 }
0x3055   : > { %12321 = vmatpush3.bf16.msra.mxu1 %v13074_v9  ;;  %v10863_v9 = vld [vmem:[%s14221_s11 + $0x13] ss:$0 sm:$0xff] }
0x3056   : > { %12326 = vmatprep.subr.bf16.mxu1 %v13621_v0 }
0x310b   : > { %v7665_v33 = vpop.f32.mrb[88].mxu1 }
0x310c   : > { %v7666_v34 = vadd.f32 %v7665_v33, %v15381_v5  ;;  %v12272_v25 = vpop.f32.mrb[89].mxu1 }
0x310d   : > { %v7668_v53 = vpop.f32.mrb[90].mxu1 }
0x310e   : > { %v7671_v37 = vpack.c.bf16 %v7666_v34, %v7666_v34  ;;  %v12273_v39 = vpop.f32.mrb[91].mxu1 }
0x3110   : > { %12283 = vmatmul.mubr.msk.bf16.vlgmr.msra.gmra.mrb[96].mxu0 %vm2468_vm2, %v7671_v37 }
0x3111   : > { %12287 = vmatpush3.bf16.msra.mxu0 %v13059_v22  ;;  %12302 = vmatprep.mubr.msk.bf16.mxu0 %vm13622_vm0, %v13621_v0 }
0x3112   : > { %12288 = vmatprep.subr.bf16.mxu0 %v13621_v0 }
0x3115   : > { %12289 = vmatpush3.bf16.msra.mxu0 %v13060_v35 }
0x3116   : > { %12290 = vmatprep.subr.bf16.mxu0 %v13621_v0 }
0x3119   : > { %12291 = vmatpush3.bf16.msra.mxu0 %v13061_v29 }
0x311a   : > { %12292 = vmatprep.subr.bf16.mxu0 %v13621_v0 }
0x311d   : > { %12293 = vmatpush3.bf16.msra.mxu0 %v13062_v43 }
0x311e   : > { %12294 = vmatprep.subr.bf16.mxu0 %v13621_v0 }
0x3121   : > { %12295 = vmatpush3.bf16.msra.mxu0 %v13063_v44 }
0x3122   : > { %12296 = vmatprep.subr.bf16.mxu0 %v13621_v0 }
0x3125   : > { %12297 = vmatpush3.bf16.msra.mxu0 %v13064_v46 }
0x3126   : > { %12298 = vmatprep.subr.bf16.mxu0 %v13621_v0 }
0x3129   : > { %12299 = vmatpush3.bf16.msra.mxu0 %v13065_v48  ;;  %v13075_v48 = vld [vmem:[%s14207_s24 + $0x240] ss:$12 sps:$4 sm:$0xff]  }
0x312a   : > { %12300 = vmatprep.subr.bf16.mxu0 %v13621_v0 }
0x312d   : > { %12301 = vmatpush3.bf16.msra.mxu0 %v13066_v31  ;;  %v13081_v31 = vld [vmem:[%s14207_s24 + $0x25c] ss:$12 sps:$4 sm:$0xff]  }
0x312e   : > { %8217 = vmatprep.subr.bf16.mxu0 %v13077_v42 }
0x3130   : > { %12303 = vmatmul.mubr.bf16.vlgmr.msra.gmra.mrb[100].mxu0 %v7767_v55  ;;  %v13085_v55 = vld [vmem:[%s14207_s24 + $0x274] ss:$12 sps:$4 sm:$0xff]  }
0x3131   : > { %8249 = vmatprep.mubr.bf16.mxu0 %v13626_v3  ;;  %8218 = vmatpush1.bf16.msra.mxu0 %v13075_v48 }
0x3132   : > { %8219 = vmatprep.subr.bf16.mxu0 %v13081_v31 }
0x3135   : > { %8220 = vmatpush1.bf16.msra.mxu0 %v13079_v51 }
0x3136   : > { %8221 = vmatprep.subr.bf16.mxu0 %v13085_v55 }
0x31e3   : > { %v7733_v56 = vpop.f32.mrb[96].mxu0 }
0x31e4   : > { %v15408_v59 = vadd.f32 %v7733_v56, %v15172_v41  ;;  %v12284_v60 = vpop.f32.mrb[97].mxu0  ;;  %v13083_v56 = vld [vmem:[%s14207_s24 + $0x270] ss:$12 sps:$4 sm:$0xff]  }
0x31e5   : > { %v7736_v62 = vpop.f32.mrb[98].mxu0  ;;  %v13086_v60 = vld [vmem:[%s14207_s24 + $0x278] ss:$12 sps:$4 sm:$0xff]   ;;  %8222 = vmatpush1.bf16.msra.mxu0 %v13083_v56 }
0x31e6   : > { %v12285_v63 = vpop.f32.mrb[99].mxu0  ;;  %v13089_v62 = vld [vmem:[%s14207_s24 + $0x28c] ss:$12 sps:$4 sm:$0xff]  }
0x31e7   : > { %v13087_v63 = vld [vmem:[%s14207_s24 + $0x288] ss:$12 sps:$4 sm:$0xff]   ;;  %8223 = vmatprep.subr.bf16.mxu0 %v13089_v62 }
0x31e9   : > { %8224 = vmatpush1.bf16.msra.mxu0 %v13087_v63 }
0x3203   : > { %v7872_v2 = vpop.f32.mrb[100].mxu0 }
0x3204   : > { %v7873_v47 = vadd.f32 %v10827_v1, %v7872_v2  ;;  %v12304_v52 = vpop.f32.mrb[101].mxu0  ;;  %v13090_v1 = vld [vmem:[%s14207_s24 + $0x290] ss:$12 sps:$4 sm:$0xff]  }
0x3205   : > { %v7875_v38 = vpop.f32.mrb[102].mxu0  ;;  %v13093_v2 = vld [vmem:[%s14207_s24 + $0x2a4] ss:$12 sps:$4 sm:$0xff]   ;;  %v13094_v52 = vld [vmem:[%s14207_s24 + $0x2a8] ss:$12 sps:$4 sm:$0xff]  }
0x3206   : > { %7880 = vadd.xlane.f32.xlu1 %v7873_v47  ;;  %v12305_v6 = vpop.f32.mrb[103].mxu0  ;;  %8225 = vmatprep.subr.bf16.mxu0 %v13093_v2  ;;  %v13097_v38 = vld [vmem:[%s14207_s24 + $0x2bc] ss:$12 sps:$4 sm:$0xff]  }
0x3207   : > { %v13095_v6 = vld [vmem:[%s14207_s24 + $0x2b8] ss:$12 sps:$4 sm:$0xff]  }
0x3293   : > { %v7881_v27 = vpop.xlane.xlu1 %7880 }
0x3294   : > { %v7882_v3 = vmul.f32 0.0078125, %v7881_v27  ;;  %v13098_v27 = vld [vmem:[%s14207_s24 + $0x2c0] ss:$12 sps:$4 sm:$0xff]  }
0x3296   : > { %v7883_v7 = vsub.f32 %v7873_v47, %v7882_v3  ;;  %v13091_v47 = vld [vmem:[%s14207_s24 + $0x2a0] ss:$12 sps:$4 sm:$0xff]  }
0x3297   : > { %8226 = vmatpush1.bf16.msra.mxu0 %v13091_v47  ;;  %v13101_v3 = vld [vmem:[%s14207_s24 + $0x2d4] ss:$12 sps:$4 sm:$0xff]  }
0x3298   : > { %v7884_v41 = vmul.f32 %v7883_v7, %v7883_v7  ;;  %8227 = vmatprep.subr.bf16.mxu0 %v13097_v38 }
0x329a   : > { %7885 = vadd.xlane.f32.xlu0 %v7884_v41  ;;  %v13102_v41 = vld [vmem:[%s14207_s24 + $0x2d8] ss:$12 sps:$4 sm:$0xff]  }
0x329b   : > { %8228 = vmatpush1.bf16.msra.mxu0 %v13095_v6 }
0x329c   : > { %8229 = vmatprep.subr.bf16.mxu0 %v13101_v3 }
0x3327   : > { %v7886_v10 = vpop.xlane.xlu0 %7885 }
0x3328   : > { %v7887_v11 = vmul.f32 0.0078125, %v7886_v10 }
0x332a   : > { %v7888_v12 = vadd.f32 1e-05, %v7887_v11  ;;  %v10864_v11 = vld [vmem:[%s14221_s11 + $0x1b] ss:$0 sm:$0xff] }
0x332c   : > { %13227 = vrsqrt.f32 %v7888_v12 }
0x3336   : > { %v13228_v14 = vpop.eup %13227 }
0x3337   : > { %v7890_v16 = vmul.f32 %v13228_v14, %v7883_v7  ;;  %v13099_v7 = vld [vmem:[%s14207_s24 + $0x2d0] ss:$12 sps:$4 sm:$0xff]  }
0x3338   : > { %8230 = vmatpush1.bf16.msra.mxu0 %v13099_v7 }
0x3339   : > { %v7895_v19 = vmul.f32 %v10836_v15, %v7890_v16  ;;  %8231 = vmatprep.subr.bf16.mxu0 %v13105_v49 }
0x333b   : > { %v7900_v20 = vadd.f32 %v10837_v17, %v7895_v19 }
0x333c   : > { %8232 = vmatpush1.bf16.msra.mxu0 %v13103_v32 }
0x333d   : > { %v7902_v21 = vmul.f32 0.044715, %v7900_v20  ;;  %v7901_v33 = vmul.f32 0.5, %v7900_v20  ;;  %12346 = vmatprep.subr.mxu0 %v13621_v0 }
0x333f   : > { %v7903_v24 = vmul.f32 %v7902_v21, %v7900_v20 }
0x3341   : > { %v7904_v26 = vmul.f32 %v7903_v24, %v7900_v20 }
0x3343   : > { %v7905_v23 = vadd.f32 %v7904_v26, %v7900_v20 }
0x3345   : > { %v7906_v18 = vmul.f32 0.7978846, %v7905_v23 }
0x3347   : > { %13229 = vtanh.f32 %v7906_v18 }
0x3351   : > { %v13230_v30 = vpop.eup %13229 }
0x3352   : > { %v7908_v34 = vadd.f32 1.0, %v13230_v30 }
0x3354   : > { %v7909_v25 = vmul.f32 %v7908_v34, %v7901_v33  ;;  %v10921_v33 = vld [vmem:[%s14221_s11 + $0x25] ss:$0 sm:$0xff]  ;;  %v10922_v34 = vld [vmem:[%s14221_s11 + $0x26] ss:$0 sm:$0xff] }
0x3356   : > { %v15430_v53 = vadd.f32 %v7909_v25, %v15402_v45  ;;  %v13082_v45 = vld [vmem:[%s14207_s24 + $0x260] ss:$12 sps:$4 sm:$0xff]   ;;  %s15839_s24 = sld [smem:[#allocation50_spill]] }
0x3358   : > { %v7911_v22 = vpack.c.bf16 %v15430_v53, %v15430_v53 }
0x335a   : > { %12323 = vmatmul.mubr.bf16.vlgmr.msra.gmra.mrb[92].mxu1 %v7911_v22 }
0x335b   : > { %12342 = vmatprep.mubr.msk.bf16.mxu1 %vm13622_vm0, %v13621_v0  ;;  %12327 = vmatpush3.bf16.msra.mxu1 %v13078_v50 }
0x335c   : > { %12328 = vmatprep.subr.bf16.mxu1 %v13621_v0 }
0x335f   : > { %12329 = vmatpush3.bf16.msra.mxu1 %v13082_v45 }
0x3360   : > { %12330 = vmatprep.subr.bf16.mxu1 %v13621_v0 }
0x3363   : > { %12331 = vmatpush3.bf16.msra.mxu1 %v13086_v60 }
0x3364   : > { %12332 = vmatprep.subr.bf16.mxu1 %v13621_v0 }
0x3367   : > { %12333 = vmatpush3.bf16.msra.mxu1 %v13090_v1 }
0x3368   : > { %12334 = vmatprep.subr.bf16.mxu1 %v13621_v0 }
0x336b   : > { %12335 = vmatpush3.bf16.msra.mxu1 %v13094_v52 }
0x336c   : > { %12336 = vmatprep.subr.bf16.mxu1 %v13621_v0 }
0x336f   : > { %12337 = vmatpush3.bf16.msra.mxu1 %v13098_v27 }
0x3370   : > { %12338 = vmatprep.subr.bf16.mxu1 %v13621_v0 }
0x3373   : > { %12339 = vmatpush3.bf16.msra.mxu1 %v13102_v41 }
0x3374   : > { %12340 = vmatprep.subr.bf16.mxu1 %v13621_v0 }
0x3377   : > { %12341 = vmatpush3.bf16.msra.mxu1 %v13106_v57 }
0x3378   : > { %12366 = vmatprep.subr.bf16.mxu1 %v13621_v0 }
0x342d   : > { %v8016_v37 = vpop.f32.mrb[92].mxu1 }
0x342e   : > { %v8017_v39 = vadd.f32 %v10854_v36, %v8016_v37  ;;  %v12324_v35 = vpop.f32.mrb[93].mxu1 }
0x342f   : > { %v8019_v40 = vpop.f32.mrb[94].mxu1 }
0x3430   : > { %8024 = vadd.xlane.f32.xlu0 %v8017_v39  ;;  %v12325_v29 = vpop.f32.mrb[95].mxu1 }
0x3431   : > { %v10923_v29 = vld [vmem:[%s14221_s11 + $0x27] ss:$0 sm:$0xff] }
0x34bd   : > { %v8025_v58 = vpop.xlane.xlu0 %8024 }
0x34be   : > { %v8026_v43 = vmul.f32 0.0078125, %v8025_v58 }
0x34c0   : > { %v15437_v44 = vsub.f32 %v8017_v39, %v8026_v43 }
0x34c2   : > { %v8028_v46 = vmul.f32 %v15437_v44, %v15437_v44 }
0x34c4   : > { %8029 = vadd.xlane.f32.xlu1 %v8028_v46 }
0x3551   : > { %v8030_v8 = vpop.xlane.xlu1 %8029 }
0x3552   : > { %v8031_v13 = vmul.f32 0.0078125, %v8030_v8 }
0x3554   : > { %v8032_v28 = vadd.f32 1e-05, %v8031_v13  ;;  %v13109_v13 = vld [vmem:[%s14214_s18 + $0xd0] sm:$0xff]  }
0x3556   : > { %13231 = vrsqrt.f32 %v8032_v28  ;;  %v13110_v28 = vld [vmem:[%s14214_s18 + $0xd8] sm:$0xff]  }
0x3560   : > { %v13232_v54 = vpop.eup %13231 }
0x3561   : > { %v8034_v10 = vmul.f32 %v13232_v54, %v15437_v44 }
0x3563   : > { %v8039_v12 = vmul.f32 %v10863_v9, %v8034_v10 }
0x3565   : > { %v8044_v14 = vadd.f32 %v10864_v11, %v8039_v12  ;;  %v13107_v11 = vld [vmem:[%s14214_s18 + $0xc0] sm:$0xff]  }
0x3567   : > { %v8046_v15 = vmul.f32 0.044715, %v8044_v14  ;;  %v8045_v24 = vmul.f32 0.5, %v8044_v14 }
0x3569   : > { %v8047_v16 = vmul.f32 %v8046_v15, %v8044_v14 }
0x356b   : > { %v8048_v17 = vmul.f32 %v8047_v16, %v8044_v14 }
0x356d   : > { %v8049_v19 = vadd.f32 %v8048_v17, %v8044_v14  ;;  %v13108_v14 = vld [vmem:[%s14214_s18 + $0xc8] sm:$0xff]  }
0x356f   : > { %v8050_v20 = vmul.f32 0.7978846, %v8049_v19 }
0x3571   : > { %13233 = vtanh.f32 %v8050_v20 }
0x357b   : > { %v13234_v21 = vpop.eup %13233 }
0x357c   : > { %v8052_v26 = vadd.f32 1.0, %v13234_v21 }
0x357e   : > { %v8053_v23 = vmul.f32 %v8052_v26, %v8045_v24 }
0x3580   : > { %v15478_v18 = vadd.f32 %v8053_v23, %v15430_v53 }
0x3582   : > { %v8055_v30 = vpack.c.bf16 %v15478_v18, %v15478_v18 }
0x3584   : > { %8250 = vmatmul.mubr.bf16.vlgmr.msra.gmra.mrb[104].mxu0 %v8055_v30  ;;  %12343 = vmatmul.mubr.bf16.vlgmr.msra.gmra.mrb[96].mxu1 %v8055_v30 }
0x3585   : > { %12348 = vmatprep.mubr.msk.f32.mxu0 %vm13622_vm0, %v13621_v0  ;;  %12370 = vmatprep.mubr.msk.bf16.mxu1 %vm13622_vm0, %v13621_v0 }
0x3586   : > { %12367 = vmatpush3.bf16.msra.mxu1 %v13109_v13 }
0x3587   : > { %12368 = vmatprep.subr.bf16.mxu1 %v13621_v0 }
0x358a   : > { %12369 = vmatpush3.bf16.msra.mxu1 %v13110_v28 }
0x358b   : > { %12382 = vmatprep.subr.mxu1 %v13621_v0 }
0x3657   : > { %v8251_v25 = vpop.f32.mrb[104].mxu0  ;;  %v8292_v22 = vpop.f32.mrb[96].mxu1 }
0x3658   : > { %v8303_v36 = vadd.f32 %v10921_v33, %v8251_v25  ;;  %v8253_v37 = vpop.f32.mrb[105].mxu0  ;;  %v12344_v53 = vpop.f32.mrb[97].mxu1  ;;  %v15496_v46 = vadd.f32 %v10923_v29, %v8292_v22 }
0x3659   : > { %v15488_v39 = vadd.f32 %v10922_v34, %v8253_v37  ;;  %v8255_v35 = vpop.f32.mrb[106].mxu0  ;;  %v8295_v40 = vpop.f32.mrb[98].mxu1 }
0x365a   : > { %v8256_v58 = vpop.f32.mrb[107].mxu0  ;;  %v12345_v43 = vpop.f32.mrb[99].mxu1  ;;  %v15493_v44 = vmul.f32 0.17677669, %v8303_v36 }
0x365b   : > { %12347 = vmatpush3.xpose.msk.msra.mxu0 %vm2466_vm1, %v15488_v39 }
0x365c   : > { %12351 = vmatprep.subr.mxu0 %v13621_v0 }
0x365e   : > { %12349 = vmatmul.mubr.msk.f32.vlgmr.msra.gmra.mrb[108].mxu0 %vm2466_vm1, %v15493_v44 }
0x365f   : > { %12352 = vmatpush3.msra.mxu0 %v15496_v46  ;;  %12353 = vmatprep.mubr.msk.f32.mxu0 %vm13622_vm0, %v13621_v0 }
0x3660   : > { %12356 = vmatprep.subr.mxu0 %v13621_v0 }
0x3731   : > { %v8406_v42 = vpop.f32.mrb[108].mxu0 }
0x3732   : > { %v8410_v48 = vsel %vm3133_vm5, %v8406_v42, -1e+30  ;;  %v12350_v50 = vpop.f32.mrb[109].mxu0 }
0x3733   : > { %v8411_v51 = vsel %vm3135_vm6, %v8410_v48, -inf }
0x3734   : > { %8412 = vmax.xlane.f32.xlu0 %v8411_v51  ;;  %v13111_v51 = vld [vmem:[%s14214_s18 + $0xe0] sm:$0xff]  }
0x374a   : > { %8498 = vrot.lane.b32.xlu0 %v15488_v39, %s13624_s2 }
0x37c1   : > { %v8413_v31 = vpop.xlane.xlu0 %8412 }
0x37c2   : > { %v8414_v45 = vsub.f32 %v8410_v48, %v8413_v31 }
0x37c4   : > { %v8415_v55 = vmul.f32 1.442695, %v8414_v45 }
0x37c5   : > { %v8499_v2 = vpop.permute.xlu0 %8498 }
0x37c6   : > { %13235 = vpow2.f32 %v8415_v55 }
0x37d0   : > { %v13236_v56 = vpop.eup %13235 }
0x37d1   : > { %v8417_v60 = vsel %vm3135_vm6, %v13236_v56, 0.0 }
0x37d2   : > { %8418 = vadd.xlane.f32.xlu1 %v8417_v60 }
0x37e3   : > { %8496 = vrot.lane.b32.xlu1 %v15493_v44, %s13624_s2 }
0x385f   : > { %v8419_v62 = vpop.xlane.xlu1 %8418 }
0x3860   : > { %13237 = vrcp.f32 %v8419_v62 }
0x3863   : > { %v8497_v47 = vpop.permute.xlu1 %8496 }
0x386a   : > { %v13238_v63 = vpop.eup %13237 }
0x386b   : > { %v8421_v1 = vmul.f32 %v13238_v63, %v13236_v56  ;;  %v13112_v56 = vld [vmem:[%s14214_s18 + $0xe8] sm:$0xff]  }
0x386d   : > { %12354 = vmatmul.mubr.msk.f32.vlgmr.msra.gmra.mrb[110].mxu0 %vm3135_vm6, %v8421_v1 }
0x386e   : > { %12357 = vmatpush3.xpose.msk.msra.mxu0 %vm2466_vm1, %v8499_v2  ;;  %12358 = vmatprep.mubr.msk.f32.mxu0 %vm13622_vm0, %v13621_v0 }
0x386f   : > { %12361 = vmatprep.subr.mxu0 %v13621_v0 }
0x3871   : > { %12359 = vmatmul.mubr.msk.f32.vlgmr.msra.gmra.mrb[112].mxu0 %vm2466_vm1, %v8497_v47 }
0x3872   : > { %12363 = vmatprep.mubr.msk.f32.mxu0 %vm13622_vm0, %v13621_v0 }
0x3940   : > { %v8491_v52 = vpop.f32.mrb[110].mxu0 }
0x3941   : > { %v12355_v38 = vpop.f32.mrb[111].mxu0  ;;  %v8495_v15 = vpack.c.bf16 %v8491_v52, %v8491_v52 }
0x3944   : > { %v8570_v6 = vpop.f32.mrb[112].mxu0 }
0x3945   : > { %v8574_v27 = vsel %vm3133_vm5, %v8570_v6, -1e+30  ;;  %v12360_v3 = vpop.f32.mrb[113].mxu0 }
0x3946   : > { %v8575_v7 = vsel %vm3135_vm6, %v8574_v27, -inf }
0x3947   : > { %8576 = vmax.xlane.f32.xlu1 %v8575_v7 }
0x3958   : > { %8776 = vrot.lane.b32.xlu1 %v15488_v39, %s13625_s29 }
0x395c   : > { %8774 = vrot.lane.b32.xlu1 %v15493_v44, %s13625_s29 }
0x39d4   : > { %v8577_v41 = vpop.xlane.xlu1 %8576 }
0x39d5   : > { %v8578_v49 = vsub.f32 %v8574_v27, %v8577_v41  ;;  %v13113_v41 = vld [vmem:[%s14214_s18 + $0xf0] sm:$0xff]  }
0x39d7   : > { %v8579_v32 = vmul.f32 1.442695, %v8578_v49 }
0x39d8   : > { %v8777_v20 = vpop.permute.xlu1 %8776 }
0x39d9   : > { %13239 = vpow2.f32 %v8579_v32 }
0x39dc   : > { %v8775_v26 = vpop.permute.xlu1 %8774 }
0x39e3   : > { %v13240_v57 = vpop.eup %13239 }
0x39e4   : > { %v8581_v8 = vsel %vm3135_vm6, %v13240_v57, 0.0 }
0x39e5   : > { %8582 = vadd.xlane.f32.xlu0 %v8581_v8 }
0x39fb   : > { %8587 = vrot.lane.b32.xlu0 %v15496_v46, %s13624_s2 }
0x3a72   : > { %v8583_v54 = vpop.xlane.xlu0 %8582 }
0x3a73   : > { %13241 = vrcp.f32 %v8583_v54 }
0x3a76   : > { %v8588_v9 = vpop.permute.xlu0 %8587 }
0x3a77   : > { %12362 = vmatpush3.msra.mxu0 %v8588_v9 }
0x3a78   : > { %12374 = vmatprep.subr.bf16.mxu0 %v13621_v0 }
0x3a7d   : > { %v13242_v10 = vpop.eup %13241 }
0x3a7e   : > { %v8585_v12 = vmul.f32 %v13242_v10, %v13240_v57 }
0x3a80   : > { %12364 = vmatmul.mubr.msk.f32.vlgmr.msra.gmra.mrb[114].mxu0 %vm3135_vm6, %v8585_v12 }
0x3a81   : > { %12375 = vmatpush3.bf16.msra.mxu0 %v13107_v11  ;;  %12378 = vmatprep.mubr.msk.bf16.mxu0 %vm13622_vm0, %v13621_v0 }
0x3a82   : > { %12376 = vmatprep.subr.bf16.mxu0 %v13621_v0 }
0x3a85   : > { %12377 = vmatpush3.bf16.msra.mxu0 %v13108_v14 }
0x3a86   : > { %12392 = vmatprep.subr.bf16.mxu0 %v13621_v0 }
0x3a88   : > { %12379 = vmatmul.mubr.msk.bf16.vlgmr.msra.gmra.mrb[116].mxu0 %vm2466_vm1, %v8495_v15  ;;  %v10964_v15 = vld [vmem:[%s14221_s11 + $0x2b] ss:$0 sm:$0xff] }
0x3a89   : > { %12396 = vmatprep.mubr.msk.bf16.mxu0 %vm13622_vm0, %v13621_v0  ;;  %12393 = vmatpush3.bf16.msra.mxu0 %v13111_v51  ;;  %v13260_v51 = vld [vmem:[%s14716_s3] sm:$0x1] }
0x3a8a   : > { %12394 = vmatprep.subr.bf16.mxu0 %v13621_v0 }
0x3a8d   : > { %12395 = vmatpush3.bf16.msra.mxu0 %v13112_v56 }
0x3a8e   : > { %12410 = vmatprep.subr.bf16.mxu0 %v13621_v0 }
0x3b53   : > { %v8659_v16 = vpop.f32.mrb[114].mxu0 }
0x3b54   : > { %v8663_v17 = vpack.c.bf16 %v8659_v16, %v8659_v16  ;;  %v12365_v19 = vpop.f32.mrb[115].mxu0 }
0x3b56   : > { %12371 = vmatmul.mubr.msk.bf16.vlgmr.msra.gmra.mrb[100].mxu1 %vm2466_vm1, %v8663_v17 }
0x3b57   : > { %12383 = vmatpush3.xpose.msk.msra.mxu1 %vm2466_vm1, %v8777_v20  ;;  %12384 = vmatprep.mubr.msk.f32.mxu1 %vm13622_vm0, %v13621_v0 }
0x3b58   : > { %12387 = vmatprep.subr.mxu1 %v13621_v0 }
0x3b5b   : > { %v8768_v21 = vpop.f32.mrb[116].mxu0 }
0x3b5c   : > { %v12380_v24 = vpop.f32.mrb[117].mxu0 }
0x3b5d   : > { %v8771_v23 = vpop.f32.mrb[118].mxu0 }
0x3b5e   : > { %v12381_v30 = vpop.f32.mrb[119].mxu0  ;;  %12385 = vmatmul.mubr.msk.f32.vlgmr.msra.gmra.mrb[86].mxu1 %vm2466_vm1, %v8775_v26 }
0x3b5f   : > { %12389 = vmatprep.mubr.msk.f32.mxu1 %vm13622_vm0, %v13621_v0 }
0x3c29   : > { %v8713_v33 = vpop.f32.mrb[100].mxu1 }
0x3c2a   : > { %v8769_v34 = vadd.f32 %v8768_v21, %v8713_v33  ;;  %v12372_v25 = vpop.f32.mrb[101].mxu1 }
0x3c2b   : > { %v8716_v22 = vpop.f32.mrb[102].mxu1  ;;  %v13116_v25 = vld [vmem:[%s14861_s21 + $0xc8] sm:$0xff]  }
0x3c2c   : > { %v12373_v36 = vpop.f32.mrb[103].mxu1  ;;  %v13118_v22 = vld [vmem:[%s14861_s21 + $0xd8] sm:$0xff]  }
0x3c2d   : > { %v13119_v36 = vld [vmem:[%s14861_s21 + $0xe0] sm:$0xff]  }
0x3c31   : > { %v8848_v37 = vpop.f32.mrb[86].mxu1 }
0x3c32   : > { %v8852_v53 = vsel %vm3133_vm5, %v8848_v37, -1e+30  ;;  %v12386_v35 = vpop.f32.mrb[87].mxu1  ;;  %v13121_v37 = vld [vmem:[%s14861_s21 + $0xf0] sm:$0xff]  }
0x3c33   : > { %v8853_v40 = vsel %vm3135_vm6, %v8852_v53, -inf }
0x3c34   : > { %8854 = vmax.xlane.f32.xlu0 %v8853_v40 }
0x3c4a   : > { %8864 = vrot.lane.b32.xlu0 %v15496_v46, %s13625_s29 }
0x3c4e   : > { %8997 = vrot.lane.b32.xlu0 %v15493_v44, %s13623_s9 }
0x3cc1   : > { %v8855_v29 = vpop.xlane.xlu0 %8854 }
0x3cc2   : > { %v8856_v58 = vsub.f32 %v8852_v53, %v8855_v29 }
0x3cc4   : > { %v8857_v43 = vmul.f32 1.442695, %v8856_v58  ;;  %v10965_v58 = vld [vmem:[%s14221_s11 + $0x2f] ss:$0 sm:$0xff] }
0x3cc5   : > { %v8865_v42 = vpop.permute.xlu0 %8864 }
0x3cc6   : > { %13243 = vpow2.f32 %v8857_v43  ;;  %12388 = vmatpush3.msra.mxu1 %v8865_v42  ;;  %v10966_v42 = vld [vmem:[%s14221_s11 + $0x33] ss:$0 sm:$0xff] }
0x3cc7   : > { %12400 = vmatprep.subr.mxu1 %v13621_v0 }
0x3cd0   : > { %v13244_v48 = vpop.eup %13243 }
0x3cd1   : > { %v8859_v50 = vsel %vm3135_vm6, %v13244_v48, 0.0 }
0x3cd2   : > { %8860 = vadd.xlane.f32.xlu1 %v8859_v50 }
0x3ce3   : > { %8999 = vrot.lane.b32.xlu1 %v15488_v39, %s13623_s9  ;;  %v8998_v39 = vpop.permute.xlu0 %8997 }
0x3d5f   : > { %v8861_v44 = vpop.xlane.xlu1 %8860 }
0x3d60   : > { %13245 = vrcp.f32 %v8861_v44  ;;  %v13122_v44 = vld [vmem:[%s14861_s21 + $0xf8] sm:$0xff]  }
0x3d63   : > { %v9000_v55 = vpop.permute.xlu1 %8999 }
0x3d6a   : > { %v13246_v31 = vpop.eup %13245 }
0x3d6b   : > { %v8863_v45 = vmul.f32 %v13246_v31, %v13244_v48  ;;  %v13123_v31 = vld [vmem:[#allocation11 + $0x60] sm:$0xff]  }
0x3d6d   : > { %12390 = vmatmul.mubr.msk.f32.vlgmr.msra.gmra.mrb[104].mxu1 %vm3135_vm6, %v8863_v45  ;;  %v13124_v45 = vld [vmem:[#allocation11 + $0x68] sm:$0xff]  }
0x3d6e   : > { %12401 = vmatpush3.xpose.msk.msra.mxu1 %vm2466_vm1, %v9000_v55  ;;  %12402 = vmatprep.mubr.msk.f32.mxu1 %vm13622_vm0, %v13621_v0  ;;  %v13125_v55 = vld [vmem:[#allocation11 + $0x70] sm:$0xff]  }
0x3d6f   : > { %12405 = vmatprep.subr.mxu1 %v13621_v0 }
0x3d71   : > { %12403 = vmatmul.mubr.msk.f32.vlgmr.msra.gmra.mrb[106].mxu1 %vm2466_vm1, %v8998_v39 }
0x3d72   : > { %12407 = vmatprep.mubr.msk.f32.mxu1 %vm13622_vm0, %v13621_v0 }
0x3e40   : > { %v8936_v60 = vpop.f32.mrb[104].mxu1 }
0x3e41   : > { %v8940_v62 = vpack.c.bf16 %v8936_v60, %v8936_v60  ;;  %v12391_v63 = vpop.f32.mrb[105].mxu1 }
0x3e42   : > { %v13126_v63 = vld [vmem:[#allocation11 + $0x78] sm:$0xff]  }
0x3e43   : > { %12397 = vmatmul.mubr.msk.bf16.vlgmr.msra.gmra.mrb[120].mxu0 %vm2466_vm1, %v8940_v62 }
0x3e44   : > { %v9071_v1 = vpop.f32.mrb[106].mxu1  ;;  %12414 = vmatprep.mubr.msk.bf16.mxu0 %vm13622_vm0, %v13621_v0  ;;  %12411 = vmatpush3.bf16.msra.mxu0 %v13113_v41 }
0x3e45   : > { %v9075_v2 = vsel %vm3133_vm5, %v9071_v1, -1e+30  ;;  %v12404_v47 = vpop.f32.mrb[107].mxu1  ;;  %12412 = vmatprep.subr.bf16.mxu0 %v13621_v0 }
0x3e46   : > { %v9076_v52 = vsel %vm3135_vm6, %v9075_v2, -inf }
0x3e47   : > { %9077 = vmax.xlane.f32.xlu1 %v9076_v52 }
0x3ed4   : > { %v9078_v38 = vpop.xlane.xlu1 %9077 }
0x3ed5   : > { %v9079_v6 = vsub.f32 %v9075_v2, %v9078_v38 }
0x3ed7   : > { %v9080_v27 = vmul.f32 1.442695, %v9079_v6 }
0x3ed9   : > { %13247 = vpow2.f32 %v9080_v27 }
0x3ee3   : > { %v13248_v3 = vpop.eup %13247 }
0x3ee4   : > { %v9082_v7 = vsel %vm3135_vm6, %v13248_v3, 0.0 }
0x3ee5   : > { %9083 = vadd.xlane.f32.xlu0 %v9082_v7 }
0x3efb   : > { %9087 = vrot.lane.b32.xlu0 %v15496_v46, %s13623_s9  ;;  %v13114_v46 = vld [vmem:[%s14214_s18 + $0xf8] sm:$0xff]   ;;  %s15837_s18 = sld [smem:[#allocation47_spill]] }
0x3efc   : > { %12413 = vmatpush3.bf16.msra.mxu0 %v13114_v46 }
0x3efd   : > { %12423 = vmatprep.subr.bf16.mxu0 %v13621_v0 }
0x3f01   : > { %s15838_s11 = smov %s15837_s18  ;;  %v13127_v46 = vld [vmem:[%s15837_s18] sm:$0xff]   ;;  %s698_s18 = scalar_lea.vmem %s15839_s24, %s14250_s28 }
0x3f16   : > { %v8990_v61 = vpop.f32.mrb[120].mxu0 }
0x3f17   : > { %v8996_v49 = vadd.f32 %v8990_v61, %v8769_v34  ;;  %v12398_v32 = vpop.f32.mrb[121].mxu0  ;;  %v13115_v34 = vld [vmem:[%s14861_s21 + $0xc0] sm:$0xff]  }
0x3f18   : > { %v8993_v57 = vpop.f32.mrb[122].mxu0 }
0x3f19   : > { %v12399_v8 = vpop.f32.mrb[123].mxu0 }
0x3f72   : > { %v9084_v13 = vpop.xlane.xlu0 %9083 }
0x3f73   : > { %13249 = vrcp.f32 %v9084_v13 }
0x3f76   : > { %v9088_v28 = vpop.permute.xlu0 %9087 }
0x3f77   : > { %12406 = vmatpush3.msra.mxu1 %v9088_v28 }
0x3f78   : > { %12418 = vmatprep.subr.mxu1 %v13621_v0 }
0x3f7d   : > { %v13250_v54 = vpop.eup %13249 }
0x3f7e   : > { %v9086_v9 = vmul.f32 %v13250_v54, %v13248_v3  ;;  %v9500_v3 = vld [vmem:[#allocation14] sm:$0x1] }
0x3f80   : > { %12408 = vmatmul.mubr.msk.f32.vlgmr.msra.gmra.mrb[108].mxu1 %vm3135_vm6, %v9086_v9 }
0x3f81   : > { %12420 = vmatprep.mubr.msk.f32.mxu1 %vm13622_vm0, %v13621_v0 }
0x4053   : > { %v9159_v10 = vpop.f32.mrb[108].mxu1 }
0x4054   : > { %v9163_v11 = vpack.c.bf16 %v9159_v10, %v9159_v10  ;;  %v12409_v12 = vpop.f32.mrb[109].mxu1  ;;  %v13129_v10 = vld [vmem:[%s15838_s11 + $0x10] sm:$0xff]  }
0x4055   : > { %v13131_v12 = vld [vmem:[%s15838_s11 + $0x20] sm:$0xff]  }
0x4056   : > { %12415 = vmatmul.mubr.msk.bf16.vlgmr.msra.gmra.mrb[124].mxu0 %vm2466_vm1, %v9163_v11  ;;  %v13130_v11 = vld [vmem:[%s15838_s11 + $0x18] sm:$0xff]  }
0x4057   : > { %12439 = vmatprep.mubr.msk.bf16.mxu0 %vm13622_vm0, %v13621_v0  ;;  %12424 = vmatpush3.bf16.msra.mxu0 %v13115_v34  ;;  %v9503_v34 = vld [vmem:[#allocation14 + $0x2] sm:$0x1] }
0x4058   : > { %12425 = vmatprep.subr.bf16.mxu0 %v13621_v0 }
0x405b   : > { %12426 = vmatpush3.bf16.msra.mxu0 %v13116_v25 }
0x405c   : > { %12427 = vmatprep.subr.bf16.mxu0 %v13621_v0 }
0x4129   : > { %v9213_v14 = vpop.f32.mrb[124].mxu0 }
0x412a   : > { %v9219_v16 = vadd.f32 %v9213_v14, %v8996_v49  ;;  %v12416_v17 = vpop.f32.mrb[125].mxu0  ;;  %v13132_v14 = vld [vmem:[%s15838_s11 + $0x28] sm:$0xff]  }
0x412b   : > { %v9216_v19 = vpop.f32.mrb[126].mxu0  ;;  %v13135_v17 = vld [vmem:[#allocation12] sm:$0xff]  }
0x412c   : > { %v9225_v20 = vadd.f32 %v10964_v15, %v9219_v16  ;;  %v12417_v21 = vpop.f32.mrb[127].mxu0  ;;  %v13133_v15 = vld [vmem:[%s15838_s11 + $0x30] sm:$0xff]   ;;  %v13134_v16 = vld [vmem:[%s15838_s11 + $0x38] sm:$0xff]  }
0x412d   : > { %v13136_v19 = vld [vmem:[#allocation12 + $0x8] sm:$0xff]  }
0x412e   : > { %v9226_v24 = vadd.f32 %v9225_v20, %v15478_v18  ;;  %v13117_v18 = vld [vmem:[%s14861_s21 + $0xd0] sm:$0xff]   ;;  %v13137_v20 = vld [vmem:[#allocation12 + $0x10] sm:$0xff]  }
0x412f   : > { %12428 = vmatpush3.bf16.msra.mxu0 %v13117_v18 }
0x4130   : > { %9229 = vadd.xlane.f32.xlu1 %v9226_v24  ;;  %12429 = vmatprep.subr.bf16.mxu0 %v13621_v0 }
0x4133   : > { %12430 = vmatpush3.bf16.msra.mxu0 %v13118_v22 }
0x4134   : > { %12431 = vmatprep.subr.bf16.mxu0 %v13621_v0 }
0x4137   : > { %12432 = vmatpush3.bf16.msra.mxu0 %v13119_v36 }
0x4138   : > { %12433 = vmatprep.subr.bf16.mxu0 %v13621_v0 }
0x41bd   : > { %v9230_v26 = vpop.xlane.xlu1 %9229 }
0x41be   : > { %v9231_v23 = vmul.f32 0.0078125, %v9230_v26 }
0x41c0   : > { %v9232_v30 = vsub.f32 %v9226_v24, %v9231_v23 }
0x41c2   : > { %v9233_v33 = vmul.f32 %v9232_v30, %v9232_v30 }
0x41c4   : > { %9234 = vadd.xlane.f32.xlu1 %v9233_v33 }
0x41d5   : > { %9388 = vrot.lane.b32.xlu1 %v15381_v5, %s13625_s29  ;;  %v13120_v5 = vld [vmem:[%s14861_s21 + $0xe8] sm:$0xff]  }
0x41d6   : > { %12434 = vmatpush3.bf16.msra.mxu0 %v13120_v5 }
0x41d7   : > { %12435 = vmatprep.subr.bf16.mxu0 %v13621_v0 }
0x41da   : > { %12436 = vmatpush3.bf16.msra.mxu0 %v13121_v37 }
0x41db   : > { %12437 = vmatprep.subr.bf16.mxu0 %v13621_v0 }
0x41de   : > { %12438 = vmatpush3.bf16.msra.mxu0 %v13122_v44 }
0x41df   : > { %12475 = vmatprep.subr.bf16.mxu0 %v13621_v0 }
0x4251   : > { %v9235_v53 = vpop.xlane.xlu1 %9234 }
0x4252   : > { %v9236_v35 = vmul.f32 0.0078125, %v9235_v53 }
0x4254   : > { %v9237_v40 = vadd.f32 1e-05, %v9236_v35 }
0x4255   : > { %v9389_v1 = vpop.permute.xlu1 %9388 }
0x4256   : > { %13251 = vrsqrt.f32 %v9237_v40 }
0x4260   : > { %v13252_v29 = vpop.eup %13251 }
0x4261   : > { %v9239_v43 = vmul.f32 %v13252_v29, %v9232_v30  ;;  %v9502_v30 = vld [vmem:[#allocation14 + $0x1] sm:$0x1] }
0x4263   : > { %v9244_v48 = vmul.f32 %v10965_v58, %v9239_v43  ;;  %v13138_v43 = vld [vmem:[#allocation12 + $0x18] sm:$0xff]  }
0x4265   : > { %v9249_v50 = vadd.f32 %v10966_v42, %v9244_v48  ;;  %v9546_v42 = vld [vmem:[#allocation14 + $0x3] sm:$0x1] }
0x4267   : > { %12419 = vmatpush3.msra.mxu1 %v9249_v50 }
0x4268   : > { %12421 = vmatmul.mubr.msk.f32.vlgmr.msra.gmra.mrb[110].mxu1 %vm3135_vm6, %v13260_v51  ;;  %12443 = vmatprep.subr.bf16.mxu1 %v13621_v0 }
0x4269   : > { %12451 = vmatprep.mubr.msk.bf16.mxu1 %vm13622_vm0, %v13621_v0  ;;  %12444 = vmatpush3.bf16.msra.mxu1 %v13123_v31 }
0x426a   : > { %12445 = vmatprep.subr.bf16.mxu1 %v13621_v0 }
0x426d   : > { %12446 = vmatpush3.bf16.msra.mxu1 %v13124_v45 }
0x426e   : > { %12447 = vmatprep.subr.bf16.mxu1 %v13621_v0 }
0x4271   : > { %12448 = vmatpush3.bf16.msra.mxu1 %v13125_v55  ;;  %v9644_v55 = vld [vmem:[#allocation14 + $0x4] sm:$0x1] }
0x4272   : > { %12449 = vmatprep.subr.bf16.mxu1 %v13621_v0 }
0x4275   : > { %12450 = vmatpush3.bf16.msra.mxu1 %v13126_v63 }
0x4276   : > { %12455 = vmatprep.subr.bf16.mxu1 %v13621_v0 }
0x433b   : > { %v9316_v39 = vpop.f32.mrb[110].mxu1 }
0x433c   : > { %v9320_v56 = vmul.f32 %v14881_v4, %v9316_v39  ;;  %v12422_v60 = vpop.f32.mrb[111].mxu1 }
0x433e   : > { %v9321_v62 = vpack.c.bf16 %v9320_v56, %v9320_v56 }
0x4340   : > { %12440 = vmatmul.mubr.bf16.vlgmr.msra.gmra.mrb[128].mxu0 %v9321_v62 }
0x4341   : > { %12483 = vmatprep.mubr.msk.bf16.mxu0 %vm13622_vm0, %v13621_v0  ;;  %12476 = vmatpush3.bf16.msra.mxu0 %v13135_v17 }
0x4342   : > { %12477 = vmatprep.subr.bf16.mxu0 %v13621_v0 }
0x4345   : > { %12478 = vmatpush3.bf16.msra.mxu0 %v13136_v19 }
0x4346   : > { %12479 = vmatprep.subr.bf16.mxu0 %v13621_v0 }
0x4349   : > { %12480 = vmatpush3.bf16.msra.mxu0 %v13137_v20 }
0x434a   : > { %12481 = vmatprep.subr.bf16.mxu0 %v13621_v0 }
0x434d   : > { %12482 = vmatpush3.bf16.msra.mxu0 %v13138_v43 }
0x4413   : > { %v9425_v2 = vpop.f32.mrb[128].mxu0 }
0x4414   : > { %v9426_v47 = vadd.f32 %v9425_v2, %v9389_v1  ;;  %v12441_v52 = vpop.f32.mrb[129].mxu0 }
0x4415   : > { %v9428_v38 = vpop.f32.mrb[130].mxu0 }
0x4416   : > { %v9431_v6 = vpack.c.bf16 %v9426_v47, %v9426_v47  ;;  %v12442_v27 = vpop.f32.mrb[131].mxu0 }
0x4418   : > { %12452 = vmatmul.mubr.msk.bf16.vlgmr.msra.gmra.mrb[112].mxu1 %vm2468_vm2, %v9431_v6 }
0x4419   : > { %12471 = vmatprep.mubr.msk.bf16.mxu1 %vm13622_vm0, %v13621_v0  ;;  %12456 = vmatpush3.bf16.msra.mxu1 %v13127_v46 }
0x441a   : > { %12457 = vmatprep.subr.bf16.mxu1 %v13621_v0 }
0x44eb   : > { %v9493_v4 = vpop.f32.mrb[112].mxu1 }
0x44ec   : > { %v9499_v7 = vadd.f32 %v9493_v4, %v15408_v59  ;;  %v12453_v41 = vpop.f32.mrb[113].mxu1  ;;  %v13128_v59 = vld [vmem:[%s15838_s11 + $0x8] sm:$0xff]  }
0x44ed   : > { %v9496_v61 = vpop.f32.mrb[114].mxu1  ;;  %12458 = vmatpush3.bf16.msra.mxu1 %v13128_v59 }
0x44ee   : > { %v9501_v49 = vadd.f32 %v9500_v3, %v9499_v7  ;;  %v12454_v32 = vpop.f32.mrb[115].mxu1  ;;  %12459 = vmatprep.subr.bf16.mxu1 %v13621_v0  ;;  %v9721_v3 = vld [vmem:[#allocation14 + $0x5] sm:$0x1] }
0x44f0   : > { %v9505_v57 = vsel %vm9504_vm8, %v9501_v49, 0.0 }
0x44f1   : > { %9506 = vadd.xlane.f32.xlu0 %v9505_v57  ;;  %12460 = vmatpush3.bf16.msra.mxu1 %v13129_v10 }
0x44f2   : > { %12461 = vmatprep.subr.bf16.mxu1 %v13621_v0 }
0x44f5   : > { %12462 = vmatpush3.bf16.msra.mxu1 %v13130_v11 }
0x44f6   : > { %12463 = vmatprep.subr.bf16.mxu1 %v13621_v0 }
0x44f9   : > { %12464 = vmatpush3.bf16.msra.mxu1 %v13131_v12 }
0x44fa   : > { %12465 = vmatprep.subr.bf16.mxu1 %v13621_v0 }
0x44fd   : > { %12466 = vmatpush3.bf16.msra.mxu1 %v13132_v14 }
0x44fe   : > { %12467 = vmatprep.subr.bf16.mxu1 %v13621_v0 }
0x4501   : > { %12468 = vmatpush3.bf16.msra.mxu1 %v13133_v15 }
0x4502   : > { %12469 = vmatprep.subr.bf16.mxu1 %v13621_v0 }
0x4505   : > { %12470 = vmatpush3.bf16.msra.mxu1 %v13134_v16 }
0x457e   : > { %v9507_v8 = vpop.xlane.xlu0 %9506 }
0x457f   : > { %v9508_v13 = vmul.f32 0.0078125, %v9507_v8 }
0x4581   : > { %v9509_v28 = vsub.f32 %v9501_v49, %v9508_v13  ;;  %v9727_v49 = vld [vmem:[#allocation14 + $0x6] sm:$0x1] }
0x4583   : > { %v9510_v54 = vmul.f32 %v9509_v28, %v9509_v28 }
0x4585   : > { %v9511_v9 = vsel %vm9504_vm8, %v9510_v54, 0.0 }
0x4586   : > { %9512 = vadd.xlane.f32.xlu1 %v9511_v9 }
0x4613   : > { %v9513_v21 = vpop.xlane.xlu1 %9512 }
0x4614   : > { %v9514_v24 = vmul.f32 0.0078125, %v9513_v21 }
0x4616   : > { %v9515_v26 = vadd.f32 1e-05, %v9514_v24 }
0x4618   : > { %13253 = vrsqrt.f32 %v9515_v26 }
0x4622   : > { %v13254_v23 = vpop.eup %13253 }
0x4623   : > { %v9517_v33 = vmul.f32 %v13254_v23, %v9509_v28 }
0x4625   : > { %v9518_v25 = vmul.f32 %v9517_v33, %v9502_v30 }
0x4627   : > { %v9519_v18 = vadd.f32 %v9518_v25, %v9503_v34 }
0x4629   : > { %v9521_v22 = vmul.f32 0.044715, %v9519_v18  ;;  %v9520_v40 = vmul.f32 0.5, %v9519_v18 }
0x462b   : > { %v9522_v36 = vmul.f32 %v9521_v22, %v9519_v18 }
0x462d   : > { %v9523_v5 = vmul.f32 %v9522_v36, %v9519_v18 }
0x462f   : > { %v9524_v37 = vadd.f32 %v9523_v5, %v9519_v18 }
0x4631   : > { %v9525_v53 = vmul.f32 0.7978846, %v9524_v37 }
0x4633   : > { %13255 = vtanh.f32 %v9525_v53 }
0x463d   : > { %v13256_v35 = vpop.eup %13255 }
0x463e   : > { %v9527_v29 = vadd.f32 1.0, %v13256_v35 }
0x4640   : > { %v9528_v0 = vmul.f32 %v9527_v29, %v9520_v40 }
0x4642   : > { %v9529_v58 = vpack.c.bf16 %v9528_v0, %v9528_v0 }
0x4644   : > { %12472 = vmatmul.mubr.bf16.vlgmr.msra.gmra.mrb[116].mxu1 %v9529_v58 }
0x4717   : > { %v9629_v48 = vpop.f32.mrb[116].mxu1 }
0x4718   : > { %v9630_v50 = vadd.f32 %v9629_v48, %v9546_v42  ;;  %v12473_v51 = vpop.f32.mrb[117].mxu1 }
0x4719   : > { %v9632_v44 = vpop.f32.mrb[118].mxu1 }
0x471a   : > { %v9635_v31 = vpack.c.bf16 %v9630_v50, %v9630_v50  ;;  %v12474_v45 = vpop.f32.mrb[119].mxu1 }
0x471c   : > { %12484 = vmatmul.mubr.msk.bf16.vlgmr.msra.gmra.mrb[132].mxu0 %vm2468_vm2, %v9635_v31 }
0x47ef   : > { %v9706_v39 = vpop.f32.mrb[132].mxu0 }
0x47f0   : > { %v9707_v56 = vadd.f32 %v9706_v39, %v9644_v55  ;;  %v12485_v60 = vpop.f32.mrb[133].mxu0 }
0x47f1   : > { %v9709_v62 = vpop.f32.mrb[134].mxu0 }
0x47f2   : > { %v9713_v63 = vmul.f32 0.044715, %v9707_v56  ;;  %v12486_v1 = vpop.f32.mrb[135].mxu0  ;;  %v9712_v27 = vmul.f32 0.5, %v9707_v56 }
0x47f4   : > { %v9714_v2 = vmul.f32 %v9713_v63, %v9707_v56 }
0x47f6   : > { %v9715_v47 = vmul.f32 %v9714_v2, %v9707_v56 }
0x47f8   : > { %v9716_v52 = vadd.f32 %v9715_v47, %v9707_v56 }
0x47fa   : > { %v9717_v38 = vmul.f32 0.7978846, %v9716_v52 }
0x47fc   : > { %13257 = vtanh.f32 %v9717_v38 }
0x4806   : > { %v13258_v6 = vpop.eup %13257 }
0x4807   : > { %v9719_v4 = vadd.f32 1.0, %v13258_v6 }
0x4809   : > { %v9720_v7 = vmul.f32 %v9719_v4, %v9712_v27 }
0x480b   : > { %v9722_v41 = vmul.f32 %v9721_v3, %v9720_v7 }
0x480d   : > { %v9724_v61 = vsel %vm9723_vm9, %v9722_v41, 0.0 }
0x480e   : > { %9725 = vadd.xlane.f32.xlu0 %v9724_v61 }
0x489b   : > { %v9726_v32 = vpop.xlane.xlu0 %9725 }
0x489c   : > { %v9728_v57 = vadd.f32 %v9727_v49, %v9726_v32 }
0x489e   : > { %9730 = vrot.lane.b32.xlu0 %v9728_v57, %s13625_s29 }
0x4910   : > { %v9731_v8 = vpop.permute.xlu0 %9730 }
0x4911   : > { %v9733_v13 = vsel %vm2468_vm2, %v9630_v50, %v9731_v8 }
0x4912   : > { %v9735_v28 = vsel %vm9734_vm10, %v9733_v13, 0.0 }
0x4913   : > { %9736 = vst [vmem:[%s698_s18] sm:$0x1] %v9735_v28 }
0x4914 PF: > { %s15840_s0 = sld [smem:[#allocation31_spill]]  ;;  %s15841_s9 = sld [smem:[#allocation32_spill]] }
0x4915   : > { %s15842_s29 = sld [smem:[#allocation36_spill]]  ;;  %s15843_s26 = sld [smem:[#allocation33_spill]] }
0x4916   : > { %s15844_s23 = sld [smem:[#allocation37_spill]]  ;;  %s15845_s28 = smov %s13846_s30 }
0x4917   : > { %p36_p5 = scmp.ge.s32.totalorder %s13846_s30, 4   ;;  %s15848_s14 = smov %s15871_s25 }
0x4918   : > { %s15849_s15 = smov %s13573_s16  ;;  %s15850_s16 = smov %s13577_s17 }
0x4919   : > { %s15851_s17 = smov %s14064_s12  ;;  %s15852_s18 = smov %s13585_s19 }
0x491a   : > { %s15847_s30 = smov %s15841_s9  ;;  %s15853_s19 = smov %s13589_s20 }
0x491b   : > { %s15854_s20 = smov %s15842_s29  ;;  %s15855_s21 = smov %s13597_s22 }
0x491c   : > { %s15856_s22 = smov %s15843_s26  ;;  %s15857_s24 = smov %s15845_s28 }
0x491d   :  { %38 = sbr.rel (!%p36_p5) target bundleno = 33 (0x21), region = 200 }
0x4924   :  { %9754 = vsyncpa [#allocation5], 1 }
0x4925   :  { %9756 = vsyncpa [#allocation5 + $0x1], 1 }
0x4926   :  { %9757 = vsyncpa [#allocation7], 1 }
0x4927   :  { %9759 = vsyncpa [#allocation7 + $0x1], 1 }
0x4928   :  { %9760 = vsyncpa [#allocation10], 1 }
0x4929   :  { %9762 = vsyncpa [#allocation10 + $0x1], 1 }
0x492a   :  { %9763 = vsyncpa [#allocation13], 1 }

</bundles_post_ra>
